<compile_context>
chip_gen: v5e
topology: v5e:2x2
jax: 0.10.0
libtpu: 0.0.40
codegen_flags: <defaults>
</compile_context>

<pallas_src>
import functools

import jax
import jax.numpy as jnp
from jax.experimental import pallas as pl
from jax.experimental.pallas import tpu as pltpu

_COL0 = 8  # sublane-aligned column offset of the interior inside the haloed scratch


def _round_up(v, m):
    return ((v + m - 1) // m) * m


def _elu(v):
    return jnp.where(v > 0.0, v, jnp.exp(jnp.minimum(v, 0.0)) - 1.0)


# ---------------------------------------------------------------------------
# Fused Cpm kernel (one grid step == one batch element)
# ---------------------------------------------------------------------------

def _cpm_kernel(x_ref, wal_ref, bal_ref, wdw_ref, wpw_ref, wcv_ref, bcv_ref,
                o_ref, pad_ref, *, H, W, C, Cin):
    HW = H * W
    Wp = pad_ref.shape[1]

    # ---- align: 1x1 conv + bias + ReLU (MXU, bf16 operands, f32 accumulate).
    # Kept live in bf16 across the trunk (it is only reused for the residual),
    # halving the long-lived compiler-managed state.
    x2d = x_ref[0].reshape(HW, Cin)                                    # bf16
    a2d = jnp.dot(x2d, wal_ref[...], preferred_element_type=jnp.float32)
    a2d = jnp.maximum(a2d + bal_ref[...], 0.0).astype(jnp.bfloat16)    # (HW, C)

    # ---- zero ONLY the halo cells that are ever read as zeros --------------
    # rows 0 / H+1 plus the 8-wide sublane-aligned bands containing the left
    # (_COL0-1) and right (_COL0+W) halo columns. The interior is fully
    # overwritten by write_interior() before every tap read, and the other
    # columns are never read, so no full-scratch memset is needed.
    zrow = jnp.zeros((1, Wp, C), jnp.float32)
    pad_ref[0:1, :, :] = zrow
    pad_ref[H + 1:H + 2, :, :] = zrow
    zband = jnp.zeros((H, 8, C), jnp.float32)
    pad_ref[1:H + 1, _COL0 - 8:_COL0, :] = zband
    pad_ref[1:H + 1, _COL0 + W:_COL0 + W + 8, :] = zband

    def write_interior(v2d):
        # row offset 1 is on the untiled leading dim; column offset _COL0 is a
        # multiple of 8 -> tile-aligned store. Never touches the halo cells.
        pad_ref[1:H + 1, _COL0:_COL0 + W, :] = (
            v2d.reshape(H, W, C).astype(jnp.float32))

    def tap(ki, kj):
        c0 = _COL0 - 1 + kj
        return pad_ref[ki:ki + H, c0:c0 + W, :]

    # ---- trunk: 3 x (dw 3x3 + ELU -> pw 1x1 + ELU), fully fused in VMEM ----
    h2d = a2d
    for blk in range(3):
        write_interior(h2d)
        acc = None
        for ki in range(3):
            for kj in range(3):
                k = 3 * ki + kj
                term = tap(ki, kj) * wdw_ref[blk, k:k + 1, :]      # (H,W,C)*(1,C)
                acc = term if acc is None else acc + term
        dw = _elu(acc).reshape(HW, C).astype(jnp.bfloat16)
        h2d = _elu(jnp.dot(dw, wpw_ref[blk],
                           preferred_element_type=jnp.float32))

    # residual: the final conv sees (align_out + trunk_out)
    s2d = a2d.astype(jnp.float32) + h2d

    # ---- conv: 3x3 + bias + ReLU. The 3 kj taps of each row are concatenated
    # along the lane dim so every MXU matmul runs with K = 3*C (fills the
    # 256-deep MXU on v6e/v7x); the f32 acc += dot chain stays contiguous.
    write_interior(s2d)
    acc = jnp.zeros((HW, C), jnp.float32)
    for ki in range(3):
        t_cat = jnp.concatenate(
            [tap(ki, kj).reshape(HW, C) for kj in range(3)],
            axis=-1).astype(jnp.bfloat16)                          # (HW, 3C)
        acc = acc + jnp.dot(t_cat, wcv_ref[ki],
                            preferred_element_type=jnp.float32)
    y = jnp.maximum(acc + bcv_ref[...], 0.0)
    o_ref[...] = y.reshape(1, H, W, C).astype(o_ref.dtype)         # bf16 writeback


# ---------------------------------------------------------------------------
# Wrappers
# ---------------------------------------------------------------------------

def _vmem_limit_bytes(H, W, Wp, C, Cin):
    """Explicit scoped-VMEM budget derived from the real buffers (+headroom)."""
    bf16, f32 = 2, 4
    HW = H * W
    blocks = 2 * HW * Cin * bf16 + 2 * HW * C * bf16                # dbl-buffered in/out
    weights = 2 * ((Cin * C + 3 * C * C + 9 * C * C) * bf16
                   + (3 * 16 + 2 * 8) * C * f32)                    # sublane-padded
    scratch = (H + 2) * Wp * C * f32
    temps = 14 * HW * C * f32                                       # a2d/h2d/acc/concat
    est = blocks + weights + scratch + temps
    # stay well under v7x's 64 MiB physical VMEM, never below the v5e default.
    return max(16 * 1024 * 1024, min(48 * 1024 * 1024, 2 * est))


def cpm_forward_nhwc(params, x_nhwc):
    """Fused Cpm forward on NHWC activations (bf16 in, bf16 out) — no layout
    or dtype round-trips; this is the interface an NHWC model should use."""
    N, H, W, Cin = x_nhwc.shape
    C = params['b_conv'].shape[-1]
    assert Cin % 128 == 0 and C % 128 == 0, "channels must be lane aligned (x128)"
    assert W % 8 == 0, "W must be a multiple of 8 (sublanes) for the fused kernel"
    # TODO(synk): for large H*W, add a haloed spatial (H-tile) grid axis so both
    # v7x TensorCores stay busy and the scratch fits its 64 MiB VMEM.

    Wp = _round_up(_COL0 + W + 8, 8)              # interior + left/right halo bands
    w_conv_packed = params['w_conv'].reshape(3, 3 * C, C)  # kj taps stacked on K

    x = x_nhwc.astype(jnp.bfloat16)

    return pl.pallas_call(
        functools.partial(_cpm_kernel, H=H, W=W, C=C, Cin=Cin),
        out_shape=jax.ShapeDtypeStruct((N, H, W, C), jnp.bfloat16),
        grid_spec=pltpu.PrefetchScalarGridSpec(
            num_scalar_prefetch=0,
            grid=(N,),
            in_specs=[
                pl.BlockSpec((1, H, W, Cin), lambda n: (n, 0, 0, 0)),   # x
                pl.BlockSpec((Cin, C), lambda n: (0, 0)),               # w_align (bf16)
                pl.BlockSpec((1, C), lambda n: (0, 0)),                 # b_align (f32)
                pl.BlockSpec((3, 9, C), lambda n: (0, 0, 0)),           # w_dw (f32)
                pl.BlockSpec((3, C, C), lambda n: (0, 0, 0)),           # w_pw (bf16)
                pl.BlockSpec((3, 3 * C, C), lambda n: (0, 0, 0)),       # w_conv packed-K
                pl.BlockSpec((1, C), lambda n: (0, 0)),                 # b_conv (f32)
            ],
            out_specs=pl.BlockSpec((1, H, W, C), lambda n: (n, 0, 0, 0)),
            scratch_shapes=[pltpu.VMEM((H + 2, Wp, C), jnp.float32)],
        ),
        compiler_params=pltpu.CompilerParams(
            dimension_semantics=("parallel",),
            vmem_limit_bytes=_vmem_limit_bytes(H, W, Wp, C, Cin)),
    )(x, params['w_align'], params['b_align'], params['w_dw'],
      params['w_pw'], w_conv_packed, params['b_conv'])


def cpm_forward(params, x_nchw):
    """NCHW convenience wrapper (PyTorch parity only). Prefer cpm_forward_nhwc
    from an NHWC/bf16 model to avoid the extra transpose/cast HBM passes."""
    x = jnp.transpose(x_nchw, (0, 2, 3, 1))
    y = cpm_forward_nhwc(params, x)                 # bf16 NHWC
    return jnp.transpose(y, (0, 3, 1, 2))


# ---------------------------------------------------------------------------
# Deterministic synthetic parameters + pure-JAX reference (for validation)
# ---------------------------------------------------------------------------

def build_cpm_params(key, in_channels, out_channels):
    C = out_channels
    ks = jax.random.split(key, 10)

    def he(k, shape, fan_in):
        return jax.random.normal(k, shape, jnp.float32) * (2.0 / fan_in) ** 0.5

    return {
        'w_align': he(ks[0], (in_channels, C), in_channels).astype(jnp.bfloat16),
        'b_align': 0.05 * jax.random.normal(ks[1], (1, C), jnp.float32),
        'w_dw':    jnp.stack([he(ks[2 + i], (9, C), 9) for i in range(3)]),
        'w_pw':    jnp.stack([he(ks[5 + i], (C, C), C)
                              for i in range(3)]).astype(jnp.bfloat16),
        'w_conv':  he(ks[8], (9, C, C), 9 * C).astype(jnp.bfloat16),
        'b_conv':  0.05 * jax.random.normal(ks[9], (1, C), jnp.float32),
    }


def cpm_reference(params, x_nchw):
    """Pure-JAX reference mirroring the kernel math (bf16 matmul operands and
    the bf16 residual cast)."""
    x = jnp.transpose(x_nchw, (0, 2, 3, 1)).astype(jnp.float32)    # NHWC
    N, H, W, _ = x.shape
    C = params['b_conv'].shape[-1]

    def pw(h, w):
        h2d = h.reshape(-1, h.shape[-1]).astype(jnp.bfloat16)
        y = jax.lax.dot_general(h2d, w, (((1,), (0,)), ((), ())),
                                preferred_element_type=jnp.float32)
        return y.reshape(h.shape[:-1] + (w.shape[-1],))

    def dw3x3(h, wd):                                              # wd: (9, C)
        hp = jnp.pad(h, ((0, 0), (1, 1), (1, 1), (0, 0)))
        acc = jnp.zeros_like(h)
        for ki in range(3):
            for kj in range(3):
                acc = acc + hp[:, ki:ki + H, kj:kj + W, :] * wd[3 * ki + kj]
        return acc

    a = jnp.maximum(pw(x, params['w_align'])
                    + params['b_align'].reshape(1, 1, 1, C), 0.0)
    a = a.astype(jnp.bfloat16).astype(jnp.float32)   # kernel keeps the residual in bf16
    h = a
    for blk in range(3):
        h = _elu(pw(_elu(dw3x3(h, params['w_dw'][blk])), params['w_pw'][blk]))
    s = a + h
    sp = jnp.pad(s, ((0, 0), (1, 1), (1, 1), (0, 0)))
    acc = jnp.zeros((N, H, W, C), jnp.float32)
    for ki in range(3):
        for kj in range(3):
            acc = acc + pw(sp[:, ki:ki + H, kj:kj + W, :],
                           params['w_conv'][3 * ki + kj])
    y = jnp.maximum(acc + params['b_conv'].reshape(1, 1, 1, C), 0.0)
    return jnp.transpose(y, (0, 3, 1, 2))


# ---------------------------------------------------------------------------

if __name__ == "__main__":
    key = jax.random.PRNGKey(0)
    k_x, k_p = jax.random.split(key)

    N, Cin, Cout, H, W = 2, 256, 128, 16, 16
    x = jax.random.normal(k_x, (N, Cin, H, W), jnp.float32)
    params = build_cpm_params(k_p, Cin, Cout)

    fwd = jax.jit(functools.partial(cpm_forward, params))
    out = fwd(x)
    jax.block_until_ready(out)

    assert out.shape == (N, Cout, H, W), out.shape
    out_f32 = out.astype(jnp.float32)
    assert bool(jnp.isfinite(out_f32).all())

    ref = cpm_reference(params, x)
    max_err = float(jnp.max(jnp.abs(out_f32 - ref)))
    ref_scale = float(jnp.max(jnp.abs(ref)))
    tol = 3e-2 + 2e-2 * ref_scale        # bf16 MXU operands + bf16 output writeback
    assert max_err < tol, f"Pallas/reference mismatch: max abs err = {max_err} (tol {tol})"

    print("KERNEL_OK")
</pallas_src>

<mosaic_0001>
module attributes {stable_mosaic.version = 11 : i64} {
  func.func @_cpm_kernel(%arg0: i32, %arg1: memref<1x16x16x256xbf16, #tpu.memory_space<vmem>>, %arg2: memref<256x128xbf16, #tpu.memory_space<vmem>>, %arg3: memref<1x128xf32, #tpu.memory_space<vmem>>, %arg4: memref<3x9x128xf32, #tpu.memory_space<vmem>>, %arg5: memref<3x128x128xbf16, #tpu.memory_space<vmem>>, %arg6: memref<3x384x128xbf16, #tpu.memory_space<vmem>>, %arg7: memref<1x128xf32, #tpu.memory_space<vmem>>, %arg8: memref<1x16x16x128xbf16, #tpu.memory_space<vmem>>, %arg9: memref<18x32x128xf32, #tpu.memory_space<vmem>>) attributes {dimension_semantics = [#tpu.dimension_semantics<parallel>], iteration_bounds = array<i64: 2>, scalar_prefetch = 0 : i64, scratch_operands = 1 : i64, tpu.core_type = #tpu.core_type<tc>, window_params = [{transform_indices = @transform_0, window_bounds = array<i64: 1, 16, 16, 256>}, {pipeline_mode = #tpu.pipeline_mode<synchronous>, transform_indices = @transform_1, window_bounds = array<i64: 256, 128>}, {pipeline_mode = #tpu.pipeline_mode<synchronous>, transform_indices = @transform_2, window_bounds = array<i64: 1, 128>}, {pipeline_mode = #tpu.pipeline_mode<synchronous>, transform_indices = @transform_3, window_bounds = array<i64: 3, 9, 128>}, {pipeline_mode = #tpu.pipeline_mode<synchronous>, transform_indices = @transform_4, window_bounds = array<i64: 3, 128, 128>}, {pipeline_mode = #tpu.pipeline_mode<synchronous>, transform_indices = @transform_5, window_bounds = array<i64: 3, 384, 128>}, {pipeline_mode = #tpu.pipeline_mode<synchronous>, transform_indices = @transform_6, window_bounds = array<i64: 1, 128>}, {transform_indices = @transform_7, window_bounds = array<i64: 1, 16, 16, 128>}]} {
    %c0 = arith.constant 0 : index
    %c0_0 = arith.constant 0 : index
    %c0_1 = arith.constant 0 : index
    %c0_2 = arith.constant 0 : index
    %0 = vector.load %arg1[%c0, %c0_0, %c0_1, %c0_2] : memref<1x16x16x256xbf16, #tpu.memory_space<vmem>>, vector<1x16x16x256xbf16>
    %1 = vector.shape_cast %0 : vector<1x16x16x256xbf16> to vector<16x16x256xbf16>
    %2 = vector.shape_cast %1 : vector<16x16x256xbf16> to vector<256x256xbf16>
    %c0_3 = arith.constant 0 : index
    %c0_4 = arith.constant 0 : index
    %3 = vector.load %arg2[%c0_3, %c0_4] : memref<256x128xbf16, #tpu.memory_space<vmem>>, vector<256x128xbf16>
    %cst = arith.constant dense<0.000000e+00> : vector<256x128xf32>
    %4 = tpu.matmul %2, %3, %cst {dimension_numbers = #tpu.dot_dimension_numbers<[1], [0], [0], [1], [0, 0, 1, 1], [], []>} : vector<256x256xbf16>, vector<256x128xbf16>, vector<256x128xf32> -> vector<256x128xf32>
    %c0_5 = arith.constant 0 : index
    %c0_6 = arith.constant 0 : index
    %5 = vector.load %arg3[%c0_5, %c0_6] : memref<1x128xf32, #tpu.memory_space<vmem>>, vector<1x128xf32>
    %6 = vector.broadcast %5 : vector<1x128xf32> to vector<256x128xf32>
    %7 = arith.addf %4, %6 : vector<256x128xf32>
    %cst_7 = arith.constant 0.000000e+00 : f32
    %8 = vector.broadcast %cst_7 : f32 to vector<256x128xf32>
    %9 = arith.maximumf %7, %8 : vector<256x128xf32>
    %10 = arith.truncf %9 : vector<256x128xf32> to vector<256x128xbf16>
    %cst_8 = arith.constant 0.000000e+00 : f32
    %11 = vector.broadcast %cst_8 : f32 to vector<1x32x128xf32>
    %c0_9 = arith.constant 0 : index
    %c0_10 = arith.constant 0 : index
    %c0_11 = arith.constant 0 : index
    %12 = vector.load %arg9[%c0_9, %c0_10, %c0_11] : memref<18x32x128xf32, #tpu.memory_space<vmem>>, vector<1x32x128xf32>
    tpu.vector_store %arg9[%c0_9, %c0_10, %c0_11], %11 {strides = array<i32>} : memref<18x32x128xf32, #tpu.memory_space<vmem>>, vector<1x32x128xf32>,
    %c17 = arith.constant 17 : index
    %c0_12 = arith.constant 0 : index
    %c0_13 = arith.constant 0 : index
    %13 = vector.load %arg9[%c17, %c0_12, %c0_13] : memref<18x32x128xf32, #tpu.memory_space<vmem>>, vector<1x32x128xf32>
    tpu.vector_store %arg9[%c17, %c0_12, %c0_13], %11 {strides = array<i32>} : memref<18x32x128xf32, #tpu.memory_space<vmem>>, vector<1x32x128xf32>,
    %cst_14 = arith.constant 0.000000e+00 : f32
    %14 = vector.broadcast %cst_14 : f32 to vector<16x8x128xf32>
    %c1 = arith.constant 1 : index
    %c0_15 = arith.constant 0 : index
    %c0_16 = arith.constant 0 : index
    %15 = vector.load %arg9[%c1, %c0_15, %c0_16] : memref<18x32x128xf32, #tpu.memory_space<vmem>>, vector<16x8x128xf32>
    tpu.vector_store %arg9[%c1, %c0_15, %c0_16], %14 {strides = array<i32>} : memref<18x32x128xf32, #tpu.memory_space<vmem>>, vector<16x8x128xf32>,
    %c1_17 = arith.constant 1 : index
    %c24 = arith.constant 24 : index
    %c0_18 = arith.constant 0 : index
    %16 = vector.load %arg9[%c1_17, %c24, %c0_18] : memref<18x32x128xf32, #tpu.memory_space<vmem>>, vector<16x8x128xf32>
    tpu.vector_store %arg9[%c1_17, %c24, %c0_18], %14 {strides = array<i32>} : memref<18x32x128xf32, #tpu.memory_space<vmem>>, vector<16x8x128xf32>,
    %17 = vector.shape_cast %10 : vector<256x128xbf16> to vector<16x16x128xbf16>
    %18 = arith.extf %17 : vector<16x16x128xbf16> to vector<16x16x128xf32>
    %c1_19 = arith.constant 1 : index
    %c8 = arith.constant 8 : index
    %c0_20 = arith.constant 0 : index
    %19 = vector.load %arg9[%c1_19, %c8, %c0_20] : memref<18x32x128xf32, #tpu.memory_space<vmem>>, vector<16x16x128xf32>
    tpu.vector_store %arg9[%c1_19, %c8, %c0_20], %18 {strides = array<i32>} : memref<18x32x128xf32, #tpu.memory_space<vmem>>, vector<16x16x128xf32>,
    %c0_21 = arith.constant 0 : index
    %c7 = arith.constant 7 : index
    %c0_22 = arith.constant 0 : index
    %20 = vector.load %arg9[%c0_21, %c7, %c0_22] : memref<18x32x128xf32, #tpu.memory_space<vmem>>, vector<16x16x128xf32>
    %c0_23 = arith.constant 0 : index
    %c0_24 = arith.constant 0 : index
    %c0_25 = arith.constant 0 : index
    %21 = vector.load %arg4[%c0_23, %c0_24, %c0_25] : memref<3x9x128xf32, #tpu.memory_space<vmem>>, vector<1x1x128xf32>
    %22 = vector.shape_cast %21 : vector<1x1x128xf32> to vector<1x128xf32>
    %23 = vector.shape_cast %22 : vector<1x128xf32> to vector<1x1x128xf32>
    %24 = vector.broadcast %23 : vector<1x1x128xf32> to vector<16x16x128xf32>
    %25 = arith.mulf %20, %24 : vector<16x16x128xf32>
    %c0_26 = arith.constant 0 : index
    %c8_27 = arith.constant 8 : index
    %c0_28 = arith.constant 0 : index
    %26 = vector.load %arg9[%c0_26, %c8_27, %c0_28] : memref<18x32x128xf32, #tpu.memory_space<vmem>>, vector<16x16x128xf32>
    %c0_29 = arith.constant 0 : index
    %c1_30 = arith.constant 1 : index
    %c0_31 = arith.constant 0 : index
    %27 = vector.load %arg4[%c0_29, %c1_30, %c0_31] : memref<3x9x128xf32, #tpu.memory_space<vmem>>, vector<1x1x128xf32>
    %28 = vector.shape_cast %27 : vector<1x1x128xf32> to vector<1x128xf32>
    %29 = vector.shape_cast %28 : vector<1x128xf32> to vector<1x1x128xf32>
    %30 = vector.broadcast %29 : vector<1x1x128xf32> to vector<16x16x128xf32>
    %31 = arith.mulf %26, %30 : vector<16x16x128xf32>
    %32 = arith.addf %25, %31 : vector<16x16x128xf32>
    %c0_32 = arith.constant 0 : index
    %c9 = arith.constant 9 : index
    %c0_33 = arith.constant 0 : index
    %33 = vector.load %arg9[%c0_32, %c9, %c0_33] : memref<18x32x128xf32, #tpu.memory_space<vmem>>, vector<16x16x128xf32>
    %c0_34 = arith.constant 0 : index
    %c2 = arith.constant 2 : index
    %c0_35 = arith.constant 0 : index
    %34 = vector.load %arg4[%c0_34, %c2, %c0_35] : memref<3x9x128xf32, #tpu.memory_space<vmem>>, vector<1x1x128xf32>
    %35 = vector.shape_cast %34 : vector<1x1x128xf32> to vector<1x128xf32>
    %36 = vector.shape_cast %35 : vector<1x128xf32> to vector<1x1x128xf32>
    %37 = vector.broadcast %36 : vector<1x1x128xf32> to vector<16x16x128xf32>
    %38 = arith.mulf %33, %37 : vector<16x16x128xf32>
    %39 = arith.addf %32, %38 : vector<16x16x128xf32>
    %c1_36 = arith.constant 1 : index
    %c7_37 = arith.constant 7 : index
    %c0_38 = arith.constant 0 : index
    %40 = vector.load %arg9[%c1_36, %c7_37, %c0_38] : memref<18x32x128xf32, #tpu.memory_space<vmem>>, vector<16x16x128xf32>
    %c0_39 = arith.constant 0 : index
    %c3 = arith.constant 3 : index
    %c0_40 = arith.constant 0 : index
    %41 = vector.load %arg4[%c0_39, %c3, %c0_40] : memref<3x9x128xf32, #tpu.memory_space<vmem>>, vector<1x1x128xf32>
    %42 = vector.shape_cast %41 : vector<1x1x128xf32> to vector<1x128xf32>
    %43 = vector.shape_cast %42 : vector<1x128xf32> to vector<1x1x128xf32>
    %44 = vector.broadcast %43 : vector<1x1x128xf32> to vector<16x16x128xf32>
    %45 = arith.mulf %40, %44 : vector<16x16x128xf32>
    %46 = arith.addf %39, %45 : vector<16x16x128xf32>
    %c1_41 = arith.constant 1 : index
    %c8_42 = arith.constant 8 : index
    %c0_43 = arith.constant 0 : index
    %47 = vector.load %arg9[%c1_41, %c8_42, %c0_43] : memref<18x32x128xf32, #tpu.memory_space<vmem>>, vector<16x16x128xf32>
    %c0_44 = arith.constant 0 : index
    %c4 = arith.constant 4 : index
    %c0_45 = arith.constant 0 : index
    %48 = vector.load %arg4[%c0_44, %c4, %c0_45] : memref<3x9x128xf32, #tpu.memory_space<vmem>>, vector<1x1x128xf32>
    %49 = vector.shape_cast %48 : vector<1x1x128xf32> to vector<1x128xf32>
    %50 = vector.shape_cast %49 : vector<1x128xf32> to vector<1x1x128xf32>
    %51 = vector.broadcast %50 : vector<1x1x128xf32> to vector<16x16x128xf32>
    %52 = arith.mulf %47, %51 : vector<16x16x128xf32>
    %53 = arith.addf %46, %52 : vector<16x16x128xf32>
    %c1_46 = arith.constant 1 : index
    %c9_47 = arith.constant 9 : index
    %c0_48 = arith.constant 0 : index
    %54 = vector.load %arg9[%c1_46, %c9_47, %c0_48] : memref<18x32x128xf32, #tpu.memory_space<vmem>>, vector<16x16x128xf32>
    %c0_49 = arith.constant 0 : index
    %c5 = arith.constant 5 : index
    %c0_50 = arith.constant 0 : index
    %55 = vector.load %arg4[%c0_49, %c5, %c0_50] : memref<3x9x128xf32, #tpu.memory_space<vmem>>, vector<1x1x128xf32>
    %56 = vector.shape_cast %55 : vector<1x1x128xf32> to vector<1x128xf32>
    %57 = vector.shape_cast %56 : vector<1x128xf32> to vector<1x1x128xf32>
    %58 = vector.broadcast %57 : vector<1x1x128xf32> to vector<16x16x128xf32>
    %59 = arith.mulf %54, %58 : vector<16x16x128xf32>
    %60 = arith.addf %53, %59 : vector<16x16x128xf32>
    %c2_51 = arith.constant 2 : index
    %c7_52 = arith.constant 7 : index
    %c0_53 = arith.constant 0 : index
    %61 = vector.load %arg9[%c2_51, %c7_52, %c0_53] : memref<18x32x128xf32, #tpu.memory_space<vmem>>, vector<16x16x128xf32>
    %c0_54 = arith.constant 0 : index
    %c6 = arith.constant 6 : index
    %c0_55 = arith.constant 0 : index
    %62 = vector.load %arg4[%c0_54, %c6, %c0_55] : memref<3x9x128xf32, #tpu.memory_space<vmem>>, vector<1x1x128xf32>
    %63 = vector.shape_cast %62 : vector<1x1x128xf32> to vector<1x128xf32>
    %64 = vector.shape_cast %63 : vector<1x128xf32> to vector<1x1x128xf32>
    %65 = vector.broadcast %64 : vector<1x1x128xf32> to vector<16x16x128xf32>
    %66 = arith.mulf %61, %65 : vector<16x16x128xf32>
    %67 = arith.addf %60, %66 : vector<16x16x128xf32>
    %c2_56 = arith.constant 2 : index
    %c8_57 = arith.constant 8 : index
    %c0_58 = arith.constant 0 : index
    %68 = vector.load %arg9[%c2_56, %c8_57, %c0_58] : memref<18x32x128xf32, #tpu.memory_space<vmem>>, vector<16x16x128xf32>
    %c0_59 = arith.constant 0 : index
    %c7_60 = arith.constant 7 : index
    %c0_61 = arith.constant 0 : index
    %69 = vector.load %arg4[%c0_59, %c7_60, %c0_61] : memref<3x9x128xf32, #tpu.memory_space<vmem>>, vector<1x1x128xf32>
    %70 = vector.shape_cast %69 : vector<1x1x128xf32> to vector<1x128xf32>
    %71 = vector.shape_cast %70 : vector<1x128xf32> to vector<1x1x128xf32>
    %72 = vector.broadcast %71 : vector<1x1x128xf32> to vector<16x16x128xf32>
    %73 = arith.mulf %68, %72 : vector<16x16x128xf32>
    %74 = arith.addf %67, %73 : vector<16x16x128xf32>
    %c2_62 = arith.constant 2 : index
    %c9_63 = arith.constant 9 : index
    %c0_64 = arith.constant 0 : index
    %75 = vector.load %arg9[%c2_62, %c9_63, %c0_64] : memref<18x32x128xf32, #tpu.memory_space<vmem>>, vector<16x16x128xf32>
    %c0_65 = arith.constant 0 : index
    %c8_66 = arith.constant 8 : index
    %c0_67 = arith.constant 0 : index
    %76 = vector.load %arg4[%c0_65, %c8_66, %c0_67] : memref<3x9x128xf32, #tpu.memory_space<vmem>>, vector<1x1x128xf32>
    %77 = vector.shape_cast %76 : vector<1x1x128xf32> to vector<1x128xf32>
    %78 = vector.shape_cast %77 : vector<1x128xf32> to vector<1x1x128xf32>
    %79 = vector.broadcast %78 : vector<1x1x128xf32> to vector<16x16x128xf32>
    %80 = arith.mulf %75, %79 : vector<16x16x128xf32>
    %81 = arith.addf %74, %80 : vector<16x16x128xf32>
    %cst_68 = arith.constant 0.000000e+00 : f32
    %82 = vector.broadcast %cst_68 : f32 to vector<16x16x128xf32>
    %83 = arith.cmpf ogt, %81, %82 : vector<16x16x128xf32>
    %cst_69 = arith.constant 0.000000e+00 : f32
    %84 = vector.broadcast %cst_69 : f32 to vector<16x16x128xf32>
    %85 = arith.minimumf %81, %84 : vector<16x16x128xf32>
    %86 = math.exp %85 : vector<16x16x128xf32>
    %cst_70 = arith.constant 1.000000e+00 : f32
    %87 = vector.broadcast %cst_70 : f32 to vector<16x16x128xf32>
    %88 = arith.subf %86, %87 : vector<16x16x128xf32>
    %89 = arith.select %83, %81, %88 : vector<16x16x128xi1>, vector<16x16x128xf32>
    %90 = vector.shape_cast %89 : vector<16x16x128xf32> to vector<256x128xf32>
    %91 = arith.truncf %90 : vector<256x128xf32> to vector<256x128xbf16>
    %c0_71 = arith.constant 0 : index
    %c0_72 = arith.constant 0 : index
    %c0_73 = arith.constant 0 : index
    %92 = vector.load %arg5[%c0_71, %c0_72, %c0_73] : memref<3x128x128xbf16, #tpu.memory_space<vmem>>, vector<1x128x128xbf16>
    %93 = vector.shape_cast %92 : vector<1x128x128xbf16> to vector<128x128xbf16>
    %cst_74 = arith.constant dense<0.000000e+00> : vector<256x128xf32>
    %94 = tpu.matmul %91, %93, %cst_74 {dimension_numbers = #tpu.dot_dimension_numbers<[1], [0], [0], [1], [0, 0, 1, 1], [], []>} : vector<256x128xbf16>, vector<128x128xbf16>, vector<256x128xf32> -> vector<256x128xf32>
    %cst_75 = arith.constant 0.000000e+00 : f32
    %95 = vector.broadcast %cst_75 : f32 to vector<256x128xf32>
    %96 = arith.cmpf ogt, %94, %95 : vector<256x128xf32>
    %cst_76 = arith.constant 0.000000e+00 : f32
    %97 = vector.broadcast %cst_76 : f32 to vector<256x128xf32>
    %98 = arith.minimumf %94, %97 : vector<256x128xf32>
    %99 = math.exp %98 : vector<256x128xf32>
    %cst_77 = arith.constant 1.000000e+00 : f32
    %100 = vector.broadcast %cst_77 : f32 to vector<256x128xf32>
    %101 = arith.subf %99, %100 : vector<256x128xf32>
    %102 = arith.select %96, %94, %101 : vector<256x128xi1>, vector<256x128xf32>
    %103 = vector.shape_cast %102 : vector<256x128xf32> to vector<16x16x128xf32>
    %c1_78 = arith.constant 1 : index
    %c8_79 = arith.constant 8 : index
    %c0_80 = arith.constant 0 : index
    %104 = vector.load %arg9[%c1_78, %c8_79, %c0_80] : memref<18x32x128xf32, #tpu.memory_space<vmem>>, vector<16x16x128xf32>
    tpu.vector_store %arg9[%c1_78, %c8_79, %c0_80], %103 {strides = array<i32>} : memref<18x32x128xf32, #tpu.memory_space<vmem>>, vector<16x16x128xf32>,
    %c0_81 = arith.constant 0 : index
    %c7_82 = arith.constant 7 : index
    %c0_83 = arith.constant 0 : index
    %105 = vector.load %arg9[%c0_81, %c7_82, %c0_83] : memref<18x32x128xf32, #tpu.memory_space<vmem>>, vector<16x16x128xf32>
    %c1_84 = arith.constant 1 : index
    %c0_85 = arith.constant 0 : index
    %c0_86 = arith.constant 0 : index
    %106 = vector.load %arg4[%c1_84, %c0_85, %c0_86] : memref<3x9x128xf32, #tpu.memory_space<vmem>>, vector<1x1x128xf32>
    %107 = vector.shape_cast %106 : vector<1x1x128xf32> to vector<1x128xf32>
    %108 = vector.shape_cast %107 : vector<1x128xf32> to vector<1x1x128xf32>
    %109 = vector.broadcast %108 : vector<1x1x128xf32> to vector<16x16x128xf32>
    %110 = arith.mulf %105, %109 : vector<16x16x128xf32>
    %c0_87 = arith.constant 0 : index
    %c8_88 = arith.constant 8 : index
    %c0_89 = arith.constant 0 : index
    %111 = vector.load %arg9[%c0_87, %c8_88, %c0_89] : memref<18x32x128xf32, #tpu.memory_space<vmem>>, vector<16x16x128xf32>
    %c1_90 = arith.constant 1 : index
    %c1_91 = arith.constant 1 : index
    %c0_92 = arith.constant 0 : index
    %112 = vector.load %arg4[%c1_90, %c1_91, %c0_92] : memref<3x9x128xf32, #tpu.memory_space<vmem>>, vector<1x1x128xf32>
    %113 = vector.shape_cast %112 : vector<1x1x128xf32> to vector<1x128xf32>
    %114 = vector.shape_cast %113 : vector<1x128xf32> to vector<1x1x128xf32>
    %115 = vector.broadcast %114 : vector<1x1x128xf32> to vector<16x16x128xf32>
    %116 = arith.mulf %111, %115 : vector<16x16x128xf32>
    %117 = arith.addf %110, %116 : vector<16x16x128xf32>
    %c0_93 = arith.constant 0 : index
    %c9_94 = arith.constant 9 : index
    %c0_95 = arith.constant 0 : index
    %118 = vector.load %arg9[%c0_93, %c9_94, %c0_95] : memref<18x32x128xf32, #tpu.memory_space<vmem>>, vector<16x16x128xf32>
    %c1_96 = arith.constant 1 : index
    %c2_97 = arith.constant 2 : index
    %c0_98 = arith.constant 0 : index
    %119 = vector.load %arg4[%c1_96, %c2_97, %c0_98] : memref<3x9x128xf32, #tpu.memory_space<vmem>>, vector<1x1x128xf32>
    %120 = vector.shape_cast %119 : vector<1x1x128xf32> to vector<1x128xf32>
    %121 = vector.shape_cast %120 : vector<1x128xf32> to vector<1x1x128xf32>
    %122 = vector.broadcast %121 : vector<1x1x128xf32> to vector<16x16x128xf32>
    %123 = arith.mulf %118, %122 : vector<16x16x128xf32>
    %124 = arith.addf %117, %123 : vector<16x16x128xf32>
    %c1_99 = arith.constant 1 : index
    %c7_100 = arith.constant 7 : index
    %c0_101 = arith.constant 0 : index
    %125 = vector.load %arg9[%c1_99, %c7_100, %c0_101] : memref<18x32x128xf32, #tpu.memory_space<vmem>>, vector<16x16x128xf32>
    %c1_102 = arith.constant 1 : index
    %c3_103 = arith.constant 3 : index
    %c0_104 = arith.constant 0 : index
    %126 = vector.load %arg4[%c1_102, %c3_103, %c0_104] : memref<3x9x128xf32, #tpu.memory_space<vmem>>, vector<1x1x128xf32>
    %127 = vector.shape_cast %126 : vector<1x1x128xf32> to vector<1x128xf32>
    %128 = vector.shape_cast %127 : vector<1x128xf32> to vector<1x1x128xf32>
    %129 = vector.broadcast %128 : vector<1x1x128xf32> to vector<16x16x128xf32>
    %130 = arith.mulf %125, %129 : vector<16x16x128xf32>
    %131 = arith.addf %124, %130 : vector<16x16x128xf32>
    %c1_105 = arith.constant 1 : index
    %c8_106 = arith.constant 8 : index
    %c0_107 = arith.constant 0 : index
    %132 = vector.load %arg9[%c1_105, %c8_106, %c0_107] : memref<18x32x128xf32, #tpu.memory_space<vmem>>, vector<16x16x128xf32>
    %c1_108 = arith.constant 1 : index
    %c4_109 = arith.constant 4 : index
    %c0_110 = arith.constant 0 : index
    %133 = vector.load %arg4[%c1_108, %c4_109, %c0_110] : memref<3x9x128xf32, #tpu.memory_space<vmem>>, vector<1x1x128xf32>
    %134 = vector.shape_cast %133 : vector<1x1x128xf32> to vector<1x128xf32>
    %135 = vector.shape_cast %134 : vector<1x128xf32> to vector<1x1x128xf32>
    %136 = vector.broadcast %135 : vector<1x1x128xf32> to vector<16x16x128xf32>
    %137 = arith.mulf %132, %136 : vector<16x16x128xf32>
    %138 = arith.addf %131, %137 : vector<16x16x128xf32>
    %c1_111 = arith.constant 1 : index
    %c9_112 = arith.constant 9 : index
    %c0_113 = arith.constant 0 : index
    %139 = vector.load %arg9[%c1_111, %c9_112, %c0_113] : memref<18x32x128xf32, #tpu.memory_space<vmem>>, vector<16x16x128xf32>
    %c1_114 = arith.constant 1 : index
    %c5_115 = arith.constant 5 : index
    %c0_116 = arith.constant 0 : index
    %140 = vector.load %arg4[%c1_114, %c5_115, %c0_116] : memref<3x9x128xf32, #tpu.memory_space<vmem>>, vector<1x1x128xf32>
    %141 = vector.shape_cast %140 : vector<1x1x128xf32> to vector<1x128xf32>
    %142 = vector.shape_cast %141 : vector<1x128xf32> to vector<1x1x128xf32>
    %143 = vector.broadcast %142 : vector<1x1x128xf32> to vector<16x16x128xf32>
    %144 = arith.mulf %139, %143 : vector<16x16x128xf32>
    %145 = arith.addf %138, %144 : vector<16x16x128xf32>
    %c2_117 = arith.constant 2 : index
    %c7_118 = arith.constant 7 : index
    %c0_119 = arith.constant 0 : index
    %146 = vector.load %arg9[%c2_117, %c7_118, %c0_119] : memref<18x32x128xf32, #tpu.memory_space<vmem>>, vector<16x16x128xf32>
    %c1_120 = arith.constant 1 : index
    %c6_121 = arith.constant 6 : index
    %c0_122 = arith.constant 0 : index
    %147 = vector.load %arg4[%c1_120, %c6_121, %c0_122] : memref<3x9x128xf32, #tpu.memory_space<vmem>>, vector<1x1x128xf32>
    %148 = vector.shape_cast %147 : vector<1x1x128xf32> to vector<1x128xf32>
    %149 = vector.shape_cast %148 : vector<1x128xf32> to vector<1x1x128xf32>
    %150 = vector.broadcast %149 : vector<1x1x128xf32> to vector<16x16x128xf32>
    %151 = arith.mulf %146, %150 : vector<16x16x128xf32>
    %152 = arith.addf %145, %151 : vector<16x16x128xf32>
    %c2_123 = arith.constant 2 : index
    %c8_124 = arith.constant 8 : index
    %c0_125 = arith.constant 0 : index
    %153 = vector.load %arg9[%c2_123, %c8_124, %c0_125] : memref<18x32x128xf32, #tpu.memory_space<vmem>>, vector<16x16x128xf32>
    %c1_126 = arith.constant 1 : index
    %c7_127 = arith.constant 7 : index
    %c0_128 = arith.constant 0 : index
    %154 = vector.load %arg4[%c1_126, %c7_127, %c0_128] : memref<3x9x128xf32, #tpu.memory_space<vmem>>, vector<1x1x128xf32>
    %155 = vector.shape_cast %154 : vector<1x1x128xf32> to vector<1x128xf32>
    %156 = vector.shape_cast %155 : vector<1x128xf32> to vector<1x1x128xf32>
    %157 = vector.broadcast %156 : vector<1x1x128xf32> to vector<16x16x128xf32>
    %158 = arith.mulf %153, %157 : vector<16x16x128xf32>
    %159 = arith.addf %152, %158 : vector<16x16x128xf32>
    %c2_129 = arith.constant 2 : index
    %c9_130 = arith.constant 9 : index
    %c0_131 = arith.constant 0 : index
    %160 = vector.load %arg9[%c2_129, %c9_130, %c0_131] : memref<18x32x128xf32, #tpu.memory_space<vmem>>, vector<16x16x128xf32>
    %c1_132 = arith.constant 1 : index
    %c8_133 = arith.constant 8 : index
    %c0_134 = arith.constant 0 : index
    %161 = vector.load %arg4[%c1_132, %c8_133, %c0_134] : memref<3x9x128xf32, #tpu.memory_space<vmem>>, vector<1x1x128xf32>
    %162 = vector.shape_cast %161 : vector<1x1x128xf32> to vector<1x128xf32>
    %163 = vector.shape_cast %162 : vector<1x128xf32> to vector<1x1x128xf32>
    %164 = vector.broadcast %163 : vector<1x1x128xf32> to vector<16x16x128xf32>
    %165 = arith.mulf %160, %164 : vector<16x16x128xf32>
    %166 = arith.addf %159, %165 : vector<16x16x128xf32>
    %cst_135 = arith.constant 0.000000e+00 : f32
    %167 = vector.broadcast %cst_135 : f32 to vector<16x16x128xf32>
    %168 = arith.cmpf ogt, %166, %167 : vector<16x16x128xf32>
    %cst_136 = arith.constant 0.000000e+00 : f32
    %169 = vector.broadcast %cst_136 : f32 to vector<16x16x128xf32>
    %170 = arith.minimumf %166, %169 : vector<16x16x128xf32>
    %171 = math.exp %170 : vector<16x16x128xf32>
    %cst_137 = arith.constant 1.000000e+00 : f32
    %172 = vector.broadcast %cst_137 : f32 to vector<16x16x128xf32>
    %173 = arith.subf %171, %172 : vector<16x16x128xf32>
    %174 = arith.select %168, %166, %173 : vector<16x16x128xi1>, vector<16x16x128xf32>
    %175 = vector.shape_cast %174 : vector<16x16x128xf32> to vector<256x128xf32>
    %176 = arith.truncf %175 : vector<256x128xf32> to vector<256x128xbf16>
    %c1_138 = arith.constant 1 : index
    %c0_139 = arith.constant 0 : index
    %c0_140 = arith.constant 0 : index
    %177 = vector.load %arg5[%c1_138, %c0_139, %c0_140] : memref<3x128x128xbf16, #tpu.memory_space<vmem>>, vector<1x128x128xbf16>
    %178 = vector.shape_cast %177 : vector<1x128x128xbf16> to vector<128x128xbf16>
    %cst_141 = arith.constant dense<0.000000e+00> : vector<256x128xf32>
    %179 = tpu.matmul %176, %178, %cst_141 {dimension_numbers = #tpu.dot_dimension_numbers<[1], [0], [0], [1], [0, 0, 1, 1], [], []>} : vector<256x128xbf16>, vector<128x128xbf16>, vector<256x128xf32> -> vector<256x128xf32>
    %cst_142 = arith.constant 0.000000e+00 : f32
    %180 = vector.broadcast %cst_142 : f32 to vector<256x128xf32>
    %181 = arith.cmpf ogt, %179, %180 : vector<256x128xf32>
    %cst_143 = arith.constant 0.000000e+00 : f32
    %182 = vector.broadcast %cst_143 : f32 to vector<256x128xf32>
    %183 = arith.minimumf %179, %182 : vector<256x128xf32>
    %184 = math.exp %183 : vector<256x128xf32>
    %cst_144 = arith.constant 1.000000e+00 : f32
    %185 = vector.broadcast %cst_144 : f32 to vector<256x128xf32>
    %186 = arith.subf %184, %185 : vector<256x128xf32>
    %187 = arith.select %181, %179, %186 : vector<256x128xi1>, vector<256x128xf32>
    %188 = vector.shape_cast %187 : vector<256x128xf32> to vector<16x16x128xf32>
    %c1_145 = arith.constant 1 : index
    %c8_146 = arith.constant 8 : index
    %c0_147 = arith.constant 0 : index
    %189 = vector.load %arg9[%c1_145, %c8_146, %c0_147] : memref<18x32x128xf32, #tpu.memory_space<vmem>>, vector<16x16x128xf32>
    tpu.vector_store %arg9[%c1_145, %c8_146, %c0_147], %188 {strides = array<i32>} : memref<18x32x128xf32, #tpu.memory_space<vmem>>, vector<16x16x128xf32>,
    %c0_148 = arith.constant 0 : index
    %c7_149 = arith.constant 7 : index
    %c0_150 = arith.constant 0 : index
    %190 = vector.load %arg9[%c0_148, %c7_149, %c0_150] : memref<18x32x128xf32, #tpu.memory_space<vmem>>, vector<16x16x128xf32>
    %c2_151 = arith.constant 2 : index
    %c0_152 = arith.constant 0 : index
    %c0_153 = arith.constant 0 : index
    %191 = vector.load %arg4[%c2_151, %c0_152, %c0_153] : memref<3x9x128xf32, #tpu.memory_space<vmem>>, vector<1x1x128xf32>
    %192 = vector.shape_cast %191 : vector<1x1x128xf32> to vector<1x128xf32>
    %193 = vector.shape_cast %192 : vector<1x128xf32> to vector<1x1x128xf32>
    %194 = vector.broadcast %193 : vector<1x1x128xf32> to vector<16x16x128xf32>
    %195 = arith.mulf %190, %194 : vector<16x16x128xf32>
    %c0_154 = arith.constant 0 : index
    %c8_155 = arith.constant 8 : index
    %c0_156 = arith.constant 0 : index
    %196 = vector.load %arg9[%c0_154, %c8_155, %c0_156] : memref<18x32x128xf32, #tpu.memory_space<vmem>>, vector<16x16x128xf32>
    %c2_157 = arith.constant 2 : index
    %c1_158 = arith.constant 1 : index
    %c0_159 = arith.constant 0 : index
    %197 = vector.load %arg4[%c2_157, %c1_158, %c0_159] : memref<3x9x128xf32, #tpu.memory_space<vmem>>, vector<1x1x128xf32>
    %198 = vector.shape_cast %197 : vector<1x1x128xf32> to vector<1x128xf32>
    %199 = vector.shape_cast %198 : vector<1x128xf32> to vector<1x1x128xf32>
    %200 = vector.broadcast %199 : vector<1x1x128xf32> to vector<16x16x128xf32>
    %201 = arith.mulf %196, %200 : vector<16x16x128xf32>
    %202 = arith.addf %195, %201 : vector<16x16x128xf32>
    %c0_160 = arith.constant 0 : index
    %c9_161 = arith.constant 9 : index
    %c0_162 = arith.constant 0 : index
    %203 = vector.load %arg9[%c0_160, %c9_161, %c0_162] : memref<18x32x128xf32, #tpu.memory_space<vmem>>, vector<16x16x128xf32>
    %c2_163 = arith.constant 2 : index
    %c2_164 = arith.constant 2 : index
    %c0_165 = arith.constant 0 : index
    %204 = vector.load %arg4[%c2_163, %c2_164, %c0_165] : memref<3x9x128xf32, #tpu.memory_space<vmem>>, vector<1x1x128xf32>
    %205 = vector.shape_cast %204 : vector<1x1x128xf32> to vector<1x128xf32>
    %206 = vector.shape_cast %205 : vector<1x128xf32> to vector<1x1x128xf32>
    %207 = vector.broadcast %206 : vector<1x1x128xf32> to vector<16x16x128xf32>
    %208 = arith.mulf %203, %207 : vector<16x16x128xf32>
    %209 = arith.addf %202, %208 : vector<16x16x128xf32>
    %c1_166 = arith.constant 1 : index
    %c7_167 = arith.constant 7 : index
    %c0_168 = arith.constant 0 : index
    %210 = vector.load %arg9[%c1_166, %c7_167, %c0_168] : memref<18x32x128xf32, #tpu.memory_space<vmem>>, vector<16x16x128xf32>
    %c2_169 = arith.constant 2 : index
    %c3_170 = arith.constant 3 : index
    %c0_171 = arith.constant 0 : index
    %211 = vector.load %arg4[%c2_169, %c3_170, %c0_171] : memref<3x9x128xf32, #tpu.memory_space<vmem>>, vector<1x1x128xf32>
    %212 = vector.shape_cast %211 : vector<1x1x128xf32> to vector<1x128xf32>
    %213 = vector.shape_cast %212 : vector<1x128xf32> to vector<1x1x128xf32>
    %214 = vector.broadcast %213 : vector<1x1x128xf32> to vector<16x16x128xf32>
    %215 = arith.mulf %210, %214 : vector<16x16x128xf32>
    %216 = arith.addf %209, %215 : vector<16x16x128xf32>
    %c1_172 = arith.constant 1 : index
    %c8_173 = arith.constant 8 : index
    %c0_174 = arith.constant 0 : index
    %217 = vector.load %arg9[%c1_172, %c8_173, %c0_174] : memref<18x32x128xf32, #tpu.memory_space<vmem>>, vector<16x16x128xf32>
    %c2_175 = arith.constant 2 : index
    %c4_176 = arith.constant 4 : index
    %c0_177 = arith.constant 0 : index
    %218 = vector.load %arg4[%c2_175, %c4_176, %c0_177] : memref<3x9x128xf32, #tpu.memory_space<vmem>>, vector<1x1x128xf32>
    %219 = vector.shape_cast %218 : vector<1x1x128xf32> to vector<1x128xf32>
    %220 = vector.shape_cast %219 : vector<1x128xf32> to vector<1x1x128xf32>
    %221 = vector.broadcast %220 : vector<1x1x128xf32> to vector<16x16x128xf32>
    %222 = arith.mulf %217, %221 : vector<16x16x128xf32>
    %223 = arith.addf %216, %222 : vector<16x16x128xf32>
    %c1_178 = arith.constant 1 : index
    %c9_179 = arith.constant 9 : index
    %c0_180 = arith.constant 0 : index
    %224 = vector.load %arg9[%c1_178, %c9_179, %c0_180] : memref<18x32x128xf32, #tpu.memory_space<vmem>>, vector<16x16x128xf32>
    %c2_181 = arith.constant 2 : index
    %c5_182 = arith.constant 5 : index
    %c0_183 = arith.constant 0 : index
    %225 = vector.load %arg4[%c2_181, %c5_182, %c0_183] : memref<3x9x128xf32, #tpu.memory_space<vmem>>, vector<1x1x128xf32>
    %226 = vector.shape_cast %225 : vector<1x1x128xf32> to vector<1x128xf32>
    %227 = vector.shape_cast %226 : vector<1x128xf32> to vector<1x1x128xf32>
    %228 = vector.broadcast %227 : vector<1x1x128xf32> to vector<16x16x128xf32>
    %229 = arith.mulf %224, %228 : vector<16x16x128xf32>
    %230 = arith.addf %223, %229 : vector<16x16x128xf32>
    %c2_184 = arith.constant 2 : index
    %c7_185 = arith.constant 7 : index
    %c0_186 = arith.constant 0 : index
    %231 = vector.load %arg9[%c2_184, %c7_185, %c0_186] : memref<18x32x128xf32, #tpu.memory_space<vmem>>, vector<16x16x128xf32>
    %c2_187 = arith.constant 2 : index
    %c6_188 = arith.constant 6 : index
    %c0_189 = arith.constant 0 : index
    %232 = vector.load %arg4[%c2_187, %c6_188, %c0_189] : memref<3x9x128xf32, #tpu.memory_space<vmem>>, vector<1x1x128xf32>
    %233 = vector.shape_cast %232 : vector<1x1x128xf32> to vector<1x128xf32>
    %234 = vector.shape_cast %233 : vector<1x128xf32> to vector<1x1x128xf32>
    %235 = vector.broadcast %234 : vector<1x1x128xf32> to vector<16x16x128xf32>
    %236 = arith.mulf %231, %235 : vector<16x16x128xf32>
    %237 = arith.addf %230, %236 : vector<16x16x128xf32>
    %c2_190 = arith.constant 2 : index
    %c8_191 = arith.constant 8 : index
    %c0_192 = arith.constant 0 : index
    %238 = vector.load %arg9[%c2_190, %c8_191, %c0_192] : memref<18x32x128xf32, #tpu.memory_space<vmem>>, vector<16x16x128xf32>
    %c2_193 = arith.constant 2 : index
    %c7_194 = arith.constant 7 : index
    %c0_195 = arith.constant 0 : index
    %239 = vector.load %arg4[%c2_193, %c7_194, %c0_195] : memref<3x9x128xf32, #tpu.memory_space<vmem>>, vector<1x1x128xf32>
    %240 = vector.shape_cast %239 : vector<1x1x128xf32> to vector<1x128xf32>
    %241 = vector.shape_cast %240 : vector<1x128xf32> to vector<1x1x128xf32>
    %242 = vector.broadcast %241 : vector<1x1x128xf32> to vector<16x16x128xf32>
    %243 = arith.mulf %238, %242 : vector<16x16x128xf32>
    %244 = arith.addf %237, %243 : vector<16x16x128xf32>
    %c2_196 = arith.constant 2 : index
    %c9_197 = arith.constant 9 : index
    %c0_198 = arith.constant 0 : index
    %245 = vector.load %arg9[%c2_196, %c9_197, %c0_198] : memref<18x32x128xf32, #tpu.memory_space<vmem>>, vector<16x16x128xf32>
    %c2_199 = arith.constant 2 : index
    %c8_200 = arith.constant 8 : index
    %c0_201 = arith.constant 0 : index
    %246 = vector.load %arg4[%c2_199, %c8_200, %c0_201] : memref<3x9x128xf32, #tpu.memory_space<vmem>>, vector<1x1x128xf32>
    %247 = vector.shape_cast %246 : vector<1x1x128xf32> to vector<1x128xf32>
    %248 = vector.shape_cast %247 : vector<1x128xf32> to vector<1x1x128xf32>
    %249 = vector.broadcast %248 : vector<1x1x128xf32> to vector<16x16x128xf32>
    %250 = arith.mulf %245, %249 : vector<16x16x128xf32>
    %251 = arith.addf %244, %250 : vector<16x16x128xf32>
    %cst_202 = arith.constant 0.000000e+00 : f32
    %252 = vector.broadcast %cst_202 : f32 to vector<16x16x128xf32>
    %253 = arith.cmpf ogt, %251, %252 : vector<16x16x128xf32>
    %cst_203 = arith.constant 0.000000e+00 : f32
    %254 = vector.broadcast %cst_203 : f32 to vector<16x16x128xf32>
    %255 = arith.minimumf %251, %254 : vector<16x16x128xf32>
    %256 = math.exp %255 : vector<16x16x128xf32>
    %cst_204 = arith.constant 1.000000e+00 : f32
    %257 = vector.broadcast %cst_204 : f32 to vector<16x16x128xf32>
    %258 = arith.subf %256, %257 : vector<16x16x128xf32>
    %259 = arith.select %253, %251, %258 : vector<16x16x128xi1>, vector<16x16x128xf32>
    %260 = vector.shape_cast %259 : vector<16x16x128xf32> to vector<256x128xf32>
    %261 = arith.truncf %260 : vector<256x128xf32> to vector<256x128xbf16>
    %c2_205 = arith.constant 2 : index
    %c0_206 = arith.constant 0 : index
    %c0_207 = arith.constant 0 : index
    %262 = vector.load %arg5[%c2_205, %c0_206, %c0_207] : memref<3x128x128xbf16, #tpu.memory_space<vmem>>, vector<1x128x128xbf16>
    %263 = vector.shape_cast %262 : vector<1x128x128xbf16> to vector<128x128xbf16>
    %cst_208 = arith.constant dense<0.000000e+00> : vector<256x128xf32>
    %264 = tpu.matmul %261, %263, %cst_208 {dimension_numbers = #tpu.dot_dimension_numbers<[1], [0], [0], [1], [0, 0, 1, 1], [], []>} : vector<256x128xbf16>, vector<128x128xbf16>, vector<256x128xf32> -> vector<256x128xf32>
    %cst_209 = arith.constant 0.000000e+00 : f32
    %265 = vector.broadcast %cst_209 : f32 to vector<256x128xf32>
    %266 = arith.cmpf ogt, %264, %265 : vector<256x128xf32>
    %cst_210 = arith.constant 0.000000e+00 : f32
    %267 = vector.broadcast %cst_210 : f32 to vector<256x128xf32>
    %268 = arith.minimumf %264, %267 : vector<256x128xf32>
    %269 = math.exp %268 : vector<256x128xf32>
    %cst_211 = arith.constant 1.000000e+00 : f32
    %270 = vector.broadcast %cst_211 : f32 to vector<256x128xf32>
    %271 = arith.subf %269, %270 : vector<256x128xf32>
    %272 = arith.select %266, %264, %271 : vector<256x128xi1>, vector<256x128xf32>
    %273 = arith.extf %10 : vector<256x128xbf16> to vector<256x128xf32>
    %274 = arith.addf %273, %272 : vector<256x128xf32>
    %275 = vector.shape_cast %274 : vector<256x128xf32> to vector<16x16x128xf32>
    %c1_212 = arith.constant 1 : index
    %c8_213 = arith.constant 8 : index
    %c0_214 = arith.constant 0 : index
    %276 = vector.load %arg9[%c1_212, %c8_213, %c0_214] : memref<18x32x128xf32, #tpu.memory_space<vmem>>, vector<16x16x128xf32>
    tpu.vector_store %arg9[%c1_212, %c8_213, %c0_214], %275 {strides = array<i32>} : memref<18x32x128xf32, #tpu.memory_space<vmem>>, vector<16x16x128xf32>,
    %cst_215 = arith.constant 0.000000e+00 : f32
    %277 = vector.broadcast %cst_215 : f32 to vector<256x128xf32>
    %c0_216 = arith.constant 0 : index
    %c7_217 = arith.constant 7 : index
    %c0_218 = arith.constant 0 : index
    %278 = vector.load %arg9[%c0_216, %c7_217, %c0_218] : memref<18x32x128xf32, #tpu.memory_space<vmem>>, vector<16x16x128xf32>
    %279 = vector.shape_cast %278 : vector<16x16x128xf32> to vector<256x128xf32>
    %c0_219 = arith.constant 0 : index
    %c8_220 = arith.constant 8 : index
    %c0_221 = arith.constant 0 : index
    %280 = vector.load %arg9[%c0_219, %c8_220, %c0_221] : memref<18x32x128xf32, #tpu.memory_space<vmem>>, vector<16x16x128xf32>
    %281 = vector.shape_cast %280 : vector<16x16x128xf32> to vector<256x128xf32>
    %c0_222 = arith.constant 0 : index
    %c9_223 = arith.constant 9 : index
    %c0_224 = arith.constant 0 : index
    %282 = vector.load %arg9[%c0_222, %c9_223, %c0_224] : memref<18x32x128xf32, #tpu.memory_space<vmem>>, vector<16x16x128xf32>
    %283 = vector.shape_cast %282 : vector<16x16x128xf32> to vector<256x128xf32>
    %284 = tpu.concatenate %279, %281, %283 in 1 : vector<256x128xf32>, vector<256x128xf32>, vector<256x128xf32> -> vector<256x384xf32>
    %285 = arith.truncf %284 : vector<256x384xf32> to vector<256x384xbf16>
    %c0_225 = arith.constant 0 : index
    %c0_226 = arith.constant 0 : index
    %c0_227 = arith.constant 0 : index
    %286 = vector.load %arg6[%c0_225, %c0_226, %c0_227] : memref<3x384x128xbf16, #tpu.memory_space<vmem>>, vector<1x384x128xbf16>
    %287 = vector.shape_cast %286 : vector<1x384x128xbf16> to vector<384x128xbf16>
    %cst_228 = arith.constant dense<0.000000e+00> : vector<256x128xf32>
    %288 = tpu.matmul %285, %287, %cst_228 {dimension_numbers = #tpu.dot_dimension_numbers<[1], [0], [0], [1], [0, 0, 1, 1], [], []>} : vector<256x384xbf16>, vector<384x128xbf16>, vector<256x128xf32> -> vector<256x128xf32>
    %289 = arith.addf %277, %288 : vector<256x128xf32>
    %c1_229 = arith.constant 1 : index
    %c7_230 = arith.constant 7 : index
    %c0_231 = arith.constant 0 : index
    %290 = vector.load %arg9[%c1_229, %c7_230, %c0_231] : memref<18x32x128xf32, #tpu.memory_space<vmem>>, vector<16x16x128xf32>
    %291 = vector.shape_cast %290 : vector<16x16x128xf32> to vector<256x128xf32>
    %c1_232 = arith.constant 1 : index
    %c8_233 = arith.constant 8 : index
    %c0_234 = arith.constant 0 : index
    %292 = vector.load %arg9[%c1_232, %c8_233, %c0_234] : memref<18x32x128xf32, #tpu.memory_space<vmem>>, vector<16x16x128xf32>
    %293 = vector.shape_cast %292 : vector<16x16x128xf32> to vector<256x128xf32>
    %c1_235 = arith.constant 1 : index
    %c9_236 = arith.constant 9 : index
    %c0_237 = arith.constant 0 : index
    %294 = vector.load %arg9[%c1_235, %c9_236, %c0_237] : memref<18x32x128xf32, #tpu.memory_space<vmem>>, vector<16x16x128xf32>
    %295 = vector.shape_cast %294 : vector<16x16x128xf32> to vector<256x128xf32>
    %296 = tpu.concatenate %291, %293, %295 in 1 : vector<256x128xf32>, vector<256x128xf32>, vector<256x128xf32> -> vector<256x384xf32>
    %297 = arith.truncf %296 : vector<256x384xf32> to vector<256x384xbf16>
    %c1_238 = arith.constant 1 : index
    %c0_239 = arith.constant 0 : index
    %c0_240 = arith.constant 0 : index
    %298 = vector.load %arg6[%c1_238, %c0_239, %c0_240] : memref<3x384x128xbf16, #tpu.memory_space<vmem>>, vector<1x384x128xbf16>
    %299 = vector.shape_cast %298 : vector<1x384x128xbf16> to vector<384x128xbf16>
    %cst_241 = arith.constant dense<0.000000e+00> : vector<256x128xf32>
    %300 = tpu.matmul %297, %299, %cst_241 {dimension_numbers = #tpu.dot_dimension_numbers<[1], [0], [0], [1], [0, 0, 1, 1], [], []>} : vector<256x384xbf16>, vector<384x128xbf16>, vector<256x128xf32> -> vector<256x128xf32>
    %301 = arith.addf %289, %300 : vector<256x128xf32>
    %c2_242 = arith.constant 2 : index
    %c7_243 = arith.constant 7 : index
    %c0_244 = arith.constant 0 : index
    %302 = vector.load %arg9[%c2_242, %c7_243, %c0_244] : memref<18x32x128xf32, #tpu.memory_space<vmem>>, vector<16x16x128xf32>
    %303 = vector.shape_cast %302 : vector<16x16x128xf32> to vector<256x128xf32>
    %c2_245 = arith.constant 2 : index
    %c8_246 = arith.constant 8 : index
    %c0_247 = arith.constant 0 : index
    %304 = vector.load %arg9[%c2_245, %c8_246, %c0_247] : memref<18x32x128xf32, #tpu.memory_space<vmem>>, vector<16x16x128xf32>
    %305 = vector.shape_cast %304 : vector<16x16x128xf32> to vector<256x128xf32>
    %c2_248 = arith.constant 2 : index
    %c9_249 = arith.constant 9 : index
    %c0_250 = arith.constant 0 : index
    %306 = vector.load %arg9[%c2_248, %c9_249, %c0_250] : memref<18x32x128xf32, #tpu.memory_space<vmem>>, vector<16x16x128xf32>
    %307 = vector.shape_cast %306 : vector<16x16x128xf32> to vector<256x128xf32>
    %308 = tpu.concatenate %303, %305, %307 in 1 : vector<256x128xf32>, vector<256x128xf32>, vector<256x128xf32> -> vector<256x384xf32>
    %309 = arith.truncf %308 : vector<256x384xf32> to vector<256x384xbf16>
    %c2_251 = arith.constant 2 : index
    %c0_252 = arith.constant 0 : index
    %c0_253 = arith.constant 0 : index
    %310 = vector.load %arg6[%c2_251, %c0_252, %c0_253] : memref<3x384x128xbf16, #tpu.memory_space<vmem>>, vector<1x384x128xbf16>
    %311 = vector.shape_cast %310 : vector<1x384x128xbf16> to vector<384x128xbf16>
    %cst_254 = arith.constant dense<0.000000e+00> : vector<256x128xf32>
    %312 = tpu.matmul %309, %311, %cst_254 {dimension_numbers = #tpu.dot_dimension_numbers<[1], [0], [0], [1], [0, 0, 1, 1], [], []>} : vector<256x384xbf16>, vector<384x128xbf16>, vector<256x128xf32> -> vector<256x128xf32>
    %313 = arith.addf %301, %312 : vector<256x128xf32>
    %c0_255 = arith.constant 0 : index
    %c0_256 = arith.constant 0 : index
    %314 = vector.load %arg7[%c0_255, %c0_256] : memref<1x128xf32, #tpu.memory_space<vmem>>, vector<1x128xf32>
    %315 = vector.broadcast %314 : vector<1x128xf32> to vector<256x128xf32>
    %316 = arith.addf %313, %315 : vector<256x128xf32>
    %cst_257 = arith.constant 0.000000e+00 : f32
    %317 = vector.broadcast %cst_257 : f32 to vector<256x128xf32>
    %318 = arith.maximumf %316, %317 : vector<256x128xf32>
    %319 = vector.shape_cast %318 : vector<256x128xf32> to vector<1x16x16x128xf32>
    %320 = arith.truncf %319 : vector<1x16x16x128xf32> to vector<1x16x16x128xbf16>
    %c0_258 = arith.constant 0 : index
    %c0_259 = arith.constant 0 : index
    %c0_260 = arith.constant 0 : index
    %c0_261 = arith.constant 0 : index
    %321 = vector.load %arg8[%c0_258, %c0_259, %c0_260, %c0_261] : memref<1x16x16x128xbf16, #tpu.memory_space<vmem>>, vector<1x16x16x128xbf16>
    tpu.vector_store %arg8[%c0_258, %c0_259, %c0_260, %c0_261], %320 {strides = array<i32>} : memref<1x16x16x128xbf16, #tpu.memory_space<vmem>>, vector<1x16x16x128xbf16>,
    return
  }
  func.func @transform_0(%arg0: i32) -> (i32, i32, i32, i32) {
    %c0_i32 = arith.constant 0 : i32
    %c0_i32_0 = arith.constant 0 : i32
    %c0_i32_1 = arith.constant 0 : i32
    %c0_i32_2 = arith.constant 0 : i32
    return %arg0, %c0_i32, %c0_i32_0, %c0_i32_1 : i32, i32, i32, i32
  }
  func.func @transform_1(%arg0: i32) -> (i32, i32) {
    %c0_i32 = arith.constant 0 : i32
    %c0_i32_0 = arith.constant 0 : i32
    %c0_i32_1 = arith.constant 0 : i32
    return %c0_i32, %c0_i32_0 : i32, i32
  }
  func.func @transform_2(%arg0: i32) -> (i32, i32) {
    %c0_i32 = arith.constant 0 : i32
    %c0_i32_0 = arith.constant 0 : i32
    %c0_i32_1 = arith.constant 0 : i32
    return %c0_i32, %c0_i32_0 : i32, i32
  }
  func.func @transform_3(%arg0: i32) -> (i32, i32, i32) {
    %c0_i32 = arith.constant 0 : i32
    %c0_i32_0 = arith.constant 0 : i32
    %c0_i32_1 = arith.constant 0 : i32
    %c0_i32_2 = arith.constant 0 : i32
    return %c0_i32, %c0_i32_0, %c0_i32_1 : i32, i32, i32
  }
  func.func @transform_4(%arg0: i32) -> (i32, i32, i32) {
    %c0_i32 = arith.constant 0 : i32
    %c0_i32_0 = arith.constant 0 : i32
    %c0_i32_1 = arith.constant 0 : i32
    %c0_i32_2 = arith.constant 0 : i32
    return %c0_i32, %c0_i32_0, %c0_i32_1 : i32, i32, i32
  }
  func.func @transform_5(%arg0: i32) -> (i32, i32, i32) {
    %c0_i32 = arith.constant 0 : i32
    %c0_i32_0 = arith.constant 0 : i32
    %c0_i32_1 = arith.constant 0 : i32
    %c0_i32_2 = arith.constant 0 : i32
    return %c0_i32, %c0_i32_0, %c0_i32_1 : i32, i32, i32
  }
  func.func @transform_6(%arg0: i32) -> (i32, i32) {
    %c0_i32 = arith.constant 0 : i32
    %c0_i32_0 = arith.constant 0 : i32
    %c0_i32_1 = arith.constant 0 : i32
    return %c0_i32, %c0_i32_0 : i32, i32
  }
  func.func @transform_7(%arg0: i32) -> (i32, i32, i32, i32) {
    %c0_i32 = arith.constant 0 : i32
    %c0_i32_0 = arith.constant 0 : i32
    %c0_i32_1 = arith.constant 0 : i32
    %c0_i32_2 = arith.constant 0 : i32
    return %arg0, %c0_i32, %c0_i32_0, %c0_i32_1 : i32, i32, i32, i32
  }
}

</mosaic_0001>

<bundles_post_ra>
// kernel: cpm_forward.1
= control target key start
LH: loop header
LB: loop body
LE: loop exit
PB: predicated region body
PF: predicated region fallthrough
CT: control target
= control target key end

     0   :  { %12 = vsyncpa [#allocation4], 0  ;;  %s14132_s0 = inlined_call_operand.vmem [shape: bf16[2,16,16,256], index: 0, kind: input, shape index: {}]   ;;  %s14133_s1 = inlined_call_operand.vmem [shape: bf16[256,128], index: 1, kind: input, shape index: {}]   ;;  %s14134_s2 = inlined_call_operand.vmem [shape: f32[1,128], index: 2, kind: input, shape index: {}]   ;;  %s14135_s3 = inlined_call_operand.vmem [shape: f32[3,9,128], index: 3, kind: input, shape index: {}]   ;;  %s14136_s4 = inlined_call_operand.vmem [shape: bf16[3,128,128], index: 4, kind: input, shape index: {}]   ;;  %s14137_s5 = inlined_call_operand.vmem [shape: bf16[3,384,128], index: 5, kind: input, shape index: {}]   ;;  %s14138_s6 = inlined_call_operand.vmem [shape: f32[1,128], index: 6, kind: input, shape index: {}]   ;;  %s14139_s7 = inlined_call_operand.hbm [shape: bf16[2,16,16,128], index: 7, kind: output, shape index: {}]  }
   0x1   :  { %14 = vsyncpa [#allocation4 + $0x1], 0  ;;  %s9149_s24 = smov 0   ;;  %s9151_s25 = smov 0  }
   0x2   :  { %s9153_s26 = smov 0   ;;  %s9155_s27 = smov 0  }
   0x3 LB: > { %s9170_s28 = sadd.s32 4294967295, %s9104_s27   ;;  %s7344_s29 = sadd.s32 4294967294, %s9104_s27   ;;  %s9104_s27 = sphi %s9155_s27, %s14322_s27   ;;  %s9100_s26 = sphi %s9153_s26, %s14321_s26   ;;  %s9096_s25 = sphi %s9151_s25, %s14320_s25   ;;  %s9092_s24 = sphi %s9149_s24, %s14319_s24  }
   0x4   : > { %s9174_s30 = sadd.s32 1, %s9104_s27   ;;  %s179_s8 = sadd.s32 1, %s9100_s26 }
   0x5   : > { %s176_s9 = ssub.s32 %s9104_s27, %s9174_s30  ;;  %p189_p0 = scmp.ne.s32.totalorder %s9100_s26, %s9096_s25 }
   0x6   : > { %p177_p1 = scmp.eq.s32.totalorder %s176_s9, 0  ;;  %p190_p2 = scmp.eq.s32.totalorder %s9170_s28, 1 }
   0x7   : > { %p195_p3 = scmp.ne.s32.totalorder %s9096_s25, %s9092_s24  ;;  %p196_p4 = scmp.eq.s32.totalorder %s7344_s29, 1 }
   0x8   : > { %s9185_s10 = scalar_select %p177_p1, %s9100_s26, %s179_s8  }
   0x9   : > { %p9187_p5 = por %p190_p2, %p189_p0  ;;  %p9191_p6 = por %p196_p4, %p195_p3 }
   0xa   : > { %p7347_p7 = scmp.ge.s32.totalorder %s9104_s27, 1  ;;  %p240_p8 = scmp.lt.s32.totalorder %s9104_s27, 3 }
   0xc   : > { %p241_p9 = pnand %p7347_p7, %p240_p8 }
   0xe   : > { %244 = sbr.rel (%p241_p9) target bundleno = 1778 (0x6f2), region = 48 }
  0x13   : > { %v8310_v0 = vld [vmem:[%s14133_s1 + $0x38] sm:$0xff]  ;;  %v8309_v2 = vld [vmem:[%s14133_s1 + $0x30] sm:$0xff]  ;;  %v8308_v4 = vld [vmem:[%s14133_s1 + $0x28] sm:$0xff]  ;;  %p272_p10 = scmp.lt.s32.totalorder %s9170_s28, 1  ;;  %s8415_s21 = sshll.u32 %s9170_s28, 7 }
  0x14   : > { %v8318_v1 = vld [vmem:[%s14133_s1 + $0x78] sm:$0xff]  ;;  %601 = vmatpush.bf16.msra.mxu0 %v8310_v0  ;;  %v8317_v3 = vld [vmem:[%s14133_s1 + $0x70] sm:$0xff]  ;;  %8511 = vmatpush.bf16.msra.mxu2 %v8310_v0  ;;  %v8316_v5 = vld [vmem:[%s14133_s1 + $0x68] sm:$0xff]  ;;  %s9062_s18 = scalar_lea.hbm %s14139_s7, 256 }
  0x15   : > { %690 = vmatpush.bf16.msra.mxu1 %v8318_v1  ;;  %8519 = vmatpush.bf16.msra.mxu3 %v8318_v1  ;;  %v8307_v6 = vld [vmem:[%s14133_s1 + $0x20] sm:$0xff]  ;;  %v8306_v8 = vld [vmem:[%s14133_s1 + $0x18] sm:$0xff]  ;;  %s273_s19 = scalar_select %p272_p10, %s9170_s28, 1  ;;  %v8305_v10 = vld [vmem:[%s14133_s1 + $0x10] sm:$0xff] }
  0x16   : > { %v8315_v7 = vld [vmem:[%s14133_s1 + $0x60] sm:$0xff]  ;;  %v8314_v9 = vld [vmem:[%s14133_s1 + $0x58] sm:$0xff]  ;;  %v8313_v11 = vld [vmem:[%s14133_s1 + $0x50] sm:$0xff] }
  0x17   : > { %s8270_s29 = sshll.u32 %s273_s19, 8  ;;  %v8304_v12 = vld [vmem:[%s14133_s1 + $0x8] sm:$0xff]  ;;  %v8303_v14 = vld [vmem:[%s14133_s1] sm:$0xff]  ;;  %v8326_v52 = vld [vmem:[%s14136_s4 + $0x38] sm:$0xff] }
  0x18   : > { %602 = vmatpush.bf16.msra.mxu0 %v8309_v2  ;;  %8512 = vmatpush.bf16.msra.mxu2 %v8309_v2  ;;  %v8312_v13 = vld [vmem:[%s14133_s1 + $0x48] sm:$0xff]  ;;  %s9244_s17 = scalar_lea.vmem %s14132_s0, %s8270_s29  ;;  %v8311_v15 = vld [vmem:[%s14133_s1 + $0x40] sm:$0xff]  ;;  %v8325_v1 = vld [vmem:[%s14136_s4 + $0x30] sm:$0xff]  ;;  %s7278_s29 = scalar_lea.hbm %s14139_s7, %s8415_s21 }
  0x19   : > { %691 = vmatpush.bf16.msra.mxu1 %v8317_v3  ;;  %8520 = vmatpush.bf16.msra.mxu3 %v8317_v3  ;;  %v7353_v16 = vld [vmem:[%s9244_s17] sm:$0xf]  ;;  %v8272_v17 = vld [vmem:[%s9244_s17 + $0x4] sm:$0xf0]  ;;  %v8271_v18 = vld [vmem:[%s9244_s17 + $0x4] sm:$0xf] }
  0x1a   : > { %v7355_v19 = vld [vmem:[%s9244_s17 + $0x8] sm:$0xf0]  ;;  %v7417_v20 = vld [vmem:[%s9244_s17 + $0x80] sm:$0xf]  ;;  %v8288_v21 = vld [vmem:[%s9244_s17 + $0x84] sm:$0xf0]  ;;  %v7354_v24 = vor.u32 %v8272_v17, %v7353_v16 }
  0x1b   : > { %v8287_v22 = vld [vmem:[%s9244_s17 + $0x84] sm:$0xf]  ;;  %v7419_v23 = vld [vmem:[%s9244_s17 + $0x88] sm:$0xf0]  ;;  %v7358_v25 = vor.u32 %v8271_v18, %v7355_v19  ;;  %v7418_v26 = vor.u32 %v8288_v21, %v7417_v20  ;;  %v7361_v28 = vld [vmem:[%s9244_s17 + $0x10] sm:$0xf] }
  0x1c   : > { %603 = vmatpush.bf16.msra.mxu0 %v8308_v4  ;;  %8513 = vmatpush.bf16.msra.mxu2 %v8308_v4  ;;  %v7422_v27 = vor.u32 %v8287_v22, %v7419_v23  ;;  %v8274_v29 = vld [vmem:[%s9244_s17 + $0x14] sm:$0xf0]  ;;  %v8273_v30 = vld [vmem:[%s9244_s17 + $0x14] sm:$0xf]  ;;  %v7363_v31 = vld [vmem:[%s9244_s17 + $0x18] sm:$0xf0] }
  0x1d   : > { %692 = vmatpush.bf16.msra.mxu1 %v8316_v5  ;;  %8521 = vmatpush.bf16.msra.mxu3 %v8316_v5  ;;  %v7425_v32 = vld [vmem:[%s9244_s17 + $0x90] sm:$0xf]  ;;  %v8290_v33 = vld [vmem:[%s9244_s17 + $0x94] sm:$0xf0]  ;;  %v8289_v34 = vld [vmem:[%s9244_s17 + $0x94] sm:$0xf]  ;;  %v7362_v36 = vor.u32 %v8274_v29, %v7361_v28  ;;  %v7366_v37 = vor.u32 %v8273_v30, %v7363_v31 }
  0x1e   : > { %v7427_v35 = vld [vmem:[%s9244_s17 + $0x98] sm:$0xf0]  ;;  %v7426_v38 = vor.u32 %v8290_v33, %v7425_v32  ;;  %v7369_v40 = vld [vmem:[%s9244_s17 + $0x20] sm:$0xf]  ;;  %v8276_v41 = vld [vmem:[%s9244_s17 + $0x24] sm:$0xf0] }
  0x1f   : > { %v7430_v39 = vor.u32 %v8289_v34, %v7427_v35  ;;  %v8275_v42 = vld [vmem:[%s9244_s17 + $0x24] sm:$0xf]  ;;  %v7371_v43 = vld [vmem:[%s9244_s17 + $0x28] sm:$0xf0]  ;;  %v7433_v44 = vld [vmem:[%s9244_s17 + $0xa0] sm:$0xf]  ;;  %v7370_v48 = vor.u32 %v8276_v41, %v7369_v40 }
  0x20   : > { %604 = vmatpush.bf16.msra.mxu0 %v8307_v6  ;;  %8514 = vmatpush.bf16.msra.mxu2 %v8307_v6  ;;  %v8292_v45 = vld [vmem:[%s9244_s17 + $0xa4] sm:$0xf0]  ;;  %v8291_v46 = vld [vmem:[%s9244_s17 + $0xa4] sm:$0xf]  ;;  %v7435_v47 = vld [vmem:[%s9244_s17 + $0xa8] sm:$0xf0]  ;;  %v7374_v49 = vor.u32 %v8275_v42, %v7371_v43 }
  0x21   : > { %693 = vmatpush.bf16.msra.mxu1 %v8315_v7  ;;  %8522 = vmatpush.bf16.msra.mxu3 %v8315_v7  ;;  %v7434_v50 = vor.u32 %v8292_v45, %v7433_v44  ;;  %v7438_v51 = vor.u32 %v8291_v46, %v7435_v47  ;;  %v7377_v53 = vld [vmem:[%s9244_s17 + $0x30] sm:$0xf]  ;;  %v8278_v54 = vld [vmem:[%s9244_s17 + $0x34] sm:$0xf0]  ;;  %v8277_v55 = vld [vmem:[%s9244_s17 + $0x34] sm:$0xf] }
  0x22   : > { %v7379_v56 = vld [vmem:[%s9244_s17 + $0x38] sm:$0xf0]  ;;  %v7441_v57 = vld [vmem:[%s9244_s17 + $0xb0] sm:$0xf]  ;;  %v8294_v58 = vld [vmem:[%s9244_s17 + $0xb4] sm:$0xf0]  ;;  %v7378_v61 = vor.u32 %v8278_v54, %v7377_v53 }
  0x23   : > { %v8293_v59 = vld [vmem:[%s9244_s17 + $0xb4] sm:$0xf]  ;;  %v7443_v60 = vld [vmem:[%s9244_s17 + $0xb8] sm:$0xf0]  ;;  %v7382_v62 = vor.u32 %v8277_v55, %v7379_v56  ;;  %v7442_v63 = vor.u32 %v8294_v58, %v7441_v57  ;;  %v7385_v2 = vld [vmem:[%s9244_s17 + $0x40] sm:$0xf] }
  0x24   : > { %605 = vmatpush.bf16.msra.mxu0 %v8306_v8  ;;  %8515 = vmatpush.bf16.msra.mxu2 %v8306_v8  ;;  %v7446_v0 = vor.u32 %v8293_v59, %v7443_v60  ;;  %v8280_v3 = vld [vmem:[%s9244_s17 + $0x44] sm:$0xf0]  ;;  %v8279_v4 = vld [vmem:[%s9244_s17 + $0x44] sm:$0xf]  ;;  %v7387_v5 = vld [vmem:[%s9244_s17 + $0x48] sm:$0xf0] }
  0x25   : > { %694 = vmatpush.bf16.msra.mxu1 %v8314_v9  ;;  %8523 = vmatpush.bf16.msra.mxu3 %v8314_v9  ;;  %v7449_v6 = vld [vmem:[%s9244_s17 + $0xc0] sm:$0xf]  ;;  %v8296_v7 = vld [vmem:[%s9244_s17 + $0xc4] sm:$0xf0]  ;;  %v8295_v8 = vld [vmem:[%s9244_s17 + $0xc4] sm:$0xf] }
  0x26   : > { %v7451_v9 = vld [vmem:[%s9244_s17 + $0xc8] sm:$0xf0]  ;;  %v8282_v16 = vld [vmem:[%s9244_s17 + $0x54] sm:$0xf0]  ;;  %v8281_v17 = vld [vmem:[%s9244_s17 + $0x54] sm:$0xf] }
  0x27   : > { %v7395_v18 = vld [vmem:[%s9244_s17 + $0x58] sm:$0xf0]  ;;  %v7457_v19 = vld [vmem:[%s9244_s17 + $0xd0] sm:$0xf]  ;;  %v8298_v20 = vld [vmem:[%s9244_s17 + $0xd4] sm:$0xf0] }
  0x28   : > { %606 = vmatpush.bf16.msra.mxu0 %v8305_v10  ;;  %8516 = vmatpush.bf16.msra.mxu2 %v8305_v10  ;;  %v7386_v10 = vor.u32 %v8280_v3, %v7385_v2  ;;  %v8297_v21 = vld [vmem:[%s9244_s17 + $0xd4] sm:$0xf]  ;;  %v7459_v22 = vld [vmem:[%s9244_s17 + $0xd8] sm:$0xf0]  ;;  %v7401_v28 = vld [vmem:[%s9244_s17 + $0x60] sm:$0xf] }
  0x29   : > { %695 = vmatpush.bf16.msra.mxu1 %v8313_v11  ;;  %8524 = vmatpush.bf16.msra.mxu3 %v8313_v11  ;;  %v7390_v11 = vor.u32 %v8279_v4, %v7387_v5  ;;  %v8284_v29 = vld [vmem:[%s9244_s17 + $0x64] sm:$0xf0]  ;;  %v8283_v30 = vld [vmem:[%s9244_s17 + $0x64] sm:$0xf]  ;;  %v7403_v31 = vld [vmem:[%s9244_s17 + $0x68] sm:$0xf0] }
  0x2a   : > { %v7465_v32 = vld [vmem:[%s9244_s17 + $0xe0] sm:$0xf]  ;;  %v8300_v33 = vld [vmem:[%s9244_s17 + $0xe4] sm:$0xf0]  ;;  %v8299_v34 = vld [vmem:[%s9244_s17 + $0xe4] sm:$0xf] }
  0x2b   : > { %v7467_v35 = vld [vmem:[%s9244_s17 + $0xe8] sm:$0xf0]  ;;  %v9106_v40 = vmov 0.0   ;;  %v7409_v41 = vld [vmem:[%s9244_s17 + $0x70] sm:$0xf]  ;;  %v8322_v45 = vld [vmem:[%s14136_s4 + $0x18] sm:$0xff] }
  0x2c   : > { %607 = vmatpush.bf16.msra.mxu0 %v8304_v12  ;;  %8517 = vmatpush.bf16.msra.mxu2 %v8304_v12  ;;  %v7450_v12 = vor.u32 %v8296_v7, %v7449_v6  ;;  %843 = vst [vmem:[#allocation2] sm:$0xff] %v9106_v40  ;;  %v8286_v42 = vld [vmem:[%s9244_s17 + $0x74] sm:$0xf0]  ;;  %v8285_v43 = vld [vmem:[%s9244_s17 + $0x74] sm:$0xf]  ;;  %v8320_v7 = vld [vmem:[%s14136_s4 + $0x8] sm:$0xff] }
  0x2d   : > { %696 = vmatpush.bf16.msra.mxu1 %v8312_v13  ;;  %8525 = vmatpush.bf16.msra.mxu3 %v8312_v13  ;;  %v7454_v13 = vor.u32 %v8295_v8, %v7451_v9  ;;  %844 = vst [vmem:[#allocation2 + $0x8] sm:$0xff] %v9106_v40  ;;  %v7411_v44 = vld [vmem:[%s9244_s17 + $0x78] sm:$0xf0]  ;;  %v7473_v46 = vld [vmem:[%s9244_s17 + $0xf0] sm:$0xf]  ;;  %s7281_s9 = sshll.u32 %s7278_s29, 4  ;;  %s7282_s9 = int_to_ptr.hbm [resolvable:$true] %s7281_s9 }
  0x2e   : > { %845 = vst [vmem:[#allocation2 + $0x10] sm:$0xff] %v9106_v40  ;;  %v8302_v47 = vld [vmem:[%s9244_s17 + $0xf4] sm:$0xf0]  ;;  %v8321_v54 = vld [vmem:[%s14136_s4 + $0x10] sm:$0xff]  ;;  %v9359_v55 = vld [vmem:[%s14134_s2] ss:$0 sm:$0xff] }
  0x2f   : > { %846 = vst [vmem:[#allocation2 + $0x18] sm:$0xff] %v9106_v40  ;;  %s9056_s13 = sshra.s32 %s7282_s9, 4  ;;  %s9057_s13 = int_to_ptr.hbm [resolvable:$true] %s9056_s13 }
  0x30   : > { %608 = vmatpush.bf16.msra.mxu0 %v8303_v14  ;;  %8518 = vmatpush.bf16.msra.mxu2 %v8303_v14  ;;  %v8324_v14 = vld [vmem:[%s14136_s4 + $0x28] sm:$0xff]  ;;  %853 = vst [vmem:[#allocation2 + $0x20] sm:$0xff] %v9106_v40  ;;  %s9058_s14 = scalar_lea.hbm %s9057_s13, 128  ;;  %p9063_p0 = scmp.lt.s32.totalorder %s9057_s13, %s14139_s7 }
  0x31   : > { %697 = vmatpush.bf16.msra.mxu1 %v8311_v15  ;;  %8526 = vmatpush.bf16.msra.mxu3 %v8311_v15  ;;  %v7393_v15 = vld [vmem:[%s9244_s17 + $0x50] sm:$0xf]  ;;  %854 = vst [vmem:[#allocation2 + $0x40] sm:$0xff] %v9106_v40  ;;  %p9059_p11 = scmp.ne.s32.totalorder %s9057_s13, %s9058_s14  ;;  %p9064_p1 = scmp.lt.s32.totalorder %s9062_s18, %s9058_s14 }
  0x32   : > { %v7394_v23 = vor.u32 %v8282_v16, %v7393_v15  ;;  %869 = vst [vmem:[#allocation2 + $0x38] sm:$0xff] %v9106_v40 }
  0x33   : > { %609 = vmatmul.bf16.vlgmr.msra.gmra.mxu0 %v7354_v24  ;;  %649 = vmatmul.bf16.vlgmr.msra.gmra.mxu2 %v7418_v26  ;;  %v7398_v24 = vor.u32 %v8281_v17, %v7395_v18  ;;  %v7462_v26 = vor.u32 %v8297_v21, %v7459_v22  ;;  %870 = vst [vmem:[#allocation2 + $0x58] sm:$0xff] %v9106_v40  ;;  %v9403_v22 = vld [vmem:[%s14135_s3 + $0x1] ss:$0 sm:$0xff]  ;;  %p9060_p12 = pnand %p9059_p11, %p9187_p5  ;;  %p9065_p2 = por %p9064_p1, %p9063_p0 }
  0x34   : > { %698 = vmatmul.bf16.vlgmr.msra.gmra.mxu1 %v7358_v25  ;;  %738 = vmatmul.bf16.vlgmr.msra.gmra.mxu3 %v7422_v27  ;;  %v7458_v25 = vor.u32 %v8298_v20, %v7457_v19  ;;  %v8323_v27 = vld [vmem:[%s14136_s4 + $0x20] sm:$0xff]  ;;  %848 = vst [vmem:[#allocation2 + $0x220] sm:$0xff] %v9106_v40 }
  0x35   : > { %2072 = vmatpush.bf16.msrb.mxu2 %v8326_v52  ;;  %v7474_v52 = vor.u32 %v8302_v47, %v7473_v46  ;;  %849 = vst [vmem:[#allocation2 + $0x228] sm:$0xff] %v9106_v40  ;;  %v949_v19 = vld [vmem:[#allocation2 + $0x7] sm:$0xff]  ;;  %p9061_p13 = pneg %p9060_p12 }
  0x36   : > { %850 = vst [vmem:[#allocation2 + $0x230] sm:$0xff] %v9106_v40 }
  0x37   : > { %851 = vst [vmem:[#allocation2 + $0x238] sm:$0xff] %v9106_v40  ;;  %p9066_p3 = pnand %p9065_p2, %p9061_p13 }
  0x38   : > { %855 = vst [vmem:[#allocation2 + $0x60] sm:$0xff] %v9106_v40 }
  0x39   : > { %2073 = vmatpush.bf16.msrb.mxu2 %v8325_v1  ;;  %856 = vst [vmem:[#allocation2 + $0x80] sm:$0xff] %v9106_v40 }
  0x3a   : > { %857 = vst [vmem:[#allocation2 + $0xa0] sm:$0xff] %v9106_v40 }
  0x3b   : > { %858 = vst [vmem:[#allocation2 + $0xc0] sm:$0xff] %v9106_v40 }
  0x3c   : > { %859 = vst [vmem:[#allocation2 + $0xe0] sm:$0xff] %v9106_v40 }
  0x3d   : > { %2074 = vmatpush.bf16.msrb.mxu2 %v8324_v14  ;;  %860 = vst [vmem:[#allocation2 + $0x100] sm:$0xff] %v9106_v40  ;;  %v9392_v14 = vld [vmem:[%s14135_s3] ss:$0 sm:$0xff] }
  0x3e   : > { %861 = vst [vmem:[#allocation2 + $0x120] sm:$0xff] %v9106_v40 }
  0x3f   : > { %862 = vst [vmem:[#allocation2 + $0x140] sm:$0xff] %v9106_v40 }
  0x40   : > { %863 = vst [vmem:[#allocation2 + $0x160] sm:$0xff] %v9106_v40 }
  0x41   : > { %2075 = vmatpush.bf16.msrb.mxu2 %v8323_v27  ;;  %864 = vst [vmem:[#allocation2 + $0x180] sm:$0xff] %v9106_v40  ;;  %v1049_v27 = vmul.f32 0.0, %v9403_v22 }
  0x42   : > { %865 = vst [vmem:[#allocation2 + $0x1a0] sm:$0xff] %v9106_v40 }
  0x43   : > { %614 = vmatmul.bf16.gmra.mxu0 %v7362_v36  ;;  %654 = vmatmul.bf16.gmra.mxu2 %v7426_v38  ;;  %v7402_v36 = vor.u32 %v8284_v29, %v7401_v28  ;;  %v7466_v38 = vor.u32 %v8300_v33, %v7465_v32  ;;  %866 = vst [vmem:[#allocation2 + $0x1c0] sm:$0xff] %v9106_v40  ;;  %v9413_v28 = vld [vmem:[%s14135_s3 + $0x2] ss:$0 sm:$0xff] }
  0x44   : > { %703 = vmatmul.bf16.gmra.mxu1 %v7366_v37  ;;  %743 = vmatmul.bf16.gmra.mxu3 %v7430_v39  ;;  %v7406_v37 = vor.u32 %v8283_v30, %v7403_v31  ;;  %v7470_v39 = vor.u32 %v8299_v34, %v7467_v35  ;;  %867 = vst [vmem:[#allocation2 + $0x1e0] sm:$0xff] %v9106_v40  ;;  %v1113_v30 = vld [vmem:[#allocation2 + $0x9] sm:$0xff] }
  0x45   : > { %2076 = vmatpush.bf16.msrb.mxu2 %v8322_v45  ;;  %868 = vst [vmem:[#allocation2 + $0x200] sm:$0xff] %v9106_v40 }
  0x46   : > { %871 = vst [vmem:[#allocation2 + $0x78] sm:$0xff] %v9106_v40 }
  0x47   : > { %872 = vst [vmem:[#allocation2 + $0x98] sm:$0xff] %v9106_v40 }
  0x48   : > { %873 = vst [vmem:[#allocation2 + $0xb8] sm:$0xff] %v9106_v40 }
  0x49   : > { %2077 = vmatpush.bf16.msrb.mxu2 %v8321_v54  ;;  %874 = vst [vmem:[#allocation2 + $0xd8] sm:$0xff] %v9106_v40 }
  0x4a   : > { %875 = vst [vmem:[#allocation2 + $0xf8] sm:$0xff] %v9106_v40 }
  0x4b   : > { %876 = vst [vmem:[#allocation2 + $0x118] sm:$0xff] %v9106_v40 }
  0x4c   : > { %877 = vst [vmem:[#allocation2 + $0x138] sm:$0xff] %v9106_v40 }
  0x4d   : > { %878 = vst [vmem:[#allocation2 + $0x158] sm:$0xff] %v9106_v40  ;;  %2078 = vmatpush.bf16.msrb.mxu2 %v8320_v7 }
  0x4e   : > { %879 = vst [vmem:[#allocation2 + $0x178] sm:$0xff] %v9106_v40 }
  0x4f   : > { %880 = vst [vmem:[#allocation2 + $0x198] sm:$0xff] %v9106_v40 }
  0x50   : > { %881 = vst [vmem:[#allocation2 + $0x1b8] sm:$0xff] %v9106_v40 }
  0x51   : > { %882 = vst [vmem:[#allocation2 + $0x1d8] sm:$0xff] %v9106_v40 }
  0x52   : > { %883 = vst [vmem:[#allocation2 + $0x1f8] sm:$0xff] %v9106_v40 }
  0x53   : > { %619 = vmatmul.bf16.gmra.mxu0 %v7370_v48  ;;  %659 = vmatmul.bf16.gmra.mxu2 %v7434_v50  ;;  %v8301_v48 = vld [vmem:[%s9244_s17 + $0xf4] sm:$0xf]  ;;  %v7410_v50 = vor.u32 %v8286_v42, %v7409_v41  ;;  %884 = vst [vmem:[#allocation2 + $0x218] sm:$0xff] %v9106_v40  ;;  %v9422_v40 = vld [vmem:[%s14135_s3 + $0x3] ss:$0 sm:$0xff] }
  0x54   : > { %708 = vmatmul.bf16.gmra.mxu1 %v7374_v49  ;;  %748 = vmatmul.bf16.gmra.mxu3 %v7438_v51  ;;  %v7475_v49 = vld [vmem:[%s9244_s17 + $0xf8] sm:$0xf0]  ;;  %v7414_v51 = vor.u32 %v8285_v43, %v7411_v44  ;;  %s269_s17 = sand.u32 1, %s9096_s25  }
  0x55   : > { %v7478_v53 = vor.u32 %v8301_v48, %v7475_v49  ;;  %s7348_s19 = sshll.u32 %s269_s17, 7  ;;  %s7267_s28 = scalar_lea.sflag [#allocation4], %s269_s17 }
  0x56   : > { %s13983_s20 = scalar_lea.vmem [#allocation3], %s7348_s19 }
  0x57   : > { %s7279_s8 = sshll.u32 %s13983_s20, 4  ;;  %s7280_s8 = int_to_ptr.vmem [resolvable:$true] %s7279_s8 }
  0x63   : > { %624 = vmatmul.bf16.gmra.mxu0 %v7378_v61  ;;  %664 = vmatmul.bf16.gmra.mxu2 %v7442_v63 }
  0x64   : > { %713 = vmatmul.bf16.gmra.mxu1 %v7382_v62  ;;  %753 = vmatmul.bf16.gmra.mxu3 %v7446_v0 }
  0x73   : > { %629 = vmatmul.bf16.gmra.mxu0 %v7386_v10  ;;  %669 = vmatmul.bf16.gmra.mxu2 %v7450_v12 }
  0x74   : > { %718 = vmatmul.bf16.gmra.mxu1 %v7390_v11  ;;  %758 = vmatmul.bf16.gmra.mxu3 %v7454_v13 }
  0x83   : > { %634 = vmatmul.bf16.gmra.mxu0 %v7394_v23  ;;  %674 = vmatmul.bf16.gmra.mxu2 %v7458_v25  ;;  %v950_v25 = vld [vmem:[#allocation2 + $0xf] sm:$0xff] }
  0x84   : > { %723 = vmatmul.bf16.gmra.mxu1 %v7398_v24  ;;  %763 = vmatmul.bf16.gmra.mxu3 %v7462_v26  ;;  %v983_v26 = vmul.f32 %v9392_v14, %v949_v19  ;;  %v984_v33 = vmul.f32 %v9392_v14, %v950_v25 }
  0x86   : > { %v1082_v49 = vadd.f32 %v1049_v27, %v984_v33 }
  0x93   : > { %639 = vmatmul.bf16.gmra.mxu0 %v7402_v36  ;;  %679 = vmatmul.bf16.gmra.mxu2 %v7466_v38  ;;  %v1114_v38 = vld [vmem:[#allocation2 + $0x11] sm:$0xff] }
  0x94   : > { %728 = vmatmul.bf16.gmra.mxu1 %v7406_v37  ;;  %768 = vmatmul.bf16.gmra.mxu3 %v7470_v39  ;;  %v1081_v37 = vadd.f32 %v1049_v27, %v983_v26  ;;  %v1147_v39 = vmul.f32 %v9413_v28, %v1113_v30  ;;  %v9472_v30 = vld [vmem:[%s14135_s3 + $0x7] ss:$0 sm:$0xff] }
  0xa3   : > { %644 = vmatmul.bf16.gmra.mxu0 %v7410_v50  ;;  %684 = vmatmul.bf16.gmra.mxu2 %v7474_v52  ;;  %v1148_v50 = vmul.f32 %v9413_v28, %v1114_v38  ;;  %v8319_v52 = vld [vmem:[%s14136_s4] sm:$0xff] }
  0xa4   : > { %733 = vmatmul.bf16.gmra.mxu1 %v7414_v51  ;;  %773 = vmatmul.bf16.gmra.mxu3 %v7478_v53  ;;  %v1179_v53 = vadd.f32 %v1147_v39, %v1081_v37 }
  0xa5   : > { %2079 = vmatpush.bf16.msrb.mxu2 %v8319_v52  ;;  %v9489_v52 = vld [vmem:[%s14135_s3 + $0x8] ss:$0 sm:$0xff] }
  0xb0   : > { %v610_v56 = vpop.f32.mrf.mxu0 }
  0xb1   : > { %v699_v57 = vpop.f32.mrf.mxu1  ;;  %v611_v58 = vadd.f32 %v9359_v55, %v610_v56 }
  0xb3   : > { %v700_v59 = vadd.f32 %v699_v57, %v611_v58  ;;  %v9440_v58 = vld [vmem:[%s14135_s3 + $0x4] ss:$0 sm:$0xff] }
  0xb5   : > { %v779_v60 = vmax.f32 %v700_v59, 0.0 }
  0xb6   : > { %v650_v62 = vpop.f32.mrf.mxu2 }
  0xb7   : > { %v811_v61 = vpack.c.bf16 %v779_v60, %v779_v60  ;;  %v739_v63 = vpop.f32.mrf.mxu3  ;;  %v651_v2 = vadd.f32 %v9359_v55, %v650_v62  ;;  %v9445_v60 = vld [vmem:[%s14135_s3 + $0x5] ss:$0 sm:$0xff]  ;;  %v1180_v62 = vadd.f32 %v1148_v50, %v1082_v49 }
  0xb8   : > { %v612_v0 = vpop.f32.mrf.mxu0 }
  0xb9   : > { %v701_v1 = vpop.f32.mrf.mxu1  ;;  %v9375_v3 = vunpack.c.l.bf16 %v811_v61  ;;  %v613_v4 = vadd.f32 %v9359_v55, %v612_v0  ;;  %v740_v5 = vadd.f32 %v739_v63, %v651_v2 }
  0xbb   : > { %14207 = vst [vmem:[#allocation6_spill] sm:$0xff] %v9375_v3  ;;  %v702_v6 = vadd.f32 %v701_v1, %v613_v4  ;;  %v795_v8 = vmax.f32 %v740_v5, 0.0 }
  0xbc   : > { %917 = vst [vmem:[#allocation2 + $0x28] sm:$0xff] %v9375_v3 }
  0xbd   : > { %v780_v9 = vmax.f32 %v702_v6, 0.0  ;;  %v9386_v10 = vpack.c.bf16 %v795_v8, %v795_v8  ;;  %v9453_v6 = vld [vmem:[%s14135_s3 + $0x6] ss:$0 sm:$0xff] }
  0xbe   : > { %v652_v12 = vpop.f32.mrf.mxu2 }
  0xbf   : > { %14208 = vst [vmem:[#allocation7_spill] sm:$0xff] %v9386_v10  ;;  %v812_v11 = vpack.c.bf16 %v780_v9, %v780_v9  ;;  %v741_v13 = vpop.f32.mrf.mxu3  ;;  %v14149_v17 = vunpack.c.l.bf16 %v9386_v10  ;;  %v653_v18 = vadd.f32 %v9359_v55, %v652_v12  ;;  %v1343_v12 = vmul.f32 %v9440_v58, %v9375_v3 }
  0xc0   : > { %v615_v15 = vpop.f32.mrf.mxu0 }
  0xc1   : > { %v704_v16 = vpop.f32.mrf.mxu1  ;;  %v9397_v20 = vunpack.c.l.bf16 %v812_v11  ;;  %v616_v21 = vadd.f32 %v9359_v55, %v615_v15  ;;  %933 = vst [vmem:[#allocation2 + $0x128] sm:$0xff] %v14149_v17  ;;  %v742_v23 = vadd.f32 %v741_v13, %v653_v18 }
  0xc3   : > { %14209 = vst [vmem:[#allocation8_spill] sm:$0xff] %v9397_v20  ;;  %v705_v24 = vadd.f32 %v704_v16, %v616_v21  ;;  %v796_v29 = vmax.f32 %v742_v23, 0.0  ;;  %v1211_v45 = vld [vmem:[#allocation2 + $0x27] sm:$0xff] }
  0xc4   : > { %918 = vst [vmem:[#allocation2 + $0x30] sm:$0xff] %v9397_v20  ;;  %v1245_v56 = vmul.f32 %v9422_v40, %v1211_v45 }
  0xc5   : > { %v781_v31 = vmax.f32 %v705_v24, 0.0  ;;  %v9415_v32 = vpack.c.bf16 %v796_v29, %v796_v29  ;;  %v985_v24 = vmul.f32 %v9392_v14, %v1211_v45 }
  0xc6   : > { %v655_v35 = vpop.f32.mrf.mxu2  ;;  %v1277_v5 = vadd.f32 %v1245_v56, %v1179_v53 }
  0xc7   : > { %14210 = vst [vmem:[#allocation9_spill] sm:$0xff] %v9415_v32  ;;  %v813_v34 = vpack.c.bf16 %v781_v31, %v781_v31  ;;  %v744_v36 = vpop.f32.mrf.mxu3  ;;  %v14148_v43 = vunpack.c.l.bf16 %v9415_v32  ;;  %v656_v44 = vadd.f32 %v9359_v55, %v655_v35  ;;  %v1052_v31 = vmul.f32 %v9403_v22, %v9397_v20 }
  0xc8   : > { %v617_v41 = vpop.f32.mrf.mxu0  ;;  %v1375_v26 = vadd.f32 %v1343_v12, %v1277_v5  ;;  %v1051_v35 = vmul.f32 %v9403_v22, %v9375_v3 }
  0xc9   : > { %v706_v42 = vpop.f32.mrf.mxu1  ;;  %v9426_v46 = vunpack.c.l.bf16 %v813_v34  ;;  %v618_v47 = vadd.f32 %v9359_v55, %v617_v41  ;;  %934 = vst [vmem:[#allocation2 + $0x130] sm:$0xff] %v14148_v43  ;;  %v745_v48 = vadd.f32 %v744_v36, %v656_v44  ;;  %v1344_v34 = vmul.f32 %v9440_v58, %v9397_v20 }
  0xca   : > { %v1083_v45 = vadd.f32 %v1051_v35, %v985_v24 }
  0xcb   : > { %14211 = vst [vmem:[#allocation10_spill] sm:$0xff] %v9426_v46  ;;  %v707_v51 = vadd.f32 %v706_v42, %v618_v47  ;;  %v1212_v54 = vld [vmem:[#allocation2 + $0x2f] sm:$0xff]  ;;  %v797_v57 = vmax.f32 %v745_v48, 0.0 }
  0xcc   : > { %919 = vst [vmem:[#allocation2 + $0x48] sm:$0xff] %v9426_v46  ;;  %v1246_v63 = vmul.f32 %v9422_v40, %v1212_v54  ;;  %v1407_v0 = vld [vmem:[#allocation2 + $0x29] sm:$0xff]  ;;  %v986_v18 = vmul.f32 %v9392_v14, %v1212_v54  ;;  %v1408_v27 = vld [vmem:[#allocation2 + $0x31] sm:$0xff] }
  0xcd   : > { %v782_v59 = vmax.f32 %v707_v51, 0.0  ;;  %v9447_v61 = vpack.c.bf16 %v797_v57, %v797_v57  ;;  %v1441_v16 = vmul.f32 %v9445_v60, %v1407_v0  ;;  %v1149_v36 = vmul.f32 %v9413_v28, %v1407_v0 }
  0xce   : > { %v657_v2 = vpop.f32.mrf.mxu2  ;;  %v1278_v21 = vadd.f32 %v1246_v63, %v1180_v62  ;;  %v1084_v39 = vadd.f32 %v1052_v31, %v986_v18  ;;  %v1442_v44 = vmul.f32 %v9445_v60, %v1408_v27  ;;  %v1638_v51 = vmul.f32 %v9472_v30, %v9426_v46 }
  0xcf   : > { %14212 = vst [vmem:[#allocation11_spill] sm:$0xff] %v9447_v61  ;;  %v814_v1 = vpack.c.bf16 %v782_v59, %v782_v59  ;;  %v746_v4 = vpop.f32.mrf.mxu3  ;;  %v14147_v9 = vunpack.c.l.bf16 %v9447_v61  ;;  %v658_v11 = vadd.f32 %v9359_v55, %v657_v2  ;;  %v1473_v38 = vadd.f32 %v1441_v16, %v1375_v26 }
  0xd0   : > { %v620_v7 = vpop.f32.mrf.mxu0  ;;  %v1376_v42 = vadd.f32 %v1344_v34, %v1278_v21  ;;  %v1150_v53 = vmul.f32 %v9413_v28, %v1408_v27  ;;  %v1181_v62 = vadd.f32 %v1149_v36, %v1083_v45  ;;  %v1345_v63 = vmul.f32 %v9440_v58, %v9426_v46 }
  0xd1   : > { %v709_v8 = vpop.f32.mrf.mxu1  ;;  %v9459_v13 = vunpack.c.l.bf16 %v814_v1  ;;  %v621_v15 = vadd.f32 %v9359_v55, %v620_v7  ;;  %935 = vst [vmem:[#allocation2 + $0x148] sm:$0xff] %v14147_v9  ;;  %v747_v19 = vadd.f32 %v746_v4, %v658_v11  ;;  %v1053_v4 = vmul.f32 %v9403_v22, %v9426_v46 }
  0xd2   : > { %v1182_v2 = vadd.f32 %v1150_v53, %v1084_v39  ;;  %v1474_v7 = vadd.f32 %v1442_v44, %v1376_v42 }
  0xd3   : > { %14213 = vst [vmem:[#allocation12_spill] sm:$0xff] %v9459_v13  ;;  %v1506_v23 = vld [vmem:[#allocation2 + $0x47] sm:$0xff]  ;;  %v710_v25 = vadd.f32 %v709_v8, %v621_v15  ;;  %v798_v33 = vmax.f32 %v747_v19, 0.0  ;;  %v1054_v34 = vmul.f32 %v9403_v22, %v9459_v13 }
  0xd4   : > { %920 = vst [vmem:[#allocation2 + $0x50] sm:$0xff] %v9459_v13  ;;  %v1540_v29 = vmul.f32 %v9453_v6, %v1506_v23  ;;  %v1247_v12 = vmul.f32 %v9422_v40, %v1506_v23  ;;  %v987_v15 = vmul.f32 %v9392_v14, %v1506_v23 }
  0xd5   : > { %v783_v37 = vmax.f32 %v710_v25, 0.0  ;;  %v9481_v41 = vpack.c.bf16 %v798_v33, %v798_v33  ;;  %v1639_v25 = vmul.f32 %v9472_v30, %v9459_v13 }
  0xd6   : > { %v660_v48 = vpop.f32.mrf.mxu2  ;;  %v1572_v50 = vadd.f32 %v1540_v29, %v1473_v38  ;;  %v1346_v29 = vmul.f32 %v9440_v58, %v9459_v13  ;;  %v1279_v36 = vadd.f32 %v1247_v12, %v1181_v62  ;;  %v1085_v38 = vadd.f32 %v1053_v4, %v987_v15 }
  0xd7   : > { %14214 = vst [vmem:[#allocation13_spill] sm:$0xff] %v9481_v41  ;;  %v815_v47 = vpack.c.bf16 %v783_v37, %v783_v37  ;;  %v749_v49 = vpop.f32.mrf.mxu3  ;;  %v14144_v57 = vunpack.c.l.bf16 %v9481_v41  ;;  %v661_v59 = vadd.f32 %v9359_v55, %v660_v48 }
  0xd8   : > { %v622_v54 = vpop.f32.mrf.mxu0  ;;  %v1670_v19 = vadd.f32 %v1638_v51, %v1572_v50 }
  0xd9   : > { %v711_v56 = vpop.f32.mrf.mxu1  ;;  %v9496_v0 = vunpack.c.l.bf16 %v815_v47  ;;  %v623_v1 = vadd.f32 %v9359_v55, %v622_v54  ;;  %936 = vst [vmem:[#allocation2 + $0x150] sm:$0xff] %v14144_v57  ;;  %v750_v5 = vadd.f32 %v749_v49, %v661_v59 }
  0xdb   : > { %14215 = vst [vmem:[#allocation14_spill] sm:$0xff] %v9496_v0  ;;  %v1507_v8 = vld [vmem:[#allocation2 + $0x4f] sm:$0xff]  ;;  %v712_v16 = vadd.f32 %v711_v56, %v623_v1  ;;  %v799_v24 = vmax.f32 %v750_v5, 0.0  ;;  %v1377_v5 = vadd.f32 %v1345_v63, %v1279_v36 }
  0xdc   : > { %v1702_v11 = vld [vmem:[#allocation2 + $0x49] sm:$0xff]  ;;  %921 = vst [vmem:[#allocation2 + $0x68] sm:$0xff] %v9496_v0  ;;  %v1541_v18 = vmul.f32 %v9453_v6, %v1507_v8  ;;  %v1703_v26 = vld [vmem:[#allocation2 + $0x51] sm:$0xff]  ;;  %v1248_v27 = vmul.f32 %v9422_v40, %v1507_v8  ;;  %v988_v56 = vmul.f32 %v9392_v14, %v1507_v8 }
  0xdd   : > { %v1736_v21 = vmul.f32 %v9489_v52, %v1702_v11  ;;  %v784_v31 = vmax.f32 %v712_v16, 0.0  ;;  %v9517_v35 = vpack.c.bf16 %v799_v24, %v799_v24  ;;  %v1737_v47 = vmul.f32 %v9489_v52, %v1703_v26 }
  0xde   : > { %v1573_v23 = vadd.f32 %v1541_v18, %v1474_v7  ;;  %v1280_v37 = vadd.f32 %v1248_v27, %v1182_v2  ;;  %v662_v42 = vpop.f32.mrf.mxu2  ;;  %v1443_v54 = vmul.f32 %v9445_v60, %v1702_v11  ;;  %v1444_v12 = vmul.f32 %v9445_v60, %v1703_v26 }
  0xdf   : > { %v9513_v33 = vadd.f32 %v1736_v21, %v1670_v19  ;;  %14216 = vst [vmem:[#allocation15_spill] sm:$0xff] %v9517_v35  ;;  %v816_v39 = vpack.c.bf16 %v784_v31, %v784_v31  ;;  %v751_v44 = vpop.f32.mrf.mxu3  ;;  %v14143_v51 = vunpack.c.l.bf16 %v9517_v35  ;;  %v663_v53 = vadd.f32 %v9359_v55, %v662_v42 }
  0xe0   : > { %v1671_v45 = vadd.f32 %v1639_v25, %v1573_v23  ;;  %v625_v49 = vpop.f32.mrf.mxu0  ;;  %v1378_v7 = vadd.f32 %v1346_v29, %v1280_v37  ;;  %v1151_v18 = vmul.f32 %v9413_v28, %v1702_v11  ;;  %v1475_v21 = vadd.f32 %v1443_v54, %v1377_v5 }
  0xe1   : > { %v1832_v48 = vmin.f32 %v9513_v33, 0.0  ;;  %v714_v50 = vpop.f32.mrf.mxu1  ;;  %v9525_v59 = vunpack.c.l.bf16 %v816_v39  ;;  %v626_v62 = vadd.f32 %v9359_v55, %v625_v49  ;;  %937 = vst [vmem:[#allocation2 + $0x168] sm:$0xff] %v14143_v51  ;;  %v752_v4 = vadd.f32 %v751_v44, %v663_v53 }
  0xe2   : > { %v9528_v1 = vadd.f32 %v1737_v47, %v1671_v45  ;;  %v1640_v25 = vmul.f32 %v9472_v30, %v9496_v0  ;;  %v1086_v29 = vadd.f32 %v1054_v34, %v988_v56  ;;  %vm1800_vm0 = vcmp.gt.f32.partialorder %v9513_v33, 0.0 }
  0xe3   : > { %14217 = vst [vmem:[#allocation16_spill] sm:$0xff] %v9525_v59  ;;  %v1864_v2 = vmul.f32 1.442695, %v1832_v48  ;;  %v1508_v15 = vld [vmem:[#allocation2 + $0x67] sm:$0xff]  ;;  %v715_v16 = vadd.f32 %v714_v50, %v626_v62  ;;  %v800_v19 = vmax.f32 %v752_v4, 0.0  ;;  %v1476_v36 = vadd.f32 %v1444_v12, %v1378_v7 }
  0xe4   : > { %922 = vst [vmem:[#allocation2 + $0x70] sm:$0xff] %v9525_v59  ;;  %v1833_v8 = vmin.f32 %v9528_v1, 0.0  ;;  %v1542_v24 = vmul.f32 %v9453_v6, %v1508_v15  ;;  %v1249_v31 = vmul.f32 %v9422_v40, %v1508_v15  ;;  %v1152_v37 = vmul.f32 %v9413_v28, %v1703_v26 }
  0xe5   : > { %8598 = vpow2.f32 %v1864_v2  ;;  %v785_v63 = vmax.f32 %v715_v16, 0.0  ;;  %v9540_v23 = vpack.c.bf16 %v800_v19, %v800_v19  ;;  %v1183_v45 = vadd.f32 %v1151_v18, %v1085_v38 }
  0xe6   : > { %v1866_v27 = vmul.f32 1.442695, %v1833_v8  ;;  %v665_v39 = vpop.f32.mrf.mxu2  ;;  %v1574_v44 = vadd.f32 %v1542_v24, %v1475_v21  ;;  %vm1801_vm1 = vcmp.gt.f32.partialorder %v9528_v1, 0.0  ;;  %v1641_v50 = vmul.f32 %v9472_v30, %v9525_v59 }
  0xe7   : > { %14218 = vst [vmem:[#allocation17_spill] sm:$0xff] %v9540_v23  ;;  %v817_v11 = vpack.c.bf16 %v785_v63, %v785_v63  ;;  %v754_v42 = vpop.f32.mrf.mxu3  ;;  %v14142_v49 = vunpack.c.l.bf16 %v9540_v23  ;;  %v666_v34 = vadd.f32 %v9359_v55, %v665_v39  ;;  %v1184_v56 = vadd.f32 %v1152_v37, %v1086_v29 }
  0xe8   : > { %8600 = vpow2.f32 %v1866_v27  ;;  %v627_v47 = vpop.f32.mrf.mxu0  ;;  %v1281_v62 = vadd.f32 %v1249_v31, %v1183_v45  ;;  %v1347_v7 = vmul.f32 %v9440_v58, %v9496_v0  ;;  %v1348_v12 = vmul.f32 %v9440_v58, %v9525_v59 }
  0xe9   : > { %v716_v48 = vpop.f32.mrf.mxu1  ;;  %v9549_v54 = vunpack.c.l.bf16 %v817_v11  ;;  %v628_v26 = vadd.f32 %v9359_v55, %v627_v47  ;;  %938 = vst [vmem:[#allocation2 + $0x170] sm:$0xff] %v14142_v49  ;;  %v755_v2 = vadd.f32 %v754_v42, %v666_v34  ;;  %v1672_v18 = vadd.f32 %v1640_v25, %v1574_v44 }
  0xea   : > { %v989_v27 = vmul.f32 %v9392_v14, %v1508_v15  ;;  %v1055_v29 = vmul.f32 %v9403_v22, %v9496_v0  ;;  %v1379_v42 = vadd.f32 %v1347_v7, %v1281_v62 }
  0xeb   : > { %v8599_v53 = vpop.eup %8598  ;;  %14219 = vst [vmem:[#allocation18_spill] sm:$0xff] %v9549_v54  ;;  %v1509_v4 = vld [vmem:[#allocation2 + $0x6f] sm:$0xff]  ;;  %v717_v16 = vadd.f32 %v716_v48, %v628_v26  ;;  %v801_v24 = vmax.f32 %v755_v2, 0.0 }
  0xec   : > { %v7543_v38 = vadd.f32 -1.0, %v8599_v53  ;;  %v1704_v5 = vld [vmem:[#allocation2 + $0x69] sm:$0xff]  ;;  %923 = vst [vmem:[#allocation2 + $0x88] sm:$0xff] %v9549_v54  ;;  %v1543_v8 = vmul.f32 %v9453_v6, %v1509_v4  ;;  %v9560_v19 = vld [vmem:[#allocation2 + $0x71] sm:$0xff]  ;;  %v1250_v63 = vmul.f32 %v9422_v40, %v1509_v4 }
  0xed   : > { %v1738_v21 = vmul.f32 %v9489_v52, %v1704_v5  ;;  %v786_v37 = vmax.f32 %v717_v16, 0.0  ;;  %v9572_v44 = vpack.c.bf16 %v801_v24, %v801_v24  ;;  %v1739_v47 = vmul.f32 %v9489_v52, %v9560_v19 }
  0xee   : > { %v8601_v31 = vpop.eup %8600  ;;  %v1575_v11 = vadd.f32 %v1543_v8, %v1476_v36  ;;  %v1960_v25 = vsel %vm1800_vm0, %v9513_v33, %v7543_v38  ;;  %v667_v48 = vpop.f32.mrf.mxu2  ;;  %v1282_v36 = vadd.f32 %v1250_v63, %v1184_v56  ;;  %v1445_v7 = vmul.f32 %v9445_v60, %v1704_v5 }
  0xef   : > { %v9567_v39 = vadd.f32 %v1738_v21, %v1672_v18  ;;  %v7544_v45 = vadd.f32 -1.0, %v8601_v31  ;;  %14220 = vst [vmem:[#allocation19_spill] sm:$0xff] %v9572_v44  ;;  %v818_v15 = vpack.c.bf16 %v786_v37, %v786_v37  ;;  %v756_v34 = vpop.f32.mrf.mxu3  ;;  %v14141_v33 = vunpack.c.l.bf16 %v9572_v44  ;;  %v10007_v44 = vld [vmem:[#allocation2 + $0x128] sm:$0xff] }
  0xf0   : > { %v1673_v53 = vadd.f32 %v1641_v50, %v1575_v11  ;;  %v630_v2 = vpop.f32.mrf.mxu0  ;;  %v668_v38 = vadd.f32 %v9359_v55, %v667_v48  ;;  %v1087_v31 = vadd.f32 %v1055_v29, %v989_v27  ;;  %v990_v48 = vmul.f32 %v9392_v14, %v1509_v4 }
  0xf1   : > { %v1834_v26 = vmin.f32 %v9567_v39, 0.0  ;;  %v719_v16 = vpop.f32.mrf.mxu1  ;;  %v1961_v62 = vsel %vm1801_vm1, %v9528_v1, %v7544_v45  ;;  %v9583_v8 = vunpack.c.l.bf16 %v818_v15  ;;  %v631_v18 = vadd.f32 %v9359_v55, %v630_v2  ;;  %939 = vst [vmem:[#allocation2 + $0x188] sm:$0xff] %v14141_v33 }
  0xf2   : > { %v1992_v50 = vpack.c.bf16 %v1961_v62, %v1960_v25  ;;  %v9586_v21 = vadd.f32 %v1739_v47, %v1673_v53  ;;  %v757_v56 = vadd.f32 %v756_v34, %v668_v38  ;;  %v1056_v1 = vmul.f32 %v9403_v22, %v9525_v59 }
  0xf3   : > { %14221 = vst [vmem:[#allocation20_spill] sm:$0xff] %v9583_v8  ;;  %v1868_v24 = vmul.f32 1.442695, %v1834_v26  ;;  %v9590_v63 = vld [vmem:[#allocation2 + $0x87] sm:$0xff]  ;;  %v720_v37 = vadd.f32 %v719_v16, %v631_v18  ;;  %v1380_v45 = vadd.f32 %v1348_v12, %v1282_v36  ;;  %v1477_v15 = vadd.f32 %v1445_v7, %v1379_v42 }
  0xf4   : > { %924 = vst [vmem:[#allocation2 + $0x90] sm:$0xff] %v9583_v8  ;;  %2080 = vmatmul.bf16.vlgmr.msrb.gmra.mxu2 %v1992_v50  ;;  %v1835_v11 = vmin.f32 %v9586_v21, 0.0  ;;  %v1544_v25 = vmul.f32 %v9453_v6, %v9590_v63  ;;  %v802_v47 = vmax.f32 %v757_v56, 0.0  ;;  %v1446_v27 = vmul.f32 %v9445_v60, %v9560_v19 }
  0xf5   : > { %8602 = vpow2.f32 %v1868_v24  ;;  %v787_v34 = vmax.f32 %v720_v37, 0.0  ;;  %v1153_v29 = vmul.f32 %v9413_v28, %v1704_v5  ;;  %v1088_v16 = vadd.f32 %v1056_v1, %v990_v48 }
  0xf6   : > { %v1870_v53 = vmul.f32 1.442695, %v1835_v11  ;;  %v9602_v26 = vpack.c.bf16 %v802_v47, %v802_v47  ;;  %v1576_v2 = vadd.f32 %v1544_v25, %v1477_v15  ;;  %v1251_v12 = vmul.f32 %v9422_v40, %v9590_v63  ;;  %v670_v42 = vpop.f32.mrf.mxu2 }
  0xf7   : > { %v819_v36 = vpack.c.bf16 %v787_v34, %v787_v34  ;;  %vm1802_vm2 = vcmp.gt.f32.partialorder %v9567_v39, 0.0  ;;  %v759_v4 = vpop.f32.mrf.mxu3  ;;  %v1478_v62 = vadd.f32 %v1446_v27, %v1380_v45  ;;  %v1642_v38 = vmul.f32 %v9472_v30, %v9549_v54 }
  0xf8   : > { %14222 = vst [vmem:[#allocation21_spill] sm:$0xff] %v9602_v26  ;;  %8604 = vpow2.f32 %v1870_v53  ;;  %v632_v7 = vpop.f32.mrf.mxu0  ;;  %v14140_v5 = vunpack.c.l.bf16 %v9602_v26  ;;  %v671_v50 = vadd.f32 %v9359_v55, %v670_v42  ;;  %v1154_v56 = vmul.f32 %v9413_v28, %v9560_v19 }
  0xf9   : > { %v721_v18 = vpop.f32.mrf.mxu1  ;;  %v1185_v24 = vadd.f32 %v1153_v29, %v1087_v31  ;;  %v9613_v1 = vunpack.c.l.bf16 %v819_v36  ;;  %v633_v37 = vadd.f32 %v9359_v55, %v632_v7  ;;  %vm1803_vm3 = vcmp.gt.f32.partialorder %v9586_v21, 0.0 }
  0xfa   : > { %v1643_v11 = vmul.f32 %v9472_v30, %v9583_v8  ;;  %940 = vst [vmem:[#allocation2 + $0x190] sm:$0xff] %v14140_v5  ;;  %v760_v47 = vadd.f32 %v759_v4, %v671_v50  ;;  %v1674_v15 = vadd.f32 %v1642_v38, %v1576_v2  ;;  %v1186_v31 = vadd.f32 %v1154_v56, %v1088_v16 }
  0xfb   : > { %14223 = vst [vmem:[#allocation22_spill] sm:$0xff] %v9613_v1  ;;  %v8603_v45 = vpop.eup %8602  ;;  %v9619_v25 = vld [vmem:[#allocation2 + $0x8f] sm:$0xff]  ;;  %v1283_v34 = vadd.f32 %v1251_v12, %v1185_v24  ;;  %v722_v53 = vadd.f32 %v721_v18, %v633_v37  ;;  %v1349_v36 = vmul.f32 %v9440_v58, %v9549_v54  ;;  %v1350_v16 = vmul.f32 %v9440_v58, %v9583_v8 }
  0xfc   : > { %v1706_v48 = vld [vmem:[#allocation2 + $0x89] sm:$0xff]  ;;  %v9623_v19 = vld [vmem:[#allocation2 + $0x91] sm:$0xff]  ;;  %925 = vst [vmem:[#allocation2 + $0xa8] sm:$0xff] %v9613_v1  ;;  %v1545_v27 = vmul.f32 %v9453_v6, %v9619_v25  ;;  %v7545_v42 = vadd.f32 -1.0, %v8603_v45  ;;  %v803_v7 = vmax.f32 %v760_v47, 0.0  ;;  %v1252_v2 = vmul.f32 %v9422_v40, %v9619_v25 }
  0xfd   : > { %v1740_v29 = vmul.f32 %v9489_v52, %v1706_v48  ;;  %v788_v4 = vmax.f32 %v722_v53, 0.0  ;;  %v1741_v18 = vmul.f32 %v9489_v52, %v9623_v19  ;;  %v1381_v45 = vadd.f32 %v1349_v36, %v1283_v34 }
  0xfe   : > { %v8605_v12 = vpop.eup %8604  ;;  %v1577_v38 = vadd.f32 %v1545_v27, %v1478_v62  ;;  %v9639_v24 = vpack.c.bf16 %v803_v7, %v803_v7  ;;  %v1284_v37 = vadd.f32 %v1252_v2, %v1186_v31  ;;  %v672_v5 = vpop.f32.mrf.mxu2  ;;  %v1447_v57 = vmul.f32 %v9445_v60, %v1706_v48 }
  0xff   : > { %v9637_v50 = vadd.f32 %v1740_v29, %v1674_v15  ;;  %v7546_v56 = vadd.f32 -1.0, %v8605_v12  ;;  %v820_v47 = vpack.c.bf16 %v788_v4, %v788_v4  ;;  %v761_v33 = vpop.f32.mrf.mxu3  ;;  %v1962_v15 = vsel %vm1802_vm2, %v9567_v39, %v7545_v42 }
 0x100   : > { %14224 = vst [vmem:[#allocation23_spill] sm:$0xff] %v9639_v24  ;;  %v1675_v49 = vadd.f32 %v1643_v11, %v1577_v38  ;;  %v635_v53 = vpop.f32.mrf.mxu0  ;;  %v14146_v31 = vunpack.c.l.bf16 %v9639_v24  ;;  %v673_v34 = vadd.f32 %v9359_v55, %v672_v5  ;;  %v1382_v42 = vadd.f32 %v1350_v16, %v1284_v37 }
 0x101   : > { %v1836_v51 = vmin.f32 %v9637_v50, 0.0  ;;  %v724_v62 = vpop.f32.mrf.mxu1  ;;  %v1963_v27 = vsel %vm1803_vm3, %v9586_v21, %v7546_v56  ;;  %v9651_v29 = vunpack.c.l.bf16 %v820_v47  ;;  %v636_v11 = vadd.f32 %v9359_v55, %v635_v53 }
 0x102   : > { %v1993_v36 = vpack.c.bf16 %v1963_v27, %v1962_v15  ;;  %v9654_v7 = vadd.f32 %v1741_v18, %v1675_v49  ;;  %941 = vst [vmem:[#allocation2 + $0x1a8] sm:$0xff] %v14146_v31  ;;  %v762_v2 = vadd.f32 %v761_v33, %v673_v34  ;;  %v991_v21 = vmul.f32 %v9392_v14, %v9590_v63 }
 0x103   : > { %14225 = vst [vmem:[#allocation24_spill] sm:$0xff] %v9651_v29  ;;  %v1872_v39 = vmul.f32 1.442695, %v1836_v51  ;;  %v9658_v12 = vld [vmem:[#allocation2 + $0xa7] sm:$0xff]  ;;  %v725_v5 = vadd.f32 %v724_v62, %v636_v11  ;;  %v1479_v38 = vadd.f32 %v1447_v57, %v1381_v45  ;;  %v1057_v51 = vmul.f32 %v9403_v22, %v9549_v54 }
 0x104   : > { %926 = vst [vmem:[#allocation2 + $0xb0] sm:$0xff] %v9651_v29  ;;  %2085 = vmatmul.bf16.gmra.mxu2 %v1993_v36  ;;  %v1837_v4 = vmin.f32 %v9654_v7, 0.0  ;;  %v1546_v49 = vmul.f32 %v9453_v6, %v9658_v12  ;;  %v804_v18 = vmax.f32 %v762_v2, 0.0  ;;  %v1058_v33 = vmul.f32 %v9403_v22, %v9583_v8 }
 0x105   : > { %8606 = vpow2.f32 %v1872_v39  ;;  %v789_v16 = vmax.f32 %v725_v5, 0.0  ;;  %v1448_v56 = vmul.f32 %v9445_v60, %v9623_v19  ;;  %vm1804_vm4 = vcmp.gt.f32.partialorder %v9637_v50, 0.0 }
 0x106   : > { %v1874_v63 = vmul.f32 1.442695, %v1837_v4  ;;  %v1578_v37 = vadd.f32 %v1546_v49, %v1479_v38  ;;  %v9672_v47 = vpack.c.bf16 %v804_v18, %v804_v18  ;;  %v992_v57 = vmul.f32 %v9392_v14, %v9619_v25  ;;  %v675_v62 = vpop.f32.mrf.mxu2 }
 0x107   : > { %v1155_v45 = vmul.f32 %v9413_v28, %v1706_v48  ;;  %v821_v53 = vpack.c.bf16 %v789_v16, %v789_v16  ;;  %vm1805_vm5 = vcmp.gt.f32.partialorder %v9654_v7, 0.0  ;;  %v764_v15 = vpop.f32.mrf.mxu3  ;;  %v1480_v27 = vadd.f32 %v1448_v56, %v1382_v42 }
 0x108   : > { %14226 = vst [vmem:[#allocation25_spill] sm:$0xff] %v9672_v47  ;;  %8608 = vpow2.f32 %v1874_v63  ;;  %v1644_v34 = vmul.f32 %v9472_v30, %v9613_v1  ;;  %v637_v11 = vpop.f32.mrf.mxu0  ;;  %v14145_v2 = vunpack.c.l.bf16 %v9672_v47  ;;  %v1645_v39 = vmul.f32 %v9472_v30, %v9651_v29 }
 0x109   : > { %v726_v36 = vpop.f32.mrf.mxu1  ;;  %v1089_v25 = vadd.f32 %v1057_v51, %v991_v21  ;;  %v1090_v5 = vadd.f32 %v1058_v33, %v992_v57  ;;  %v9684_v48 = vunpack.c.l.bf16 %v821_v53  ;;  %v638_v4 = vadd.f32 %v9359_v55, %v637_v11 }
 0x10a   : > { %v1676_v38 = vadd.f32 %v1644_v34, %v1578_v37  ;;  %v1253_v42 = vmul.f32 %v9422_v40, %v9658_v12  ;;  %942 = vst [vmem:[#allocation2 + $0x1b0] sm:$0xff] %v14145_v2  ;;  %v676_v16 = vadd.f32 %v9359_v55, %v675_v62  ;;  %v1156_v21 = vmul.f32 %v9413_v28, %v9623_v19 }
 0x10b   : > { %14227 = vst [vmem:[#allocation26_spill] sm:$0xff] %v9684_v48  ;;  %v8607_v49 = vpop.eup %8606  ;;  %v9689_v18 = vld [vmem:[#allocation2 + $0xaf] sm:$0xff]  ;;  %v1187_v51 = vadd.f32 %v1155_v45, %v1089_v25  ;;  %v1351_v33 = vmul.f32 %v9440_v58, %v9613_v1  ;;  %v727_v56 = vadd.f32 %v726_v36, %v638_v4  ;;  %v1352_v45 = vmul.f32 %v9440_v58, %v9651_v29 }
 0x10c   : > { %v9694_v63 = vld [vmem:[#allocation2 + $0xa9] sm:$0xff]  ;;  %927 = vst [vmem:[#allocation2 + $0xc8] sm:$0xff] %v9684_v48  ;;  %v7547_v37 = vadd.f32 -1.0, %v8607_v49  ;;  %v1547_v57 = vmul.f32 %v9453_v6, %v9689_v18  ;;  %v9703_v53 = vld [vmem:[#allocation2 + $0xb1] sm:$0xff]  ;;  %v765_v34 = vadd.f32 %v764_v15, %v676_v16  ;;  %v1188_v11 = vadd.f32 %v1156_v21, %v1090_v5 }
 0x10d   : > { %v1742_v62 = vmul.f32 %v9489_v52, %v9694_v63  ;;  %v1254_v19 = vmul.f32 %v9422_v40, %v9689_v18  ;;  %v790_v2 = vmax.f32 %v727_v56, 0.0  ;;  %v1285_v49 = vadd.f32 %v1253_v42, %v1187_v51 }
 0x10e   : > { %v8609_v25 = vpop.eup %8608  ;;  %v1579_v36 = vadd.f32 %v1547_v57, %v1480_v27  ;;  %v1964_v9 = vsel %vm1804_vm4, %v9637_v50, %v7547_v37  ;;  %v805_v43 = vmax.f32 %v765_v34, 0.0  ;;  %v1743_v15 = vmul.f32 %v9489_v52, %v9703_v53  ;;  %v677_v16 = vpop.f32.mrf.mxu2 }
 0x10f   : > { %v9711_v4 = vadd.f32 %v1742_v62, %v1676_v38  ;;  %v7548_v31 = vadd.f32 -1.0, %v8609_v25  ;;  %v822_v5 = vpack.c.bf16 %v790_v2, %v790_v2  ;;  %v766_v21 = vpop.f32.mrf.mxu3  ;;  %v1286_v56 = vadd.f32 %v1254_v19, %v1188_v11 }
 0x110   : > { %v1677_v17 = vadd.f32 %v1645_v39, %v1579_v36  ;;  %v640_v27 = vpop.f32.mrf.mxu0  ;;  %v9722_v51 = vpack.c.bf16 %v805_v43, %v805_v43  ;;  %v678_v50 = vadd.f32 %v9359_v55, %v677_v16  ;;  %v1449_v37 = vmul.f32 %v9445_v60, %v9694_v63 }
 0x111   : > { %v1838_v47 = vmin.f32 %v9711_v4, 0.0  ;;  %v729_v38 = vpop.f32.mrf.mxu1  ;;  %v1965_v42 = vsel %vm1805_vm5, %v9654_v7, %v7548_v31  ;;  %v9727_v2 = vunpack.c.l.bf16 %v822_v5  ;;  %v641_v39 = vadd.f32 %v9359_v55, %v640_v27 }
 0x112   : > { %14228 = vst [vmem:[#allocation27_spill] sm:$0xff] %v9722_v51  ;;  %v1994_v57 = vpack.c.bf16 %v1965_v42, %v1964_v9  ;;  %v9730_v62 = vadd.f32 %v1743_v15, %v1677_v17  ;;  %v14155_v34 = vunpack.c.l.bf16 %v9722_v51  ;;  %v767_v11 = vadd.f32 %v766_v21, %v678_v50  ;;  %v1025_v9 = vld [vmem:[#allocation2 + $0xa8] sm:$0xff] }
 0x113   : > { %14229 = vst [vmem:[#allocation28_spill] sm:$0xff] %v9727_v2  ;;  %v1876_v19 = vmul.f32 1.442695, %v1838_v47  ;;  %v1383_v25 = vadd.f32 %v1351_v33, %v1285_v49  ;;  %v9733_v31 = vld [vmem:[#allocation2 + $0xc7] sm:$0xff]  ;;  %v730_v43 = vadd.f32 %v729_v38, %v641_v39  ;;  %v1384_v36 = vadd.f32 %v1352_v45, %v1286_v56 }
 0x114   : > { %928 = vst [vmem:[#allocation2 + $0xd0] sm:$0xff] %v9727_v2  ;;  %2090 = vmatmul.bf16.gmra.mxu2 %v1994_v57  ;;  %v1839_v7 = vmin.f32 %v9730_v62, 0.0  ;;  %v993_v5 = vmul.f32 %v9392_v14, %v9658_v12  ;;  %v806_v17 = vmax.f32 %v767_v11, 0.0  ;;  %v1548_v33 = vmul.f32 %v9453_v6, %v9733_v31 }
 0x115   : > { %943 = vst [vmem:[#allocation2 + $0x1c8] sm:$0xff] %v14155_v34  ;;  %8610 = vpow2.f32 %v1876_v19  ;;  %v1481_v47 = vadd.f32 %v1449_v37, %v1383_v25  ;;  %v791_v49 = vmax.f32 %v730_v43, 0.0  ;;  %v1450_v16 = vmul.f32 %v9445_v60, %v9703_v53 }
 0x116   : > { %v1878_v15 = vmul.f32 1.442695, %v1839_v7  ;;  %v1646_v45 = vmul.f32 %v9472_v30, %v9684_v48  ;;  %v9747_v21 = vpack.c.bf16 %v806_v17, %v806_v17  ;;  %v994_v56 = vmul.f32 %v9392_v14, %v9689_v18  ;;  %v680_v42 = vpop.f32.mrf.mxu2 }
 0x117   : > { %v1580_v12 = vadd.f32 %v1548_v33, %v1481_v47  ;;  %v1059_v27 = vmul.f32 %v9403_v22, %v1025_v9  ;;  %v823_v38 = vpack.c.bf16 %v791_v49, %v791_v49  ;;  %vm1806_vm6 = vcmp.gt.f32.partialorder %v9711_v4, 0.0  ;;  %v769_v7 = vpop.f32.mrf.mxu3 }
 0x118   : > { %14230 = vst [vmem:[#allocation29_spill] sm:$0xff] %v9747_v21  ;;  %vm1807_vm7 = vcmp.gt.f32.partialorder %v9730_v62, 0.0  ;;  %8612 = vpow2.f32 %v1878_v15  ;;  %v1060_v50 = vmul.f32 %v9403_v22, %v9651_v29  ;;  %v1157_v37 = vmul.f32 %v9413_v28, %v9694_v63  ;;  %v642_v39 = vpop.f32.mrf.mxu0 }
 0x119   : > { %v731_v57 = vpop.f32.mrf.mxu1  ;;  %v14151_v11 = vunpack.c.l.bf16 %v9747_v21  ;;  %v1482_v14 = vadd.f32 %v1450_v16, %v1384_v36  ;;  %v1647_v18 = vmul.f32 %v9472_v30, %v9727_v2  ;;  %v1091_v19 = vadd.f32 %v1059_v27, %v993_v5  ;;  %v1521_v21 = vld [vmem:[#allocation2 + $0x12f] sm:$0xff] }
 0x11a   : > { %v9761_v25 = vunpack.c.l.bf16 %v823_v38  ;;  %v643_v43 = vadd.f32 %v9359_v55, %v642_v39  ;;  %v1678_v9 = vadd.f32 %v1646_v45, %v1580_v12  ;;  %v1092_v17 = vadd.f32 %v1060_v50, %v994_v56  ;;  %v8334_v12 = vld [vmem:[%s14136_s4 + $0x78] sm:$0xff] }
 0x11b   : > { %v8611_v22 = vpop.eup %8610  ;;  %v9764_v47 = vld [vmem:[#allocation2 + $0xcf] sm:$0xff]  ;;  %944 = vst [vmem:[#allocation2 + $0x1d0] sm:$0xff] %v14151_v11  ;;  %v681_v63 = vadd.f32 %v9359_v55, %v680_v42  ;;  %v1158_v5 = vmul.f32 %v9413_v28, %v9703_v53  ;;  %v1189_v33 = vadd.f32 %v1157_v37, %v1091_v19  ;;  %v1255_v49 = vmul.f32 %v9422_v40, %v9733_v31 }
 0x11c   : > { %14231 = vst [vmem:[#allocation30_spill] sm:$0xff] %v9761_v25  ;;  %v9769_v36 = vld [vmem:[#allocation2 + $0xc9] sm:$0xff]  ;;  %v732_v15 = vadd.f32 %v731_v57, %v643_v43  ;;  %v1549_v16 = vmul.f32 %v9453_v6, %v9764_v47  ;;  %v9778_v45 = vld [vmem:[#allocation2 + $0xd1] sm:$0xff]  ;;  %v1353_v28 = vmul.f32 %v9440_v58, %v9684_v48  ;;  %v7549_v53 = vadd.f32 -1.0, %v8611_v22  ;;  %3509 = vmatpush.bf16.msrb.mxu3 %v8334_v12 }
 0x11d   : > { %929 = vst [vmem:[#allocation2 + $0xe8] sm:$0xff] %v9761_v25  ;;  %v1744_v55 = vmul.f32 %v9489_v52, %v9769_v36  ;;  %v770_v56 = vadd.f32 %v769_v7, %v681_v63  ;;  %v1190_v27 = vadd.f32 %v1158_v5, %v1092_v17  ;;  %v1256_v38 = vmul.f32 %v9422_v40, %v9764_v47 }
 0x11e   : > { %v8613_v42 = vpop.eup %8612  ;;  %v792_v50 = vmax.f32 %v732_v15, 0.0  ;;  %v1581_v37 = vadd.f32 %v1549_v16, %v1482_v14  ;;  %v1354_v57 = vmul.f32 %v9440_v58, %v9727_v2  ;;  %v1745_v11 = vmul.f32 %v9489_v52, %v9778_v45  ;;  %v682_v17 = vpop.f32.mrf.mxu2 }
 0x11f   : > { %v9789_v39 = vadd.f32 %v1744_v55, %v1678_v9  ;;  %v7550_v19 = vadd.f32 -1.0, %v8613_v42  ;;  %v807_v43 = vmax.f32 %v770_v56, 0.0  ;;  %v1288_v22 = vadd.f32 %v1256_v38, %v1190_v27  ;;  %v9807_v55 = vld [vmem:[%s14134_s2] ss:$0 sm:$0xff]  ;;  %v771_v56 = vpop.f32.mrf.mxu3 }
 0x120   : > { %v824_v7 = vpack.c.bf16 %v792_v50, %v792_v50  ;;  %v1679_v63 = vadd.f32 %v1647_v18, %v1581_v37  ;;  %v1287_v5 = vadd.f32 %v1255_v49, %v1189_v33  ;;  %v645_v15 = vpop.f32.mrf.mxu0  ;;  %v1966_v9 = vsel %vm1806_vm6, %v9711_v4, %v7549_v53 }
 0x121   : > { %v1840_v40 = vmin.f32 %v9789_v39, 0.0  ;;  %v734_v14 = vpop.f32.mrf.mxu1  ;;  %v1967_v58 = vsel %vm1807_vm7, %v9730_v62, %v7550_v19  ;;  %v9802_v16 = vpack.c.bf16 %v807_v43, %v807_v43  ;;  %v683_v18 = vadd.f32 %v9807_v55, %v682_v17 }
 0x122   : > { %v9810_v33 = vunpack.c.l.bf16 %v824_v7  ;;  %v646_v49 = vadd.f32 %v9807_v55, %v645_v15  ;;  %v1995_v12 = vpack.c.bf16 %v1967_v58, %v1966_v9  ;;  %v9813_v4 = vadd.f32 %v1745_v11, %v1679_v63  ;;  %v8333_v11 = vld [vmem:[%s14136_s4 + $0x70] sm:$0xff] }
 0x123   : > { %14232 = vst [vmem:[#allocation31_spill] sm:$0xff] %v9802_v16  ;;  %v14153_v53 = vunpack.c.l.bf16 %v9802_v16  ;;  %v772_v62 = vadd.f32 %v771_v56, %v683_v18  ;;  %v1880_v27 = vmul.f32 1.442695, %v1840_v40  ;;  %v1386_v38 = vadd.f32 %v1354_v57, %v1288_v22  ;;  %3510 = vmatpush.bf16.msrb.mxu3 %v8333_v11  ;;  %v9991_v16 = vld [vmem:[#allocation2 + $0x127] sm:$0xff] }
 0x124   : > { %14233 = vst [vmem:[#allocation32_spill] sm:$0xff] %v9810_v33  ;;  %v9816_v42 = vld [vmem:[#allocation2 + $0xe7] sm:$0xff]  ;;  %v735_v50 = vadd.f32 %v734_v14, %v646_v49  ;;  %2095 = vmatmul.bf16.gmra.mxu2 %v1995_v12  ;;  %v1841_v37 = vmin.f32 %v9813_v4, 0.0  ;;  %v1385_v19 = vadd.f32 %v1353_v28, %v1287_v5  ;;  %v1451_v43 = vmul.f32 %v9445_v60, %v9769_v36  ;;  %v9839_v14 = vld [vmem:[%s14135_s3] ss:$0 sm:$0xff] }
 0x125   : > { %930 = vst [vmem:[#allocation2 + $0xf0] sm:$0xff] %v9810_v33  ;;  %v808_v57 = vmax.f32 %v772_v62, 0.0  ;;  %8614 = vpow2.f32 %v1880_v27  ;;  %v1452_v22 = vmul.f32 %v9445_v60, %v9778_v45  ;;  %v1550_v7 = vmul.f32 %v9453_v6, %v9816_v42  ;;  %v9851_v27 = vld [vmem:[%s14135_s3 + $0x1] ss:$0 sm:$0xff] }
 0x126   : > { %945 = vst [vmem:[#allocation2 + $0x1e8] sm:$0xff] %v14153_v53  ;;  %v793_v17 = vmax.f32 %v735_v50, 0.0  ;;  %v1882_v28 = vmul.f32 1.442695, %v1841_v37  ;;  %v1483_v63 = vadd.f32 %v1451_v43, %v1385_v19  ;;  %vm1808_vm8 = vcmp.gt.f32.partialorder %v9789_v39, 0.0  ;;  %v685_v58 = vpop.f32.mrf.mxu2 }
 0x127   : > { %v9831_v40 = vpack.c.bf16 %v808_v57, %v808_v57  ;;  %v1484_v5 = vadd.f32 %v1452_v22, %v1386_v38  ;;  %v1648_v15 = vmul.f32 %v9472_v30, %v9761_v25  ;;  %v995_v60 = vmul.f32 %v9839_v14, %v9733_v31  ;;  %v774_v37 = vpop.f32.mrf.mxu3  ;;  %v9863_v43 = vld [vmem:[%s14135_s3 + $0x2] ss:$0 sm:$0xff] }
 0x128   : > { %v825_v9 = vpack.c.bf16 %v793_v17, %v793_v17  ;;  %vm1809_vm9 = vcmp.gt.f32.partialorder %v9813_v4, 0.0  ;;  %8616 = vpow2.f32 %v1882_v28  ;;  %v1582_v18 = vadd.f32 %v1550_v7, %v1483_v63  ;;  %v647_v12 = vpop.f32.mrf.mxu0 }
 0x129   : > { %14234 = vst [vmem:[#allocation33_spill] sm:$0xff] %v9831_v40  ;;  %v996_v49 = vmul.f32 %v9839_v14, %v9764_v47  ;;  %v14152_v56 = vunpack.c.l.bf16 %v9831_v40  ;;  %v686_v62 = vadd.f32 %v9807_v55, %v685_v58  ;;  %v1061_v31 = vmul.f32 %v9851_v27, %v9684_v48  ;;  %v736_v7 = vpop.f32.mrf.mxu1 }
 0x12a   : > { %v1062_v38 = vmul.f32 %v9851_v27, %v9727_v2  ;;  %v9857_v50 = vunpack.c.l.bf16 %v825_v9  ;;  %v648_v47 = vadd.f32 %v9807_v55, %v647_v12  ;;  %v1680_v19 = vadd.f32 %v1648_v15, %v1582_v18 }
 0x12b   : > { %v1159_v11 = vmul.f32 %v9863_v43, %v9769_v36  ;;  %v8615_v57 = vpop.eup %8614  ;;  %946 = vst [vmem:[#allocation2 + $0x1f0] sm:$0xff] %v14152_v56  ;;  %v775_v17 = vadd.f32 %v774_v37, %v686_v62  ;;  %v1093_v15 = vadd.f32 %v1061_v31, %v995_v60  ;;  %v1160_v58 = vmul.f32 %v9863_v43, %v9778_v45 }
 0x12c   : > { %14235 = vst [vmem:[#allocation34_spill] sm:$0xff] %v9857_v50  ;;  %v9867_v22 = vld [vmem:[#allocation2 + $0xef] sm:$0xff]  ;;  %v1094_v9 = vadd.f32 %v1062_v38, %v996_v49  ;;  %v737_v36 = vadd.f32 %v736_v7, %v648_v47  ;;  %v7551_v18 = vadd.f32 -1.0, %v8615_v57  ;;  %v1649_v37 = vmul.f32 %v9472_v30, %v9810_v33 }
 0x12d   : > { %v9871_v28 = vld [vmem:[#allocation2 + $0xe9] sm:$0xff]  ;;  %v9873_v63 = vld [vmem:[#allocation2 + $0xf1] sm:$0xff]  ;;  %931 = vst [vmem:[#allocation2 + $0x108] sm:$0xff] %v9857_v50  ;;  %v1551_v12 = vmul.f32 %v9453_v6, %v9867_v22  ;;  %v809_v62 = vmax.f32 %v775_v17, 0.0  ;;  %v1191_v49 = vadd.f32 %v1159_v11, %v1093_v15  ;;  %v9893_v6 = vld [vmem:[%s14135_s3 + $0x3] ss:$0 sm:$0xff] }
 0x12e   : > { %v1746_v56 = vmul.f32 %v9489_v52, %v9871_v28  ;;  %v1747_v60 = vmul.f32 %v9489_v52, %v9873_v63  ;;  %v8617_v31 = vpop.eup %8616  ;;  %v794_v45 = vmax.f32 %v737_v36, 0.0  ;;  %v1192_v47 = vadd.f32 %v1160_v58, %v1094_v9 }
 0x12f   : > { %v1583_v38 = vadd.f32 %v1551_v12, %v1484_v5  ;;  %v7552_v57 = vadd.f32 -1.0, %v8617_v31  ;;  %v9888_v7 = vpack.c.bf16 %v809_v62, %v809_v62  ;;  %v1257_v30 = vmul.f32 %v9893_v6, %v9816_v42  ;;  %v776_v31 = vpop.f32.mrf.mxu3 }
 0x130   : > { %v9886_v53 = vadd.f32 %v1746_v56, %v1680_v19  ;;  %v1258_v52 = vmul.f32 %v9893_v6, %v9867_v22  ;;  %v826_v11 = vpack.c.bf16 %v794_v45, %v794_v45  ;;  %v1968_v5 = vsel %vm1808_vm8, %v9789_v39, %v7551_v18  ;;  %v687_v56 = vpop.f32.mrf.mxu2 }
 0x131   : > { %14236 = vst [vmem:[#allocation35_spill] sm:$0xff] %v9888_v7  ;;  %v1681_v19 = vadd.f32 %v1649_v37, %v1583_v38  ;;  %v1969_v15 = vsel %vm1809_vm9, %v9813_v4, %v7552_v57  ;;  %v14154_v9 = vunpack.c.l.bf16 %v9888_v7  ;;  %v688_v58 = vadd.f32 %v9807_v55, %v687_v56  ;;  %v9917_v4 = vld [vmem:[%s14135_s3 + $0x4] ss:$0 sm:$0xff]  ;;  %v9928_v38 = vld [vmem:[%s14135_s3 + $0x5] ss:$0 sm:$0xff]  ;;  %v8332_v57 = vld [vmem:[%s14136_s4 + $0x68] sm:$0xff] }
 0x132   : > { %v1842_v17 = vmin.f32 %v9886_v53, 0.0  ;;  %v1289_v36 = vadd.f32 %v1257_v30, %v1191_v49  ;;  %v9908_v12 = vunpack.c.l.bf16 %v826_v11  ;;  %v1996_v62 = vpack.c.bf16 %v1969_v15, %v1968_v5  ;;  %v9940_v56 = vld [vmem:[%s14135_s3 + $0x6] ss:$0 sm:$0xff]  ;;  %3511 = vmatpush.bf16.msrb.mxu3 %v8332_v57 }
 0x133   : > { %v9910_v45 = vadd.f32 %v1747_v60, %v1681_v19  ;;  %947 = vst [vmem:[#allocation2 + $0x208] sm:$0xff] %v14154_v9  ;;  %v777_v18 = vadd.f32 %v776_v31, %v688_v58  ;;  %v1290_v37 = vadd.f32 %v1258_v52, %v1192_v47  ;;  %v1355_v55 = vmul.f32 %v9917_v4, %v9761_v25 }
 0x134   : > { %14237 = vst [vmem:[#allocation36_spill] sm:$0xff] %v9908_v12  ;;  %v1884_v39 = vmul.f32 1.442695, %v1842_v17  ;;  %v9921_v49 = vld [vmem:[#allocation2 + $0x107] sm:$0xff]  ;;  %2100 = vmatmul.bf16.gmra.mxu2 %v1996_v62  ;;  %v1453_v47 = vmul.f32 %v9928_v38, %v9871_v28  ;;  %v1356_v52 = vmul.f32 %v9917_v4, %v9810_v33  ;;  %vm1810_vm10 = vcmp.gt.f32.partialorder %v9886_v53, 0.0 }
 0x135   : > { %932 = vst [vmem:[#allocation2 + $0x110] sm:$0xff] %v9908_v12  ;;  %v1843_v60 = vmin.f32 %v9910_v45, 0.0  ;;  %v810_v30 = vmax.f32 %v777_v18, 0.0  ;;  %v1387_v11 = vadd.f32 %v1355_v55, %v1289_v36  ;;  %v1552_v19 = vmul.f32 %v9940_v56, %v9921_v49 }
 0x136   : > { %8618 = vpow2.f32 %v1884_v39  ;;  %v1388_v15 = vadd.f32 %v1356_v52, %v1290_v37  ;;  %v997_v62 = vmul.f32 %v9839_v14, %v9816_v42  ;;  %vm1811_vm11 = vcmp.gt.f32.partialorder %v9910_v45, 0.0 }
 0x137   : > { %v1886_v5 = vmul.f32 1.442695, %v1843_v60  ;;  %v9944_v17 = vpack.c.bf16 %v810_v30, %v810_v30  ;;  %v1485_v58 = vadd.f32 %v1453_v47, %v1387_v11  ;;  %v998_v36 = vmul.f32 %v9839_v14, %v9867_v22  ;;  %v9964_v22 = vld [vmem:[%s14135_s3 + $0x7] ss:$0 sm:$0xff] }
 0x138   : > { %v1063_v31 = vmul.f32 %v9851_v27, %v9761_v25  ;;  %v1064_v39 = vmul.f32 %v9851_v27, %v9810_v33  ;;  %v1454_v37 = vmul.f32 %v9928_v38, %v9873_v63  ;;  %v1161_v42 = vmul.f32 %v9863_v43, %v9871_v28 }
 0x139   : > { %14238 = vst [vmem:[#allocation37_spill] sm:$0xff] %v9944_v17  ;;  %8620 = vpow2.f32 %v1886_v5  ;;  %v14156_v18 = vunpack.c.l.bf16 %v9944_v17  ;;  %v1584_v55 = vadd.f32 %v1552_v19, %v1485_v58  ;;  %v1650_v47 = vmul.f32 %v9964_v22, %v9857_v50 }
 0x13a   : > { %v1095_v57 = vadd.f32 %v1063_v31, %v997_v62  ;;  %v1096_v30 = vadd.f32 %v1064_v39, %v998_v36  ;;  %v1259_v52 = vmul.f32 %v9893_v6, %v9921_v49  ;;  %v1486_v28 = vadd.f32 %v1454_v37, %v1388_v15  ;;  %v9980_v31 = vld [vmem:[%s14135_s3 + $0x8] ss:$0 sm:$0xff] }
 0x13b   : > { %948 = vst [vmem:[#allocation2 + $0x210] sm:$0xff] %v14156_v18  ;;  %v1651_v19 = vmul.f32 %v9964_v22, %v9908_v12  ;;  %v1162_v9 = vmul.f32 %v9863_v43, %v9873_v63  ;;  %v1682_v62 = vadd.f32 %v1650_v47, %v1584_v55  ;;  %v1357_v18 = vmul.f32 %v9917_v4, %v9857_v50 }
 0x13c   : > { %v8619_v60 = vpop.eup %8618  ;;  %v966_v11 = vld [vmem:[#allocation2 + $0x10f] sm:$0xff]  ;;  %v1358_v63 = vmul.f32 %v9917_v4, %v9908_v12 }
 0x13d   : > { %v7553_v5 = vadd.f32 -1.0, %v8619_v60  ;;  %v1714_v58 = vld [vmem:[#allocation2 + $0x109] sm:$0xff]  ;;  %v1553_v34 = vmul.f32 %v9940_v56, %v966_v11  ;;  %v1715_v36 = vld [vmem:[#allocation2 + $0x111] sm:$0xff]  ;;  %v1193_v60 = vadd.f32 %v1161_v42, %v1095_v57  ;;  %v1194_v15 = vadd.f32 %v1162_v9, %v1096_v30 }
 0x13e   : > { %v1748_v39 = vmul.f32 %v9980_v31, %v1714_v58  ;;  %v1260_v37 = vmul.f32 %v9893_v6, %v966_v11  ;;  %v1455_v40 = vmul.f32 %v9928_v38, %v1714_v58  ;;  %v1749_v9 = vmul.f32 %v9980_v31, %v1715_v36 }
 0x13f   : > { %v8621_v17 = vpop.eup %8620  ;;  %v1585_v55 = vadd.f32 %v1553_v34, %v1486_v28  ;;  %v1291_v7 = vadd.f32 %v1259_v52, %v1193_v60  ;;  %v1554_v30 = vmul.f32 %v9940_v56, %v9991_v16  ;;  %v1970_v51 = vsel %vm1810_vm10, %v9886_v53, %v7553_v5  ;;  %v10009_v53 = vld [vmem:[#allocation2 + $0x130] sm:$0xff] }
 0x140   : > { %v9988_v47 = vadd.f32 %v1748_v39, %v1682_v62  ;;  %v7554_v42 = vadd.f32 -1.0, %v8621_v17  ;;  %v1292_v57 = vadd.f32 %v1260_v37, %v1194_v15  ;;  %v1456_v17 = vmul.f32 %v9928_v38, %v1715_v36  ;;  %v10011_v5 = vld [vmem:[#allocation2 + $0x129] sm:$0xff] }
 0x141   : > { %v1683_v34 = vadd.f32 %v1651_v19, %v1585_v55  ;;  %v1389_v52 = vadd.f32 %v1357_v18, %v1291_v7  ;;  %v1555_v60 = vmul.f32 %v9940_v56, %v1521_v21  ;;  %v1653_v18 = vmul.f32 %v9964_v22, %v10009_v53  ;;  %v10017_v19 = vld [vmem:[#allocation2 + $0x131] sm:$0xff] }
 0x142   : > { %v1844_v28 = vmin.f32 %v9988_v47, 0.0  ;;  %v1971_v62 = vsel %vm1811_vm11, %v9910_v45, %v7554_v42  ;;  %v1390_v39 = vadd.f32 %v1358_v63, %v1292_v57  ;;  %v1652_v45 = vmul.f32 %v9964_v22, %v10007_v44  ;;  %v8331_v42 = vld [vmem:[%s14136_s4 + $0x60] sm:$0xff] }
 0x143   : > { %v1997_v15 = vpack.c.bf16 %v1971_v62, %v1970_v51  ;;  %v10005_v37 = vadd.f32 %v1749_v9, %v1683_v34  ;;  %v1487_v26 = vadd.f32 %v1455_v40, %v1389_v52  ;;  %v1750_v51 = vmul.f32 %v9980_v31, %v10011_v5  ;;  %3512 = vmatpush.bf16.msrb.mxu3 %v8331_v42 }
 0x144   : > { %v1888_v24 = vmul.f32 1.442695, %v1844_v28  ;;  %v1488_v7 = vadd.f32 %v1456_v17, %v1390_v39  ;;  %vm1812_vm12 = vcmp.gt.f32.partialorder %v9988_v47, 0.0  ;;  %v1751_v55 = vmul.f32 %v9980_v31, %v10017_v19 }
 0x145   : > { %2105 = vmatmul.bf16.gmra.mxu2 %v1997_v15  ;;  %v1845_v40 = vmin.f32 %v10005_v37, 0.0  ;;  %v1586_v63 = vadd.f32 %v1554_v30, %v1487_v26  ;;  %v999_v57 = vmul.f32 %v9839_v14, %v9921_v49  ;;  %v1000_v34 = vmul.f32 %v9839_v14, %v966_v11 }
 0x146   : > { %8622 = vpow2.f32 %v1888_v24  ;;  %v1587_v9 = vadd.f32 %v1555_v60, %v1488_v7  ;;  %v1065_v28 = vmul.f32 %v9851_v27, %v9857_v50  ;;  %v1066_v26 = vmul.f32 %v9851_v27, %v9908_v12 }
 0x147   : > { %v1890_v52 = vmul.f32 1.442695, %v1845_v40  ;;  %v1684_v62 = vadd.f32 %v1652_v45, %v1586_v63  ;;  %v1163_v24 = vmul.f32 %v9863_v43, %v1714_v58  ;;  %v1261_v17 = vmul.f32 %v9893_v6, %v9991_v16 }
 0x148   : > { %v1685_v30 = vadd.f32 %v1653_v18, %v1587_v9  ;;  %v1097_v39 = vadd.f32 %v1065_v28, %v999_v57  ;;  %v1262_v49 = vmul.f32 %v9893_v6, %v1521_v21  ;;  %v1098_v60 = vadd.f32 %v1066_v26, %v1000_v34  ;;  %v10055_v57 = vld [vmem:[#allocation2 + $0x147] sm:$0xff]  ;;  %v1523_v34 = vld [vmem:[#allocation2 + $0x14f] sm:$0xff] }
 0x149   : > { %8624 = vpow2.f32 %v1890_v52  ;;  %v10039_v11 = vadd.f32 %v1750_v51, %v1684_v62  ;;  %v1164_v15 = vmul.f32 %v9863_v43, %v1715_v36  ;;  %vm1813_vm13 = vcmp.gt.f32.partialorder %v10005_v37, 0.0 }
 0x14a   : > { %v10043_v7 = vadd.f32 %v1751_v55, %v1685_v30  ;;  %v1195_v45 = vadd.f32 %v1163_v24, %v1097_v39  ;;  %v1359_v58 = vmul.f32 %v9917_v4, %v10007_v44  ;;  %v1360_v21 = vmul.f32 %v9917_v4, %v10009_v53  ;;  %v10060_v24 = vld [vmem:[#allocation2 + $0x148] sm:$0xff] }
 0x14b   : > { %v1846_v40 = vmin.f32 %v10039_v11, 0.0  ;;  %v1196_v63 = vadd.f32 %v1164_v15, %v1098_v60  ;;  %v1457_v51 = vmul.f32 %v9928_v38, %v10011_v5  ;;  %v1458_v55 = vmul.f32 %v9928_v38, %v10017_v19  ;;  %v968_v30 = vld [vmem:[#allocation2 + $0x12f] sm:$0xff] }
 0x14c   : > { %v8623_v18 = vpop.eup %8622  ;;  %v1847_v36 = vmin.f32 %v10043_v7, 0.0  ;;  %v1293_v9 = vadd.f32 %v1261_v17, %v1195_v45  ;;  %v1556_v62 = vmul.f32 %v9940_v56, %v10055_v57  ;;  %v1557_v26 = vmul.f32 %v9940_v56, %v1523_v34  ;;  %v10065_v15 = vld [vmem:[#allocation2 + $0x150] sm:$0xff] }
 0x14d   : > { %v7555_v42 = vadd.f32 -1.0, %v8623_v18  ;;  %v1892_v28 = vmul.f32 1.442695, %v1846_v40  ;;  %v1294_v52 = vadd.f32 %v1262_v49, %v1196_v63  ;;  %v1654_v45 = vmul.f32 %v9964_v22, %v10060_v24  ;;  %v10069_v49 = vld [vmem:[#allocation2 + $0x149] sm:$0xff] }
 0x14e   : > { %v1894_v17 = vmul.f32 1.442695, %v1847_v36  ;;  %v1391_v60 = vadd.f32 %v1359_v58, %v1293_v9  ;;  %v1655_v63 = vmul.f32 %v9964_v22, %v10065_v15  ;;  %v1752_v23 = vmul.f32 %v9980_v31, %v10069_v49 }
 0x14f   : > { %v1972_v39 = vsel %vm1812_vm12, %v9988_v47, %v7555_v42  ;;  %v8625_v18 = vpop.eup %8624  ;;  %8626 = vpow2.f32 %v1892_v28  ;;  %v1392_v40 = vadd.f32 %v1360_v21, %v1294_v52  ;;  %v1001_v58 = vmul.f32 %v9839_v14, %v9991_v16 }
 0x150   : > { %v7556_v35 = vadd.f32 -1.0, %v8625_v18  ;;  %8628 = vpow2.f32 %v1894_v17  ;;  %v1489_v47 = vadd.f32 %v1457_v51, %v1391_v60  ;;  %v1002_v36 = vmul.f32 %v9839_v14, %v968_v30  ;;  %v1719_v30 = vld [vmem:[#allocation2 + $0x151] sm:$0xff] }
 0x151   : > { %v1490_v42 = vadd.f32 %v1458_v55, %v1392_v40  ;;  %v1067_v9 = vmul.f32 %v9851_v27, %v10007_v44  ;;  %v1068_v21 = vmul.f32 %v9851_v27, %v10009_v53  ;;  %v1165_v51 = vmul.f32 %v9863_v43, %v10011_v5 }
 0x152   : > { %v1973_v28 = vsel %vm1813_vm13, %v10005_v37, %v7556_v35  ;;  %v1588_v52 = vadd.f32 %v1556_v62, %v1489_v47  ;;  %v1166_v16 = vmul.f32 %v9863_v43, %v10017_v19  ;;  %v1753_v40 = vmul.f32 %v9980_v31, %v1719_v30 }
 0x153   : > { %v1998_v55 = vpack.c.bf16 %v1973_v28, %v1972_v39  ;;  %v1589_v17 = vadd.f32 %v1557_v26, %v1490_v42  ;;  %v1099_v60 = vadd.f32 %v1067_v9, %v1001_v58  ;;  %v1100_v18 = vadd.f32 %v1068_v21, %v1002_v36  ;;  %v10099_v58 = vld [vmem:[#allocation2 + $0x167] sm:$0xff]  ;;  %v1525_v9 = vld [vmem:[#allocation2 + $0x16f] sm:$0xff] }
 0x154   : > { %v1686_v44 = vadd.f32 %v1654_v45, %v1588_v52  ;;  %v1263_v53 = vmul.f32 %v9893_v6, %v10055_v57  ;;  %v1264_v35 = vmul.f32 %v9893_v6, %v1523_v34  ;;  %v1361_v19 = vmul.f32 %v9917_v4, %v10060_v24  ;;  %v10108_v28 = vld [vmem:[#allocation2 + $0x168] sm:$0xff]  ;;  %v10110_v52 = vld [vmem:[#allocation2 + $0x170] sm:$0xff] }
 0x155   : > { %v8627_v37 = vpop.eup %8626  ;;  %2110 = vmatmul.bf16.gmra.mxu2 %v1998_v55  ;;  %v1687_v62 = vadd.f32 %v1655_v63, %v1589_v17  ;;  %v1197_v5 = vadd.f32 %v1165_v51, %v1099_v60  ;;  %v1198_v47 = vadd.f32 %v1166_v16, %v1100_v18  ;;  %v1362_v45 = vmul.f32 %v9917_v4, %v10065_v15  ;;  %v10115_v60 = vld [vmem:[#allocation2 + $0x169] sm:$0xff]  ;;  %v10117_v18 = vld [vmem:[#allocation2 + $0x171] sm:$0xff] }
 0x156   : > { %v8629_v26 = vpop.eup %8628  ;;  %v10095_v39 = vadd.f32 %v1752_v23, %v1686_v44  ;;  %v1459_v63 = vmul.f32 %v9928_v38, %v10069_v49  ;;  %vm1815_vm14 = vcmp.gt.f32.partialorder %v10043_v7, 0.0  ;;  %v1460_v23 = vmul.f32 %v9928_v38, %v1719_v30  ;;  %v970_v44 = vld [vmem:[#allocation2 + $0x14f] sm:$0xff] }
 0x157   : > { %v10101_v42 = vadd.f32 %v1753_v40, %v1687_v62  ;;  %v1295_v36 = vadd.f32 %v1263_v53, %v1197_v5  ;;  %v1296_v34 = vadd.f32 %v1264_v35, %v1198_v47  ;;  %v7557_v51 = vadd.f32 -1.0, %v8627_v37 }
 0x158   : > { %v1848_v21 = vmin.f32 %v10095_v39, 0.0  ;;  %v1558_v17 = vmul.f32 %v9940_v56, %v10099_v58  ;;  %v7558_v40 = vadd.f32 -1.0, %v8629_v26  ;;  %v1559_v62 = vmul.f32 %v9940_v56, %v1525_v9 }
 0x159   : > { %v1849_v16 = vmin.f32 %v10101_v42, 0.0  ;;  %v1393_v55 = vadd.f32 %v1361_v19, %v1295_v36  ;;  %v1394_v35 = vadd.f32 %v1362_v45, %v1296_v34  ;;  %v1656_v37 = vmul.f32 %v9964_v22, %v10108_v28 }
 0x15a   : > { %v1896_v53 = vmul.f32 1.442695, %v1848_v21  ;;  %v1657_v19 = vmul.f32 %v9964_v22, %v10110_v52  ;;  %v1754_v41 = vmul.f32 %v9980_v31, %v10115_v60  ;;  %v1755_v26 = vmul.f32 %v9980_v31, %v10117_v18 }
 0x15b   : > { %v1898_v5 = vmul.f32 1.442695, %v1849_v16  ;;  %v1491_v47 = vadd.f32 %v1459_v63, %v1393_v55  ;;  %v1492_v36 = vadd.f32 %v1460_v23, %v1394_v35  ;;  %v1003_v34 = vmul.f32 %v9839_v14, %v10055_v57 }
 0x15c   : > { %8630 = vpow2.f32 %v1896_v53  ;;  %v1004_v63 = vmul.f32 %v9839_v14, %v970_v44  ;;  %v1069_v16 = vmul.f32 %v9851_v27, %v10060_v24  ;;  %v1070_v23 = vmul.f32 %v9851_v27, %v10065_v15 }
 0x15d   : > { %8632 = vpow2.f32 %v1898_v5  ;;  %v1590_v45 = vadd.f32 %v1558_v17, %v1491_v47  ;;  %v1591_v21 = vadd.f32 %v1559_v62, %v1492_v36  ;;  %v1167_v55 = vmul.f32 %v9863_v43, %v10069_v49  ;;  %v10148_v47 = vld [vmem:[#allocation2 + $0x187] sm:$0xff] }
 0x15e   : > { %vm1814_vm15 = vcmp.gt.f32.partialorder %v10039_v11, 0.0  ;;  %v1975_v17 = vsel %vm1815_vm14, %v10043_v7, %v7558_v40  ;;  %v1168_v57 = vmul.f32 %v9863_v43, %v1719_v30  ;;  %v1101_v35 = vadd.f32 %v1069_v16, %v1003_v34  ;;  %v10167_v16 = vld [vmem:[#allocation2 + $0x190] sm:$0xff] }
 0x15f   : > { %v1688_v53 = vadd.f32 %v1656_v37, %v1590_v45  ;;  %v1689_v44 = vadd.f32 %v1657_v19, %v1591_v21  ;;  %v1102_v62 = vadd.f32 %v1070_v23, %v1004_v63  ;;  %v1265_v24 = vmul.f32 %v9893_v6, %v10099_v58  ;;  %v1527_v37 = vld [vmem:[#allocation2 + $0x18f] sm:$0xff] }
 0x160   : > { %v1974_v15 = vsel %vm1814_vm15, %v10039_v11, %v7557_v51  ;;  %v1266_v49 = vmul.f32 %v9893_v6, %v1525_v9  ;;  %v1199_v7 = vadd.f32 %v1167_v55, %v1101_v35  ;;  %v1363_v30 = vmul.f32 %v9917_v4, %v10108_v28  ;;  %v10160_v51 = vld [vmem:[#allocation2 + $0x188] sm:$0xff] }
 0x161   : > { %v10145_v5 = vadd.f32 %v1754_v41, %v1688_v53  ;;  %v10150_v61 = vadd.f32 %v1755_v26, %v1689_v44  ;;  %v1200_v40 = vadd.f32 %v1168_v57, %v1102_v62  ;;  %v1999_v45 = vpack.c.bf16 %v1975_v17, %v1974_v15  ;;  %v10169_v23 = vld [vmem:[#allocation2 + $0x189] sm:$0xff]  ;;  %v10173_v44 = vld [vmem:[#allocation2 + $0x191] sm:$0xff] }
 0x162   : > { %v8631_v36 = vpop.eup %8630  ;;  %vm1817_vm0 = vcmp.gt.f32.partialorder %v10101_v42, 0.0  ;;  %v1364_v11 = vmul.f32 %v9917_v4, %v10110_v52  ;;  %v1461_v9 = vmul.f32 %v9928_v38, %v10115_v60  ;;  %v1297_v34 = vadd.f32 %v1265_v24, %v1199_v7  ;;  %v972_v35 = vld [vmem:[#allocation2 + $0x16f] sm:$0xff] }
 0x163   : > { %v8633_v19 = vpop.eup %8632  ;;  %v1850_v41 = vmin.f32 %v10145_v5, 0.0  ;;  %v1851_v26 = vmin.f32 %v10150_v61, 0.0  ;;  %v1462_v63 = vmul.f32 %v9928_v38, %v10117_v18  ;;  %v1560_v21 = vmul.f32 %v9940_v56, %v10148_v47 }
 0x164   : > { %vm1816_vm1 = vcmp.gt.f32.partialorder %v10095_v39, 0.0  ;;  %v7559_v55 = vadd.f32 -1.0, %v8631_v36  ;;  %v1298_v53 = vadd.f32 %v1266_v49, %v1200_v40  ;;  %v1561_v57 = vmul.f32 %v9940_v56, %v1527_v37 }
 0x165   : > { %2115 = vmatmul.bf16.gmra.mxu2 %v1999_v45  ;;  %v1900_v17 = vmul.f32 1.442695, %v1850_v41  ;;  %v7560_v62 = vadd.f32 -1.0, %v8633_v19  ;;  %v1902_v24 = vmul.f32 1.442695, %v1851_v26  ;;  %v1395_v15 = vadd.f32 %v1363_v30, %v1297_v34  ;;  %v8330_v45 = vld [vmem:[%s14136_s4 + $0x58] sm:$0xff] }
 0x166   : > { %v1658_v7 = vmul.f32 %v9964_v22, %v10160_v51  ;;  %v1396_v32 = vadd.f32 %v1364_v11, %v1298_v53  ;;  %v1659_v49 = vmul.f32 %v9964_v22, %v10167_v16  ;;  %v1756_v36 = vmul.f32 %v9980_v31, %v10169_v23  ;;  %3513 = vmatpush.bf16.msrb.mxu3 %v8330_v45  ;;  %v10207_v45 = vld [vmem:[#allocation2 + $0x1a7] sm:$0xff] }
 0x167   : > { %8634 = vpow2.f32 %v1900_v17  ;;  %v1493_v40 = vadd.f32 %v1461_v9, %v1395_v15  ;;  %v1757_v30 = vmul.f32 %v9980_v31, %v10173_v44  ;;  %v1005_v19 = vmul.f32 %v9839_v14, %v10099_v58 }
 0x168   : > { %8636 = vpow2.f32 %v1902_v24  ;;  %v1494_v41 = vadd.f32 %v1462_v63, %v1396_v32  ;;  %v1006_v26 = vmul.f32 %v9839_v14, %v972_v35  ;;  %v1071_v11 = vmul.f32 %v9851_v27, %v10108_v28 }
 0x169   : > { %v1072_v34 = vmul.f32 %v9851_v27, %v10110_v52  ;;  %v1592_v17 = vadd.f32 %v1560_v21, %v1493_v40  ;;  %v1169_v9 = vmul.f32 %v9863_v43, %v10115_v60  ;;  %v1170_v53 = vmul.f32 %v9863_v43, %v10117_v18 }
 0x16a   : > { %v1267_v58 = vmul.f32 %v9893_v6, %v10148_v47  ;;  %v1593_v24 = vadd.f32 %v1561_v57, %v1494_v41  ;;  %v1103_v32 = vadd.f32 %v1071_v11, %v1005_v19  ;;  %v1268_v35 = vmul.f32 %v9893_v6, %v1527_v37  ;;  %v1529_v19 = vld [vmem:[#allocation2 + $0x1af] sm:$0xff] }
 0x16b   : > { %v1104_v63 = vadd.f32 %v1072_v34, %v1006_v26  ;;  %v1977_v28 = vsel %vm1817_vm0, %v10101_v42, %v7560_v62  ;;  %vm1818_vm2 = vcmp.gt.f32.partialorder %v10145_v5, 0.0  ;;  %vm1819_vm3 = vcmp.gt.f32.partialorder %v10150_v61, 0.0  ;;  %v10220_v34 = vld [vmem:[#allocation2 + $0x1a8] sm:$0xff] }
 0x16c   : > { %v1690_v52 = vadd.f32 %v1658_v7, %v1592_v17  ;;  %v1691_v21 = vadd.f32 %v1659_v49, %v1593_v24  ;;  %v1201_v18 = vadd.f32 %v1169_v9, %v1103_v32  ;;  %v1365_v57 = vmul.f32 %v9917_v4, %v10160_v51 }
 0x16d   : > { %v8635_v60 = vpop.eup %8634  ;;  %v1202_v15 = vadd.f32 %v1170_v53, %v1104_v63  ;;  %v1976_v37 = vsel %vm1816_vm1, %v10095_v39, %v7559_v55  ;;  %v1366_v7 = vmul.f32 %v9917_v4, %v10167_v16  ;;  %v1463_v11 = vmul.f32 %v9928_v38, %v10169_v23  ;;  %v974_v53 = vld [vmem:[#allocation2 + $0x18f] sm:$0xff] }
 0x16e   : > { %v8637_v40 = vpop.eup %8636  ;;  %v7561_v42 = vadd.f32 -1.0, %v8635_v60  ;;  %v10212_v62 = vadd.f32 %v1756_v36, %v1690_v52  ;;  %v10216_v49 = vadd.f32 %v1757_v30, %v1691_v21  ;;  %v1299_v41 = vadd.f32 %v1267_v58, %v1201_v18  ;;  %v10227_v36 = vld [vmem:[#allocation2 + $0x1b0] sm:$0xff] }
 0x16f   : > { %v1300_v26 = vadd.f32 %v1268_v35, %v1202_v15  ;;  %v2000_v17 = vpack.c.bf16 %v1977_v28, %v1976_v37  ;;  %v1464_v39 = vmul.f32 %v9928_v38, %v10173_v44  ;;  %v1562_v55 = vmul.f32 %v9940_v56, %v10207_v45  ;;  %v10229_v30 = vld [vmem:[#allocation2 + $0x1a9] sm:$0xff] }
 0x170   : > { %v1852_v9 = vmin.f32 %v10212_v62, 0.0  ;;  %v7562_v58 = vadd.f32 -1.0, %v8637_v40  ;;  %v1853_v24 = vmin.f32 %v10216_v49, 0.0  ;;  %v1397_v32 = vadd.f32 %v1365_v57, %v1299_v41  ;;  %v10242_v40 = vld [vmem:[#allocation2 + $0x1b1] sm:$0xff] }
 0x171   : > { %v1563_v63 = vmul.f32 %v9940_v56, %v1529_v19  ;;  %v10236_v35 = vsel %vm1818_vm2, %v10145_v5, %v7561_v42  ;;  %v1398_v52 = vadd.f32 %v1366_v7, %v1300_v26  ;;  %v1660_v60 = vmul.f32 %v9964_v22, %v10220_v34 }
 0x172   : > { %v1904_v28 = vmul.f32 1.442695, %v1852_v9  ;;  %v1906_v21 = vmul.f32 1.442695, %v1853_v24  ;;  %v1495_v18 = vadd.f32 %v1463_v11, %v1397_v32  ;;  %v1661_v15 = vmul.f32 %v9964_v22, %v10227_v36 }
 0x173   : > { %v1758_v57 = vmul.f32 %v9980_v31, %v10229_v30  ;;  %v1496_v37 = vadd.f32 %v1464_v39, %v1398_v52  ;;  %v1007_v5 = vmul.f32 %v9839_v14, %v10148_v47  ;;  %v1008_v42 = vmul.f32 %v9839_v14, %v974_v53 }
 0x174   : > { %8638 = vpow2.f32 %v1904_v28  ;;  %v1594_v7 = vadd.f32 %v1562_v55, %v1495_v18  ;;  %v1073_v41 = vmul.f32 %v9851_v27, %v10160_v51  ;;  %v1074_v26 = vmul.f32 %v9851_v27, %v10167_v16  ;;  %v8329_v51 = vld [vmem:[%s14136_s4 + $0x50] sm:$0xff] }
 0x175   : > { %2120 = vmatmul.bf16.gmra.mxu2 %v2000_v17  ;;  %8640 = vpow2.f32 %v1906_v21  ;;  %v1595_v11 = vadd.f32 %v1563_v63, %v1496_v37  ;;  %v1759_v9 = vmul.f32 %v9980_v31, %v10242_v40  ;;  %v1171_v39 = vmul.f32 %v9863_v43, %v10169_v23  ;;  %3514 = vmatpush.bf16.msrb.mxu3 %v8329_v51  ;;  %v10296_v51 = vld [vmem:[#allocation2 + $0x1d0] sm:$0xff] }
 0x176   : > { %v1172_v47 = vmul.f32 %v9863_v43, %v10173_v44  ;;  %v10262_v17 = vsel %vm1819_vm3, %v10150_v61, %v7562_v58  ;;  %v1692_v16 = vadd.f32 %v1660_v60, %v1594_v7  ;;  %v1105_v55 = vadd.f32 %v1073_v41, %v1007_v5  ;;  %v10286_v7 = vld [vmem:[#allocation2 + $0x1c7] sm:$0xff] }
 0x177   : > { %v1106_v53 = vadd.f32 %v1074_v26, %v1008_v42  ;;  %v10267_v24 = vpop.f32.mrf.mxu2  ;;  %vm1820_vm4 = vcmp.gt.f32.partialorder %v10212_v62, 0.0  ;;  %vm1821_vm5 = vcmp.gt.f32.partialorder %v10216_v49, 0.0  ;;  %v1693_v23 = vadd.f32 %v1661_v15, %v1595_v11  ;;  %v1531_v11 = vld [vmem:[#allocation2 + $0x1cf] sm:$0xff] }
 0x178   : > { %v1269_v44 = vmul.f32 %v9893_v6, %v10207_v45  ;;  %v2193_v61 = vmin.f32 %v10267_v24, 0.0  ;;  %v10274_v58 = vadd.f32 %v1758_v57, %v1692_v16  ;;  %v1203_v32 = vadd.f32 %v1171_v39, %v1105_v55 }
 0x179   : > { %v1270_v63 = vmul.f32 %v9893_v6, %v1529_v19  ;;  %v2001_v52 = vpack.c.bf16 %v10262_v17, %v10236_v35  ;;  %v10279_v60 = vadd.f32 %v1759_v9, %v1693_v23  ;;  %v1204_v21 = vadd.f32 %v1172_v47, %v1106_v53  ;;  %v10294_v17 = vld [vmem:[#allocation2 + $0x1c8] sm:$0xff] }
 0x17a   : > { %v8639_v28 = vpop.eup %8638  ;;  %v1367_v18 = vmul.f32 %v9917_v4, %v10220_v34  ;;  %v2225_v37 = vmul.f32 1.442695, %v2193_v61  ;;  %v1854_v42 = vmin.f32 %v10274_v58, 0.0  ;;  %v1368_v57 = vmul.f32 %v9917_v4, %v10227_v36  ;;  %v10307_v61 = vld [vmem:[#allocation2 + $0x1d1] sm:$0xff] }
 0x17b   : > { %v8641_v15 = vpop.eup %8640  ;;  %v7563_v5 = vadd.f32 -1.0, %v8639_v28  ;;  %v1855_v41 = vmin.f32 %v10279_v60, 0.0  ;;  %v1301_v35 = vadd.f32 %v1269_v44, %v1203_v32  ;;  %v1465_v26 = vmul.f32 %v9928_v38, %v10229_v30  ;;  %v10305_v44 = vld [vmem:[#allocation2 + $0x1c9] sm:$0xff] }
 0x17c   : > { %v7564_v19 = vadd.f32 -1.0, %v8641_v15  ;;  %vm2161_vm6 = vcmp.gt.f32.partialorder %v10267_v24, 0.0  ;;  %8642 = vpow2.f32 %v2225_v37  ;;  %v1908_v9 = vmul.f32 1.442695, %v1854_v42  ;;  %v976_v32 = vld [vmem:[#allocation2 + $0x1af] sm:$0xff] }
 0x17d   : > { %v1302_v39 = vadd.f32 %v1270_v63, %v1204_v21  ;;  %v1466_v47 = vmul.f32 %v9928_v38, %v10242_v40  ;;  %v10301_v16 = vsel %vm1820_vm4, %v10212_v62, %v7563_v5  ;;  %v1910_v55 = vmul.f32 1.442695, %v1855_v41 }
 0x17e   : > { %v1399_v53 = vadd.f32 %v1367_v18, %v1301_v35  ;;  %v1564_v23 = vmul.f32 %v9940_v56, %v10286_v7  ;;  %v10312_v63 = vsel %vm1821_vm5, %v10216_v49, %v7564_v19  ;;  %8644 = vpow2.f32 %v1908_v9 }
 0x17f   : > { %v1400_v28 = vadd.f32 %v1368_v57, %v1302_v39  ;;  %v1565_v62 = vmul.f32 %v9940_v56, %v1531_v11  ;;  %v10315_v21 = vpop.f32.mrf.mxu2  ;;  %8646 = vpow2.f32 %v1910_v55  ;;  %v1662_v15 = vmul.f32 %v9964_v22, %v10294_v17 }
 0x180   : > { %v1497_v18 = vadd.f32 %v1465_v26, %v1399_v53  ;;  %v1663_v37 = vmul.f32 %v9964_v22, %v10296_v51  ;;  %v2194_v5 = vmin.f32 %v10315_v21, 0.0  ;;  %v1760_v49 = vmul.f32 %v9980_v31, %v10305_v44 }
 0x181   : > { %v1498_v42 = vadd.f32 %v1466_v47, %v1400_v28  ;;  %v1761_v57 = vmul.f32 %v9980_v31, %v10307_v61  ;;  %v1009_v41 = vmul.f32 %v9839_v14, %v10207_v45  ;;  %v1010_v35 = vmul.f32 %v9839_v14, %v976_v32 }
 0x182   : > { %v1596_v19 = vadd.f32 %v1564_v23, %v1497_v18  ;;  %v1075_v26 = vmul.f32 %v9851_v27, %v10220_v34  ;;  %v8643_v9 = vpop.eup %8642  ;;  %v2227_v39 = vmul.f32 1.442695, %v2194_v5  ;;  %v1076_v47 = vmul.f32 %v9851_v27, %v10227_v36 }
 0x183   : > { %v1597_v55 = vadd.f32 %v1565_v62, %v1498_v42  ;;  %v1173_v53 = vmul.f32 %v9863_v43, %v10229_v30  ;;  %v7607_v28 = vadd.f32 -1.0, %v8643_v9  ;;  %v1174_v45 = vmul.f32 %v9863_v43, %v10242_v40  ;;  %v8328_v40 = vld [vmem:[%s14136_s4 + $0x48] sm:$0xff] }
 0x184   : > { %v1694_v10 = vadd.f32 %v1662_v15, %v1596_v19  ;;  %v1107_v23 = vadd.f32 %v1075_v26, %v1009_v41  ;;  %v8645_v18 = vpop.eup %8644  ;;  %8648 = vpow2.f32 %v2227_v39  ;;  %v1108_v34 = vadd.f32 %v1076_v47, %v1010_v35  ;;  %3515 = vmatpush.bf16.msrb.mxu3 %v8328_v40  ;;  %v10363_v9 = vld [vmem:[#allocation2 + $0x1e7] sm:$0xff] }
 0x185   : > { %2125 = vmatmul.bf16.gmra.mxu2 %v2001_v52  ;;  %v1695_v14 = vadd.f32 %v1663_v37, %v1597_v55  ;;  %v1271_v32 = vmul.f32 %v9893_v6, %v10286_v7  ;;  %v8647_v62 = vpop.eup %8646  ;;  %v10342_v36 = vsel %vm2161_vm6, %v10267_v24, %v7607_v28  ;;  %v1272_v5 = vmul.f32 %v9893_v6, %v1531_v11  ;;  %v10419_v24 = vld [vmem:[%s14135_s3 + $0x1] ss:$0 sm:$0xff] }
 0x186   : > { %v10344_v30 = vadd.f32 %v1760_v49, %v1694_v10  ;;  %v1205_v15 = vadd.f32 %v1173_v53, %v1107_v23  ;;  %2353 = vst [vmem:[#allocation2 + $0x28] sm:$0xff] %v10342_v36  ;;  %v1206_v37 = vadd.f32 %v1174_v45, %v1108_v34  ;;  %vm1822_vm7 = vcmp.gt.f32.partialorder %v10274_v58, 0.0  ;;  %v1533_v23 = vld [vmem:[#allocation2 + $0x1ef] sm:$0xff] }
 0x187   : > { %v10350_v52 = vadd.f32 %v1761_v57, %v1695_v14  ;;  %v10353_v42 = vpop.f32.mrf.mxu2  ;;  %vm1823_vm8 = vcmp.gt.f32.partialorder %v10279_v60, 0.0  ;;  %vm2162_vm9 = vcmp.gt.f32.partialorder %v10315_v21, 0.0  ;;  %v7565_v57 = vadd.f32 -1.0, %v8645_v18  ;;  %v10373_v34 = vld [vmem:[#allocation2 + $0x1e8] sm:$0xff] }
 0x188   : > { %v1856_v10 = vmin.f32 %v10344_v30, 0.0  ;;  %v2195_v49 = vmin.f32 %v10353_v42, 0.0  ;;  %v1303_v19 = vadd.f32 %v1271_v32, %v1205_v15  ;;  %v7566_v41 = vadd.f32 -1.0, %v8647_v62  ;;  %v10375_v32 = vld [vmem:[#allocation2 + $0x1f0] sm:$0xff] }
 0x189   : > { %v1857_v11 = vmin.f32 %v10350_v52, 0.0  ;;  %v1304_v26 = vadd.f32 %v1272_v5, %v1206_v37  ;;  %v1369_v47 = vmul.f32 %v9917_v4, %v10294_v17  ;;  %v1370_v53 = vmul.f32 %v9917_v4, %v10296_v51  ;;  %v978_v62 = vld [vmem:[#allocation2 + $0x1cf] sm:$0xff] }
 0x18a   : > { %v1912_v35 = vmul.f32 1.442695, %v1856_v10  ;;  %v8649_v39 = vpop.eup %8648  ;;  %v2229_v55 = vmul.f32 1.442695, %v2195_v49  ;;  %v1467_v28 = vmul.f32 %v9928_v38, %v10305_v44  ;;  %v1468_v14 = vmul.f32 %v9928_v38, %v10307_v61  ;;  %v10379_v5 = vld [vmem:[#allocation2 + $0x1e9] sm:$0xff] }
 0x18b   : > { %v7608_v45 = vadd.f32 -1.0, %v8649_v39  ;;  %v1914_v18 = vmul.f32 1.442695, %v1857_v11  ;;  %v1401_v15 = vadd.f32 %v1369_v47, %v1303_v19  ;;  %v1402_v40 = vadd.f32 %v1370_v53, %v1304_v26  ;;  %v10392_v19 = vld [vmem:[#allocation2 + $0x1f1] sm:$0xff] }
 0x18c   : > { %8650 = vpow2.f32 %v1912_v35  ;;  %v1566_v37 = vmul.f32 %v9940_v56, %v10363_v9  ;;  %v10389_v49 = vsel %vm1822_vm7, %v10274_v58, %v7565_v57  ;;  %v1567_v11 = vmul.f32 %v9940_v56, %v1533_v23  ;;  %v10406_v57 = vld [vmem:[%s14135_s3] ss:$0 sm:$0xff] }
 0x18d   : > { %8652 = vpow2.f32 %v2229_v55  ;;  %v10384_v10 = vsel %vm2162_vm9, %v10315_v21, %v7608_v45  ;;  %v1499_v35 = vadd.f32 %v1467_v28, %v1401_v15  ;;  %v1500_v26 = vadd.f32 %v1468_v14, %v1402_v40 }
 0x18e   : > { %8654 = vpow2.f32 %v1914_v18  ;;  %2354 = vst [vmem:[#allocation2 + $0x30] sm:$0xff] %v10384_v10  ;;  %v1664_v39 = vmul.f32 %v9964_v22, %v10373_v34  ;;  %v1665_v21 = vmul.f32 %v9964_v22, %v10375_v32  ;;  %v1762_v58 = vmul.f32 %v9980_v31, %v10379_v5 }
 0x18f   : > { %v10399_v55 = vpop.f32.mrf.mxu2  ;;  %v1011_v47 = vmul.f32 %v10406_v57, %v10286_v7  ;;  %v1012_v53 = vmul.f32 %v10406_v57, %v978_v62  ;;  %v1077_v28 = vmul.f32 %v9851_v27, %v10294_v17  ;;  %v1598_v18 = vadd.f32 %v1566_v37, %v1499_v35 }
 0x190   : > { %v2196_v45 = vmin.f32 %v10399_v55, 0.0  ;;  %v1599_v14 = vadd.f32 %v1567_v11, %v1500_v26  ;;  %v1763_v15 = vmul.f32 %v9980_v31, %v10392_v19  ;;  %v1078_v7 = vmul.f32 %v10419_v24, %v10296_v51 }
 0x191   : > { %v1109_v62 = vadd.f32 %v1077_v28, %v1011_v47  ;;  %v1175_v27 = vmul.f32 %v9863_v43, %v10305_v44  ;;  %v1176_v17 = vmul.f32 %v9863_v43, %v10307_v61  ;;  %v10430_v35 = vsel %vm1823_vm8, %v10279_v60, %v7566_v41 }
 0x192   : > { %v8651_v40 = vpop.eup %8650  ;;  %v2231_v11 = vmul.f32 1.442695, %v2196_v45  ;;  %v1696_v26 = vadd.f32 %v1664_v39, %v1598_v18  ;;  %v1697_v12 = vadd.f32 %v1665_v21, %v1599_v14  ;;  %v1110_v25 = vadd.f32 %v1078_v7, %v1012_v53  ;;  %v10464_v18 = vld [vmem:[#allocation2 + $0x20f] sm:$0xff] }
 0x193   : > { %v8653_v37 = vpop.eup %8652  ;;  %v1207_v51 = vadd.f32 %v1175_v27, %v1109_v62  ;;  %v1273_v47 = vmul.f32 %v9893_v6, %v10363_v9  ;;  %vm2163_vm10 = vcmp.gt.f32.partialorder %v10353_v42, 0.0  ;;  %v14239_v43 = vpack.c.bf16 %v10312_v63, %v10301_v16  ;;  %v8327_v16 = vld [vmem:[%s14136_s4 + $0x40] sm:$0xff]  ;;  %v10472_v62 = vld [vmem:[#allocation2 + $0x208] sm:$0xff] }
 0x194   : > { %v8655_v50 = vpop.eup %8654  ;;  %v7609_v33 = vadd.f32 -1.0, %v8653_v37  ;;  %8656 = vpow2.f32 %v2231_v11  ;;  %vm1824_vm11 = vcmp.gt.f32.partialorder %v10344_v30, 0.0  ;;  %v10439_v60 = vadd.f32 %v1762_v58, %v1696_v26  ;;  %3516 = vmatpush.bf16.msrb.mxu3 %v8327_v16  ;;  %v10476_v11 = vld [vmem:[#allocation2 + $0x210] sm:$0xff] }
 0x195   : > { %2130 = vmatmul.bf16.gmra.mxu2 %v14239_v43  ;;  %v10444_v61 = vadd.f32 %v1763_v15, %v1697_v12  ;;  %v1208_v41 = vadd.f32 %v1176_v17, %v1110_v25  ;;  %v1274_v39 = vmul.f32 %v9893_v6, %v1533_v23  ;;  %v2003_v21 = vpack.c.bf16 %v10430_v35, %v10389_v49  ;;  %v10459_v23 = vld [vmem:[#allocation2 + $0x207] sm:$0xff]  ;;  %v10489_v16 = vld [vmem:[#allocation2 + $0x211] sm:$0xff]  ;;  %v8995_v49 = vld [vmem:[%s14135_s3 + $0x3] ss:$0 sm:$0xff] }
 0x196   : > { %v10442_v44 = vsel %vm2163_vm10, %v10353_v42, %v7609_v33  ;;  %vm1825_vm12 = vcmp.gt.f32.partialorder %v10350_v52, 0.0  ;;  %v1858_v63 = vmin.f32 %v10439_v60, 0.0  ;;  %v1305_v33 = vadd.f32 %v1273_v47, %v1207_v51  ;;  %v10480_v47 = vld [vmem:[#allocation2 + $0x209] sm:$0xff] }
 0x197   : > { %2355 = vst [vmem:[#allocation2 + $0x48] sm:$0xff] %v10442_v44  ;;  %vm2164_vm13 = vcmp.gt.f32.partialorder %v10399_v55, 0.0  ;;  %v10456_v12 = vpop.f32.mrf.mxu2  ;;  %v7567_v25 = vadd.f32 -1.0, %v8651_v40  ;;  %v1859_v6 = vmin.f32 %v10444_v61, 0.0  ;;  %v1306_v42 = vadd.f32 %v1274_v39, %v1208_v41 }
 0x198   : > { %v2197_v58 = vmin.f32 %v10456_v12, 0.0  ;;  %v7568_v53 = vadd.f32 -1.0, %v8655_v50  ;;  %v1916_v28 = vmul.f32 1.442695, %v1858_v63  ;;  %v1371_v45 = vmul.f32 %v9917_v4, %v10373_v34 }
 0x199   : > { %v1918_v14 = vmul.f32 1.442695, %v1859_v6  ;;  %v1372_v15 = vmul.f32 %v9917_v4, %v10375_v32  ;;  %v1469_v40 = vmul.f32 %v9928_v38, %v10379_v5  ;;  %v1470_v7 = vmul.f32 %v9928_v38, %v10392_v19  ;;  %v980_v38 = vld [vmem:[#allocation2 + $0x1ef] sm:$0xff] }
 0x19a   : > { %v8657_v27 = vpop.eup %8656  ;;  %v2233_v50 = vmul.f32 1.442695, %v2197_v58  ;;  %8658 = vpow2.f32 %v1916_v28  ;;  %v1403_v17 = vadd.f32 %v1371_v45, %v1305_v33  ;;  %v1568_v37 = vmul.f32 %v9940_v56, %v10459_v23 }
 0x19b   : > { %v7610_v26 = vadd.f32 -1.0, %v8657_v27  ;;  %8660 = vpow2.f32 %v1918_v14  ;;  %v1404_v4 = vadd.f32 %v1372_v15, %v1306_v42  ;;  %v1569_v51 = vmul.f32 %v9940_v56, %v10464_v18 }
 0x19c   : > { %8662 = vpow2.f32 %v2233_v50  ;;  %v10485_v43 = vsel %vm1824_vm11, %v10344_v30, %v7567_v25  ;;  %v1501_v41 = vadd.f32 %v1469_v40, %v1403_v17  ;;  %v1666_v39 = vmul.f32 %v9964_v22, %v10472_v62 }
 0x19d   : > { %v10494_v63 = vsel %vm2164_vm13, %v10399_v55, %v7610_v26  ;;  %v10499_v56 = vsel %vm1825_vm12, %v10350_v52, %v7568_v53  ;;  %v1502_v33 = vadd.f32 %v1470_v7, %v1404_v4  ;;  %v1667_v30 = vmul.f32 %v9964_v22, %v10476_v11 }
 0x19e   : > { %2356 = vst [vmem:[#allocation2 + $0x50] sm:$0xff] %v10494_v63  ;;  %v1600_v25 = vadd.f32 %v1568_v37, %v1501_v41  ;;  %v1764_v6 = vmul.f32 %v9980_v31, %v10480_v47  ;;  %v1013_v42 = vmul.f32 %v10406_v57, %v10363_v9  ;;  %v1079_v55 = vmul.f32 %v10419_v24, %v10373_v34 }
 0x19f   : > { %v10510_v58 = vpop.f32.mrf.mxu2  ;;  %v1601_v52 = vadd.f32 %v1569_v51, %v1502_v33  ;;  %v1765_v53 = vmul.f32 %v9980_v31, %v10489_v16  ;;  %v1014_v22 = vmul.f32 %v10406_v57, %v980_v38  ;;  %v1080_v28 = vmul.f32 %v10419_v24, %v10375_v32  ;;  %v8994_v31 = vld [vmem:[%s14135_s3 + $0x2] ss:$0 sm:$0xff] }
 0x1a0   : > { %v8659_v45 = vpop.eup %8658  ;;  %v2198_v14 = vmin.f32 %v10510_v58, 0.0  ;;  %vm1826_vm14 = vcmp.gt.f32.partialorder %v10439_v60, 0.0  ;;  %vm1827_vm15 = vcmp.gt.f32.partialorder %v10444_v61, 0.0  ;;  %v1698_v9 = vadd.f32 %v1666_v39, %v1600_v25  ;;  %v2551_v25 = vld [vmem:[#allocation2 + $0x11] sm:$0xff] }
 0x1a1   : > { %v8661_v34 = vpop.eup %8660  ;;  %v7569_v15 = vadd.f32 -1.0, %v8659_v45  ;;  %v1699_v40 = vadd.f32 %v1667_v30, %v1601_v52  ;;  %v1111_v7 = vadd.f32 %v1079_v55, %v1013_v42  ;;  %v1177_v57 = vmul.f32 %v8994_v31, %v10379_v5  ;;  %v2550_v30 = vld [vmem:[#allocation2 + $0x9] sm:$0xff] }
 0x1a2   : > { %v8663_v27 = vpop.eup %8662  ;;  %vm2165_vm0 = vcmp.gt.f32.partialorder %v10456_v12, 0.0  ;;  %v2235_v24 = vmul.f32 1.442695, %v2198_v14  ;;  %v7570_v32 = vadd.f32 -1.0, %v8661_v34  ;;  %v10525_v50 = vadd.f32 %v1764_v6, %v1698_v9  ;;  %v10578_v45 = vld [vmem:[#allocation2 + $0x27] sm:$0xff] }
 0x1a3   : > { %v7611_v17 = vadd.f32 -1.0, %v8663_v27  ;;  %v10527_v37 = vadd.f32 %v1765_v53, %v1699_v40  ;;  %v1112_v26 = vadd.f32 %v1080_v28, %v1014_v22  ;;  %v1178_v4 = vmul.f32 %v8994_v31, %v10392_v19  ;;  %v10576_v28 = vld [vmem:[%s14135_s3 + $0x12] ss:$0 sm:$0xff]  ;;  %v10581_v9 = vld [vmem:[#allocation2] sm:$0xff]  ;;  %v10590_v40 = vld [vmem:[%s14135_s3 + $0x13] ss:$0 sm:$0xff] }
 0x1a4   : > { %8664 = vpow2.f32 %v2235_v24  ;;  %v10536_v5 = vsel %vm1826_vm14, %v10439_v60, %v7569_v15  ;;  %v10541_v51 = vsel %vm1827_vm15, %v10444_v61, %v7570_v32  ;;  %v1860_v38 = vmin.f32 %v10525_v50, 0.0  ;;  %v2385_v60 = vld [vmem:[#allocation2 + $0x7] sm:$0xff]  ;;  %v10556_v61 = vld [vmem:[%s14135_s3 + $0x10] ss:$0 sm:$0xff]  ;;  %v8997_v31 = vld [vmem:[%s14135_s3 + $0x4] ss:$0 sm:$0xff] }
 0x1a5   : > { %2135 = vmatmul.bf16.gmra.mxu2 %v2003_v21  ;;  %v10545_v41 = vsel %vm2165_vm0, %v10456_v12, %v7611_v17  ;;  %vm2166_vm1 = vcmp.gt.f32.partialorder %v10510_v58, 0.0  ;;  %v1209_v19 = vadd.f32 %v1177_v57, %v1111_v7  ;;  %v1275_v35 = vmul.f32 %v8995_v49, %v10459_v23  ;;  %v2386_v21 = vld [vmem:[#allocation2 + $0xf] sm:$0xff] }
 0x1a6   : > { %2357 = vst [vmem:[#allocation2 + $0x68] sm:$0xff] %v10545_v41  ;;  %v10566_v23 = vld [vmem:[%s14135_s3 + $0x11] ss:$0 sm:$0xff]  ;;  %v1920_v42 = vmul.f32 1.442695, %v1860_v38  ;;  %v1210_v55 = vadd.f32 %v1178_v4, %v1112_v26  ;;  %v2420_v53 = vmul.f32 %v10556_v61, %v2385_v60  ;;  %v2421_v22 = vmul.f32 %v10556_v61, %v2386_v21  ;;  %v10615_v60 = vld [vmem:[#allocation2 + $0x29] sm:$0xff] }
 0x1a7   : > { %v10559_v39 = vpop.f32.mrf.mxu2  ;;  %v1276_v14 = vmul.f32 %v8995_v49, %v10464_v18  ;;  %v2486_v34 = vmul.f32 %v10581_v9, %v10566_v23  ;;  %v10585_v15 = vld [vmem:[#allocation2 + $0x2f] sm:$0xff]  ;;  %v1307_v7 = vadd.f32 %v1275_v35, %v1209_v19  ;;  %v1373_v57 = vmul.f32 %v8997_v31, %v10472_v62  ;;  %v1536_v49 = vld [vmem:[#allocation2 + $0x227] sm:$0xff]  ;;  %v8998_v21 = vld [vmem:[%s14135_s3 + $0x5] ss:$0 sm:$0xff] }
 0x1a8   : > { %v2199_v52 = vmin.f32 %v10559_v39, 0.0  ;;  %v10597_v18 = vmul.f32 %v8997_v31, %v10476_v11  ;;  %v2584_v32 = vmul.f32 %v10576_v28, %v2550_v30  ;;  %v2585_v17 = vmul.f32 %v10576_v28, %v2551_v25  ;;  %v10604_v26 = vld [vmem:[%s14135_s3 + $0x14] ss:$0 sm:$0xff]  ;;  %v10611_v11 = vld [vmem:[%s14135_s3 + $0x15] ss:$0 sm:$0xff]  ;;  %v10630_v31 = vld [vmem:[#allocation2 + $0x47] sm:$0xff] }
 0x1a9   : > { %8666 = vpow2.f32 %v1920_v42  ;;  %v2518_v38 = vadd.f32 %v2486_v34, %v2420_v53  ;;  %v2519_v19 = vadd.f32 %v2486_v34, %v2421_v22  ;;  %v2682_v62 = vmul.f32 %v10590_v40, %v10578_v45  ;;  %v1537_v42 = vld [vmem:[#allocation2 + $0x22f] sm:$0xff] }
 0x1aa   : > { %v8665_v27 = vpop.eup %8664  ;;  %v2237_v24 = vmul.f32 1.442695, %v2199_v52  ;;  %v2683_v35 = vmul.f32 %v10590_v40, %v10585_v15  ;;  %v1471_v30 = vmul.f32 %v8998_v21, %v10480_v47  ;;  %v10622_v25 = vmul.f32 %v8998_v21, %v10489_v16  ;;  %v2845_v34 = vld [vmem:[#allocation2 + $0x31] sm:$0xff]  ;;  %v10663_v2 = vld [vmem:[#allocation2 + $0x49] sm:$0xff] }
 0x1ab   : > { %v7612_v4 = vadd.f32 -1.0, %v8665_v27  ;;  %vm2167_vm2 = vcmp.gt.f32.partialorder %v10559_v39, 0.0  ;;  %v2616_v53 = vadd.f32 %v2584_v32, %v2518_v38  ;;  %v2617_v22 = vadd.f32 %v2585_v17, %v2519_v19  ;;  %v10635_v47 = vld [vmem:[%s14135_s3 + $0x16] ss:$0 sm:$0xff] }
 0x1ac   : > { %8668 = vpow2.f32 %v2237_v24  ;;  %v2780_v16 = vmul.f32 %v10604_v26, %v10342_v36  ;;  %v10640_v27 = vld [vmem:[#allocation2 + $0x4f] sm:$0xff]  ;;  %v10650_v24 = vld [vmem:[%s14135_s3 + $0x18] ss:$0 sm:$0xff]  ;;  %v1308_v32 = vadd.f32 %v1276_v14, %v1210_v55  ;;  %v1405_v17 = vadd.f32 %v1373_v57, %v1307_v7 }
 0x1ad   : > { %v10627_v52 = vsel %vm2166_vm1, %v10510_v58, %v7612_v4  ;;  %v10645_v58 = vld [vmem:[%s14135_s3 + $0x17] ss:$0 sm:$0xff]  ;;  %v8999_v4 = vld [vmem:[%s14135_s3 + $0x6] ss:$0 sm:$0xff]  ;;  %v2714_v21 = vadd.f32 %v2682_v62, %v2616_v53  ;;  %v2715_v6 = vadd.f32 %v2683_v35, %v2617_v22  ;;  %v2781_v33 = vmul.f32 %v10604_v26, %v10384_v10 }
 0x1ae   : > { %2358 = vst [vmem:[#allocation2 + $0x70] sm:$0xff] %v10627_v52  ;;  %v10655_v38 = vmul.f32 %v8999_v4, %v1536_v49  ;;  %v2878_v12 = vmul.f32 %v10611_v11, %v10615_v60  ;;  %vm1828_vm3 = vcmp.gt.f32.partialorder %v10525_v50, 0.0  ;;  %v2879_v7 = vmul.f32 %v10611_v11, %v2845_v34  ;;  %v10676_v29 = vld [vmem:[#allocation2 + $0x51] sm:$0xff] }
 0x1af   : > { %v10657_v19 = vpop.f32.mrf.mxu2  ;;  %v8667_v55 = vpop.eup %8666  ;;  %v14240_v57 = vmin.f32 %v10527_v37, 0.0  ;;  %v10670_v62 = vmul.f32 %v8999_v4, %v1537_v42  ;;  %v2812_v35 = vadd.f32 %v2780_v16, %v2714_v21  ;;  %v2813_v53 = vadd.f32 %v2781_v33, %v2715_v6 }
 0x1b0   : > { %v2200_v14 = vmin.f32 %v10657_v19, 0.0  ;;  %v2976_v22 = vmul.f32 %v10635_v47, %v10630_v31  ;;  %v2977_v48 = vmul.f32 %v10635_v47, %v10640_v27  ;;  %v3074_v54 = vmul.f32 %v10645_v58, %v10442_v44 }
 0x1b1   : > { %v1922_v49 = vmul.f32 1.442695, %v14240_v57  ;;  %v3075_v57 = vmul.f32 %v10645_v58, %v10494_v63  ;;  %v3172_v42 = vmul.f32 %v10650_v24, %v10663_v2  ;;  %v2910_v6 = vadd.f32 %v2878_v12, %v2812_v35 }
 0x1b2   : > { %v8669_v1 = vpop.eup %8668  ;;  %v2239_v8 = vmul.f32 1.442695, %v2200_v14  ;;  %v2911_v16 = vadd.f32 %v2879_v7, %v2813_v53  ;;  %vm2168_vm4 = vcmp.gt.f32.partialorder %v10657_v19, 0.0  ;;  %v14241_v4 = vpack.c.bf16 %v10499_v56, %v10485_v43 }
 0x1b3   : > { %v7613_v33 = vadd.f32 -1.0, %v8669_v1  ;;  %8670 = vpow2.f32 %v1922_v49  ;;  %v3173_v21 = vmul.f32 %v10650_v24, %v10676_v29  ;;  %v7571_v14 = vadd.f32 -1.0, %v8667_v55 }
 0x1b4   : > { %8672 = vpow2.f32 %v2239_v8  ;;  %v1406_v59 = vadd.f32 %v10597_v18, %v1308_v32  ;;  %v3008_v12 = vadd.f32 %v2976_v22, %v2910_v6  ;;  %v3009_v7 = vadd.f32 %v2977_v48, %v2911_v16 }
 0x1b5   : > { %2140 = vmatmul.bf16.gmra.mxu2 %v14241_v4  ;;  %v10694_v1 = vsel %vm2167_vm2, %v10559_v39, %v7613_v33  ;;  %v1503_v49 = vadd.f32 %v1471_v30, %v1405_v17  ;;  %v2422_v8 = vmul.f32 %v10556_v61, %v10578_v45  ;;  %v2423_v43 = vmul.f32 %v10556_v61, %v10585_v15  ;;  %v9000_v45 = vld [vmem:[%s14135_s3 + $0x7] ss:$0 sm:$0xff] }
 0x1b6   : > { %2359 = vst [vmem:[#allocation2 + $0x88] sm:$0xff] %v10694_v1  ;;  %v2488_v56 = vmul.f32 %v10566_v23, %v10342_v36  ;;  %v2489_v18 = vmul.f32 %v10566_v23, %v10384_v10  ;;  %v3106_v39 = vadd.f32 %v3074_v54, %v3008_v12  ;;  %v3107_v55 = vadd.f32 %v3075_v57, %v3009_v7 }
 0x1b7   : > { %v10705_v32 = vpop.f32.mrf.mxu2  ;;  %v2586_v48 = vmul.f32 %v10576_v28, %v10615_v60  ;;  %v10713_v30 = vmul.f32 %v9000_v45, %v10581_v9  ;;  %v2587_v10 = vmul.f32 %v10576_v28, %v2845_v34  ;;  %v2684_v60 = vmul.f32 %v10590_v40, %v10630_v31 }
 0x1b8   : > { %v2201_v15 = vmin.f32 %v10705_v32, 0.0  ;;  %v2520_v36 = vadd.f32 %v2488_v56, %v2422_v8  ;;  %v2521_v17 = vadd.f32 %v2489_v18, %v2423_v43  ;;  %v10717_v53 = vadd.f32 %v3172_v42, %v3106_v39  ;;  %v10737_v56 = vld [vmem:[#allocation2 + $0x6f] sm:$0xff] }
 0x1b9   : > { %v8671_v35 = vpop.eup %8670  ;;  %v10719_v54 = vadd.f32 %v3173_v21, %v3107_v55  ;;  %v2685_v22 = vmul.f32 %v10590_v40, %v10640_v27  ;;  %v10728_v16 = vsel %vm1828_vm3, %v10525_v50, %v7571_v14  ;;  %v2782_v4 = vmul.f32 %v10604_v26, %v10442_v44  ;;  %v10733_v21 = vld [vmem:[#allocation2 + $0x67] sm:$0xff] }
 0x1ba   : > { %v8673_v57 = vpop.eup %8672  ;;  %v2241_v9 = vmul.f32 1.442695, %v2201_v15  ;;  %v2618_v33 = vadd.f32 %v2586_v48, %v2520_v36  ;;  %v2619_v6 = vadd.f32 %v2587_v10, %v2521_v17  ;;  %v3268_v42 = vmin.f32 %v10717_v53, 0.0  ;;  %v1733_v48 = vld [vmem:[#allocation2 + $0x231] sm:$0xff]  ;;  %v10759_v17 = vld [vmem:[#allocation2 + $0x69] sm:$0xff] }
 0x1bb   : > { %v7614_v34 = vadd.f32 -1.0, %v8673_v57  ;;  %v1504_v12 = vadd.f32 %v10622_v25, %v1406_v59  ;;  %v3269_v7 = vmin.f32 %v10719_v54, 0.0  ;;  %v2783_v44 = vmul.f32 %v10604_v26, %v10494_v63  ;;  %v1732_v59 = vld [vmem:[#allocation2 + $0x229] sm:$0xff] }
 0x1bc   : > { %8674 = vpow2.f32 %v2241_v9  ;;  %v2716_v8 = vadd.f32 %v2684_v60, %v2618_v33  ;;  %v2717_v43 = vadd.f32 %v2685_v22, %v2619_v6  ;;  %v3300_v14 = vmul.f32 1.442695, %v3268_v42  ;;  %v10773_v42 = vld [vmem:[#allocation2 + $0x71] sm:$0xff] }
 0x1bd   : > { %v10742_v50 = vsel %vm2168_vm4, %v10657_v19, %v7614_v34  ;;  %v2880_v18 = vmul.f32 %v10611_v11, %v10663_v2  ;;  %vm1829_vm5 = vcmp.gt.f32.partialorder %v10527_v37, 0.0  ;;  %v3302_v25 = vmul.f32 1.442695, %v3269_v7 }
 0x1be   : > { %2360 = vst [vmem:[#allocation2 + $0x90] sm:$0xff] %v10742_v50  ;;  %v2814_v39 = vadd.f32 %v2782_v4, %v2716_v8  ;;  %v2978_v55 = vmul.f32 %v10635_v47, %v10733_v21  ;;  %v1602_v19 = vadd.f32 %v10655_v38, %v1503_v49  ;;  %8676 = vpow2.f32 %v3300_v14  ;;  %v9001_v38 = vld [vmem:[%s14135_s3 + $0x8] ss:$0 sm:$0xff] }
 0x1bf   : > { %v10753_v45 = vpop.f32.mrf.mxu2  ;;  %v2815_v63 = vadd.f32 %v2783_v44, %v2717_v43  ;;  %v2881_v15 = vmul.f32 %v10611_v11, %v10676_v29  ;;  %v2979_v36 = vmul.f32 %v10635_v47, %v10737_v56  ;;  %8678 = vpow2.f32 %v3302_v25 }
 0x1c0   : > { %v2202_v10 = vmin.f32 %v10753_v45, 0.0  ;;  %v2912_v60 = vadd.f32 %v2880_v18, %v2814_v39  ;;  %v10765_v49 = vmul.f32 %v9001_v38, %v1732_v59  ;;  %vm2169_vm6 = vcmp.gt.f32.partialorder %v10705_v32, 0.0 }
 0x1c1   : > { %vm3236_vm7 = vcmp.gt.f32.partialorder %v10717_v53, 0.0  ;;  %v2913_v22 = vadd.f32 %v2881_v15, %v2815_v63  ;;  %v10769_v57 = vmul.f32 %v9001_v38, %v1733_v48  ;;  %v3076_v34 = vmul.f32 %v10645_v58, %v10545_v41 }
 0x1c2   : > { %v8675_v9 = vpop.eup %8674  ;;  %v2243_v33 = vmul.f32 1.442695, %v2202_v10  ;;  %v3010_v6 = vadd.f32 %v2978_v55, %v2912_v60  ;;  %v3174_v4 = vmul.f32 %v10650_v24, %v10759_v17  ;;  %vm3237_vm8 = vcmp.gt.f32.partialorder %v10719_v54, 0.0 }
 0x1c3   : > { %v7615_v7 = vadd.f32 -1.0, %v8675_v9  ;;  %v3011_v8 = vadd.f32 %v2979_v36, %v2913_v22  ;;  %v3077_v43 = vmul.f32 %v10645_v58, %v10627_v52  ;;  %v14242_v14 = vpack.c.bf16 %v10541_v51, %v10536_v5 }
 0x1c4   : > { %8680 = vpow2.f32 %v2243_v33  ;;  %v3108_v44 = vadd.f32 %v3076_v34, %v3010_v6  ;;  %v7572_v18 = vadd.f32 -1.0, %v8671_v35  ;;  %v1603_v59 = vadd.f32 %v10670_v62, %v1504_v12  ;;  %v8677_v25 = vpop.eup %8676  ;;  %v2457_v12 = vld [vmem:[#allocation2 + $0x50] sm:$0xff] }
 0x1c5   : > { %2145 = vmatmul.bf16.gmra.mxu2 %v14242_v14  ;;  %v10787_v39 = vsel %vm2169_vm6, %v10705_v32, %v7615_v7  ;;  %vm2170_vm9 = vcmp.gt.f32.partialorder %v10753_v45, 0.0  ;;  %v3109_v55 = vadd.f32 %v3077_v43, %v3011_v8  ;;  %v3175_v48 = vmul.f32 %v10650_v24, %v10773_v42  ;;  %v8679_v63 = vpop.eup %8678  ;;  %v2456_v32 = vld [vmem:[#allocation2 + $0x48] sm:$0xff] }
 0x1c6   : > { %2361 = vst [vmem:[#allocation2 + $0xa8] sm:$0xff] %v10787_v39  ;;  %v7648_v5 = vadd.f32 -1.0, %v8677_v25  ;;  %v10793_v51 = vadd.f32 %v3174_v4, %v3108_v44  ;;  %v2424_v62 = vmul.f32 %v10556_v61, %v10630_v31  ;;  %v2425_v35 = vmul.f32 %v10556_v61, %v10640_v27 }
 0x1c7   : > { %v7649_v15 = vadd.f32 -1.0, %v8679_v63  ;;  %v10801_v10 = vadd.f32 %v3175_v48, %v3109_v55  ;;  %v2490_v60 = vmul.f32 %v10566_v23, %v2456_v32  ;;  %v2491_v38 = vmul.f32 %v10566_v23, %v2457_v12  ;;  %v10835_v48 = vld [vmem:[#allocation2 + $0x87] sm:$0xff]  ;;  %v10837_v63 = vld [vmem:[#allocation2 + $0x8f] sm:$0xff] }
 0x1c8   : > { %v10799_v36 = vpop.f32.mrf.mxu2  ;;  %v1989_v31 = vsel %vm1829_vm5, %v10527_v37, %v7572_v18  ;;  %v1700_v9 = vadd.f32 %v10713_v30, %v1602_v19  ;;  %v1701_v27 = vadd.f32 %v10713_v30, %v1603_v59  ;;  %v3396_v33 = vsel %vm3236_vm7, %v10717_v53, %v7648_v5 }
 0x1c9   : > { %v2203_v22 = vmin.f32 %v10799_v36, 0.0  ;;  %v3397_v6 = vsel %vm3237_vm8, %v10719_v54, %v7649_v15  ;;  %v3270_v34 = vmin.f32 %v10793_v51, 0.0  ;;  %v3271_v4 = vmin.f32 %v10801_v10, 0.0 }
 0x1ca   : > { %v8681_v7 = vpop.eup %8680  ;;  %v3428_v8 = vpack.c.bf16 %v3397_v6, %v3396_v33  ;;  %v2522_v37 = vadd.f32 %v2490_v60, %v2424_v62  ;;  %v2523_v14 = vadd.f32 %v2491_v38, %v2425_v35  ;;  %v2588_v18 = vmul.f32 %v10576_v28, %v10663_v2 }
 0x1cb   : > { %v2245_v43 = vmul.f32 1.442695, %v2203_v22  ;;  %v7616_v19 = vadd.f32 -1.0, %v8681_v7  ;;  %v3304_v44 = vmul.f32 1.442695, %v3270_v34  ;;  %v2589_v53 = vmul.f32 %v10576_v28, %v10676_v29  ;;  %v10859_v22 = vld [vmem:[#allocation2 + $0x89] sm:$0xff] }
 0x1cc   : > { %v3306_v30 = vmul.f32 1.442695, %v3271_v4  ;;  %3517 = vmatmul.bf16.vlgmr.msrb.gmra.mxu3 %v3428_v8  ;;  %v2686_v54 = vmul.f32 %v10590_v40, %v10733_v21  ;;  %v2687_v59 = vmul.f32 %v10590_v40, %v10737_v56  ;;  %v2006_v55 = vpack.c.bf16 %v1989_v31, %v10728_v16 }
 0x1cd   : > { %8682 = vpow2.f32 %v2245_v43  ;;  %v10830_v25 = vsel %vm2170_vm9, %v10753_v45, %v7616_v19  ;;  %v2620_v2 = vadd.f32 %v2588_v18, %v2522_v37  ;;  %vm2171_vm10 = vcmp.gt.f32.partialorder %v10799_v36, 0.0  ;;  %v10868_v43 = vld [vmem:[#allocation2 + $0x91] sm:$0xff] }
 0x1ce   : > { %8684 = vpow2.f32 %v3304_v44  ;;  %2362 = vst [vmem:[#allocation2 + $0xb0] sm:$0xff] %v10830_v25  ;;  %v2621_v29 = vadd.f32 %v2589_v53, %v2523_v14  ;;  %v10840_v5 = vadd.f32 %v10765_v49, %v1700_v9  ;;  %vm3238_vm11 = vcmp.gt.f32.partialorder %v10793_v51, 0.0 }
 0x1cf   : > { %8686 = vpow2.f32 %v3306_v30  ;;  %v2718_v62 = vadd.f32 %v2686_v54, %v2620_v2  ;;  %v2784_v16 = vmul.f32 %v10604_v26, %v10545_v41  ;;  %v2882_v35 = vmul.f32 %v10611_v11, %v10759_v17  ;;  %v2459_v2 = vld [vmem:[#allocation2 + $0x70] sm:$0xff] }
 0x1d0   : > { %v10843_v45 = vpop.f32.mrf.mxu2  ;;  %vm3239_vm12 = vcmp.gt.f32.partialorder %v10801_v10, 0.0  ;;  %v2719_v12 = vadd.f32 %v2687_v59, %v2621_v29  ;;  %v2785_v49 = vmul.f32 %v10604_v26, %v10627_v52  ;;  %v2883_v60 = vmul.f32 %v10611_v11, %v10773_v42 }
 0x1d1   : > { %v2204_v32 = vmin.f32 %v10843_v45, 0.0  ;;  %v2816_v15 = vadd.f32 %v2784_v16, %v2718_v62  ;;  %v2980_v38 = vmul.f32 %v10635_v47, %v10835_v48  ;;  %v2981_v41 = vmul.f32 %v10635_v47, %v10837_v63 }
 0x1d2   : > { %v2817_v33 = vadd.f32 %v2785_v49, %v2719_v12  ;;  %v3078_v6 = vmul.f32 %v10645_v58, %v10694_v1  ;;  %v10864_v52 = vadd.f32 %v10769_v57, %v1701_v27  ;;  %v3079_v8 = vmul.f32 %v10645_v58, %v10742_v50 }
 0x1d3   : > { %v8683_v31 = vpop.eup %8682  ;;  %v2247_v9 = vmul.f32 1.442695, %v2204_v32  ;;  %v2914_v7 = vadd.f32 %v2882_v35, %v2816_v15  ;;  %v1862_v37 = vmin.f32 %v10840_v5, 0.0  ;;  %vm2172_vm13 = vcmp.gt.f32.partialorder %v10843_v45, 0.0 }
 0x1d4   : > { %v8685_v34 = vpop.eup %8684  ;;  %v7617_v4 = vadd.f32 -1.0, %v8683_v31  ;;  %v2915_v1 = vadd.f32 %v2883_v60, %v2817_v33  ;;  %v3176_v57 = vmul.f32 %v10650_v24, %v10859_v22  ;;  %v1863_v30 = vmin.f32 %v10864_v52, 0.0 }
 0x1d5   : > { %v8687_v14 = vpop.eup %8686  ;;  %v7650_v19 = vadd.f32 -1.0, %v8685_v34  ;;  %8688 = vpow2.f32 %v2247_v9  ;;  %2150 = vmatmul.bf16.gmra.mxu2 %v2006_v55  ;;  %v3012_v44 = vadd.f32 %v2980_v38, %v2914_v7  ;;  %v3177_v54 = vmul.f32 %v10650_v24, %v10868_v43  ;;  %v2458_v55 = vld [vmem:[#allocation2 + $0x68] sm:$0xff]  ;;  %v10908_v7 = vld [vmem:[#allocation2 + $0x90] sm:$0xff] }
 0x1d6   : > { %v10877_v27 = vsel %vm2171_vm10, %v10799_v36, %v7617_v4  ;;  %v7651_v50 = vadd.f32 -1.0, %v8687_v14  ;;  %v3013_v53 = vadd.f32 %v2981_v41, %v2915_v1  ;;  %v1924_v59 = vmul.f32 1.442695, %v1862_v37  ;;  %v2752_v4 = vld [vmem:[#allocation2 + $0x88] sm:$0xff] }
 0x1d7   : > { %2363 = vst [vmem:[#allocation2 + $0xc8] sm:$0xff] %v10877_v27  ;;  %v3398_v18 = vsel %vm3238_vm11, %v10793_v51, %v7650_v19  ;;  %v3110_v62 = vadd.f32 %v3078_v6, %v3012_v44  ;;  %v1926_v16 = vmul.f32 1.442695, %v1863_v30  ;;  %v2426_v35 = vmul.f32 %v10556_v61, %v10733_v21 }
 0x1d8   : > { %v3399_v36 = vsel %vm3239_vm12, %v10801_v10, %v7651_v50  ;;  %v10889_v29 = vpop.f32.mrf.mxu2  ;;  %v3111_v12 = vadd.f32 %v3079_v8, %v3013_v53  ;;  %v2427_v49 = vmul.f32 %v10556_v61, %v10737_v56  ;;  %8690 = vpow2.f32 %v1924_v59  ;;  %v10931_v53 = vld [vmem:[#allocation2 + $0xaf] sm:$0xff] }
 0x1d9   : > { %v3429_v32 = vpack.c.bf16 %v3399_v36, %v3398_v18  ;;  %v2205_v51 = vmin.f32 %v10889_v29, 0.0  ;;  %v10896_v15 = vadd.f32 %v3176_v57, %v3110_v62  ;;  %v2492_v60 = vmul.f32 %v10566_v23, %v2458_v55  ;;  %v10929_v18 = vld [vmem:[#allocation2 + $0xa7] sm:$0xff] }
 0x1da   : > { %v2493_v10 = vmul.f32 %v10566_v23, %v2459_v2  ;;  %v10900_v31 = vadd.f32 %v3177_v54, %v3111_v12  ;;  %8692 = vpow2.f32 %v1926_v16  ;;  %v2590_v21 = vmul.f32 %v10576_v28, %v10759_v17 }
 0x1db   : > { %v8689_v38 = vpop.eup %8688  ;;  %v2249_v41 = vmul.f32 1.442695, %v2205_v51  ;;  %v3272_v33 = vmin.f32 %v10896_v15, 0.0  ;;  %vm1830_vm14 = vcmp.gt.f32.partialorder %v10840_v5, 0.0  ;;  %vm1831_vm15 = vcmp.gt.f32.partialorder %v10864_v52, 0.0 }
 0x1dc   : > { %v7618_v9 = vadd.f32 -1.0, %v8689_v38  ;;  %3522 = vmatmul.bf16.gmra.mxu3 %v3429_v32  ;;  %v3273_v56 = vmin.f32 %v10900_v31, 0.0  ;;  %v2524_v6 = vadd.f32 %v2492_v60, %v2426_v35  ;;  %v2525_v34 = vadd.f32 %v2493_v10, %v2427_v49 }
 0x1dd   : > { %8694 = vpow2.f32 %v2249_v41  ;;  %vm2173_vm0 = vcmp.gt.f32.partialorder %v10889_v29, 0.0  ;;  %v3308_v8 = vmul.f32 1.442695, %v3272_v33  ;;  %v2591_v37 = vmul.f32 %v10576_v28, %v10773_v42 }
 0x1de   : > { %v10913_v17 = vsel %vm2172_vm13, %v10843_v45, %v7618_v9  ;;  %v3310_v14 = vmul.f32 1.442695, %v3273_v56  ;;  %v2622_v19 = vadd.f32 %v2590_v21, %v2524_v6  ;;  %v2688_v1 = vmul.f32 %v10590_v40, %v10835_v48  ;;  %v8691_v50 = vpop.eup %8690  ;;  %v10949_v9 = vld [vmem:[#allocation2 + $0xa9] sm:$0xff] }
 0x1df   : > { %2364 = vst [vmem:[#allocation2 + $0xd0] sm:$0xff] %v10913_v17  ;;  %v2689_v57 = vmul.f32 %v10590_v40, %v10837_v63  ;;  %vm3240_vm1 = vcmp.gt.f32.partialorder %v10896_v15, 0.0  ;;  %8696 = vpow2.f32 %v3308_v8  ;;  %v2623_v44 = vadd.f32 %v2591_v37, %v2525_v34  ;;  %v10961_v37 = vld [vmem:[#allocation2 + $0xb1] sm:$0xff] }
 0x1e0   : > { %v10924_v45 = vpop.f32.mrf.mxu2  ;;  %v2786_v30 = vmul.f32 %v10604_v26, %v2752_v4  ;;  %v2787_v42 = vmul.f32 %v10604_v26, %v10908_v7  ;;  %v8693_v54 = vpop.eup %8692  ;;  %vm3241_vm2 = vcmp.gt.f32.partialorder %v10900_v31, 0.0  ;;  %8698 = vpow2.f32 %v3310_v14 }
 0x1e1   : > { %v2206_v59 = vmin.f32 %v10924_v45, 0.0  ;;  %v7573_v55 = vadd.f32 -1.0, %v8691_v50  ;;  %v2884_v2 = vmul.f32 %v10611_v11, %v10859_v22  ;;  %v7574_v36 = vadd.f32 -1.0, %v8693_v54 }
 0x1e2   : > { %v2720_v62 = vadd.f32 %v2688_v1, %v2622_v19  ;;  %v2721_v16 = vadd.f32 %v2689_v57, %v2623_v44  ;;  %v2885_v35 = vmul.f32 %v10611_v11, %v10868_v43  ;;  %v2982_v49 = vmul.f32 %v10635_v47, %v10929_v18 }
 0x1e3   : > { %v8695_v32 = vpop.eup %8694  ;;  %v2251_v51 = vmul.f32 1.442695, %v2206_v59  ;;  %v1990_v12 = vsel %vm1830_vm14, %v10840_v5, %v7573_v55  ;;  %v2983_v60 = vmul.f32 %v10635_v47, %v10931_v53  ;;  %v1991_v38 = vsel %vm1831_vm15, %v10864_v52, %v7574_v36 }
 0x1e4   : > { %v7619_v10 = vadd.f32 -1.0, %v8695_v32  ;;  %v2818_v41 = vadd.f32 %v2786_v30, %v2720_v62  ;;  %v2819_v21 = vadd.f32 %v2787_v42, %v2721_v16  ;;  %vm2174_vm3 = vcmp.gt.f32.partialorder %v10924_v45, 0.0 }
 0x1e5   : > { %8700 = vpow2.f32 %v2251_v51  ;;  %v2007_v33 = vpack.c.bf16 %v1991_v38, %v1990_v12  ;;  %v3080_v5 = vmul.f32 %v10645_v58, %v10787_v39  ;;  %v8697_v56 = vpop.eup %8696  ;;  %v3081_v52 = vmul.f32 %v10645_v58, %v10830_v25  ;;  %v2754_v38 = vld [vmem:[#allocation2 + $0xa8] sm:$0xff] }
 0x1e6   : > { %v10957_v6 = vsel %vm2173_vm0, %v10889_v29, %v7619_v10  ;;  %v2916_v34 = vadd.f32 %v2884_v2, %v2818_v41  ;;  %v2917_v8 = vadd.f32 %v2885_v35, %v2819_v21  ;;  %v8699_v14 = vpop.eup %8698  ;;  %v7652_v19 = vadd.f32 -1.0, %v8697_v56 }
 0x1e7   : > { %2365 = vst [vmem:[#allocation2 + $0xe8] sm:$0xff] %v10957_v6  ;;  %2155 = vmatmul.bf16.gmra.mxu2 %v2007_v33  ;;  %v3178_v39 = vmul.f32 %v10650_v24, %v10949_v9  ;;  %v2428_v1 = vmul.f32 %v10556_v61, %v10835_v48  ;;  %v2429_v29 = vmul.f32 %v10556_v61, %v10837_v63  ;;  %v7653_v57 = vadd.f32 -1.0, %v8699_v14 }
 0x1e8   : > { %v2116_v50 = vpop.f32.mrf.mxu2  ;;  %v3014_v44 = vadd.f32 %v2982_v49, %v2916_v34  ;;  %v3015_v30 = vadd.f32 %v2983_v60, %v2917_v8  ;;  %v2494_v42 = vmul.f32 %v10566_v23, %v2752_v4  ;;  %v3400_v54 = vsel %vm3240_vm1, %v10896_v15, %v7652_v19 }
 0x1e9   : > { %v2207_v59 = vmin.f32 %v2116_v50, 0.0  ;;  %v3179_v55 = vmul.f32 %v10650_v24, %v10961_v37  ;;  %v2495_v48 = vmul.f32 %v10566_v23, %v10908_v7  ;;  %v3401_v63 = vsel %vm3241_vm2, %v10900_v31, %v7653_v57 }
 0x1ea   : > { %v3112_v2 = vadd.f32 %v3080_v5, %v3014_v44  ;;  %v3113_v36 = vadd.f32 %v3081_v52, %v3015_v30  ;;  %v2526_v62 = vadd.f32 %v2494_v42, %v2428_v1  ;;  %v3430_v4 = vpack.c.bf16 %v3401_v63, %v3400_v54  ;;  %v11001_v5 = vld [vmem:[#allocation2 + $0xc7] sm:$0xff] }
 0x1eb   : > { %v8701_v16 = vpop.eup %8700  ;;  %v2253_v35 = vmul.f32 1.442695, %v2207_v59  ;;  %v2527_v32 = vadd.f32 %v2495_v48, %v2429_v29  ;;  %v2592_v15 = vmul.f32 %v10576_v28, %v10859_v22  ;;  %v2593_v7 = vmul.f32 %v10576_v28, %v10868_v43 }
 0x1ec   : > { %v7620_v51 = vadd.f32 -1.0, %v8701_v16  ;;  %v10983_v12 = vadd.f32 %v3178_v39, %v3112_v2  ;;  %v10985_v49 = vadd.f32 %v3179_v55, %v3113_v36  ;;  %3527 = vmatmul.bf16.gmra.mxu3 %v3430_v4  ;;  %v2690_v60 = vmul.f32 %v10590_v40, %v10929_v18  ;;  %v11019_v55 = vld [vmem:[#allocation2 + $0xc9] sm:$0xff]  ;;  %v11028_v4 = vld [vmem:[#allocation2 + $0xd1] sm:$0xff] }
 0x1ed   : > { %8702 = vpow2.f32 %v2253_v35  ;;  %v2624_v31 = vadd.f32 %v2592_v15, %v2526_v62  ;;  %v2691_v10 = vmul.f32 %v10590_v40, %v10931_v53  ;;  %v2625_v21 = vadd.f32 %v2593_v7, %v2527_v32  ;;  %v8342_v15 = vld [vmem:[%s14136_s4 + $0xb8] sm:$0xff]  ;;  %v2463_v7 = vld [vmem:[#allocation2 + $0xb0] sm:$0xff] }
 0x1ee   : > { %v10996_v22 = vsel %vm2174_vm3, %v10924_v45, %v7620_v51  ;;  %v3274_v41 = vmin.f32 %v10983_v12, 0.0  ;;  %v3275_v43 = vmin.f32 %v10985_v49, 0.0  ;;  %v2788_v8 = vmul.f32 %v10604_v26, %v2754_v38  ;;  %v11008_v45 = vld [vmem:[#allocation2 + $0xcf] sm:$0xff]  ;;  %4946 = vmatpush.bf16.msrb.mxu0 %v8342_v15 }
 0x1ef   : > { %2366 = vst [vmem:[#allocation2 + $0xf0] sm:$0xff] %v10996_v22  ;;  %v2722_v33 = vadd.f32 %v2690_v60, %v2624_v31  ;;  %v2886_v52 = vmul.f32 %v10611_v11, %v10949_v9  ;;  %v2723_v39 = vadd.f32 %v2691_v10, %v2625_v21  ;;  %v2789_v1 = vmul.f32 %v10604_v26, %v10830_v25 }
 0x1f0   : > { %v3312_v56 = vmul.f32 1.442695, %v3274_v41  ;;  %v11003_v34 = vpop.f32.mrf.mxu2  ;;  %v3314_v14 = vmul.f32 1.442695, %v3275_v43  ;;  %v2887_v57 = vmul.f32 %v10611_v11, %v10961_v37  ;;  %v2984_v44 = vmul.f32 %v10635_v47, %v11001_v5 }
 0x1f1   : > { %v2208_v19 = vmin.f32 %v11003_v34, 0.0  ;;  %v2820_v29 = vadd.f32 %v2788_v8, %v2722_v33  ;;  %v2821_v54 = vadd.f32 %v2789_v1, %v2723_v39  ;;  %v2985_v59 = vmul.f32 %v10635_v47, %v11008_v45 }
 0x1f2   : > { %8704 = vpow2.f32 %v3312_v56  ;;  %vm2175_vm4 = vcmp.gt.f32.partialorder %v2116_v50, 0.0  ;;  %vm3242_vm5 = vcmp.gt.f32.partialorder %v10983_v12, 0.0  ;;  %v3082_v2 = vmul.f32 %v10645_v58, %v10877_v27 }
 0x1f3   : > { %v8703_v30 = vpop.eup %8702  ;;  %8706 = vpow2.f32 %v3314_v14  ;;  %v2255_v42 = vmul.f32 1.442695, %v2208_v19  ;;  %v2918_v25 = vadd.f32 %v2886_v52, %v2820_v29  ;;  %v2919_v63 = vadd.f32 %v2887_v57, %v2821_v54 }
 0x1f4   : > { %v7621_v48 = vadd.f32 -1.0, %v8703_v30  ;;  %v3083_v16 = vmul.f32 %v10645_v58, %v10913_v17  ;;  %v3180_v35 = vmul.f32 %v10650_v24, %v11019_v55  ;;  %v2431_v51 = vmul.f32 %v10556_v61, %v10931_v53 }
 0x1f5   : > { %8708 = vpow2.f32 %v2255_v42  ;;  %v3016_v62 = vadd.f32 %v2984_v44, %v2918_v25  ;;  %v3017_v32 = vadd.f32 %v2985_v59, %v2919_v63  ;;  %v2496_v31 = vmul.f32 %v10566_v23, %v2754_v38 }
 0x1f6   : > { %v11024_v36 = vsel %vm2175_vm4, %v2116_v50, %v7621_v48  ;;  %v2430_v50 = vmul.f32 %v10556_v61, %v10929_v18  ;;  %vm3243_vm6 = vcmp.gt.f32.partialorder %v10985_v49, 0.0  ;;  %vm2176_vm7 = vcmp.gt.f32.partialorder %v11003_v34, 0.0  ;;  %v11080_v15 = vld [vmem:[#allocation2 + $0xef] sm:$0xff] }
 0x1f7   : > { %2367 = vst [vmem:[#allocation2 + $0x108] sm:$0xff] %v11024_v36  ;;  %v3114_v41 = vadd.f32 %v3082_v2, %v3016_v62  ;;  %v2497_v43 = vmul.f32 %v10566_v23, %v2463_v7  ;;  %v3115_v8 = vadd.f32 %v3083_v16, %v3017_v32  ;;  %v3181_v18 = vmul.f32 %v10650_v24, %v11028_v4  ;;  %v11072_v16 = vld [vmem:[#allocation2 + $0xe7] sm:$0xff] }
 0x1f8   : > { %v8705_v60 = vpop.eup %8704  ;;  %v2121_v10 = vpop.f32.mrf.mxu2  ;;  %v2528_v38 = vadd.f32 %v2496_v31, %v2430_v50  ;;  %v2594_v14 = vmul.f32 %v10576_v28, %v10949_v9  ;;  %v2692_v54 = vmul.f32 %v10590_v40, %v11001_v5  ;;  %v2693_v62 = vmul.f32 %v10590_v40, %v11008_v45 }
 0x1f9   : > { %v8707_v21 = vpop.eup %8706  ;;  %v7654_v33 = vadd.f32 -1.0, %v8705_v60  ;;  %v2209_v56 = vmin.f32 %v2121_v10, 0.0  ;;  %v11046_v52 = vadd.f32 %v3180_v35, %v3114_v41  ;;  %v11053_v29 = vadd.f32 %v3181_v18, %v3115_v8 }
 0x1fa   : > { %v7655_v53 = vadd.f32 -1.0, %v8707_v21  ;;  %v2529_v57 = vadd.f32 %v2497_v43, %v2431_v51  ;;  %v2888_v32 = vmul.f32 %v10611_v11, %v11019_v55  ;;  %v2791_v7 = vmul.f32 %v10604_v26, %v10913_v17 }
 0x1fb   : > { %v8709_v19 = vpop.eup %8708  ;;  %v3402_v39 = vsel %vm3242_vm5, %v10983_v12, %v7654_v33  ;;  %v2257_v1 = vmul.f32 1.442695, %v2209_v56  ;;  %v3276_v42 = vmin.f32 %v11046_v52, 0.0  ;;  %v3277_v59 = vmin.f32 %v11053_v29, 0.0  ;;  %v11091_v56 = vld [vmem:[#allocation2 + $0xe9] sm:$0xff] }
 0x1fc   : > { %v3403_v44 = vsel %vm3243_vm6, %v10985_v49, %v7655_v53  ;;  %v7622_v30 = vadd.f32 -1.0, %v8709_v19  ;;  %v2595_v12 = vmul.f32 %v10576_v28, %v10961_v37  ;;  %v2626_v49 = vadd.f32 %v2594_v14, %v2528_v38 }
 0x1fd   : > { %v3431_v9 = vpack.c.bf16 %v3403_v44, %v3402_v39  ;;  %8710 = vpow2.f32 %v2257_v1  ;;  %v3316_v25 = vmul.f32 1.442695, %v3276_v42  ;;  %v3318_v63 = vmul.f32 1.442695, %v3277_v59 }
 0x1fe   : > { %v11067_v48 = vsel %vm2176_vm7, %v11003_v34, %v7622_v30  ;;  %v2627_v2 = vadd.f32 %v2595_v12, %v2529_v57  ;;  %v2724_v37 = vadd.f32 %v2692_v54, %v2626_v49  ;;  %v2790_v34 = vmul.f32 %v10604_v26, %v10877_v27  ;;  %v11100_v57 = vld [vmem:[#allocation2 + $0xf1] sm:$0xff]  ;;  %v2464_v12 = vld [vmem:[#allocation2 + $0xc8] sm:$0xff] }
 0x1ff   : > { %3532 = vmatmul.bf16.gmra.mxu3 %v3431_v9  ;;  %2368 = vst [vmem:[#allocation2 + $0x110] sm:$0xff] %v11067_v48  ;;  %8712 = vpow2.f32 %v3316_v25  ;;  %v2986_v60 = vmul.f32 %v10635_v47, %v11072_v16  ;;  %v2889_v27 = vmul.f32 %v10611_v11, %v11028_v4  ;;  %v2987_v33 = vmul.f32 %v10635_v47, %v11080_v15  ;;  %v8341_v9 = vld [vmem:[%s14136_s4 + $0xb0] sm:$0xff] }
 0x200   : > { %v11074_v35 = vpop.f32.mrf.mxu2  ;;  %8714 = vpow2.f32 %v3318_v63  ;;  %v2725_v51 = vadd.f32 %v2693_v62, %v2627_v2  ;;  %v2822_v31 = vadd.f32 %v2790_v34, %v2724_v37  ;;  %vm2177_vm8 = vcmp.gt.f32.partialorder %v2121_v10, 0.0  ;;  %4947 = vmatpush.bf16.msrb.mxu0 %v8341_v9 }
 0x201   : > { %v2210_v50 = vmin.f32 %v11074_v35, 0.0  ;;  %vm3244_vm9 = vcmp.gt.f32.partialorder %v11046_v52, 0.0  ;;  %v3084_v38 = vmul.f32 %v10645_v58, %v10957_v6  ;;  %v3085_v1 = vmul.f32 %v10645_v58, %v10996_v22 }
 0x202   : > { %v2823_v21 = vadd.f32 %v2791_v7, %v2725_v51  ;;  %v2920_v18 = vadd.f32 %v2888_v32, %v2822_v31  ;;  %v3182_v44 = vmul.f32 %v10650_v24, %v11091_v56  ;;  %v2433_v59 = vmul.f32 %v10556_v61, %v11008_v45 }
 0x203   : > { %v8711_v41 = vpop.eup %8710  ;;  %v2259_v43 = vmul.f32 1.442695, %v2210_v50  ;;  %v2498_v2 = vmul.f32 %v10566_v23, %v2464_v12  ;;  %v2499_v62 = vmul.f32 %v10566_v23, %v10913_v17  ;;  %vm3245_vm10 = vcmp.gt.f32.partialorder %v11053_v29, 0.0 }
 0x204   : > { %v7623_v8 = vadd.f32 -1.0, %v8711_v41  ;;  %v2921_v53 = vadd.f32 %v2889_v27, %v2823_v21  ;;  %v3018_v39 = vadd.f32 %v2986_v60, %v2920_v18  ;;  %v2596_v31 = vmul.f32 %v10576_v28, %v11019_v55 }
 0x205   : > { %8716 = vpow2.f32 %v2259_v43  ;;  %v8713_v14 = vpop.eup %8712  ;;  %v2531_v50 = vadd.f32 %v2499_v62, %v2433_v59  ;;  %vm2178_vm11 = vcmp.gt.f32.partialorder %v11074_v35, 0.0  ;;  %v2694_v55 = vmul.f32 %v10590_v40, %v11072_v16 }
 0x206   : > { %v11096_v19 = vsel %vm2177_vm8, %v2121_v10, %v7623_v8  ;;  %v8715_v30 = vpop.eup %8714  ;;  %v7656_v42 = vadd.f32 -1.0, %v8713_v14  ;;  %v3019_v54 = vadd.f32 %v2987_v33, %v2921_v53  ;;  %v2432_v10 = vmul.f32 %v10556_v61, %v11001_v5 }
 0x207   : > { %2369 = vst [vmem:[#allocation2 + $0x128] sm:$0xff] %v11096_v19  ;;  %v7657_v25 = vadd.f32 -1.0, %v8715_v30  ;;  %v3116_v63 = vadd.f32 %v3084_v38, %v3018_v39  ;;  %v3183_v5 = vmul.f32 %v10650_v24, %v11100_v57  ;;  %v2695_v53 = vmul.f32 %v10590_v40, %v11080_v15  ;;  %v11144_v38 = vld [vmem:[#allocation2 + $0x107] sm:$0xff]  ;;  %v11152_v39 = vld [vmem:[#allocation2 + $0x10f] sm:$0xff] }
 0x208   : > { %v11112_v49 = vpop.f32.mrf.mxu2  ;;  %v3117_v34 = vadd.f32 %v3085_v1, %v3019_v54  ;;  %v3404_v61 = vsel %vm3244_vm9, %v11046_v52, %v7656_v42  ;;  %v2530_v43 = vadd.f32 %v2498_v2, %v2432_v10  ;;  %v2890_v14 = vmul.f32 %v10611_v11, %v11091_v56  ;;  %v11158_v40 = vld [vmem:[%s14135_s3 + $0x14] ss:$0 sm:$0xff]  ;;  %v11167_v10 = vld [vmem:[%s14135_s3 + $0x15] ss:$0 sm:$0xff] }
 0x209   : > { %v2211_v37 = vmin.f32 %v11112_v49, 0.0  ;;  %v3405_v45 = vsel %vm3245_vm10, %v11053_v29, %v7657_v25  ;;  %v11125_v32 = vadd.f32 %v3182_v44, %v3116_v63  ;;  %v2597_v29 = vmul.f32 %v10576_v28, %v11028_v4  ;;  %v11173_v25 = vld [vmem:[#allocation2 + $0x109] sm:$0xff] }
 0x20a   : > { %v3432_v23 = vpack.c.bf16 %v3405_v45, %v3404_v61  ;;  %v11127_v7 = vadd.f32 %v3183_v5, %v3117_v34  ;;  %v2628_v33 = vadd.f32 %v2596_v31, %v2530_v43  ;;  %v2793_v30 = vmul.f32 %v11158_v40, %v10996_v22  ;;  %v11183_v61 = vld [vmem:[#allocation2 + $0x111] sm:$0xff] }
 0x20b   : > { %v8717_v51 = vpop.eup %8716  ;;  %v2261_v17 = vmul.f32 1.442695, %v2211_v37  ;;  %v3278_v41 = vmin.f32 %v11125_v32, 0.0  ;;  %v2629_v18 = vadd.f32 %v2597_v29, %v2531_v50  ;;  %v2891_v59 = vmul.f32 %v11167_v10, %v11100_v57  ;;  %v11212_v29 = vld [vmem:[%s14135_s3 + $0x11] ss:$0 sm:$0xff] }
 0x20c   : > { %v7624_v60 = vadd.f32 -1.0, %v8717_v51  ;;  %v3279_v52 = vmin.f32 %v11127_v7, 0.0  ;;  %v2726_v4 = vadd.f32 %v2694_v55, %v2628_v33  ;;  %v2989_v12 = vmul.f32 %v10635_v47, %v11152_v39 }
 0x20d   : > { %8718 = vpow2.f32 %v2261_v17  ;;  %v3320_v27 = vmul.f32 1.442695, %v3278_v41  ;;  %v2727_v44 = vadd.f32 %v2695_v53, %v2629_v18  ;;  %vm2179_vm12 = vcmp.gt.f32.partialorder %v11112_v49, 0.0  ;;  %v11191_v17 = vld [vmem:[%s14135_s3 + $0x17] ss:$0 sm:$0xff] }
 0x20e   : > { %v11137_v21 = vsel %vm2178_vm11, %v11074_v35, %v7624_v60  ;;  %v3322_v8 = vmul.f32 1.442695, %v3279_v52  ;;  %v2792_v35 = vmul.f32 %v10604_v26, %v10957_v6  ;;  %v2988_v26 = vmul.f32 %v10635_v47, %v11144_v38 }
 0x20f   : > { %3537 = vmatmul.bf16.gmra.mxu3 %v3432_v23  ;;  %2370 = vst [vmem:[#allocation2 + $0x130] sm:$0xff] %v11137_v21  ;;  %8720 = vpow2.f32 %v3320_v27  ;;  %v2825_v9 = vadd.f32 %v2793_v30, %v2727_v44  ;;  %vm3246_vm13 = vcmp.gt.f32.partialorder %v11125_v32, 0.0  ;;  %vm3247_vm14 = vcmp.gt.f32.partialorder %v11127_v7, 0.0 }
 0x210   : > { %v11146_v28 = vpop.f32.mrf.mxu2  ;;  %8722 = vpow2.f32 %v3322_v8  ;;  %v2824_v42 = vadd.f32 %v2792_v35, %v2726_v4  ;;  %v3086_v47 = vmul.f32 %v10645_v58, %v11024_v36  ;;  %v3184_v45 = vmul.f32 %v10650_v24, %v11173_v25  ;;  %v8340_v58 = vld [vmem:[%s14136_s4 + $0xa8] sm:$0xff]  ;;  %v11201_v24 = vld [vmem:[%s14135_s3 + $0x10] ss:$0 sm:$0xff] }
 0x211   : > { %v2212_v1 = vmin.f32 %v11146_v28, 0.0  ;;  %v2923_v62 = vadd.f32 %v2891_v59, %v2825_v9  ;;  %v2435_v31 = vmul.f32 %v11201_v24, %v11080_v15  ;;  %v2434_v52 = vmul.f32 %v11201_v24, %v11072_v16  ;;  %v11220_v15 = vld [vmem:[%s14135_s3 + $0x18] ss:$0 sm:$0xff]  ;;  %4948 = vmatpush.bf16.msrb.mxu0 %v8340_v58  ;;  %v11277_v58 = vld [vmem:[%s14135_s3 + $0x16] ss:$0 sm:$0xff] }
 0x212   : > { %v2922_v2 = vadd.f32 %v2890_v14, %v2824_v42  ;;  %v2501_v27 = vmul.f32 %v11212_v29, %v10996_v22  ;;  %v3185_v8 = vmul.f32 %v11220_v15, %v11183_v61  ;;  %v2500_v16 = vmul.f32 %v11212_v29, %v10957_v6  ;;  %v11239_v6 = vld [vmem:[%s14135_s3 + $0x12] ss:$0 sm:$0xff] }
 0x213   : > { %v8719_v54 = vpop.eup %8718  ;;  %v2263_v11 = vmul.f32 1.442695, %v2212_v1  ;;  %v3021_v23 = vadd.f32 %v2989_v12, %v2923_v62  ;;  %vm2180_vm15 = vcmp.gt.f32.partialorder %v11146_v28, 0.0 }
 0x214   : > { %v7625_v63 = vadd.f32 -1.0, %v8719_v54  ;;  %v3020_v5 = vadd.f32 %v2988_v26, %v2922_v2  ;;  %v2533_v4 = vadd.f32 %v2501_v27, %v2435_v31  ;;  %v2599_v54 = vmul.f32 %v11239_v6, %v11100_v57 }
 0x215   : > { %8724 = vpow2.f32 %v2263_v11  ;;  %v8721_v37 = vpop.eup %8720  ;;  %v2893_v27 = vmul.f32 %v11167_v10, %v11183_v61 }
 0x216   : > { %v11179_v34 = vsel %vm2179_vm12, %v11112_v49, %v7625_v63  ;;  %v8723_v50 = vpop.eup %8722  ;;  %v7658_v51 = vadd.f32 -1.0, %v8721_v37  ;;  %v3087_v49 = vmul.f32 %v11191_v17, %v11067_v48  ;;  %v3118_v43 = vadd.f32 %v3086_v47, %v3020_v5 }
 0x217   : > { %2371 = vst [vmem:[#allocation2 + $0x148] sm:$0xff] %v11179_v34  ;;  %v7659_v60 = vadd.f32 -1.0, %v8723_v50  ;;  %v2631_v2 = vadd.f32 %v2599_v54, %v2533_v4  ;;  %v2794_v5 = vmul.f32 %v11158_v40, %v11024_v36  ;;  %v2892_v47 = vmul.f32 %v11167_v10, %v11173_v25 }
 0x218   : > { %v11205_v41 = vpop.f32.mrf.mxu2  ;;  %v3119_v55 = vadd.f32 %v3087_v49, %v3021_v23  ;;  %v3406_v18 = vsel %vm3246_vm13, %v11125_v32, %v7658_v51  ;;  %v11232_v53 = vadd.f32 %v3184_v45, %v3118_v43  ;;  %v2598_v32 = vmul.f32 %v11239_v6, %v11091_v56  ;;  %v11254_v56 = vld [vmem:[%s14135_s3 + $0x13] ss:$0 sm:$0xff] }
 0x219   : > { %v2213_v33 = vmin.f32 %v11205_v41, 0.0  ;;  %v3407_v22 = vsel %vm3247_vm14, %v11127_v7, %v7659_v60  ;;  %v2532_v7 = vadd.f32 %v2500_v16, %v2434_v52  ;;  %v2696_v12 = vmul.f32 %v11254_v56, %v11144_v38  ;;  %v11269_v45 = vld [vmem:[#allocation2 + $0x12f] sm:$0xff] }
 0x21a   : > { %v3433_v14 = vpack.c.bf16 %v3407_v22, %v3406_v18  ;;  %v11234_v44 = vadd.f32 %v3185_v8, %v3119_v55  ;;  %v3280_v42 = vmin.f32 %v11232_v53, 0.0  ;;  %v2697_v57 = vmul.f32 %v11254_v56, %v11152_v39  ;;  %v11285_v55 = vld [vmem:[#allocation2 + $0x129] sm:$0xff] }
 0x21b   : > { %v8725_v35 = vpop.eup %8724  ;;  %v2265_v1 = vmul.f32 1.442695, %v2213_v33  ;;  %v2630_v59 = vadd.f32 %v2598_v32, %v2532_v7  ;;  %v2795_v23 = vmul.f32 %v11158_v40, %v11067_v48  ;;  %v2991_v33 = vmul.f32 %v11277_v58, %v11269_v45 }
 0x21c   : > { %v7626_v30 = vadd.f32 -1.0, %v8725_v35  ;;  %v3281_v26 = vmin.f32 %v11234_v44, 0.0  ;;  %v3324_v9 = vmul.f32 1.442695, %v3280_v42  ;;  %v2729_v51 = vadd.f32 %v2697_v57, %v2631_v2 }
 0x21d   : > { %8726 = vpow2.f32 %v2265_v1  ;;  %v2728_v37 = vadd.f32 %v2696_v12, %v2630_v59  ;;  %vm2181_vm0 = vcmp.gt.f32.partialorder %v11205_v41, 0.0  ;;  %vm3248_vm1 = vcmp.gt.f32.partialorder %v11232_v53, 0.0  ;;  %v11295_v1 = vld [vmem:[#allocation2 + $0x131] sm:$0xff] }
 0x21e   : > { %v11249_v11 = vsel %vm2180_vm15, %v11146_v28, %v7626_v30  ;;  %v3326_v63 = vmul.f32 1.442695, %v3281_v26  ;;  %v11261_v28 = vld [vmem:[#allocation2 + $0x127] sm:$0xff]  ;;  %8728 = vpow2.f32 %v3324_v9  ;;  %v2827_v52 = vadd.f32 %v2795_v23, %v2729_v51 }
 0x21f   : > { %3542 = vmatmul.bf16.gmra.mxu3 %v3433_v14  ;;  %2372 = vst [vmem:[#allocation2 + $0x150] sm:$0xff] %v11249_v11  ;;  %v2826_v49 = vadd.f32 %v2794_v5, %v2728_v37  ;;  %v2990_v31 = vmul.f32 %v11277_v58, %v11261_v28  ;;  %vm3249_vm2 = vcmp.gt.f32.partialorder %v11234_v44, 0.0  ;;  %v3088_v14 = vmul.f32 %v11191_v17, %v11096_v19 }
 0x220   : > { %v11263_v62 = vpop.f32.mrf.mxu2  ;;  %8730 = vpow2.f32 %v3326_v63  ;;  %v2925_v18 = vadd.f32 %v2893_v27, %v2827_v52  ;;  %v3186_v32 = vmul.f32 %v11220_v15, %v11285_v55  ;;  %v3089_v26 = vmul.f32 %v11191_v17, %v11137_v21 }
 0x221   : > { %v2214_v50 = vmin.f32 %v11263_v62, 0.0  ;;  %v2924_v16 = vadd.f32 %v2892_v47, %v2826_v49  ;;  %v2437_v54 = vmul.f32 %v11201_v24, %v11152_v39  ;;  %v2436_v63 = vmul.f32 %v11201_v24, %v11144_v38 }
 0x222   : > { %v3023_v7 = vadd.f32 %v2991_v33, %v2925_v18  ;;  %v2503_v2 = vmul.f32 %v11212_v29, %v11067_v48  ;;  %v3187_v5 = vmul.f32 %v11220_v15, %v11295_v1  ;;  %v2502_v47 = vmul.f32 %v11212_v29, %v11024_v36 }
 0x223   : > { %v8727_v60 = vpop.eup %8726  ;;  %v2267_v43 = vmul.f32 1.442695, %v2214_v50  ;;  %v3022_v35 = vadd.f32 %v2990_v31, %v2924_v16  ;;  %vm2182_vm3 = vcmp.gt.f32.partialorder %v11263_v62, 0.0 }
 0x224   : > { %v7627_v8 = vadd.f32 -1.0, %v8727_v60  ;;  %v8729_v22 = vpop.eup %8728  ;;  %v3121_v37 = vadd.f32 %v3089_v26, %v3023_v7  ;;  %v2535_v48 = vadd.f32 %v2503_v2, %v2437_v54  ;;  %v2600_v60 = vmul.f32 %v11239_v6, %v11173_v25 }
 0x225   : > { %8732 = vpow2.f32 %v2267_v43  ;;  %v7660_v42 = vadd.f32 -1.0, %v8729_v22  ;;  %v3120_v12 = vadd.f32 %v3088_v14, %v3022_v35  ;;  %v2534_v52 = vadd.f32 %v2502_v47, %v2436_v63  ;;  %v11340_v35 = vld [vmem:[#allocation2 + $0x147] sm:$0xff] }
 0x226   : > { %v11291_v4 = vsel %vm2181_vm0, %v11205_v41, %v7627_v8  ;;  %v8731_v30 = vpop.eup %8730  ;;  %v8339_v41 = vld [vmem:[%s14136_s4 + $0xa0] sm:$0xff]  ;;  %v11323_v31 = vadd.f32 %v3187_v5, %v3121_v37  ;;  %v2698_v25 = vmul.f32 %v11254_v56, %v11261_v28  ;;  %v2699_v22 = vmul.f32 %v11254_v56, %v11269_v45  ;;  %v11356_v37 = vld [vmem:[#allocation2 + $0x149] sm:$0xff] }
 0x227   : > { %2373 = vst [vmem:[#allocation2 + $0x168] sm:$0xff] %v11291_v4  ;;  %v7661_v9 = vadd.f32 -1.0, %v8731_v30  ;;  %4949 = vmatpush.bf16.msrb.mxu0 %v8339_v41  ;;  %v3408_v39 = vsel %vm3248_vm1, %v11232_v53, %v7660_v42  ;;  %v11321_v50 = vadd.f32 %v3186_v32, %v3120_v12  ;;  %v2632_v8 = vadd.f32 %v2600_v60, %v2534_v52  ;;  %v11346_v30 = vld [vmem:[#allocation2 + $0x14f] sm:$0xff] }
 0x228   : > { %v2136_v59 = vpop.f32.mrf.mxu2  ;;  %v3283_v53 = vmin.f32 %v11323_v31, 0.0  ;;  %v2894_v32 = vmul.f32 %v11167_v10, %v11285_v55  ;;  %v2797_v26 = vmul.f32 %v11158_v40, %v11137_v21  ;;  %v2992_v54 = vmul.f32 %v11277_v58, %v11340_v35 }
 0x229   : > { %v2215_v57 = vmin.f32 %v2136_v59, 0.0  ;;  %v3409_v38 = vsel %vm3249_vm2, %v11234_v44, %v7661_v9  ;;  %v3282_v43 = vmin.f32 %v11321_v50, 0.0  ;;  %v2601_v44 = vmul.f32 %v11239_v6, %v11183_v61 }
 0x22a   : > { %v3434_v23 = vpack.c.bf16 %v3409_v38, %v3408_v39  ;;  %v3330_v16 = vmul.f32 1.442695, %v3283_v53  ;;  %v2730_v14 = vadd.f32 %v2698_v25, %v2632_v8  ;;  %v2895_v2 = vmul.f32 %v11167_v10, %v11295_v1 }
 0x22b   : > { %v8733_v51 = vpop.eup %8732  ;;  %v2269_v49 = vmul.f32 1.442695, %v2215_v57  ;;  %v3328_v33 = vmul.f32 1.442695, %v3282_v43  ;;  %v2633_v18 = vadd.f32 %v2601_v44, %v2535_v48  ;;  %v2993_v57 = vmul.f32 %v11277_v58, %v11346_v30 }
 0x22c   : > { %v7628_v36 = vadd.f32 -1.0, %v8733_v51  ;;  %vm2183_vm4 = vcmp.gt.f32.partialorder %v2136_v59, 0.0  ;;  %v3188_v60 = vmul.f32 %v11220_v15, %v11356_v37  ;;  %v3091_v53 = vmul.f32 %v11191_v17, %v11249_v11 }
 0x22d   : > { %8734 = vpow2.f32 %v2269_v49  ;;  %v2731_v7 = vadd.f32 %v2699_v22, %v2633_v18  ;;  %v11362_v49 = vld [vmem:[#allocation2 + $0x151] sm:$0xff]  ;;  %vm3250_vm5 = vcmp.gt.f32.partialorder %v11321_v50, 0.0  ;;  %vm3251_vm6 = vcmp.gt.f32.partialorder %v11323_v31, 0.0 }
 0x22e   : > { %v11333_v27 = vsel %vm2182_vm3, %v11263_v62, %v7628_v36  ;;  %8736 = vpow2.f32 %v3328_v33  ;;  %v2796_v62 = vmul.f32 %v11158_v40, %v11096_v19 }
 0x22f   : > { %3547 = vmatmul.bf16.gmra.mxu3 %v3434_v23  ;;  %2374 = vst [vmem:[#allocation2 + $0x170] sm:$0xff] %v11333_v27  ;;  %8738 = vpow2.f32 %v3330_v16  ;;  %v2829_v63 = vadd.f32 %v2797_v26, %v2731_v7  ;;  %v3090_v23 = vmul.f32 %v11191_v17, %v11179_v34  ;;  %v3189_v16 = vmul.f32 %v11220_v15, %v11362_v49 }
 0x230   : > { %v2138_v61 = vpop.f32.mrf.mxu2  ;;  %v2828_v41 = vadd.f32 %v2796_v62, %v2730_v14 }
 0x231   : > { %v2216_v42 = vmin.f32 %v2138_v61, 0.0  ;;  %v2927_v39 = vadd.f32 %v2895_v2, %v2829_v63  ;;  %vm2184_vm7 = vcmp.gt.f32.partialorder %v2138_v61, 0.0 }
 0x232   : > { %v2926_v47 = vadd.f32 %v2894_v32, %v2828_v41 }
 0x233   : > { %v8735_v9 = vpop.eup %8734  ;;  %v2271_v12 = vmul.f32 1.442695, %v2216_v42  ;;  %v3025_v52 = vadd.f32 %v2993_v57, %v2927_v39 }
 0x234   : > { %v7629_v5 = vadd.f32 -1.0, %v8735_v9  ;;  %v8737_v38 = vpop.eup %8736  ;;  %v3024_v51 = vadd.f32 %v2992_v54, %v2926_v47 }
 0x235   : > { %8740 = vpow2.f32 %v2271_v12  ;;  %v8739_v36 = vpop.eup %8738  ;;  %v7662_v43 = vadd.f32 -1.0, %v8737_v38  ;;  %v3123_v25 = vadd.f32 %v3091_v53, %v3025_v52  ;;  %v2505_v53 = vmul.f32 %v11212_v29, %v11137_v21 }
 0x236   : > { %v11358_v48 = vsel %vm2183_vm4, %v2136_v59, %v7629_v5  ;;  %v7663_v59 = vadd.f32 -1.0, %v8739_v36  ;;  %v3122_v33 = vadd.f32 %v3090_v23, %v3024_v51  ;;  %v2438_v23 = vmul.f32 %v11201_v24, %v11261_v28 }
 0x237   : > { %2375 = vst [vmem:[#allocation2 + $0x188] sm:$0xff] %v11358_v48  ;;  %v3410_v18 = vsel %vm3250_vm5, %v11321_v50, %v7662_v43  ;;  %v3221_v7 = vadd.f32 %v3189_v16, %v3123_v25  ;;  %v8338_v50 = vld [vmem:[%s14136_s4 + $0x98] sm:$0xff]  ;;  %v2504_v36 = vmul.f32 %v11212_v29, %v11096_v19  ;;  %v2603_v28 = vmul.f32 %v11239_v6, %v11295_v1 }
 0x238   : > { %v2141_v44 = vpop.f32.mrf.mxu2  ;;  %v3411_v22 = vsel %vm3251_vm6, %v11323_v31, %v7663_v59  ;;  %v3220_v14 = vadd.f32 %v3188_v60, %v3122_v33  ;;  %4950 = vmatpush.bf16.msrb.mxu0 %v8338_v50  ;;  %v2439_v60 = vmul.f32 %v11201_v24, %v11269_v45  ;;  %v2602_v59 = vmul.f32 %v11239_v6, %v11285_v55 }
 0x239   : > { %v2217_v8 = vmin.f32 %v2141_v44, 0.0  ;;  %v3435_v32 = vpack.c.bf16 %v3411_v22, %v3410_v18  ;;  %v3285_v54 = vmin.f32 %v3221_v7, 0.0  ;;  %vm2185_vm8 = vcmp.gt.f32.partialorder %v2141_v44, 0.0 }
 0x23a   : > { %v3284_v41 = vmin.f32 %v3220_v14, 0.0  ;;  %vm3252_vm9 = vcmp.gt.f32.partialorder %v3220_v14, 0.0  ;;  %vm3253_vm10 = vcmp.gt.f32.partialorder %v3221_v7, 0.0  ;;  %v2537_v45 = vadd.f32 %v2505_v53, %v2439_v60 }
 0x23b   : > { %v8741_v62 = vpop.eup %8740  ;;  %v2273_v42 = vmul.f32 1.442695, %v2217_v8  ;;  %v3334_v63 = vmul.f32 1.442695, %v3285_v54  ;;  %v2536_v8 = vadd.f32 %v2504_v36, %v2438_v23  ;;  %v2700_v19 = vmul.f32 %v11254_v56, %v11340_v35 }
 0x23c   : > { %v7630_v26 = vadd.f32 -1.0, %v8741_v62  ;;  %v3332_v12 = vmul.f32 1.442695, %v3284_v41  ;;  %v2701_v16 = vmul.f32 %v11254_v56, %v11346_v30  ;;  %v2798_v1 = vmul.f32 %v11158_v40, %v11179_v34 }
 0x23d   : > { %8742 = vpow2.f32 %v2273_v42  ;;  %v2634_v62 = vadd.f32 %v2602_v59, %v2536_v8 }
 0x23e   : > { %v11375_v9 = vsel %vm2184_vm7, %v2138_v61, %v7630_v26  ;;  %8744 = vpow2.f32 %v3332_v12  ;;  %v11406_v26 = vld [vmem:[#allocation2 + $0x16f] sm:$0xff]  ;;  %v2799_v12 = vmul.f32 %v11158_v40, %v11249_v11 }
 0x23f   : > { %3552 = vmatmul.bf16.gmra.mxu3 %v3435_v32  ;;  %2376 = vst [vmem:[#allocation2 + $0x190] sm:$0xff] %v11375_v9  ;;  %8746 = vpow2.f32 %v3334_v63  ;;  %v11400_v32 = vld [vmem:[#allocation2 + $0x167] sm:$0xff]  ;;  %v2732_v42 = vadd.f32 %v2700_v19, %v2634_v62 }
 0x240   : > { %v2143_v31 = vpop.f32.mrf.mxu2  ;;  %v2994_v50 = vmul.f32 %v11277_v58, %v11400_v32 }
 0x241   : > { %v2218_v2 = vmin.f32 %v2143_v31, 0.0  ;;  %vm2186_vm11 = vcmp.gt.f32.partialorder %v2143_v31, 0.0  ;;  %v2830_v63 = vadd.f32 %v2798_v1, %v2732_v42 }
 0x243   : > { %v8743_v57 = vpop.eup %8742  ;;  %v2275_v5 = vmul.f32 1.442695, %v2218_v2  ;;  %v8337_v2 = vld [vmem:[%s14136_s4 + $0x90] sm:$0xff] }
 0x244   : > { %v7631_v47 = vadd.f32 -1.0, %v8743_v57  ;;  %v8745_v61 = vpop.eup %8744  ;;  %4951 = vmatpush.bf16.msrb.mxu0 %v8337_v2  ;;  %v2605_v2 = vmul.f32 %v11239_v6, %v11362_v49 }
 0x245   : > { %8748 = vpow2.f32 %v2275_v5  ;;  %v8747_v38 = vpop.eup %8746  ;;  %v7664_v51 = vadd.f32 -1.0, %v8745_v61  ;;  %v11422_v61 = vld [vmem:[#allocation2 + $0x169] sm:$0xff] }
 0x246   : > { %v11381_v39 = vsel %vm2185_vm8, %v2141_v44, %v7631_v47  ;;  %v7665_v43 = vadd.f32 -1.0, %v8747_v38  ;;  %v2995_v47 = vmul.f32 %v11277_v58, %v11406_v26  ;;  %v3190_v8 = vmul.f32 %v11220_v15, %v11422_v61 }
 0x247   : > { %2377 = vst [vmem:[#allocation2 + $0x1a8] sm:$0xff] %v11381_v39  ;;  %v3412_v44 = vsel %vm3252_vm9, %v3220_v14, %v7664_v51  ;;  %v2635_v14 = vadd.f32 %v2603_v28, %v2537_v45  ;;  %v3093_v45 = vmul.f32 %v11191_v17, %v11333_v27 }
 0x248   : > { %v2146_v52 = vpop.f32.mrf.mxu2  ;;  %v3413_v25 = vsel %vm3253_vm10, %v3221_v7, %v7665_v43  ;;  %v2896_v7 = vmul.f32 %v11167_v10, %v11356_v37 }
 0x249   : > { %v2219_v33 = vmin.f32 %v2146_v52, 0.0  ;;  %v3436_v22 = vpack.c.bf16 %v3413_v25, %v3412_v44  ;;  %v2733_v54 = vadd.f32 %v2701_v16, %v2635_v14  ;;  %v3092_v44 = vmul.f32 %v11191_v17, %v11291_v4 }
 0x24a   : > { %v2928_v23 = vadd.f32 %v2896_v7, %v2830_v63  ;;  %vm2187_vm12 = vcmp.gt.f32.partialorder %v2146_v52, 0.0  ;;  %v2441_v14 = vmul.f32 %v11201_v24, %v11346_v30  ;;  %v2506_v7 = vmul.f32 %v11212_v29, %v11179_v34 }
 0x24b   : > { %v8749_v18 = vpop.eup %8748  ;;  %v2277_v21 = vmul.f32 1.442695, %v2219_v33  ;;  %v2831_v5 = vadd.f32 %v2799_v12, %v2733_v54  ;;  %v11426_v33 = vld [vmem:[#allocation2 + $0x171] sm:$0xff]  ;;  %v2507_v63 = vmul.f32 %v11212_v29, %v11249_v11 }
 0x24c   : > { %v7632_v55 = vadd.f32 -1.0, %v8749_v18  ;;  %v3026_v59 = vadd.f32 %v2994_v50, %v2928_v23 }
 0x24d   : > { %8750 = vpow2.f32 %v2277_v21  ;;  %v3191_v21 = vmul.f32 %v11220_v15, %v11426_v33 }
 0x24e   : > { %v11408_v41 = vsel %vm2186_vm11, %v2143_v31, %v7632_v55  ;;  %v2897_v31 = vmul.f32 %v11167_v10, %v11362_v49  ;;  %v3124_v16 = vadd.f32 %v3092_v44, %v3026_v59  ;;  %v2440_v55 = vmul.f32 %v11201_v24, %v11340_v35 }
 0x24f   : > { %3557 = vmatmul.bf16.gmra.mxu3 %v3436_v22  ;;  %2378 = vst [vmem:[#allocation2 + $0x1b0] sm:$0xff] %v11408_v41  ;;  %v3518_v57 = vpop.f32.mrf.mxu3  ;;  %v2604_v35 = vmul.f32 %v11239_v6, %v11356_v37  ;;  %v2702_v37 = vmul.f32 %v11254_v56, %v11400_v32  ;;  %v2703_v44 = vmul.f32 %v11254_v56, %v11406_v26 }
 0x250   : > { %v2148_v38 = vpop.f32.mrf.mxu2  ;;  %v3630_v51 = vmin.f32 %v3518_v57, 0.0  ;;  %v2929_v60 = vadd.f32 %v2897_v31, %v2831_v5  ;;  %v11437_v62 = vadd.f32 %v3190_v8, %v3124_v16  ;;  %vm3598_vm13 = vcmp.gt.f32.partialorder %v3518_v57, 0.0  ;;  %v11468_v8 = vld [vmem:[#allocation2 + $0x187] sm:$0xff] }
 0x251   : > { %v2220_v36 = vmin.f32 %v2148_v38, 0.0  ;;  %vm2188_vm14 = vcmp.gt.f32.partialorder %v2148_v38, 0.0 }
 0x252   : > { %v3662_v53 = vmul.f32 1.442695, %v3630_v51  ;;  %v3027_v25 = vadd.f32 %v2995_v47, %v2929_v60  ;;  %v3286_v12 = vmin.f32 %v11437_v62, 0.0  ;;  %v2538_v47 = vadd.f32 %v2506_v7, %v2440_v55 }
 0x253   : > { %v8751_v43 = vpop.eup %8750  ;;  %v2279_v19 = vmul.f32 1.442695, %v2220_v36  ;;  %v2539_v51 = vadd.f32 %v2507_v63, %v2441_v14  ;;  %vm3254_vm0 = vcmp.gt.f32.partialorder %v11437_v62, 0.0  ;;  %v2899_v63 = vmul.f32 %v11167_v10, %v11426_v33 }
 0x254   : > { %v7633_v28 = vadd.f32 -1.0, %v8751_v43  ;;  %8752 = vpow2.f32 %v3662_v53  ;;  %v3125_v22 = vadd.f32 %v3093_v45, %v3027_v25  ;;  %v3336_v31 = vmul.f32 1.442695, %v3286_v12 }
 0x255   : > { %8754 = vpow2.f32 %v2279_v19  ;;  %v2636_v53 = vadd.f32 %v2604_v35, %v2538_v47  ;;  %v2637_v49 = vadd.f32 %v2605_v2, %v2539_v51  ;;  %v2800_v45 = vmul.f32 %v11158_v40, %v11291_v4  ;;  %v11475_v19 = vld [vmem:[#allocation2 + $0x18f] sm:$0xff] }
 0x256   : > { %v11432_v18 = vsel %vm2187_vm12, %v2146_v52, %v7633_v28  ;;  %v11445_v1 = vadd.f32 %v3191_v21, %v3125_v22  ;;  %v2898_v21 = vmul.f32 %v11167_v10, %v11422_v61  ;;  %v2997_v35 = vmul.f32 %v11277_v58, %v11475_v19 }
 0x257   : > { %2379 = vst [vmem:[#allocation2 + $0x1c8] sm:$0xff] %v11432_v18  ;;  %v11443_v42 = vpop.f32.mrf.mxu3  ;;  %v2734_v25 = vadd.f32 %v2702_v37, %v2636_v53  ;;  %v2735_v22 = vadd.f32 %v2703_v44, %v2637_v49 }
 0x258   : > { %v11447_v52 = vpop.f32.mrf.mxu2  ;;  %v3631_v54 = vmin.f32 %v11443_v42, 0.0  ;;  %v3287_v30 = vmin.f32 %v11445_v1, 0.0  ;;  %vm3599_vm15 = vcmp.gt.f32.partialorder %v11443_v42, 0.0  ;;  %vm3255_vm1 = vcmp.gt.f32.partialorder %v11445_v1, 0.0 }
 0x259   : > { %v2221_v50 = vmin.f32 %v11447_v52, 0.0  ;;  %v2832_v7 = vadd.f32 %v2800_v45, %v2734_v25  ;;  %vm2189_vm2 = vcmp.gt.f32.partialorder %v11447_v52, 0.0 }
 0x25a   : > { %v8753_v5 = vpop.eup %8752  ;;  %v3664_v34 = vmul.f32 1.442695, %v3631_v54  ;;  %v3338_v36 = vmul.f32 1.442695, %v3287_v30  ;;  %v2996_v54 = vmul.f32 %v11277_v58, %v11468_v8  ;;  %v11498_v30 = vld [vmem:[#allocation2 + $0x189] sm:$0xff] }
 0x25b   : > { %v8755_v23 = vpop.eup %8754  ;;  %v7728_v60 = vadd.f32 -1.0, %v8753_v5  ;;  %v2281_v11 = vmul.f32 1.442695, %v2221_v50  ;;  %v2930_v5 = vadd.f32 %v2898_v21, %v2832_v7  ;;  %v3192_v53 = vmul.f32 %v11220_v15, %v11498_v30 }
 0x25c   : > { %8756 = vpow2.f32 %v3664_v34  ;;  %v7634_v43 = vadd.f32 -1.0, %v8755_v23  ;;  %v3094_v34 = vmul.f32 %v11191_v17, %v11358_v48  ;;  %v3095_v23 = vmul.f32 %v11191_v17, %v11375_v9 }
 0x25d   : > { %v11464_v59 = vsel %vm3598_vm13, %v3518_v57, %v7728_v60  ;;  %8758 = vpow2.f32 %v3336_v31  ;;  %v8336_v57 = vld [vmem:[%s14136_s4 + $0x88] sm:$0xff]  ;;  %v11505_v60 = vld [vmem:[#allocation2 + $0x191] sm:$0xff] }
 0x25e   : > { %3790 = vst [vmem:[#allocation2 + $0x28] sm:$0xff] %v11464_v59  ;;  %8760 = vpow2.f32 %v3338_v36  ;;  %v11471_v28 = vsel %vm2188_vm14, %v2148_v38, %v7634_v43  ;;  %v2801_v38 = vmul.f32 %v11158_v40, %v11333_v27  ;;  %4952 = vmatpush.bf16.msrb.mxu0 %v8336_v57  ;;  %v3028_v43 = vadd.f32 %v2996_v54, %v2930_v5 }
 0x25f   : > { %2380 = vst [vmem:[#allocation2 + $0x1d0] sm:$0xff] %v11471_v28  ;;  %v11481_v16 = vpop.f32.mrf.mxu3  ;;  %8762 = vpow2.f32 %v2281_v11  ;;  %v3193_v21 = vmul.f32 %v11220_v15, %v11505_v60  ;;  %v2443_v5 = vmul.f32 %v11201_v24, %v11406_v26 }
 0x260   : > { %v11487_v55 = vpop.f32.mrf.mxu2  ;;  %v3632_v14 = vmin.f32 %v11481_v16, 0.0  ;;  %v2833_v12 = vadd.f32 %v2801_v38, %v2735_v22  ;;  %v3126_v7 = vadd.f32 %v3094_v34, %v3028_v43  ;;  %vm3600_vm3 = vcmp.gt.f32.partialorder %v11481_v16, 0.0 }
 0x261   : > { %v2222_v36 = vmin.f32 %v11487_v55, 0.0  ;;  %vm2190_vm4 = vcmp.gt.f32.partialorder %v11487_v55, 0.0 }
 0x262   : > { %v8757_v50 = vpop.eup %8756  ;;  %v3666_v2 = vmul.f32 1.442695, %v3632_v14  ;;  %v2931_v51 = vadd.f32 %v2899_v63, %v2833_v12 }
 0x263   : > { %v8759_v31 = vpop.eup %8758  ;;  %v7729_v47 = vadd.f32 -1.0, %v8757_v50  ;;  %v2283_v57 = vmul.f32 1.442695, %v2222_v36  ;;  %v11535_v50 = vadd.f32 %v3192_v53, %v3126_v7  ;;  %v2509_v36 = vmul.f32 %v11212_v29, %v11333_v27  ;;  %v11577_v7 = vld [vmem:[#allocation2 + $0x1af] sm:$0xff] }
 0x264   : > { %v8761_v11 = vpop.eup %8760  ;;  %v7666_v37 = vadd.f32 -1.0, %v8759_v31  ;;  %8764 = vpow2.f32 %v3666_v2  ;;  %v3029_v45 = vadd.f32 %v2997_v35, %v2931_v51  ;;  %v2442_v35 = vmul.f32 %v11201_v24, %v11400_v32 }
 0x265   : > { %v8763_v49 = vpop.eup %8762  ;;  %v11513_v44 = vsel %vm3599_vm15, %v11443_v42, %v7729_v47  ;;  %v7667_v25 = vadd.f32 -1.0, %v8761_v11  ;;  %8766 = vpow2.f32 %v2283_v57  ;;  %v2508_v32 = vmul.f32 %v11212_v29, %v11291_v4 }
 0x266   : > { %3791 = vst [vmem:[#allocation2 + $0x30] sm:$0xff] %v11513_v44  ;;  %v3414_v22 = vsel %vm3254_vm0, %v11437_v62, %v7666_v37  ;;  %v7635_v38 = vadd.f32 -1.0, %v8763_v49  ;;  %v3127_v54 = vadd.f32 %v3095_v23, %v3029_v45  ;;  %v2606_v47 = vmul.f32 %v11239_v6, %v11422_v61 }
 0x267   : > { %v3415_v42 = vsel %vm3255_vm1, %v11445_v1, %v7667_v25  ;;  %v11525_v14 = vpop.f32.mrf.mxu3  ;;  %v3288_v23 = vmin.f32 %v11535_v50, 0.0  ;;  %v2540_v37 = vadd.f32 %v2508_v32, %v2442_v35  ;;  %v2541_v53 = vadd.f32 %v2509_v36, %v2443_v5 }
 0x268   : > { %v3437_v12 = vpack.c.bf16 %v3415_v42, %v3414_v22  ;;  %v11528_v63 = vsel %vm2189_vm2, %v11447_v52, %v7635_v38  ;;  %v3633_v62 = vmin.f32 %v11525_v14, 0.0  ;;  %v11537_v1 = vadd.f32 %v3193_v21, %v3127_v54  ;;  %v11568_v21 = vld [vmem:[#allocation2 + $0x1a7] sm:$0xff] }
 0x269   : > { %2381 = vst [vmem:[#allocation2 + $0x1e8] sm:$0xff] %v11528_v63  ;;  %vm3601_vm5 = vcmp.gt.f32.partialorder %v11525_v14, 0.0  ;;  %v3340_v61 = vmul.f32 1.442695, %v3288_v23  ;;  %v2607_v49 = vmul.f32 %v11239_v6, %v11426_v33  ;;  %v2638_v45 = vadd.f32 %v2606_v47, %v2540_v37  ;;  %v8335_v54 = vld [vmem:[%s14136_s4 + $0x80] sm:$0xff] }
 0x26a   : > { %v11539_v2 = vpop.f32.mrf.mxu2  ;;  %v8765_v52 = vpop.eup %8764  ;;  %3562 = vmatmul.bf16.gmra.mxu3 %v3437_v12  ;;  %v3668_v34 = vmul.f32 1.442695, %v3633_v62  ;;  %v3289_v26 = vmin.f32 %v11537_v1, 0.0  ;;  %v2704_v38 = vmul.f32 %v11254_v56, %v11468_v8  ;;  %v2802_v35 = vmul.f32 %v11158_v40, %v11358_v48  ;;  %4953 = vmatpush.bf16.msrb.mxu0 %v8335_v54 }
 0x26b   : > { %v2223_v31 = vmin.f32 %v11539_v2, 0.0  ;;  %v7730_v51 = vadd.f32 -1.0, %v8765_v52  ;;  %v8767_v43 = vpop.eup %8766  ;;  %v2639_v22 = vadd.f32 %v2607_v49, %v2541_v53  ;;  %vm2191_vm6 = vcmp.gt.f32.partialorder %v11539_v2, 0.0 }
 0x26c   : > { %8768 = vpow2.f32 %v3668_v34  ;;  %v3342_v27 = vmul.f32 1.442695, %v3289_v26  ;;  %v7636_v25 = vadd.f32 -1.0, %v8767_v43  ;;  %v2736_v12 = vadd.f32 %v2704_v38, %v2638_v45  ;;  %v11595_v26 = vld [vmem:[#allocation2 + $0x1a9] sm:$0xff]  ;;  %v11608_v45 = vld [vmem:[#allocation2 + $0x1b1] sm:$0xff] }
 0x26d   : > { %v2285_v11 = vmul.f32 1.442695, %v2223_v31  ;;  %v11557_v4 = vsel %vm3600_vm3, %v11481_v16, %v7730_v51  ;;  %v2705_v16 = vmul.f32 %v11254_v56, %v11475_v19  ;;  %v2900_v34 = vmul.f32 %v11167_v10, %v11498_v30 }
 0x26e   : > { %3792 = vst [vmem:[#allocation2 + $0x48] sm:$0xff] %v11557_v4  ;;  %v11573_v33 = vsel %vm2190_vm4, %v11487_v55, %v7636_v25  ;;  %v2803_v55 = vmul.f32 %v11158_v40, %v11375_v9  ;;  %v2901_v31 = vmul.f32 %v11167_v10, %v11505_v60  ;;  %v2998_v32 = vmul.f32 %v11277_v58, %v11568_v21 }
 0x26f   : > { %8770 = vpow2.f32 %v2285_v11  ;;  %v11562_v57 = vpop.f32.mrf.mxu3  ;;  %2382 = vst [vmem:[#allocation2 + $0x1f0] sm:$0xff] %v11573_v33  ;;  %v2737_v62 = vadd.f32 %v2705_v16, %v2639_v22  ;;  %v2834_v51 = vadd.f32 %v2802_v35, %v2736_v12  ;;  %v2999_v36 = vmul.f32 %v11277_v58, %v11577_v7 }
 0x270   : > { %8772 = vpow2.f32 %v3340_v61  ;;  %v3634_v42 = vmin.f32 %v11562_v57, 0.0  ;;  %vm3256_vm7 = vcmp.gt.f32.partialorder %v11535_v50, 0.0  ;;  %vm3257_vm8 = vcmp.gt.f32.partialorder %v11537_v1, 0.0 }
 0x271   : > { %8774 = vpow2.f32 %v3342_v27  ;;  %v2835_v23 = vadd.f32 %v2803_v55, %v2737_v62  ;;  %v3096_v43 = vmul.f32 %v11191_v17, %v11381_v39  ;;  %v2932_v27 = vadd.f32 %v2900_v34, %v2834_v51 }
 0x272   : > { %v8769_v5 = vpop.eup %8768  ;;  %v3670_v52 = vmul.f32 1.442695, %v3634_v42  ;;  %v11597_v11 = vpop.f32.mrf.mxu2  ;;  %v3097_v16 = vmul.f32 %v11191_v17, %v11408_v41  ;;  %v3194_v42 = vmul.f32 %v11220_v15, %v11595_v26  ;;  %v3195_v34 = vmul.f32 %v11220_v15, %v11608_v45 }
 0x273   : > { %v7731_v47 = vadd.f32 -1.0, %v8769_v5  ;;  %v2933_v25 = vadd.f32 %v2901_v31, %v2835_v23  ;;  %v2224_v54 = vmin.f32 %v11597_v11, 0.0  ;;  %v3030_v35 = vadd.f32 %v2998_v32, %v2932_v27 }
 0x274   : > { %8776 = vpow2.f32 %v3670_v52  ;;  %v2444_v32 = vmul.f32 %v11201_v24, %v11468_v8  ;;  %vm3602_vm9 = vcmp.gt.f32.partialorder %v11562_v57, 0.0  ;;  %v2511_v8 = vmul.f32 %v11212_v29, %v11375_v9 }
 0x275   : > { %v8771_v37 = vpop.eup %8770  ;;  %v11606_v53 = vsel %vm3601_vm5, %v11525_v14, %v7731_v47  ;;  %v3031_v55 = vadd.f32 %v2999_v36, %v2933_v25  ;;  %v2287_v31 = vmul.f32 1.442695, %v2224_v54  ;;  %v3128_v47 = vadd.f32 %v3096_v43, %v3030_v35  ;;  %v11666_v35 = vld [vmem:[#allocation2 + $0x1c7] sm:$0xff] }
 0x276   : > { %v8773_v61 = vpop.eup %8772  ;;  %v7637_v49 = vadd.f32 -1.0, %v8771_v37  ;;  %3793 = vst [vmem:[#allocation2 + $0x50] sm:$0xff] %v11606_v53  ;;  %v2445_v37 = vmul.f32 %v11201_v24, %v11475_v19  ;;  %v2608_v43 = vmul.f32 %v11239_v6, %v11498_v30  ;;  %vm2192_vm10 = vcmp.gt.f32.partialorder %v11597_v11, 0.0 }
 0x277   : > { %v8775_v22 = vpop.eup %8774  ;;  %v7668_v38 = vadd.f32 -1.0, %v8773_v61  ;;  %v11621_v62 = vpop.f32.mrf.mxu3  ;;  %v3129_v51 = vadd.f32 %v3097_v16, %v3031_v55  ;;  %8778 = vpow2.f32 %v2287_v31  ;;  %v2609_v9 = vmul.f32 %v11239_v6, %v11505_v60  ;;  %v11673_v60 = vld [vmem:[#allocation2 + $0x1cf] sm:$0xff] }
 0x278   : > { %v7669_v12 = vadd.f32 -1.0, %v8775_v22  ;;  %v11619_v14 = vsel %vm2191_vm6, %v11539_v2, %v7637_v49  ;;  %v3635_v52 = vmin.f32 %v11621_v62, 0.0  ;;  %v11638_v49 = vadd.f32 %v3194_v42, %v3128_v47  ;;  %v3823_v47 = vld [vmem:[#allocation2 + $0xf] sm:$0xff] }
 0x279   : > { %14243 = vst [vmem:[#allocation38_spill] sm:$0xff] %v11619_v14  ;;  %v3416_v5 = vsel %vm3256_vm7, %v11535_v50, %v7668_v38  ;;  %v11640_v27 = vadd.f32 %v3195_v34, %v3129_v51  ;;  %v2543_v38 = vadd.f32 %v2511_v8, %v2445_v37  ;;  %vm3603_vm11 = vcmp.gt.f32.partialorder %v11621_v62, 0.0  ;;  %v11684_v51 = vld [vmem:[%s14135_s3 + $0x20] ss:$0 sm:$0xff]  ;;  %v3987_v37 = vld [vmem:[#allocation2 + $0x9] sm:$0xff] }
 0x27a   : > { %2383 = vst [vmem:[#allocation2 + $0x208] sm:$0xff] %v11619_v14  ;;  %v3417_v2 = vsel %vm3257_vm8, %v11537_v1, %v7669_v12  ;;  %v8777_v23 = vpop.eup %8776  ;;  %v3672_v50 = vmul.f32 1.442695, %v3635_v52  ;;  %v2510_v1 = vmul.f32 %v11212_v29, %v11358_v48  ;;  %v3290_v19 = vmin.f32 %v11638_v49, 0.0  ;;  %v11675_v52 = vld [vmem:[#allocation2 + $0x1c9] sm:$0xff] }
 0x27b   : > { %v3438_v36 = vpack.c.bf16 %v3417_v2, %v3416_v5  ;;  %v7732_v61 = vadd.f32 -1.0, %v8777_v23  ;;  %v3291_v25 = vmin.f32 %v11640_v27, 0.0  ;;  %v2706_v48 = vmul.f32 %v11254_v56, %v11568_v21  ;;  %v3822_v2 = vld [vmem:[#allocation2 + $0x7] sm:$0xff] }
 0x27c   : > { %8780 = vpow2.f32 %v3672_v50  ;;  %v2542_v22 = vadd.f32 %v2510_v1, %v2444_v32  ;;  %v3344_v29 = vmul.f32 1.442695, %v3290_v19  ;;  %v2707_v30 = vmul.f32 %v11254_v56, %v11577_v7  ;;  %v3988_v19 = vld [vmem:[#allocation2 + $0x11] sm:$0xff] }
 0x27d   : > { %3567 = vmatmul.bf16.gmra.mxu3 %v3438_v36  ;;  %v11649_v24 = vsel %vm3602_vm9, %v11562_v57, %v7732_v61  ;;  %v8779_v57 = vpop.eup %8778  ;;  %v3346_v16 = vmul.f32 1.442695, %v3291_v25  ;;  %v2804_v54 = vmul.f32 %v11158_v40, %v11381_v39  ;;  %v2805_v12 = vmul.f32 %v11158_v40, %v11408_v41  ;;  %v11701_v61 = vld [vmem:[%s14135_s3 + $0x22] ss:$0 sm:$0xff]  ;;  %v11711_v25 = vld [vmem:[%s14135_s3 + $0x23] ss:$0 sm:$0xff] }
 0x27e   : > { %3794 = vst [vmem:[#allocation2 + $0x68] sm:$0xff] %v11649_v24  ;;  %v2640_v42 = vadd.f32 %v2608_v43, %v2542_v22  ;;  %vm3258_vm12 = vcmp.gt.f32.partialorder %v11638_v49, 0.0  ;;  %8782 = vpow2.f32 %v3344_v29  ;;  %v7638_v55 = vadd.f32 -1.0, %v8779_v57  ;;  %v11722_v29 = vld [vmem:[#allocation2 + $0x27] sm:$0xff]  ;;  %v11826_v0 = vld [vmem:[#allocation2 + $0x51] sm:$0xff] }
 0x27f   : > { %v2641_v6 = vadd.f32 %v2609_v9, %v2543_v38  ;;  %v2902_v56 = vmul.f32 %v11167_v10, %v11595_v26  ;;  %vm3259_vm13 = vcmp.gt.f32.partialorder %v11640_v27, 0.0  ;;  %8784 = vpow2.f32 %v3346_v16  ;;  %v11724_v9 = vld [vmem:[#allocation2 + $0x2f] sm:$0xff] }
 0x280   : > { %v2738_v34 = vadd.f32 %v2706_v48, %v2640_v42  ;;  %v2903_v31 = vmul.f32 %v11167_v10, %v11608_v45  ;;  %v11689_v23 = vsel %vm2192_vm10, %v11597_v11, %v7638_v55  ;;  %v3000_v50 = vmul.f32 %v11277_v58, %v11666_v35  ;;  %v11696_v10 = vld [vmem:[%s14135_s3 + $0x21] ss:$0 sm:$0xff] }
 0x281   : > { %14244 = vst [vmem:[#allocation39_spill] sm:$0xff] %v11689_v23  ;;  %v2739_v36 = vadd.f32 %v2707_v30, %v2641_v6  ;;  %v3001_v8 = vmul.f32 %v11277_v58, %v11673_v60  ;;  %v3098_v43 = vmul.f32 %v11191_v17, %v11432_v18  ;;  %v3099_v48 = vmul.f32 %v11191_v17, %v11471_v28  ;;  %v11731_v17 = vld [vmem:[#allocation2] sm:$0xff] }
 0x282   : > { %v11669_v5 = vpop.f32.mrf.mxu3  ;;  %v8781_v39 = vpop.eup %8780  ;;  %2384 = vst [vmem:[#allocation2 + $0x210] sm:$0xff] %v11689_v23  ;;  %v2836_v11 = vadd.f32 %v2804_v54, %v2738_v34  ;;  %v3196_v58 = vmul.f32 %v11220_v15, %v11675_v52  ;;  %v3857_v57 = vmul.f32 %v11684_v51, %v3822_v2  ;;  %v11729_v54 = vld [vmem:[#allocation2 + $0x1d1] sm:$0xff]  ;;  %v3923_v15 = vmul.f32 %v11731_v17, %v11696_v10 }
 0x283   : > { %v3636_v40 = vmin.f32 %v11669_v5, 0.0  ;;  %v7733_v32 = vadd.f32 -1.0, %v8781_v39  ;;  %v2837_v38 = vadd.f32 %v2805_v12, %v2739_v36  ;;  %14245 = vst [vmem:[#allocation40_spill] sm:$0xff] %v11731_v17  ;;  %v4021_v12 = vmul.f32 %v11701_v61, %v3987_v37 }
 0x284   : > { %v2934_v30 = vadd.f32 %v2902_v56, %v2836_v11  ;;  %v8783_v16 = vpop.eup %8782  ;;  %v4022_v55 = vmul.f32 %v11701_v61, %v3988_v19  ;;  %v4120_v34 = vmul.f32 %v11711_v25, %v11724_v9  ;;  %vm3604_vm14 = vcmp.gt.f32.partialorder %v11669_v5, 0.0 }
 0x285   : > { %v3674_v1 = vmul.f32 1.442695, %v3636_v40  ;;  %v11716_v22 = vsel %vm3603_vm11, %v11621_v62, %v7733_v32  ;;  %v3858_v62 = vmul.f32 %v11684_v51, %v3823_v47  ;;  %v2935_v42 = vadd.f32 %v2903_v31, %v2837_v38  ;;  %v8785_v6 = vpop.eup %8784 }
 0x286   : > { %3795 = vst [vmem:[#allocation2 + $0x70] sm:$0xff] %v11716_v22  ;;  %v7670_v39 = vadd.f32 -1.0, %v8783_v16  ;;  %v3032_v56 = vadd.f32 %v3000_v50, %v2934_v30  ;;  %v4119_v40 = vmul.f32 %v11711_v25, %v11722_v29  ;;  %v7671_v31 = vadd.f32 -1.0, %v8785_v6  ;;  %v11750_v50 = vld [vmem:[%s14135_s3 + $0x18] ss:$0 sm:$0xff] }
 0x287   : > { %8786 = vpow2.f32 %v3674_v1  ;;  %v3033_v47 = vadd.f32 %v3001_v8, %v2935_v42  ;;  %v3955_v32 = vadd.f32 %v3923_v15, %v3857_v57  ;;  %v3956_v36 = vadd.f32 %v3923_v15, %v3858_v62  ;;  %v11757_v8 = vld [vmem:[%s14135_s3 + $0x24] ss:$0 sm:$0xff]  ;;  %v11768_v15 = vld [vmem:[%s14135_s3 + $0x25] ss:$0 sm:$0xff] }
 0x288   : > { %v3418_v37 = vsel %vm3258_vm12, %v11638_v49, %v7670_v39  ;;  %v3130_v11 = vadd.f32 %v3098_v43, %v3032_v56  ;;  %v3197_v19 = vmul.f32 %v11750_v50, %v11729_v54  ;;  %v3419_v49 = vsel %vm3259_vm13, %v11640_v27, %v7671_v31 }
 0x289   : > { %v3131_v38 = vadd.f32 %v3099_v48, %v3033_v47  ;;  %v4053_v30 = vadd.f32 %v4021_v12, %v3955_v32  ;;  %v4054_v43 = vadd.f32 %v4022_v55, %v3956_v36  ;;  %v3439_v62 = vpack.c.bf16 %v3419_v49, %v3418_v37  ;;  %v11772_v48 = vld [vmem:[#allocation2 + $0x29] sm:$0xff]  ;;  %v11777_v12 = vld [vmem:[%s14135_s3 + $0x26] ss:$0 sm:$0xff]  ;;  %v11784_v47 = vld [vmem:[#allocation2 + $0x31] sm:$0xff] }
 0x28a   : > { %v11741_v2 = vpop.f32.mrf.mxu3  ;;  %v11763_v42 = vadd.f32 %v3196_v58, %v3130_v11  ;;  %v4217_v55 = vmul.f32 %v11757_v8, %v11464_v59  ;;  %v4218_v31 = vmul.f32 %v11757_v8, %v11513_v44  ;;  %v11800_v59 = vld [vmem:[%s14135_s3 + $0x27] ss:$0 sm:$0xff]  ;;  %v4315_v11 = vmul.f32 %v11768_v15, %v11772_v48 }
 0x28b   : > { %v3637_v1 = vmin.f32 %v11741_v2, 0.0  ;;  %v11770_v39 = vadd.f32 %v3197_v19, %v3131_v38  ;;  %v4151_v56 = vadd.f32 %v4119_v40, %v4053_v30  ;;  %v4152_v27 = vadd.f32 %v4120_v34, %v4054_v43  ;;  %v11786_v40 = vld [vmem:[#allocation2 + $0x47] sm:$0xff]  ;;  %v11788_v34 = vld [vmem:[#allocation2 + $0x4f] sm:$0xff] }
 0x28c   : > { %v3292_v58 = vmin.f32 %v11763_v42, 0.0  ;;  %vm3605_vm15 = vcmp.gt.f32.partialorder %v11741_v2, 0.0  ;;  %v4316_v38 = vmul.f32 %v11768_v15, %v11784_v47  ;;  %v4413_v30 = vmul.f32 %v11777_v12, %v11786_v40 }
 0x28d   : > { %v8787_v57 = vpop.eup %8786  ;;  %v3676_v16 = vmul.f32 1.442695, %v3637_v1  ;;  %3572 = vmatmul.bf16.gmra.mxu3 %v3439_v62  ;;  %v3293_v36 = vmin.f32 %v11770_v39, 0.0  ;;  %v4249_v37 = vadd.f32 %v4217_v55, %v4151_v56  ;;  %v4250_v1 = vadd.f32 %v4218_v31, %v4152_v27 }
 0x28e   : > { %v7734_v6 = vadd.f32 -1.0, %v8787_v57  ;;  %v3348_v44 = vmul.f32 1.442695, %v3292_v58  ;;  %v4414_v43 = vmul.f32 %v11777_v12, %v11788_v34  ;;  %v11818_v57 = vld [vmem:[#allocation2 + $0x49] sm:$0xff]  ;;  %vm3260_vm0 = vcmp.gt.f32.partialorder %v11763_v42, 0.0 }
 0x28f   : > { %8788 = vpow2.f32 %v3676_v16  ;;  %v3350_v19 = vmul.f32 1.442695, %v3293_v36  ;;  %v4347_v16 = vadd.f32 %v4315_v11, %v4249_v37  ;;  %v4348_v56 = vadd.f32 %v4316_v38, %v4250_v1  ;;  %v11833_v37 = vld [vmem:[%s14135_s3 + $0x10] ss:$0 sm:$0xff] }
 0x290   : > { %v11793_v32 = vsel %vm3604_vm14, %v11669_v5, %v7734_v6  ;;  %v11808_v5 = vld [vmem:[%s14135_s3 + $0x28] ss:$0 sm:$0xff]  ;;  %8790 = vpow2.f32 %v3348_v44  ;;  %v4511_v27 = vmul.f32 %v11800_v59, %v11557_v4  ;;  %v4512_v58 = vmul.f32 %v11800_v59, %v11606_v53 }
 0x291   : > { %14246 = vst [vmem:[#allocation41_spill] sm:$0xff] %v11793_v32  ;;  %v2478_v6 = vld [vmem:[#allocation2 + $0x1a8] sm:$0xff]  ;;  %8792 = vpow2.f32 %v3350_v19  ;;  %v4445_v36 = vadd.f32 %v4413_v30, %v4347_v16  ;;  %v4609_v44 = vmul.f32 %v11808_v5, %v11818_v57  ;;  %v2446_v1 = vmul.f32 %v11833_v37, %v11568_v21  ;;  %v11842_v30 = vld [vmem:[%s14135_s3 + $0x11] ss:$0 sm:$0xff]  ;;  %v11850_v21 = vld [vmem:[%s14135_s3 + $0x12] ss:$0 sm:$0xff] }
 0x292   : > { %3796 = vst [vmem:[#allocation2 + $0x88] sm:$0xff] %v11793_v32  ;;  %v11810_v49 = vpop.f32.mrf.mxu3  ;;  %v4446_v19 = vadd.f32 %v4414_v43, %v4348_v56  ;;  %v2447_v38 = vmul.f32 %v11833_v37, %v11577_v7  ;;  %v2513_v13 = vmul.f32 %v11842_v30, %v11408_v41  ;;  %v2610_v7 = vmul.f32 %v11850_v21, %v11595_v26  ;;  %v11868_v26 = vld [vmem:[%s14135_s3 + $0x13] ss:$0 sm:$0xff] }
 0x293   : > { %v3638_v62 = vmin.f32 %v11810_v49, 0.0  ;;  %v4543_v16 = vadd.f32 %v4511_v27, %v4445_v36  ;;  %vm3261_vm1 = vcmp.gt.f32.partialorder %v11770_v39, 0.0  ;;  %v4610_v56 = vmul.f32 %v11808_v5, %v11826_v0  ;;  %v11899_v32 = vld [vmem:[#allocation2 + $0x1ef] sm:$0xff] }
 0x294   : > { %vm3606_vm2 = vcmp.gt.f32.partialorder %v11810_v49, 0.0 }
 0x295   : > { %v8789_v55 = vpop.eup %8788  ;;  %v3678_v31 = vmul.f32 1.442695, %v3638_v62  ;;  %v2512_v62 = vmul.f32 %v11842_v30, %v2478_v6  ;;  %v4544_v6 = vadd.f32 %v4512_v58, %v4446_v19  ;;  %v11863_v27 = vadd.f32 %v4609_v44, %v4543_v16 }
 0x296   : > { %v7735_v11 = vadd.f32 -1.0, %v8789_v55  ;;  %v8791_v41 = vpop.eup %8790  ;;  %v2611_v44 = vmul.f32 %v11850_v21, %v11608_v45 }
 0x297   : > { %8794 = vpow2.f32 %v3678_v31  ;;  %v2544_v55 = vadd.f32 %v2512_v62, %v2446_v1  ;;  %v2545_v31 = vadd.f32 %v2513_v13, %v2447_v38  ;;  %v8793_v36 = vpop.eup %8792  ;;  %v7672_v58 = vadd.f32 -1.0, %v8791_v41 }
 0x298   : > { %v11857_v43 = vsel %vm3605_vm15, %v11741_v2, %v7735_v11  ;;  %v2708_v2 = vmul.f32 %v11868_v26, %v11666_v35  ;;  %v11873_v11 = vadd.f32 %v4610_v56, %v4544_v6  ;;  %v7673_v13 = vadd.f32 -1.0, %v8793_v36  ;;  %v11890_v56 = vld [vmem:[%s14135_s3 + $0x14] ss:$0 sm:$0xff] }
 0x299   : > { %14247 = vst [vmem:[#allocation42_spill] sm:$0xff] %v11857_v43  ;;  %v4705_v1 = vmin.f32 %v11863_v27, 0.0  ;;  %v2642_v38 = vadd.f32 %v2610_v7, %v2544_v55  ;;  %v2709_v62 = vmul.f32 %v11868_v26, %v11673_v60  ;;  %v3420_v16 = vsel %vm3260_vm0, %v11763_v42, %v7672_v58  ;;  %v11897_v58 = vld [vmem:[#allocation2 + $0x1e7] sm:$0xff] }
 0x29a   : > { %3797 = vst [vmem:[#allocation2 + $0x90] sm:$0xff] %v11857_v43  ;;  %v11875_v19 = vpop.f32.mrf.mxu3  ;;  %v4706_v41 = vmin.f32 %v11873_v11, 0.0  ;;  %v2806_v45 = vmul.f32 %v11890_v56, %v11432_v18  ;;  %v3421_v55 = vsel %vm3261_vm1, %v11770_v39, %v7673_v13  ;;  %v2643_v46 = vadd.f32 %v2611_v44, %v2545_v31  ;;  %v11912_v31 = vld [vmem:[%s14135_s3 + $0x15] ss:$0 sm:$0xff]  ;;  %v3891_v44 = vld [vmem:[#allocation2 + $0x28] sm:$0xff] }
 0x29b   : > { %v3639_v6 = vmin.f32 %v11875_v19, 0.0  ;;  %v4737_v36 = vmul.f32 1.442695, %v4705_v1  ;;  %v2740_v42 = vadd.f32 %v2708_v2, %v2642_v38  ;;  %v3440_v20 = vpack.c.bf16 %v3421_v55, %v3420_v16  ;;  %v3892_v38 = vld [vmem:[#allocation2 + $0x30] sm:$0xff] }
 0x29c   : > { %v4739_v17 = vmul.f32 1.442695, %v4706_v41  ;;  %vm4673_vm3 = vcmp.gt.f32.partialorder %v11863_v27, 0.0  ;;  %v2741_v18 = vadd.f32 %v2709_v62, %v2643_v46  ;;  %v2807_v23 = vmul.f32 %v11890_v56, %v11471_v28  ;;  %v11918_v28 = vld [vmem:[#allocation2 + $0x1e9] sm:$0xff]  ;;  %v11943_v41 = vld [vmem:[#allocation2 + $0x1f1] sm:$0xff] }
 0x29d   : > { %v8795_v7 = vpop.eup %8794  ;;  %v3680_v43 = vmul.f32 1.442695, %v3639_v6  ;;  %8796 = vpow2.f32 %v4737_v36  ;;  %v2838_v14 = vadd.f32 %v2806_v45, %v2740_v42  ;;  %3577 = vmatmul.bf16.gmra.mxu3 %v3440_v20  ;;  %v2904_v2 = vmul.f32 %v11912_v31, %v11675_v52 }
 0x29e   : > { %v7736_v3 = vadd.f32 -1.0, %v8795_v7  ;;  %8798 = vpow2.f32 %v4739_v17  ;;  %v2905_v46 = vmul.f32 %v11912_v31, %v11729_v54  ;;  %v2839_v20 = vadd.f32 %v2807_v23, %v2741_v18  ;;  %v11935_v23 = vld [vmem:[%s14135_s3 + $0x17] ss:$0 sm:$0xff] }
 0x29f   : > { %8800 = vpow2.f32 %v3680_v43  ;;  %vm4674_vm4 = vcmp.gt.f32.partialorder %v11873_v11, 0.0  ;;  %vm3607_vm5 = vcmp.gt.f32.partialorder %v11875_v19, 0.0  ;;  %v2936_v13 = vadd.f32 %v2904_v2, %v2838_v14  ;;  %14250 = vst [vmem:[#allocation45_spill] sm:$0xff] %v11935_v23 }
 0x2a0   : > { %v11907_v39 = vsel %vm3606_vm2, %v11810_v49, %v7736_v3  ;;  %v11924_v3 = vld [vmem:[%s14135_s3 + $0x16] ss:$0 sm:$0xff]  ;;  %v3100_v43 = vmul.f32 %v11935_v23, %v11528_v63  ;;  %v2937_v62 = vadd.f32 %v2905_v46, %v2839_v20  ;;  %v3101_v16 = vmul.f32 %v11935_v23, %v11573_v33 }
 0x2a1   : > { %14248 = vst [vmem:[#allocation43_spill] sm:$0xff] %v11907_v39  ;;  %v3002_v17 = vmul.f32 %v11924_v3, %v11897_v58  ;;  %v3003_v49 = vmul.f32 %v11924_v3, %v11899_v32  ;;  %v3198_v14 = vmul.f32 %v11750_v50, %v11918_v28  ;;  %v3859_v7 = vmul.f32 %v11684_v51, %v11722_v29 }
 0x2a2   : > { %3798 = vst [vmem:[#allocation2 + $0xa8] sm:$0xff] %v11907_v39  ;;  %v11939_v1 = vpop.f32.mrf.mxu3  ;;  %v3860_v63 = vmul.f32 %v11684_v51, %v11724_v9  ;;  %v3925_v55 = vmul.f32 %v11696_v10, %v3891_v44  ;;  %v3926_v2 = vmul.f32 %v11696_v10, %v3892_v38  ;;  %v4023_v46 = vmul.f32 %v11701_v61, %v11772_v48 }
 0x2a3   : > { %14249 = vst [vmem:[#allocation44_spill] sm:$0xff] %v11924_v3  ;;  %v3640_v6 = vmin.f32 %v11939_v1, 0.0  ;;  %v3034_v45 = vadd.f32 %v3002_v17, %v2936_v13  ;;  %v8797_v36 = vpop.eup %8796  ;;  %v3035_v42 = vadd.f32 %v3003_v49, %v2937_v62  ;;  %v3199_v17 = vmul.f32 %v11750_v50, %v11943_v41 }
 0x2a4   : > { %v8799_v20 = vpop.eup %8798  ;;  %v7769_v39 = vadd.f32 -1.0, %v8797_v36  ;;  %v3957_v29 = vadd.f32 %v3925_v55, %v3859_v7  ;;  %v3958_v44 = vadd.f32 %v3926_v2, %v3860_v63  ;;  %v4024_v48 = vmul.f32 %v11701_v61, %v11784_v47  ;;  %v11989_v36 = vld [vmem:[#allocation2 + $0x6f] sm:$0xff] }
 0x2a5   : > { %v3682_v18 = vmul.f32 1.442695, %v3640_v6  ;;  %v3132_v23 = vadd.f32 %v3100_v43, %v3034_v45  ;;  %v8801_v13 = vpop.eup %8800  ;;  %v7770_v3 = vadd.f32 -1.0, %v8799_v20  ;;  %v3133_v9 = vadd.f32 %v3101_v16, %v3035_v42 }
 0x2a6   : > { %v4833_v49 = vsel %vm4673_vm3, %v11863_v27, %v7769_v39  ;;  %v7737_v38 = vadd.f32 -1.0, %v8801_v13  ;;  %v4055_v45 = vadd.f32 %v4023_v46, %v3957_v29  ;;  %v4121_v16 = vmul.f32 %v11711_v25, %v11786_v40 }
 0x2a7   : > { %8802 = vpow2.f32 %v3682_v18  ;;  %v11961_v62 = vadd.f32 %v3198_v14, %v3132_v23  ;;  %v4834_v43 = vsel %vm4674_vm4, %v11873_v11, %v7770_v3  ;;  %v11968_v6 = vadd.f32 %v3199_v17, %v3133_v9  ;;  %v11982_v14 = vld [vmem:[#allocation2 + $0x67] sm:$0xff]  ;;  %v11999_v9 = vld [vmem:[#allocation2 + $0x71] sm:$0xff] }
 0x2a8   : > { %v4865_v7 = vpack.c.bf16 %v4834_v43, %v4833_v49  ;;  %v11975_v27 = vsel %vm3607_vm5, %v11875_v19, %v7737_v38  ;;  %v4056_v23 = vadd.f32 %v4024_v48, %v3958_v44  ;;  %v4122_v11 = vmul.f32 %v11711_v25, %v11788_v34  ;;  %v11995_v17 = vld [vmem:[#allocation2 + $0x69] sm:$0xff] }
 0x2a9   : > { %v3294_v39 = vmin.f32 %v11961_v62, 0.0  ;;  %3799 = vst [vmem:[#allocation2 + $0xb0] sm:$0xff] %v11975_v27  ;;  %v3295_v47 = vmin.f32 %v11968_v6, 0.0  ;;  %v4153_v3 = vadd.f32 %v4121_v16, %v4055_v45  ;;  %vm3608_vm6 = vcmp.gt.f32.partialorder %v11939_v1, 0.0  ;;  %v2480_v48 = vld [vmem:[#allocation2 + $0x1c8] sm:$0xff]  ;;  %v2481_v43 = vld [vmem:[#allocation2 + $0x1d0] sm:$0xff] }
 0x2aa   : > { %4954 = vmatmul.bf16.vlgmr.msrb.gmra.mxu0 %v4865_v7  ;;  %v4219_v19 = vmul.f32 %v11757_v8, %v11557_v4  ;;  %v4317_v55 = vmul.f32 %v11768_v15, %v11818_v57  ;;  %v4154_v2 = vadd.f32 %v4122_v11, %v4056_v23  ;;  %v4220_v46 = vmul.f32 %v11757_v8, %v11606_v53  ;;  %v12001_v44 = vpop.f32.mrf.mxu3 }
 0x2ab   : > { %v3352_v63 = vmul.f32 1.442695, %v3294_v39  ;;  %v3354_v18 = vmul.f32 1.442695, %v3295_v47  ;;  %v4318_v20 = vmul.f32 %v11768_v15, %v11826_v0  ;;  %v4415_v4 = vmul.f32 %v11777_v12, %v11982_v14 }
 0x2ac   : > { %v4251_v13 = vadd.f32 %v4219_v19, %v4153_v3  ;;  %v4252_v49 = vadd.f32 %v4220_v46, %v4154_v2  ;;  %v4416_v53 = vmul.f32 %v11777_v12, %v11989_v36  ;;  %v4513_v38 = vmul.f32 %v11800_v59, %v11649_v24 }
 0x2ad   : > { %v8803_v42 = vpop.eup %8802  ;;  %8804 = vpow2.f32 %v3352_v63  ;;  %v4514_v7 = vmul.f32 %v11800_v59, %v11716_v22  ;;  %v4611_v39 = vmul.f32 %v11808_v5, %v11995_v17  ;;  %v4612_v24 = vmul.f32 %v11808_v5, %v11999_v9 }
 0x2ae   : > { %v7738_v29 = vadd.f32 -1.0, %v8803_v42  ;;  %8806 = vpow2.f32 %v3354_v18  ;;  %v4349_v16 = vadd.f32 %v4317_v55, %v4251_v13  ;;  %v4350_v47 = vadd.f32 %v4318_v20, %v4252_v49 }
 0x2af   : > { %v3641_v23 = vmin.f32 %v12001_v44, 0.0  ;;  %v2448_v11 = vmul.f32 %v11833_v37, %v11666_v35  ;;  %v2449_v3 = vmul.f32 %v11833_v37, %v11673_v60  ;;  %v2514_v63 = vmul.f32 %v11842_v30, %v2480_v48  ;;  %v12034_v48 = vld [vmem:[#allocation2 + $0x1e8] sm:$0xff] }
 0x2b0   : > { %v12010_v45 = vsel %vm3608_vm6, %v11939_v1, %v7738_v29  ;;  %v4447_v1 = vadd.f32 %v4415_v4, %v4349_v16  ;;  %v2515_v19 = vmul.f32 %v11842_v30, %v2481_v43  ;;  %v4448_v55 = vadd.f32 %v4416_v53, %v4350_v47 }
 0x2b1   : > { %3800 = vst [vmem:[#allocation2 + $0xc8] sm:$0xff] %v12010_v45  ;;  %v3684_v42 = vmul.f32 1.442695, %v3641_v23  ;;  %v2612_v18 = vmul.f32 %v11850_v21, %v11675_v52  ;;  %v2613_v2 = vmul.f32 %v11850_v21, %v11729_v54  ;;  %v2546_v29 = vadd.f32 %v2514_v63, %v2448_v11 }
 0x2b2   : > { %v4545_v20 = vadd.f32 %v4513_v38, %v4447_v1  ;;  %v2547_v35 = vadd.f32 %v2515_v19, %v2449_v3  ;;  %v2710_v13 = vmul.f32 %v11868_v26, %v11897_v58  ;;  %v4546_v49 = vadd.f32 %v4514_v7, %v4448_v55  ;;  %v12047_v3 = vld [vmem:[#allocation2 + $0x207] sm:$0xff] }
 0x2b3   : > { %v8805_v46 = vpop.eup %8804  ;;  %8808 = vpow2.f32 %v3684_v42  ;;  %v2711_v53 = vmul.f32 %v11868_v26, %v11899_v32  ;;  %vm3262_vm7 = vcmp.gt.f32.partialorder %v11961_v62, 0.0  ;;  %v2644_v38 = vadd.f32 %v2612_v18, %v2546_v29  ;;  %v14251_v29 = vld [vmem:[#allocation44_spill] sm:$0xff] }
 0x2b4   : > { %v8807_v60 = vpop.eup %8806  ;;  %v7674_v4 = vadd.f32 -1.0, %v8805_v46  ;;  %v12037_v54 = vadd.f32 %v4611_v39, %v4545_v20  ;;  %vm3263_vm8 = vcmp.gt.f32.partialorder %v11968_v6, 0.0  ;;  %v12041_v16 = vadd.f32 %v4612_v24, %v4546_v49  ;;  %v12049_v39 = vld [vmem:[#allocation2 + $0x20f] sm:$0xff]  ;;  %v12065_v49 = vpop.f32.mrf.mxu3 }
 0x2b5   : > { %v7675_v52 = vadd.f32 -1.0, %v8807_v60  ;;  %v2645_v47 = vadd.f32 %v2613_v2, %v2547_v35  ;;  %v2742_v11 = vadd.f32 %v2710_v13, %v2644_v38  ;;  %v2808_v1 = vmul.f32 %v11890_v56, %v12034_v48  ;;  %v12062_v60 = vld [vmem:[#allocation2 + $0x209] sm:$0xff]  ;;  %v14253_v38 = vld [vmem:[#allocation45_spill] sm:$0xff] }
 0x2b6   : > { %v3422_v43 = vsel %vm3262_vm7, %v11961_v62, %v7674_v4  ;;  %v4707_v23 = vmin.f32 %v12037_v54, 0.0  ;;  %v4708_v19 = vmin.f32 %v12041_v16, 0.0  ;;  %v2809_v62 = vmul.f32 %v11890_v56, %v11573_v33 }
 0x2b7   : > { %v3423_v7 = vsel %vm3263_vm8, %v11968_v6, %v7675_v52  ;;  %v2743_v55 = vadd.f32 %v2711_v53, %v2645_v47  ;;  %v2840_v42 = vadd.f32 %v2808_v1, %v2742_v11  ;;  %v2906_v6 = vmul.f32 %v11912_v31, %v11918_v28  ;;  %v14252_v52 = vld [vmem:[#allocation38_spill] sm:$0xff]  ;;  %v3893_v47 = vld [vmem:[#allocation2 + $0x48] sm:$0xff] }
 0x2b8   : > { %v3441_v63 = vpack.c.bf16 %v3423_v7, %v3422_v43  ;;  %v4741_v24 = vmul.f32 1.442695, %v4707_v23  ;;  %v2907_v18 = vmul.f32 %v11912_v31, %v11943_v41  ;;  %v4743_v46 = vmul.f32 1.442695, %v4708_v19  ;;  %v3894_v7 = vld [vmem:[#allocation2 + $0x50] sm:$0xff]  ;;  %v14255_v1 = vld [vmem:[#allocation39_spill] sm:$0xff] }
 0x2b9   : > { %v8809_v2 = vpop.eup %8808  ;;  %v2841_v20 = vadd.f32 %v2809_v62, %v2743_v55  ;;  %v3004_v35 = vmul.f32 %v14251_v29, %v12047_v3  ;;  %v3005_v13 = vmul.f32 %v14251_v29, %v12049_v39  ;;  %vm3609_vm9 = vcmp.gt.f32.partialorder %v12001_v44, 0.0  ;;  %v12075_v19 = vld [vmem:[#allocation2 + $0x211] sm:$0xff] }
 0x2ba   : > { %3582 = vmatmul.bf16.gmra.mxu3 %v3441_v63  ;;  %8810 = vpow2.f32 %v4741_v24  ;;  %v7739_v33 = vadd.f32 -1.0, %v8809_v2  ;;  %v2938_v4 = vadd.f32 %v2906_v6, %v2840_v42  ;;  %vm4675_vm10 = vcmp.gt.f32.partialorder %v12037_v54, 0.0 }
 0x2bb   : > { %8812 = vpow2.f32 %v4743_v46  ;;  %v2939_v53 = vadd.f32 %v2907_v18, %v2841_v20  ;;  %v3102_v43 = vmul.f32 %v14253_v38, %v14252_v52  ;;  %v3103_v63 = vmul.f32 %v14253_v38, %v14255_v1 }
 0x2bc   : > { %v12071_v23 = vsel %vm3609_vm9, %v12001_v44, %v7739_v33  ;;  %v3036_v11 = vadd.f32 %v3004_v35, %v2938_v4  ;;  %v3200_v55 = vmul.f32 %v11750_v50, %v12062_v60  ;;  %v3642_v24 = vmin.f32 %v12065_v49, 0.0 }
 0x2bd   : > { %14254 = vst [vmem:[#allocation44_spill] sm:$0xff] %v12071_v23  ;;  %v3037_v62 = vadd.f32 %v3005_v13, %v2939_v53  ;;  %v3861_v42 = vmul.f32 %v11684_v51, %v11786_v40  ;;  %v3862_v44 = vmul.f32 %v11684_v51, %v11788_v34  ;;  %v3927_v18 = vmul.f32 %v11696_v10, %v3893_v47 }
 0x2be   : > { %3801 = vst [vmem:[#allocation2 + $0xd0] sm:$0xff] %v12071_v23  ;;  %v3134_v6 = vadd.f32 %v3102_v43, %v3036_v11  ;;  %v3928_v2 = vmul.f32 %v11696_v10, %v3894_v7  ;;  %v4025_v46 = vmul.f32 %v11701_v61, %v11818_v57  ;;  %v3201_v35 = vmul.f32 %v11750_v50, %v12075_v19  ;;  %v12097_v43 = vld [vmem:[#allocation2 + $0x68] sm:$0xff] }
 0x2bf   : > { %v3135_v20 = vadd.f32 %v3103_v63, %v3037_v62  ;;  %v3686_v13 = vmul.f32 1.442695, %v3642_v24  ;;  %v4026_v33 = vmul.f32 %v11701_v61, %v11826_v0  ;;  %v3959_v34 = vadd.f32 %v3927_v18, %v3861_v42  ;;  %v8374_v0 = vld [vmem:[%s14137_s5 + $0xf8] sm:$0xff]  ;;  %v12114_v18 = vld [vmem:[#allocation2 + $0x87] sm:$0xff] }
 0x2c0   : > { %v8811_v40 = vpop.eup %8810  ;;  %v12093_v4 = vadd.f32 %v3200_v55, %v3134_v6  ;;  %v3960_v53 = vadd.f32 %v3928_v2, %v3862_v44  ;;  %v4123_v52 = vmul.f32 %v11711_v25, %v11982_v14  ;;  %v4124_v11 = vmul.f32 %v11711_v25, %v11989_v36  ;;  %5820 = vmatpush.bf16.msrb.mxu1 %v8374_v0 }
 0x2c1   : > { %v8813_v47 = vpop.eup %8812  ;;  %v7771_v57 = vadd.f32 -1.0, %v8811_v40  ;;  %v12099_v7 = vadd.f32 %v3201_v35, %v3135_v20  ;;  %8814 = vpow2.f32 %v3686_v13  ;;  %vm4676_vm11 = vcmp.gt.f32.partialorder %v12041_v16, 0.0  ;;  %v12119_v13 = vld [vmem:[#allocation2 + $0x8f] sm:$0xff] }
 0x2c2   : > { %v7772_v63 = vadd.f32 -1.0, %v8813_v47  ;;  %v3296_v55 = vmin.f32 %v12093_v4, 0.0  ;;  %v4057_v62 = vadd.f32 %v4025_v46, %v3959_v34  ;;  %v4058_v44 = vadd.f32 %v4026_v33, %v3960_v53  ;;  %v12126_v47 = vld [vmem:[#allocation2 + $0x89] sm:$0xff] }
 0x2c3   : > { %v4835_v24 = vsel %vm4675_vm10, %v12037_v54, %v7771_v57  ;;  %v3297_v42 = vmin.f32 %v12099_v7, 0.0  ;;  %v4221_v6 = vmul.f32 %v11757_v8, %v12097_v43  ;;  %v4222_v46 = vmul.f32 %v11757_v8, %v11716_v22  ;;  %v12130_v22 = vpop.f32.mrf.mxu3 }
 0x2c4   : > { %v4836_v2 = vsel %vm4676_vm11, %v12041_v16, %v7772_v63  ;;  %v3356_v20 = vmul.f32 1.442695, %v3296_v55  ;;  %v4155_v35 = vadd.f32 %v4123_v52, %v4057_v62  ;;  %v4156_v34 = vadd.f32 %v4124_v11, %v4058_v44  ;;  %v12128_v52 = vld [vmem:[#allocation2 + $0x91] sm:$0xff]  ;;  %v14257_v44 = vld [vmem:[#allocation42_spill] sm:$0xff] }
 0x2c5   : > { %v4866_v40 = vpack.c.bf16 %v4836_v2, %v4835_v24  ;;  %v3358_v54 = vmul.f32 1.442695, %v3297_v42  ;;  %v4319_v33 = vmul.f32 %v11768_v15, %v11995_v17  ;;  %vm3610_vm12 = vcmp.gt.f32.partialorder %v12065_v49, 0.0  ;;  %v14256_v24 = vld [vmem:[#allocation41_spill] sm:$0xff]  ;;  %v2483_v2 = vld [vmem:[#allocation2 + $0x1f0] sm:$0xff] }
 0x2c6   : > { %8816 = vpow2.f32 %v3356_v20  ;;  %v4253_v53 = vadd.f32 %v4221_v6, %v4155_v35  ;;  %v4417_v16 = vmul.f32 %v11777_v12, %v12114_v18  ;;  %v4254_v11 = vadd.f32 %v4222_v46, %v4156_v34 }
 0x2c7   : > { %v8815_v57 = vpop.eup %8814  ;;  %4959 = vmatmul.bf16.gmra.mxu0 %v4866_v40  ;;  %8818 = vpow2.f32 %v3358_v54  ;;  %v4320_v0 = vmul.f32 %v11768_v15, %v11999_v9  ;;  %v4418_v63 = vmul.f32 %v11777_v12, %v12119_v13  ;;  %v4515_v42 = vmul.f32 %v11800_v59, %v14256_v24 }
 0x2c8   : > { %v7740_v55 = vadd.f32 -1.0, %v8815_v57  ;;  %v4351_v62 = vadd.f32 %v4319_v33, %v4253_v53  ;;  %v4516_v6 = vmul.f32 %v11800_v59, %v14257_v44  ;;  %v4613_v35 = vmul.f32 %v11808_v5, %v12126_v47 }
 0x2c9   : > { %v4352_v20 = vadd.f32 %v4320_v0, %v4254_v11  ;;  %v4614_v46 = vmul.f32 %v11808_v5, %v12128_v52  ;;  %v3643_v40 = vmin.f32 %v12130_v22, 0.0  ;;  %v2450_v33 = vmul.f32 %v11833_v37, %v11897_v58 }
 0x2ca   : > { %v12148_v54 = vsel %vm3610_vm12, %v12065_v49, %v7740_v55  ;;  %v4449_v34 = vadd.f32 %v4417_v16, %v4351_v62  ;;  %v2451_v53 = vmul.f32 %v11833_v37, %v11899_v32  ;;  %v2516_v0 = vmul.f32 %v11842_v30, %v12034_v48 }
 0x2cb   : > { %3802 = vst [vmem:[#allocation2 + $0xe8] sm:$0xff] %v12148_v54  ;;  %v4450_v57 = vadd.f32 %v4418_v63, %v4352_v20  ;;  %v3688_v11 = vmul.f32 1.442695, %v3643_v40  ;;  %v2517_v24 = vmul.f32 %v11842_v30, %v2483_v2  ;;  %v2614_v49 = vmul.f32 %v11850_v21, %v11918_v28  ;;  %v2776_v2 = vld [vmem:[#allocation2 + $0x208] sm:$0xff] }
 0x2cc   : > { %v8817_v44 = vpop.eup %8816  ;;  %v4547_v23 = vadd.f32 %v4515_v42, %v4449_v34  ;;  %v2615_v58 = vmul.f32 %v11850_v21, %v11943_v41  ;;  %v2712_v32 = vmul.f32 %v11868_v26, %v12047_v3  ;;  %v2548_v55 = vadd.f32 %v2516_v0, %v2450_v33  ;;  %v2972_v20 = vld [vmem:[#allocation2 + $0x227] sm:$0xff]  ;;  %v2973_v34 = vld [vmem:[#allocation2 + $0x22f] sm:$0xff]  ;;  %v12177_v33 = vpop.f32.mrf.mxu3 }
 0x2cd   : > { %v8819_v37 = vpop.eup %8818  ;;  %v7676_v16 = vadd.f32 -1.0, %v8817_v44  ;;  %v4548_v63 = vadd.f32 %v4516_v6, %v4450_v57  ;;  %8820 = vpow2.f32 %v3688_v11  ;;  %v2549_v30 = vadd.f32 %v2517_v24, %v2451_v53 }
 0x2ce   : > { %v7677_v62 = vadd.f32 -1.0, %v8819_v37  ;;  %v12164_v48 = vadd.f32 %v4613_v35, %v4547_v23  ;;  %v2713_v42 = vmul.f32 %v11868_v26, %v12049_v39  ;;  %vm3264_vm13 = vcmp.gt.f32.partialorder %v12093_v4, 0.0 }
 0x2cf   : > { %vm3265_vm14 = vcmp.gt.f32.partialorder %v12099_v7, 0.0  ;;  %v12170_v21 = vadd.f32 %v4614_v46, %v4548_v63  ;;  %v2646_v28 = vadd.f32 %v2614_v49, %v2548_v55  ;;  %v3424_v41 = vsel %vm3264_vm13, %v12093_v4, %v7676_v16  ;;  %v3168_v49 = vld [vmem:[#allocation2 + $0x229] sm:$0xff] }
 0x2d0   : > { %v3425_v3 = vsel %vm3265_vm14, %v12099_v7, %v7677_v62  ;;  %v4709_v6 = vmin.f32 %v12164_v48, 0.0  ;;  %v2647_v23 = vadd.f32 %v2615_v58, %v2549_v30  ;;  %v2810_v39 = vmul.f32 %v11890_v56, %v2776_v2  ;;  %v3169_v58 = vld [vmem:[#allocation2 + $0x231] sm:$0xff] }
 0x2d1   : > { %v3442_v35 = vpack.c.bf16 %v3425_v3, %v3424_v41  ;;  %v4710_v40 = vmin.f32 %v12170_v21, 0.0  ;;  %v2744_v26 = vadd.f32 %v2712_v32, %v2646_v28  ;;  %v2811_v4 = vmul.f32 %v11890_v56, %v14255_v1  ;;  %v3896_v63 = vld [vmem:[#allocation2 + $0x70] sm:$0xff] }
 0x2d2   : > { %v4745_v46 = vmul.f32 1.442695, %v4709_v6  ;;  %v2745_v53 = vadd.f32 %v2713_v42, %v2647_v23  ;;  %v2908_v7 = vmul.f32 %v11912_v31, %v12062_v60  ;;  %v2909_v24 = vmul.f32 %v11912_v31, %v12075_v19  ;;  %v14258_v60 = vld [vmem:[#allocation40_spill] sm:$0xff] }
 0x2d3   : > { %v8821_v57 = vpop.eup %8820  ;;  %3587 = vmatmul.bf16.gmra.mxu3 %v3442_v35  ;;  %v4747_v11 = vmul.f32 1.442695, %v4710_v40  ;;  %v2842_v0 = vadd.f32 %v2810_v39, %v2744_v26  ;;  %v3006_v44 = vmul.f32 %v14251_v29, %v2972_v20  ;;  %v3007_v16 = vmul.f32 %v14251_v29, %v2973_v34  ;;  %v4190_v34 = vld [vmem:[#allocation2 + $0x90] sm:$0xff] }
 0x2d4   : > { %8822 = vpow2.f32 %v4745_v46  ;;  %v7741_v32 = vadd.f32 -1.0, %v8821_v57  ;;  %v2843_v37 = vadd.f32 %v2811_v4, %v2745_v53  ;;  %vm3611_vm15 = vcmp.gt.f32.partialorder %v12130_v22, 0.0 }
 0x2d5   : > { %8824 = vpow2.f32 %v4747_v11  ;;  %v2940_v56 = vadd.f32 %v2908_v7, %v2842_v0  ;;  %v3104_v1 = vmul.f32 %v14253_v38, %v14258_v60  ;;  %v3202_v19 = vmul.f32 %v11750_v50, %v3168_v49  ;;  %v12228_v0 = vld [vmem:[#allocation2 + $0xa7] sm:$0xff] }
 0x2d6   : > { %v12191_v55 = vsel %vm3611_vm15, %v12130_v22, %v7741_v32  ;;  %v2941_v31 = vadd.f32 %v2909_v24, %v2843_v37  ;;  %v3203_v62 = vmul.f32 %v11750_v50, %v3169_v58  ;;  %v3644_v29 = vmin.f32 %v12177_v33, 0.0  ;;  %v12233_v32 = vld [vmem:[#allocation2 + $0xaf] sm:$0xff] }
 0x2d7   : > { %3803 = vst [vmem:[#allocation2 + $0xf0] sm:$0xff] %v12191_v55  ;;  %v3038_v30 = vadd.f32 %v3006_v44, %v2940_v56  ;;  %v3863_v42 = vmul.f32 %v11684_v51, %v11982_v14  ;;  %v3864_v38 = vmul.f32 %v11684_v51, %v11989_v36  ;;  %v3929_v22 = vmul.f32 %v11696_v10, %v12097_v43  ;;  %v4189_v43 = vld [vmem:[#allocation2 + $0x88] sm:$0xff] }
 0x2d8   : > { %v3039_v2 = vadd.f32 %v3007_v16, %v2941_v31  ;;  %v3930_v28 = vmul.f32 %v11696_v10, %v3896_v63  ;;  %v4027_v50 = vmul.f32 %v11701_v61, %v11995_v17  ;;  %vm4677_vm0 = vcmp.gt.f32.partialorder %v12164_v48, 0.0  ;;  %v12240_v63 = vld [vmem:[#allocation2 + $0xa9] sm:$0xff] }
 0x2d9   : > { %v3136_v41 = vadd.f32 %v3104_v1, %v3038_v30  ;;  %v3690_v3 = vmul.f32 1.442695, %v3644_v29  ;;  %v4028_v6 = vmul.f32 %v11701_v61, %v11999_v9  ;;  %v3961_v20 = vadd.f32 %v3929_v22, %v3863_v42  ;;  %v8373_v61 = vld [vmem:[%s14137_s5 + $0xf0] sm:$0xff]  ;;  %v12218_v9 = vpop.f32.mrf.mxu3  ;;  %v14259_v22 = vld [vmem:[#allocation43_spill] sm:$0xff] }
 0x2da   : > { %v8823_v14 = vpop.eup %8822  ;;  %v3137_v23 = vadd.f32 %v3104_v1, %v3039_v2  ;;  %v3962_v36 = vadd.f32 %v3930_v28, %v3864_v38  ;;  %v4125_v35 = vmul.f32 %v11711_v25, %v12114_v18  ;;  %v4126_v17 = vmul.f32 %v11711_v25, %v12119_v13  ;;  %5821 = vmatpush.bf16.msrb.mxu1 %v8373_v61  ;;  %v12246_v29 = vld [vmem:[#allocation2 + $0xb1] sm:$0xff] }
 0x2db   : > { %v8825_v40 = vpop.eup %8824  ;;  %v7773_v26 = vadd.f32 -1.0, %v8823_v14  ;;  %v12211_v39 = vadd.f32 %v3202_v19, %v3136_v41  ;;  %8826 = vpow2.f32 %v3690_v3  ;;  %vm4678_vm1 = vcmp.gt.f32.partialorder %v12170_v21, 0.0 }
 0x2dc   : > { %v7774_v46 = vadd.f32 -1.0, %v8825_v40  ;;  %v12221_v53 = vadd.f32 %v3203_v62, %v3137_v23  ;;  %v4059_v4 = vadd.f32 %v4027_v50, %v3961_v20  ;;  %v4060_v25 = vadd.f32 %v4028_v6, %v3962_v36 }
 0x2dd   : > { %v4837_v7 = vsel %vm4677_vm0, %v12164_v48, %v7773_v26  ;;  %v3298_v57 = vmin.f32 %v12211_v39, 0.0  ;;  %v4223_v11 = vmul.f32 %v11757_v8, %v4189_v43  ;;  %v4224_v58 = vmul.f32 %v11757_v8, %v4190_v34 }
 0x2de   : > { %v4838_v24 = vsel %vm4678_vm1, %v12170_v21, %v7774_v46  ;;  %v3299_v44 = vmin.f32 %v12221_v53, 0.0  ;;  %v4157_v49 = vadd.f32 %v4125_v35, %v4059_v4  ;;  %v4158_v48 = vadd.f32 %v4126_v17, %v4060_v25  ;;  %v12276_v25 = vld [vmem:[%s14135_s3 + $0x22] ss:$0 sm:$0xff] }
 0x2df   : > { %v4867_v37 = vpack.c.bf16 %v4838_v24, %v4837_v7  ;;  %v3360_v16 = vmul.f32 1.442695, %v3298_v57  ;;  %v4321_v56 = vmul.f32 %v11768_v15, %v12126_v47  ;;  %vm3612_vm2 = vcmp.gt.f32.partialorder %v12177_v33, 0.0 }
 0x2e0   : > { %v3362_v60 = vmul.f32 1.442695, %v3299_v44  ;;  %v4255_v1 = vadd.f32 %v4223_v11, %v4157_v49  ;;  %v4419_v21 = vmul.f32 %v11777_v12, %v12228_v0  ;;  %v4256_v19 = vadd.f32 %v4224_v58, %v4158_v48 }
 0x2e1   : > { %v8827_v31 = vpop.eup %8826  ;;  %4964 = vmatmul.bf16.gmra.mxu0 %v4867_v37  ;;  %8828 = vpow2.f32 %v3360_v16  ;;  %v4322_v62 = vmul.f32 %v11768_v15, %v12128_v52  ;;  %v4420_v30 = vmul.f32 %v11777_v12, %v12233_v32  ;;  %vm3266_vm3 = vcmp.gt.f32.partialorder %v12211_v39, 0.0  ;;  %v12255_v3 = vpop.f32.mrf.mxu3 }
 0x2e2   : > { %8830 = vpow2.f32 %v3362_v60  ;;  %v7742_v42 = vadd.f32 -1.0, %v8827_v31  ;;  %v4353_v38 = vadd.f32 %v4321_v56, %v4255_v1  ;;  %v4517_v28 = vmul.f32 %v11800_v59, %v14259_v22  ;;  %v8372_v56 = vld [vmem:[%s14137_s5 + $0xe8] sm:$0xff] }
 0x2e3   : > { %v4354_v2 = vadd.f32 %v4322_v62, %v4256_v19  ;;  %v4518_v50 = vmul.f32 %v11800_v59, %v11975_v27  ;;  %v4615_v41 = vmul.f32 %v11808_v5, %v12240_v63  ;;  %v4616_v23 = vmul.f32 %v11808_v5, %v12246_v29  ;;  %v12308_v19 = vld [vmem:[#allocation2 + $0xc7] sm:$0xff]  ;;  %5822 = vmatpush.bf16.msrb.mxu1 %v8372_v56 }
 0x2e4   : > { %v12260_v6 = vsel %vm3612_vm2, %v12177_v33, %v7742_v42  ;;  %v4451_v14 = vadd.f32 %v4419_v21, %v4353_v38  ;;  %v3645_v20 = vmin.f32 %v12218_v9, 0.0  ;;  %v3646_v35 = vmin.f32 %v12255_v3, 0.0  ;;  %v12314_v38 = vld [vmem:[#allocation2 + $0xcf] sm:$0xff] }
 0x2e5   : > { %3804 = vst [vmem:[#allocation2 + $0x108] sm:$0xff] %v12260_v6  ;;  %v4452_v36 = vadd.f32 %v4420_v30, %v4354_v2  ;;  %v3865_v40 = vmul.f32 %v11684_v51, %v12114_v18  ;;  %v3866_v26 = vmul.f32 %v11684_v51, %v12119_v13  ;;  %v3931_v61 = vmul.f32 %v11696_v10, %v4189_v43 }
 0x2e6   : > { %v4549_v17 = vadd.f32 %v4517_v28, %v4451_v14  ;;  %v3692_v33 = vmul.f32 1.442695, %v3645_v20  ;;  %v3932_v46 = vmul.f32 %v11696_v10, %v4190_v34  ;;  %v3694_v57 = vmul.f32 1.442695, %v3646_v35 }
 0x2e7   : > { %v8829_v4 = vpop.eup %8828  ;;  %v4550_v7 = vadd.f32 %v4518_v50, %v4452_v36  ;;  %v4029_v18 = vmul.f32 %v12276_v25, %v12126_v47  ;;  %v4030_v51 = vmul.f32 %v12276_v25, %v12128_v52  ;;  %v3963_v10 = vadd.f32 %v3931_v61, %v3865_v40  ;;  %v4191_v52 = vld [vmem:[#allocation2 + $0xa8] sm:$0xff]  ;;  %v12337_v61 = vld [vmem:[#allocation2 + $0xd1] sm:$0xff] }
 0x2e8   : > { %v8831_v13 = vpop.eup %8830  ;;  %v7678_v11 = vadd.f32 -1.0, %v8829_v4  ;;  %v12282_v24 = vadd.f32 %v4615_v41, %v4549_v17  ;;  %8832 = vpow2.f32 %v3692_v33  ;;  %v3964_v44 = vadd.f32 %v3932_v46, %v3866_v26  ;;  %v14260_v17 = vld [vmem:[#allocation44_spill] sm:$0xff] }
 0x2e9   : > { %v7679_v43 = vadd.f32 -1.0, %v8831_v13  ;;  %v12284_v34 = vadd.f32 %v4616_v23, %v4550_v7  ;;  %8834 = vpow2.f32 %v3694_v57  ;;  %vm3267_vm4 = vcmp.gt.f32.partialorder %v12221_v53, 0.0  ;;  %v12297_v60 = vpop.f32.mrf.mxu3  ;;  %v3900_v7 = vld [vmem:[#allocation2 + $0xb0] sm:$0xff]  ;;  %v12363_v13 = vld [vmem:[%s14135_s3 + $0x21] ss:$0 sm:$0xff] }
 0x2ea   : > { %v3426_v47 = vsel %vm3266_vm3, %v12211_v39, %v7678_v11  ;;  %v4711_v49 = vmin.f32 %v12282_v24, 0.0  ;;  %vm3613_vm5 = vcmp.gt.f32.partialorder %v12218_v9, 0.0  ;;  %v4061_v16 = vadd.f32 %v4029_v18, %v3963_v10  ;;  %v12302_v39 = vld [vmem:[%s14135_s3 + $0x23] ss:$0 sm:$0xff]  ;;  %v12354_v18 = vld [vmem:[%s14135_s3 + $0x20] ss:$0 sm:$0xff] }
 0x2eb   : > { %v3427_v58 = vsel %vm3267_vm4, %v12221_v53, %v7679_v43  ;;  %v4712_v37 = vmin.f32 %v12284_v34, 0.0  ;;  %v4062_v48 = vadd.f32 %v4030_v51, %v3964_v44  ;;  %v4127_v53 = vmul.f32 %v12302_v39, %v12228_v0 }
 0x2ec   : > { %v3443_v1 = vpack.c.bf16 %v3427_v58, %v3426_v47  ;;  %v4749_v21 = vmul.f32 1.442695, %v4711_v49  ;;  %v4128_v31 = vmul.f32 %v12302_v39, %v12233_v32  ;;  %vm3614_vm6 = vcmp.gt.f32.partialorder %v12255_v3, 0.0 }
 0x2ed   : > { %v4751_v62 = vmul.f32 1.442695, %v4712_v37  ;;  %v4225_v30 = vmul.f32 %v11757_v8, %v4191_v52  ;;  %v4226_v42 = vmul.f32 %v11757_v8, %v11975_v27  ;;  %vm4679_vm7 = vcmp.gt.f32.partialorder %v12282_v24, 0.0  ;;  %v12323_v27 = vld [vmem:[#allocation2 + $0xc9] sm:$0xff] }
 0x2ee   : > { %v8833_v2 = vpop.eup %8832  ;;  %3592 = vmatmul.bf16.gmra.mxu3 %v3443_v1  ;;  %8836 = vpow2.f32 %v4749_v21  ;;  %v4159_v22 = vadd.f32 %v4127_v53, %v4061_v16  ;;  %v4160_v28 = vadd.f32 %v4128_v31, %v4062_v48  ;;  %v4323_v50 = vmul.f32 %v11768_v15, %v12240_v63 }
 0x2ef   : > { %v8835_v41 = vpop.eup %8834  ;;  %8838 = vpow2.f32 %v4751_v62  ;;  %v7743_v14 = vadd.f32 -1.0, %v8833_v2  ;;  %v4324_v23 = vmul.f32 %v11768_v15, %v12246_v29  ;;  %v4421_v8 = vmul.f32 %v11777_v12, %v12308_v19 }
 0x2f0   : > { %v7744_v20 = vadd.f32 -1.0, %v8835_v41  ;;  %v4257_v36 = vadd.f32 %v4225_v30, %v4159_v22  ;;  %v4258_v35 = vadd.f32 %v4226_v42, %v4160_v28  ;;  %v4422_v40 = vmul.f32 %v11777_v12, %v12314_v38 }
 0x2f1   : > { %vm4680_vm8 = vcmp.gt.f32.partialorder %v12284_v34, 0.0  ;;  %v12331_v26 = vsel %vm3613_vm5, %v12218_v9, %v7743_v14  ;;  %v4519_v15 = vmul.f32 %v11800_v59, %v12010_v45  ;;  %v4520_v33 = vmul.f32 %v11800_v59, %v14260_v17  ;;  %v12349_v59 = vpop.f32.mrf.mxu3 }
 0x2f2   : > { %3805 = vst [vmem:[#allocation2 + $0x110] sm:$0xff] %v12331_v26  ;;  %v12343_v12 = vsel %vm3614_vm6, %v12255_v3, %v7744_v20  ;;  %v4355_v46 = vadd.f32 %v4323_v50, %v4257_v36  ;;  %v4356_v4 = vadd.f32 %v4324_v23, %v4258_v35  ;;  %v4617_v9 = vmul.f32 %v11808_v5, %v12323_v27  ;;  %v12388_v50 = vld [vmem:[#allocation2 + $0xe7] sm:$0xff] }
 0x2f3   : > { %3806 = vst [vmem:[#allocation2 + $0x128] sm:$0xff] %v12343_v12  ;;  %v3647_v57 = vmin.f32 %v12297_v60, 0.0  ;;  %v3867_v3 = vmul.f32 %v12354_v18, %v12228_v0  ;;  %v3868_v51 = vmul.f32 %v12354_v18, %v12233_v32  ;;  %v3933_v11 = vmul.f32 %v12363_v13, %v4191_v52  ;;  %v8371_v20 = vld [vmem:[%s14137_s5 + $0xe0] sm:$0xff] }
 0x2f4   : > { %v8837_v10 = vpop.eup %8836  ;;  %v4453_v43 = vadd.f32 %v4421_v8, %v4355_v46  ;;  %v4454_v44 = vadd.f32 %v4422_v40, %v4356_v4  ;;  %v4618_v47 = vmul.f32 %v11808_v5, %v12337_v61  ;;  %v3648_v49 = vmin.f32 %v12349_v59, 0.0  ;;  %v12399_v8 = vld [vmem:[#allocation2 + $0xef] sm:$0xff]  ;;  %5823 = vmatpush.bf16.msrb.mxu1 %v8371_v20 }
 0x2f5   : > { %v8839_v58 = vpop.eup %8838  ;;  %v7775_v0 = vadd.f32 -1.0, %v8837_v10  ;;  %v3696_v37 = vmul.f32 1.442695, %v3647_v57  ;;  %v3934_v32 = vmul.f32 %v12363_v13, %v3900_v7  ;;  %v3965_v16 = vadd.f32 %v3933_v11, %v3867_v3  ;;  %v12419_v7 = vld [vmem:[%s14135_s3 + $0x26] ss:$0 sm:$0xff] }
 0x2f6   : > { %v7776_v48 = vadd.f32 -1.0, %v8839_v58  ;;  %v4551_v56 = vadd.f32 %v4519_v15, %v4453_v43  ;;  %v4552_v1 = vadd.f32 %v4520_v33, %v4454_v44  ;;  %v3698_v21 = vmul.f32 1.442695, %v3648_v49  ;;  %v12410_v15 = vld [vmem:[%s14135_s3 + $0x25] ss:$0 sm:$0xff]  ;;  %v12427_v43 = vld [vmem:[#allocation2 + $0xe9] sm:$0xff] }
 0x2f7   : > { %v4839_v52 = vsel %vm4679_vm7, %v12282_v24, %v7775_v0  ;;  %8840 = vpow2.f32 %v3696_v37  ;;  %v3966_v53 = vadd.f32 %v3934_v32, %v3868_v51  ;;  %v4031_v5 = vmul.f32 %v12276_v25, %v12240_v63  ;;  %v12439_v0 = vld [vmem:[%s14135_s3 + $0x27] ss:$0 sm:$0xff]  ;;  %v3901_v32 = vld [vmem:[#allocation2 + $0xc8] sm:$0xff] }
 0x2f8   : > { %v4840_v31 = vsel %vm4680_vm8, %v12284_v34, %v7776_v48  ;;  %v12378_v62 = vadd.f32 %v4617_v9, %v4551_v56  ;;  %v12380_v30 = vadd.f32 %v4618_v47, %v4552_v1  ;;  %8842 = vpow2.f32 %v3698_v21  ;;  %v12452_v1 = vld [vmem:[%s14135_s3 + $0x28] ss:$0 sm:$0xff] }
 0x2f9   : > { %v4868_v42 = vpack.c.bf16 %v4840_v31, %v4839_v52  ;;  %v4032_v2 = vmul.f32 %v12276_v25, %v12246_v29  ;;  %v4063_v22 = vadd.f32 %v4031_v5, %v3965_v16  ;;  %v4129_v24 = vmul.f32 %v12302_v39, %v12308_v19  ;;  %v12395_v29 = vld [vmem:[%s14135_s3 + $0x24] ss:$0 sm:$0xff]  ;;  %v12404_v36 = vpop.f32.mrf.mxu3 }
 0x2fa   : > { %v4713_v28 = vmin.f32 %v12378_v62, 0.0  ;;  %v4714_v63 = vmin.f32 %v12380_v30, 0.0  ;;  %v4130_v41 = vmul.f32 %v12302_v39, %v12314_v38  ;;  %v4227_v23 = vmul.f32 %v12395_v29, %v12010_v45 }
 0x2fb   : > { %4969 = vmatmul.bf16.gmra.mxu0 %v4868_v42  ;;  %v4064_v34 = vadd.f32 %v4032_v2, %v3966_v53  ;;  %v4161_v14 = vadd.f32 %v4129_v24, %v4063_v22  ;;  %vm3615_vm9 = vcmp.gt.f32.partialorder %v12297_v60, 0.0  ;;  %v4325_v45 = vmul.f32 %v12410_v15, %v12323_v27 }
 0x2fc   : > { %v4753_v35 = vmul.f32 1.442695, %v4713_v28  ;;  %v4755_v40 = vmul.f32 1.442695, %v4714_v63  ;;  %v4228_v4 = vmul.f32 %v12395_v29, %v14260_v17  ;;  %v4423_v57 = vmul.f32 %v12419_v7, %v12388_v50 }
 0x2fd   : > { %v8841_v33 = vpop.eup %8840  ;;  %v4162_v46 = vadd.f32 %v4130_v41, %v4064_v34  ;;  %v4259_v9 = vadd.f32 %v4227_v23, %v4161_v14  ;;  %v4326_v11 = vmul.f32 %v12410_v15, %v12337_v61  ;;  %v4424_v10 = vmul.f32 %v12419_v7, %v12399_v8 }
 0x2fe   : > { %v8843_v3 = vpop.eup %8842  ;;  %8844 = vpow2.f32 %v4753_v35  ;;  %v7745_v51 = vadd.f32 -1.0, %v8841_v33  ;;  %vm4681_vm10 = vcmp.gt.f32.partialorder %v12378_v62, 0.0  ;;  %vm3616_vm11 = vcmp.gt.f32.partialorder %v12349_v59, 0.0 }
 0x2ff   : > { %8846 = vpow2.f32 %v4755_v40  ;;  %v7746_v44 = vadd.f32 -1.0, %v8843_v3  ;;  %v4260_v47 = vadd.f32 %v4228_v4, %v4162_v46  ;;  %v4357_v49 = vadd.f32 %v4325_v45, %v4259_v9 }
 0x300   : > { %v12433_v58 = vsel %vm3615_vm9, %v12297_v60, %v7745_v51  ;;  %v4521_v37 = vmul.f32 %v12439_v0, %v12148_v54  ;;  %v12447_v60 = vld [vmem:[#allocation2 + $0xf1] sm:$0xff]  ;;  %v4619_v21 = vmul.f32 %v12452_v1, %v12427_v43  ;;  %vm4682_vm12 = vcmp.gt.f32.partialorder %v12380_v30, 0.0 }
 0x301   : > { %3807 = vst [vmem:[#allocation2 + $0x130] sm:$0xff] %v12433_v58  ;;  %v12445_v16 = vsel %vm3616_vm11, %v12349_v59, %v7746_v44  ;;  %v4358_v48 = vadd.f32 %v4326_v11, %v4260_v47  ;;  %v4455_v56 = vadd.f32 %v4423_v57, %v4357_v49  ;;  %v4522_v59 = vmul.f32 %v12439_v0, %v12191_v55  ;;  %v12463_v42 = vpop.f32.mrf.mxu3  ;;  %v12495_v47 = vld [vmem:[#allocation2 + $0x107] sm:$0xff] }
 0x302   : > { %3808 = vst [vmem:[#allocation2 + $0x148] sm:$0xff] %v12445_v16  ;;  %v3649_v52 = vmin.f32 %v12404_v36, 0.0  ;;  %v3870_v53 = vmul.f32 %v12354_v18, %v12314_v38  ;;  %v3869_v2 = vmul.f32 %v12354_v18, %v12308_v19  ;;  %v3935_v22 = vmul.f32 %v12363_v13, %v3901_v32  ;;  %v8370_v32 = vld [vmem:[%s14137_s5 + $0xd8] sm:$0xff] }
 0x303   : > { %v4456_v5 = vadd.f32 %v4424_v10, %v4358_v48  ;;  %v4553_v31 = vadd.f32 %v4521_v37, %v4455_v56  ;;  %v4620_v28 = vmul.f32 %v12452_v1, %v12447_v60  ;;  %v3650_v34 = vmin.f32 %v12463_v42, 0.0  ;;  %5824 = vmatpush.bf16.msrb.mxu1 %v8370_v32 }
 0x304   : > { %v8845_v24 = vpop.eup %8844  ;;  %v3700_v63 = vmul.f32 1.442695, %v3649_v52  ;;  %v3936_v41 = vmul.f32 %v12363_v13, %v14260_v17  ;;  %v4033_v19 = vmul.f32 %v12276_v25, %v12323_v27  ;;  %vm3617_vm13 = vcmp.gt.f32.partialorder %v12404_v36, 0.0 }
 0x305   : > { %v8847_v38 = vpop.eup %8846  ;;  %v7777_v14 = vadd.f32 -1.0, %v8845_v24  ;;  %v4554_v23 = vadd.f32 %v4522_v59, %v4456_v5  ;;  %v12473_v20 = vadd.f32 %v4619_v21, %v4553_v31  ;;  %v3702_v40 = vmul.f32 1.442695, %v3650_v34  ;;  %v12513_v5 = vld [vmem:[#allocation2 + $0x109] sm:$0xff] }
 0x306   : > { %v7778_v35 = vadd.f32 -1.0, %v8847_v38  ;;  %8848 = vpow2.f32 %v3700_v63  ;;  %v3968_v45 = vadd.f32 %v3936_v41, %v3870_v53  ;;  %v3967_v4 = vadd.f32 %v3935_v22, %v3869_v2 }
 0x307   : > { %v12477_v33 = vadd.f32 %v4620_v28, %v4554_v23  ;;  %v4715_v46 = vmin.f32 %v12473_v20, 0.0  ;;  %v4841_v17 = vsel %vm4681_vm10, %v12378_v62, %v7777_v14  ;;  %8850 = vpow2.f32 %v3702_v40 }
 0x308   : > { %v4842_v9 = vsel %vm4682_vm12, %v12380_v30, %v7778_v35  ;;  %v4034_v27 = vmul.f32 %v12276_v25, %v12337_v61  ;;  %vm3618_vm14 = vcmp.gt.f32.partialorder %v12463_v42, 0.0  ;;  %v4065_v11 = vadd.f32 %v4033_v19, %v3967_v4  ;;  %v12497_v30 = vld [vmem:[#allocation2 + $0x10f] sm:$0xff] }
 0x309   : > { %v4869_v57 = vpack.c.bf16 %v4842_v9, %v4841_v17  ;;  %v4716_v3 = vmin.f32 %v12477_v33, 0.0  ;;  %v4757_v51 = vmul.f32 1.442695, %v4715_v46  ;;  %v4131_v44 = vmul.f32 %v12302_v39, %v12388_v50  ;;  %v12506_v48 = vpop.f32.mrf.mxu3  ;;  %v12541_v17 = vld [vmem:[#allocation2 + $0x111] sm:$0xff] }
 0x30a   : > { %v4066_v10 = vadd.f32 %v4034_v27, %v3968_v45  ;;  %v4132_v62 = vmul.f32 %v12302_v39, %v12399_v8  ;;  %v4229_v49 = vmul.f32 %v12395_v29, %v12148_v54  ;;  %v4230_v37 = vmul.f32 %v12395_v29, %v12191_v55 }
 0x30b   : > { %4974 = vmatmul.bf16.gmra.mxu0 %v4869_v57  ;;  %8852 = vpow2.f32 %v4757_v51  ;;  %v4759_v61 = vmul.f32 1.442695, %v4716_v3  ;;  %vm4683_vm15 = vcmp.gt.f32.partialorder %v12473_v20, 0.0  ;;  %v4163_v21 = vadd.f32 %v4131_v44, %v4065_v11 }
 0x30c   : > { %v8849_v56 = vpop.eup %8848  ;;  %v4164_v59 = vadd.f32 %v4132_v62, %v4066_v10  ;;  %v4327_v52 = vmul.f32 %v12410_v15, %v12427_v43  ;;  %v4328_v53 = vmul.f32 %v12410_v15, %v12447_v60  ;;  %v4425_v2 = vmul.f32 %v12419_v7, %v12495_v47 }
 0x30d   : > { %8854 = vpow2.f32 %v4759_v61  ;;  %v7747_v31 = vadd.f32 -1.0, %v8849_v56  ;;  %v4426_v22 = vmul.f32 %v12419_v7, %v12497_v30  ;;  %v8851_v24 = vpop.eup %8850  ;;  %v4261_v28 = vadd.f32 %v4229_v49, %v4163_v21 }
 0x30e   : > { %v4262_v63 = vadd.f32 %v4230_v37, %v4164_v59  ;;  %v4523_v34 = vmul.f32 %v12439_v0, %v12260_v6  ;;  %v4524_v41 = vmul.f32 %v12439_v0, %v12331_v26  ;;  %v7748_v14 = vadd.f32 -1.0, %v8851_v24  ;;  %v12575_v24 = vld [vmem:[#allocation2 + $0x127] sm:$0xff] }
 0x30f   : > { %v12526_v38 = vsel %vm3617_vm13, %v12404_v36, %v7747_v31  ;;  %v4621_v23 = vmul.f32 %v12452_v1, %v12513_v5  ;;  %v3651_v19 = vmin.f32 %v12506_v48, 0.0  ;;  %v4359_v35 = vadd.f32 %v4327_v52, %v4261_v28 }
 0x310   : > { %3809 = vst [vmem:[#allocation2 + $0x150] sm:$0xff] %v12526_v38  ;;  %v4360_v40 = vadd.f32 %v4328_v53, %v4262_v63  ;;  %v3871_v45 = vmul.f32 %v12354_v18, %v12388_v50  ;;  %v3872_v46 = vmul.f32 %v12354_v18, %v12399_v8  ;;  %v12539_v36 = vsel %vm3618_vm14, %v12463_v42, %v7748_v14  ;;  %v12579_v14 = vld [vmem:[#allocation2 + $0x12f] sm:$0xff] }
 0x311   : > { %v8853_v4 = vpop.eup %8852  ;;  %v3704_v9 = vmul.f32 1.442695, %v3651_v19  ;;  %v3937_v27 = vmul.f32 %v12363_v13, %v12148_v54  ;;  %v3938_v57 = vmul.f32 %v12363_v13, %v12191_v55  ;;  %3810 = vst [vmem:[#allocation2 + $0x168] sm:$0xff] %v12539_v36  ;;  %v4457_v50 = vadd.f32 %v4425_v2, %v4359_v35  ;;  %v12551_v42 = vpop.f32.mrf.mxu3 }
 0x312   : > { %v7779_v3 = vadd.f32 -1.0, %v8853_v4  ;;  %v4458_v8 = vadd.f32 %v4426_v22, %v4360_v40  ;;  %v4035_v51 = vmul.f32 %v12276_v25, %v12427_v43  ;;  %vm4684_vm0 = vcmp.gt.f32.partialorder %v12477_v33, 0.0 }
 0x313   : > { %v8855_v11 = vpop.eup %8854  ;;  %8856 = vpow2.f32 %v3704_v9  ;;  %v3969_v10 = vadd.f32 %v3937_v27, %v3871_v45  ;;  %v3970_v44 = vadd.f32 %v3938_v57, %v3872_v46  ;;  %v4555_v62 = vadd.f32 %v4523_v34, %v4457_v50  ;;  %v12587_v27 = vld [vmem:[#allocation2 + $0x129] sm:$0xff] }
 0x314   : > { %v7780_v54 = vadd.f32 -1.0, %v8855_v11  ;;  %v4556_v61 = vadd.f32 %v4524_v41, %v4458_v8  ;;  %v4622_v55 = vmul.f32 %v12452_v1, %v12541_v17  ;;  %v4843_v49 = vsel %vm4683_vm15, %v12473_v20, %v7779_v3  ;;  %v8369_v57 = vld [vmem:[%s14137_s5 + $0xd0] sm:$0xff] }
 0x315   : > { %v3652_v43 = vmin.f32 %v12551_v42, 0.0  ;;  %v4036_v37 = vmul.f32 %v12276_v25, %v12447_v60  ;;  %v4067_v32 = vadd.f32 %v4035_v51, %v3969_v10  ;;  %v12562_v21 = vadd.f32 %v4621_v23, %v4555_v62  ;;  %5825 = vmatpush.bf16.msrb.mxu1 %v8369_v57 }
 0x316   : > { %v4844_v56 = vsel %vm4684_vm0, %v12477_v33, %v7780_v54  ;;  %v12564_v59 = vadd.f32 %v4622_v55, %v4556_v61  ;;  %v4133_v52 = vmul.f32 %v12302_v39, %v12495_v47  ;;  %v4134_v20 = vmul.f32 %v12302_v39, %v12497_v30  ;;  %v12607_v54 = vld [vmem:[#allocation2 + $0x131] sm:$0xff] }
 0x317   : > { %v4870_v53 = vpack.c.bf16 %v4844_v56, %v4843_v49  ;;  %v3706_v31 = vmul.f32 1.442695, %v3652_v43  ;;  %v4068_v2 = vadd.f32 %v4036_v37, %v3970_v44  ;;  %v4717_v22 = vmin.f32 %v12562_v21, 0.0 }
 0x318   : > { %v4718_v60 = vmin.f32 %v12564_v59, 0.0  ;;  %vm3619_vm1 = vcmp.gt.f32.partialorder %v12506_v48, 0.0  ;;  %v4231_v33 = vmul.f32 %v12395_v29, %v12260_v6  ;;  %v4165_v63 = vadd.f32 %v4133_v52, %v4067_v32 }
 0x319   : > { %v8857_v28 = vpop.eup %8856  ;;  %8858 = vpow2.f32 %v3706_v31  ;;  %v4166_v34 = vadd.f32 %v4134_v20, %v4068_v2  ;;  %v4232_v41 = vmul.f32 %v12395_v29, %v12331_v26  ;;  %v4761_v23 = vmul.f32 1.442695, %v4717_v22  ;;  %v12592_v3 = vpop.f32.mrf.mxu3 }
 0x31a   : > { %v4763_v19 = vmul.f32 1.442695, %v4718_v60  ;;  %v7749_v35 = vadd.f32 -1.0, %v8857_v28  ;;  %v4329_v40 = vmul.f32 %v12410_v15, %v12513_v5  ;;  %v4263_v45 = vadd.f32 %v4231_v33, %v4165_v63 }
 0x31b   : > { %4979 = vmatmul.bf16.gmra.mxu0 %v4870_v53  ;;  %v4264_v46 = vadd.f32 %v4232_v41, %v4166_v34  ;;  %v4330_v4 = vmul.f32 %v12410_v15, %v12541_v17  ;;  %v4427_v9 = vmul.f32 %v12419_v7, %v12575_v24  ;;  %8860 = vpow2.f32 %v4761_v23 }
 0x31c   : > { %v12597_v50 = vsel %vm3619_vm1, %v12506_v48, %v7749_v35  ;;  %v4428_v8 = vmul.f32 %v12419_v7, %v12579_v14  ;;  %8862 = vpow2.f32 %v4763_v19  ;;  %vm3620_vm2 = vcmp.gt.f32.partialorder %v12551_v42, 0.0 }
 0x31d   : > { %3811 = vst [vmem:[#allocation2 + $0x170] sm:$0xff] %v12597_v50  ;;  %v4361_v51 = vadd.f32 %v4329_v40, %v4263_v45  ;;  %v4362_v11 = vadd.f32 %v4330_v4, %v4264_v46  ;;  %v4525_v10 = vmul.f32 %v12439_v0, %v12343_v12  ;;  %v4526_v44 = vmul.f32 %v12439_v0, %v12433_v58 }
 0x31e   : > { %v4623_v48 = vmul.f32 %v12452_v1, %v12587_v27  ;;  %v3653_v62 = vmin.f32 %v12592_v3, 0.0  ;;  %v3873_v43 = vmul.f32 %v12354_v18, %v12495_v47  ;;  %v3874_v37 = vmul.f32 %v12354_v18, %v12497_v30 }
 0x31f   : > { %v8859_v61 = vpop.eup %8858  ;;  %v4459_v55 = vadd.f32 %v4427_v9, %v4361_v51  ;;  %v4460_v49 = vadd.f32 %v4428_v8, %v4362_v11  ;;  %v3939_v52 = vmul.f32 %v12363_v13, %v12260_v6  ;;  %v3940_v53 = vmul.f32 %v12363_v13, %v12331_v26 }
 0x320   : > { %v7750_v32 = vadd.f32 -1.0, %v8859_v61  ;;  %v3708_v56 = vmul.f32 1.442695, %v3653_v62  ;;  %v4624_v20 = vmul.f32 %v12452_v1, %v12607_v54  ;;  %v4037_v22 = vmul.f32 %v12276_v25, %v12513_v5 }
 0x321   : > { %v4557_v31 = vadd.f32 %v4525_v10, %v4459_v55  ;;  %v4558_v2 = vadd.f32 %v4526_v44, %v4460_v49  ;;  %v8861_v47 = vpop.eup %8860  ;;  %v3971_v60 = vadd.f32 %v3939_v52, %v3873_v43  ;;  %v3972_v6 = vadd.f32 %v3940_v53, %v3874_v37  ;;  %v12634_v34 = vpop.f32.mrf.mxu3  ;;  %v12657_v55 = vld [vmem:[#allocation2 + $0x14f] sm:$0xff] }
 0x322   : > { %v12627_v30 = vsel %vm3620_vm2, %v12551_v42, %v7750_v32  ;;  %8864 = vpow2.f32 %v3708_v56  ;;  %v8863_v33 = vpop.eup %8862  ;;  %v7781_v28 = vadd.f32 -1.0, %v8861_v47  ;;  %v4135_v5 = vmul.f32 %v12302_v39, %v12575_v24  ;;  %v8368_v53 = vld [vmem:[%s14137_s5 + $0xc8] sm:$0xff] }
 0x323   : > { %3812 = vst [vmem:[#allocation2 + $0x188] sm:$0xff] %v12627_v30  ;;  %v12630_v26 = vadd.f32 %v4623_v48, %v4557_v31  ;;  %v12632_v63 = vadd.f32 %v4624_v20, %v4558_v2  ;;  %vm4685_vm3 = vcmp.gt.f32.partialorder %v12562_v21, 0.0  ;;  %v7782_v42 = vadd.f32 -1.0, %v8863_v33  ;;  %v8382_v2 = vld [vmem:[%s14137_s5 + $0x138] sm:$0xff]  ;;  %5826 = vmatpush.bf16.msrb.mxu1 %v8368_v53 }
 0x324   : > { %v3654_v41 = vmin.f32 %v12634_v34, 0.0  ;;  %v4038_v23 = vmul.f32 %v12276_v25, %v12541_v17  ;;  %vm4686_vm4 = vcmp.gt.f32.partialorder %v12564_v59, 0.0  ;;  %v4845_v19 = vsel %vm4685_vm3, %v12562_v21, %v7781_v28  ;;  %v8390_v20 = vld [vmem:[%s14137_s5 + $0x178] sm:$0xff]  ;;  %5909 = vmatpush.bf16.msra.mxu2 %v8382_v2 }
 0x325   : > { %v4719_v35 = vmin.f32 %v12630_v26, 0.0  ;;  %v4069_v40 = vadd.f32 %v4037_v22, %v3971_v60  ;;  %v4846_v45 = vsel %vm4686_vm4, %v12564_v59, %v7782_v42  ;;  %v4720_v46 = vmin.f32 %v12632_v63, 0.0  ;;  %v12653_v59 = vld [vmem:[#allocation2 + $0x147] sm:$0xff]  ;;  %5998 = vmatpush.bf16.msra.mxu3 %v8390_v20 }
 0x326   : > { %v3710_v4 = vmul.f32 1.442695, %v3654_v41  ;;  %v4070_v9 = vadd.f32 %v4038_v23, %v3972_v6  ;;  %v4871_v57 = vpack.c.bf16 %v4846_v45, %v4845_v19  ;;  %v4136_v17 = vmul.f32 %v12302_v39, %v12579_v14  ;;  %v12684_v60 = vld [vmem:[#allocation2 + $0x149] sm:$0xff]  ;;  %v12686_v6 = vld [vmem:[#allocation2 + $0x151] sm:$0xff] }
 0x327   : > { %v4765_v8 = vmul.f32 1.442695, %v4719_v35  ;;  %v12647_v51 = vpop.f32.mrf.mxu0  ;;  %v4167_v11 = vadd.f32 %v4135_v5, %v4069_v40  ;;  %v4767_v44 = vmul.f32 1.442695, %v4720_v46  ;;  %vm3621_vm5 = vcmp.gt.f32.partialorder %v12592_v3, 0.0  ;;  %v8381_v19 = vld [vmem:[%s14137_s5 + $0x130] sm:$0xff] }
 0x328   : > { %v8865_v10 = vpop.eup %8864  ;;  %8866 = vpow2.f32 %v3710_v4  ;;  %v5067_v21 = vmin.f32 %v12647_v51, 0.0  ;;  %v4168_v62 = vadd.f32 %v4136_v17, %v4070_v9  ;;  %v4233_v61 = vmul.f32 %v12395_v29, %v12343_v12  ;;  %v8389_v35 = vld [vmem:[%s14137_s5 + $0x170] sm:$0xff]  ;;  %5910 = vmatpush.bf16.msra.mxu2 %v8381_v19 }
 0x329   : > { %8868 = vpow2.f32 %v4765_v8  ;;  %v7751_v48 = vadd.f32 -1.0, %v8865_v10  ;;  %v4234_v43 = vmul.f32 %v12395_v29, %v12433_v58  ;;  %v4331_v37 = vmul.f32 %v12410_v15, %v12587_v27  ;;  %v12671_v31 = vpop.f32.mrf.mxu3  ;;  %5999 = vmatpush.bf16.msra.mxu3 %v8389_v35 }
 0x32a   : > { %8870 = vpow2.f32 %v4767_v44  ;;  %v5099_v49 = vmul.f32 1.442695, %v5067_v21  ;;  %v4265_v56 = vadd.f32 %v4233_v61, %v4167_v11  ;;  %v4429_v52 = vmul.f32 %v12419_v7, %v12653_v59 }
 0x32b   : > { %4984 = vmatmul.bf16.gmra.mxu0 %v4871_v57  ;;  %v12664_v32 = vsel %vm3621_vm5, %v12592_v3, %v7751_v48  ;;  %v4266_v3 = vadd.f32 %v4234_v43, %v4168_v62  ;;  %v4332_v22 = vmul.f32 %v12410_v15, %v12607_v54  ;;  %v4430_v47 = vmul.f32 %v12419_v7, %v12657_v55 }
 0x32c   : > { %3813 = vst [vmem:[#allocation2 + $0x190] sm:$0xff] %v12664_v32  ;;  %8872 = vpow2.f32 %v5099_v49  ;;  %vm4687_vm6 = vcmp.gt.f32.partialorder %v12630_v26, 0.0  ;;  %vm4688_vm7 = vcmp.gt.f32.partialorder %v12632_v63, 0.0  ;;  %vm3622_vm8 = vcmp.gt.f32.partialorder %v12634_v34, 0.0 }
 0x32d   : > { %v4363_v33 = vadd.f32 %v4331_v37, %v4265_v56  ;;  %v4364_v5 = vadd.f32 %v4332_v22, %v4266_v3  ;;  %v4527_v42 = vmul.f32 %v12439_v0, %v12445_v16  ;;  %v4528_v41 = vmul.f32 %v12439_v0, %v12526_v38 }
 0x32e   : > { %v8867_v28 = vpop.eup %8866  ;;  %v3655_v23 = vmin.f32 %v12671_v31, 0.0  ;;  %v4625_v4 = vmul.f32 %v12452_v1, %v12684_v60  ;;  %v4626_v9 = vmul.f32 %v12452_v1, %v12686_v6  ;;  %v3875_v44 = vmul.f32 %v12354_v18, %v12575_v24  ;;  %v8380_v24 = vld [vmem:[%s14137_s5 + $0x128] sm:$0xff] }
 0x32f   : > { %v8869_v40 = vpop.eup %8868  ;;  %v7752_v45 = vadd.f32 -1.0, %v8867_v28  ;;  %v4461_v46 = vadd.f32 %v4429_v52, %v4363_v33  ;;  %v12706_v57 = vpop.f32.mrf.mxu0  ;;  %v4462_v11 = vadd.f32 %v4430_v47, %v4364_v5  ;;  %vm5035_vm9 = vcmp.gt.f32.partialorder %v12647_v51, 0.0  ;;  %v14261_v28 = vld [vmem:[#allocation6_spill] sm:$0xff]  ;;  %5911 = vmatpush.bf16.msra.mxu2 %v8380_v24  ;;  %v8378_v24 = vld [vmem:[%s14137_s5 + $0x118] sm:$0xff] }
 0x330   : > { %v8871_v8 = vpop.eup %8870  ;;  %v7783_v17 = vadd.f32 -1.0, %v8869_v40  ;;  %v3712_v10 = vmul.f32 1.442695, %v3655_v23  ;;  %v5068_v61 = vmin.f32 %v12706_v57, 0.0  ;;  %v3876_v37 = vmul.f32 %v12354_v18, %v12579_v14 }
 0x331   : > { %v7784_v21 = vadd.f32 -1.0, %v8871_v8  ;;  %v12713_v48 = vsel %vm3622_vm8, %v12634_v34, %v7752_v45  ;;  %v4559_v62 = vadd.f32 %v4527_v42, %v4461_v46  ;;  %v4560_v43 = vadd.f32 %v4528_v41, %v4462_v11  ;;  %v8388_v34 = vld [vmem:[%s14137_s5 + $0x168] sm:$0xff] }
 0x332   : > { %v8873_v49 = vpop.eup %8872  ;;  %3814 = vst [vmem:[#allocation2 + $0x1a8] sm:$0xff] %v12713_v48  ;;  %8874 = vpow2.f32 %v3712_v10  ;;  %v5101_v2 = vmul.f32 1.442695, %v5068_v61  ;;  %v4847_v20 = vsel %vm4687_vm6, %v12630_v26, %v7783_v17  ;;  %v3941_v22 = vmul.f32 %v12363_v13, %v12343_v12  ;;  %6000 = vmatpush.bf16.msra.mxu3 %v8388_v34  ;;  %v8379_v12 = vld [vmem:[%s14137_s5 + $0x120] sm:$0xff]  ;;  %v8386_v34 = vld [vmem:[%s14137_s5 + $0x158] sm:$0xff] }
 0x333   : > { %v4848_v56 = vsel %vm4688_vm7, %v12632_v63, %v7784_v21  ;;  %v7849_v52 = vadd.f32 -1.0, %v8873_v49  ;;  %v12729_v53 = vadd.f32 %v4625_v4, %v4559_v62  ;;  %v12734_v3 = vadd.f32 %v4626_v9, %v4560_v43  ;;  %v12765_v8 = vld [vmem:[#allocation2 + $0x167] sm:$0xff]  ;;  %5912 = vmatpush.bf16.msra.mxu2 %v8379_v12  ;;  %v8385_v12 = vld [vmem:[%s14137_s5 + $0x150] sm:$0xff] }
 0x334   : > { %v3942_v14 = vmul.f32 %v12363_v13, %v12433_v58  ;;  %v4872_v47 = vpack.c.bf16 %v4848_v56, %v4847_v20  ;;  %8876 = vpow2.f32 %v5101_v2  ;;  %v8387_v58 = vld [vmem:[%s14137_s5 + $0x160] sm:$0xff]  ;;  %v3973_v42 = vadd.f32 %v3941_v22, %v3875_v44  ;;  %v12775_v44 = vld [vmem:[#allocation2 + $0x169] sm:$0xff] }
 0x335   : > { %v5195_v63 = vsel %vm5035_vm9, %v12647_v51, %v7849_v52  ;;  %v4721_v33 = vmin.f32 %v12729_v53, 0.0  ;;  %v4722_v26 = vmin.f32 %v12734_v3, 0.0  ;;  %v4039_v23 = vmul.f32 %v12276_v25, %v12587_v27  ;;  %v8367_v43 = vld [vmem:[%s14137_s5 + $0xc0] sm:$0xff] }
 0x336   : > { %v12745_v5 = vadd.f32 %v5195_v63, %v14261_v28  ;;  %v3974_v51 = vadd.f32 %v3942_v14, %v3876_v37  ;;  %v4040_v19 = vmul.f32 %v12276_v25, %v12607_v54  ;;  %v4137_v35 = vmul.f32 %v12302_v39, %v12653_v59  ;;  %v12767_v54 = vld [vmem:[#allocation2 + $0x16f] sm:$0xff]  ;;  %6001 = vmatpush.bf16.msra.mxu3 %v8387_v58 }
 0x337   : > { %v4769_v41 = vmul.f32 1.442695, %v4721_v33  ;;  %v4771_v45 = vmul.f32 1.442695, %v4722_v26  ;;  %vm3623_vm10 = vcmp.gt.f32.partialorder %v12671_v31, 0.0  ;;  %vm5036_vm11 = vcmp.gt.f32.partialorder %v12706_v57, 0.0  ;;  %5827 = vmatpush.bf16.msrb.mxu1 %v8367_v43  ;;  %5913 = vmatpush.bf16.msra.mxu2 %v8378_v24 }
 0x338   : > { %v8875_v40 = vpop.eup %8874  ;;  %5259 = vst [vmem:[#allocation2 + $0x28] sm:$0xff] %v12745_v5  ;;  %v4138_v46 = vmul.f32 %v12302_v39, %v12657_v55  ;;  %v4071_v27 = vadd.f32 %v4039_v23, %v3973_v42  ;;  %v4072_v9 = vadd.f32 %v4040_v19, %v3974_v51  ;;  %v4235_v17 = vmul.f32 %v12395_v29, %v12445_v16  ;;  %v3909_v63 = vld [vmem:[#allocation2 + $0x148] sm:$0xff]  ;;  %v8377_v26 = vld [vmem:[%s14137_s5 + $0x110] sm:$0xff] }
 0x339   : > { %8878 = vpow2.f32 %v4769_v41  ;;  %v7753_v4 = vadd.f32 -1.0, %v8875_v40  ;;  %v4236_v11 = vmul.f32 %v12395_v29, %v12526_v38  ;;  %v4333_v10 = vmul.f32 %v12410_v15, %v12684_v60  ;;  %v14262_v51 = vld [vmem:[#allocation8_spill] sm:$0xff] }
 0x33a   : > { %8880 = vpow2.f32 %v4771_v45  ;;  %v8877_v21 = vpop.eup %8876  ;;  %v4169_v61 = vadd.f32 %v4137_v35, %v4071_v27  ;;  %v4170_v49 = vadd.f32 %v4138_v46, %v4072_v9  ;;  %v4334_v16 = vmul.f32 %v12410_v15, %v12686_v6  ;;  %6002 = vmatpush.bf16.msra.mxu3 %v8386_v34  ;;  %v12821_v35 = vld [vmem:[#allocation2 + $0x171] sm:$0xff] }
 0x33b   : > { %4989 = vmatmul.bf16.gmra.mxu0 %v4872_v47  ;;  %v12780_v62 = vsel %vm3623_vm10, %v12671_v31, %v7753_v4  ;;  %v7850_v31 = vadd.f32 -1.0, %v8877_v21  ;;  %v4431_v56 = vmul.f32 %v12419_v7, %v12765_v8  ;;  %v4432_v52 = vmul.f32 %v12419_v7, %v12767_v54  ;;  %5914 = vmatpush.bf16.msra.mxu2 %v8377_v26 }
 0x33c   : > { %3815 = vst [vmem:[#allocation2 + $0x1b0] sm:$0xff] %v12780_v62  ;;  %v4529_v2 = vmul.f32 %v12439_v0, %v12539_v36  ;;  %v4267_v22 = vadd.f32 %v4235_v17, %v4169_v61  ;;  %v4268_v14 = vadd.f32 %v4236_v11, %v4170_v49  ;;  %v4530_v47 = vmul.f32 %v12439_v0, %v12597_v50 }
 0x33d   : > { %v12794_v37 = vpop.f32.mrf.mxu3  ;;  %v5196_v33 = vsel %vm5036_vm11, %v12706_v57, %v7850_v31  ;;  %v4627_v28 = vmul.f32 %v12452_v1, %v12775_v44  ;;  %v3877_v58 = vmul.f32 %v12354_v18, %v12653_v59  ;;  %v3878_v46 = vmul.f32 %v12354_v18, %v12657_v55 }
 0x33e   : > { %v3656_v20 = vmin.f32 %v12794_v37, 0.0  ;;  %v12819_v41 = vadd.f32 %v5196_v33, %v14262_v51  ;;  %v4365_v23 = vadd.f32 %v4333_v10, %v4267_v22  ;;  %v4366_v19 = vadd.f32 %v4334_v16, %v4268_v14  ;;  %6003 = vmatpush.bf16.msra.mxu3 %v8385_v12 }
 0x33f   : > { %v8879_v42 = vpop.eup %8878  ;;  %v3943_v4 = vmul.f32 %v12363_v13, %v3909_v63  ;;  %v3944_v27 = vmul.f32 %v12363_v13, %v12526_v38  ;;  %vm4689_vm12 = vcmp.gt.f32.partialorder %v12729_v53, 0.0  ;;  %vm4690_vm13 = vcmp.gt.f32.partialorder %v12734_v3, 0.0 }
 0x340   : > { %v3714_v57 = vmul.f32 1.442695, %v3656_v20  ;;  %v8881_v40 = vpop.eup %8880  ;;  %v7785_v45 = vadd.f32 -1.0, %v8879_v42  ;;  %5260 = vst [vmem:[#allocation2 + $0x30] sm:$0xff] %v12819_v41  ;;  %v4463_v9 = vadd.f32 %v4431_v56, %v4365_v23  ;;  %v4464_v17 = vadd.f32 %v4432_v52, %v4366_v19 }
 0x341   : > { %v7786_v59 = vadd.f32 -1.0, %v8881_v40  ;;  %v4628_v11 = vmul.f32 %v12452_v1, %v12821_v35  ;;  %v3976_v55 = vadd.f32 %v3944_v27, %v3878_v46  ;;  %v4041_v61 = vmul.f32 %v12276_v25, %v12684_v60  ;;  %v8376_v60 = vld [vmem:[%s14137_s5 + $0x108] sm:$0xff] }
 0x342   : > { %8882 = vpow2.f32 %v3714_v57  ;;  %v4561_v21 = vadd.f32 %v4529_v2, %v4463_v9  ;;  %v4562_v38 = vadd.f32 %v4530_v47, %v4464_v17  ;;  %v4849_v49 = vsel %vm4689_vm12, %v12729_v53, %v7785_v45  ;;  %v8384_v53 = vld [vmem:[%s14137_s5 + $0x148] sm:$0xff]  ;;  %5915 = vmatpush.bf16.msra.mxu2 %v8376_v60 }
 0x343   : > { %v4850_v10 = vsel %vm4690_vm13, %v12734_v3, %v7786_v59  ;;  %v3975_v24 = vadd.f32 %v3943_v4, %v3877_v58  ;;  %v4042_v34 = vmul.f32 %v12276_v25, %v12686_v6  ;;  %v4139_v52 = vmul.f32 %v12302_v39, %v12765_v8  ;;  %6004 = vmatpush.bf16.msra.mxu3 %v8384_v53  ;;  %v3911_v45 = vld [vmem:[#allocation2 + $0x168] sm:$0xff] }
 0x344   : > { %v12837_v16 = vpop.f32.mrf.mxu0  ;;  %v12844_v56 = vadd.f32 %v4627_v28, %v4561_v21  ;;  %v12846_v3 = vadd.f32 %v4628_v11, %v4562_v38  ;;  %v4873_v2 = vpack.c.bf16 %v4850_v10, %v4849_v49  ;;  %vm3624_vm14 = vcmp.gt.f32.partialorder %v12794_v37, 0.0  ;;  %v8375_v11 = vld [vmem:[%s14137_s5 + $0x100] sm:$0xff] }
 0x345   : > { %v12839_v43 = vpop.f32.mrf.mxu3  ;;  %v5069_v31 = vmin.f32 %v12837_v16, 0.0  ;;  %v4237_v6 = vmul.f32 %v12395_v29, %v12539_v36  ;;  %v4073_v47 = vadd.f32 %v4041_v61, %v3975_v24  ;;  %v4074_v63 = vadd.f32 %v4042_v34, %v3976_v55  ;;  %v8383_v55 = vld [vmem:[%s14137_s5 + $0x140] sm:$0xff]  ;;  %v12901_v24 = vld [vmem:[#allocation2 + $0x18f] sm:$0xff] }
 0x346   : > { %v3657_v25 = vmin.f32 %v12839_v43, 0.0  ;;  %v4723_v14 = vmin.f32 %v12844_v56, 0.0  ;;  %v4724_v28 = vmin.f32 %v12846_v3, 0.0  ;;  %v4140_v12 = vmul.f32 %v12302_v39, %v12767_v54  ;;  %v12899_v49 = vld [vmem:[#allocation2 + $0x187] sm:$0xff]  ;;  %5916 = vmatpush.bf16.msra.mxu2 %v8375_v11 }
 0x347   : > { %v5103_v22 = vmul.f32 1.442695, %v5069_v31  ;;  %v4171_v42 = vadd.f32 %v4139_v52, %v4073_v47  ;;  %v4238_v36 = vmul.f32 %v12395_v29, %v12597_v50  ;;  %v4335_v39 = vmul.f32 %v12410_v15, %v12775_v44  ;;  %v12903_v34 = vld [vmem:[#allocation2 + $0x189] sm:$0xff]  ;;  %6005 = vmatpush.bf16.msra.mxu3 %v8383_v55 }
 0x348   : > { %v8883_v20 = vpop.eup %8882  ;;  %v3716_v26 = vmul.f32 1.442695, %v3657_v25  ;;  %v4773_v58 = vmul.f32 1.442695, %v4723_v14  ;;  %v4775_v57 = vmul.f32 1.442695, %v4724_v28  ;;  %v4172_v23 = vadd.f32 %v4140_v12, %v4074_v63 }
 0x349   : > { %v7754_v33 = vadd.f32 -1.0, %v8883_v20  ;;  %8884 = vpow2.f32 %v5103_v22  ;;  %vm5037_vm15 = vcmp.gt.f32.partialorder %v12837_v16, 0.0  ;;  %v4269_v29 = vadd.f32 %v4237_v6, %v4171_v42  ;;  %v5547_v20 = vld [vmem:[#allocation2 + $0x29] sm:$0xff]  ;;  %v5548_v22 = vld [vmem:[#allocation2 + $0x31] sm:$0xff]  ;;  %v14263_v14 = vld [vmem:[#allocation10_spill] sm:$0xff] }
 0x34a   : > { %8886 = vpow2.f32 %v3716_v26  ;;  %v4270_v40 = vadd.f32 %v4238_v36, %v4172_v23  ;;  %vm4691_vm0 = vcmp.gt.f32.partialorder %v12844_v56, 0.0  ;;  %vm3625_vm1 = vcmp.gt.f32.partialorder %v12839_v43, 0.0  ;;  %v5483_v28 = vld [vmem:[#allocation2 + $0x27] sm:$0xff] }
 0x34b   : > { %v12869_v51 = vsel %vm3624_vm14, %v12794_v37, %v7754_v33  ;;  %4994 = vmatmul.bf16.gmra.mxu0 %v4873_v2  ;;  %8888 = vpow2.f32 %v4773_v58  ;;  %v4336_v46 = vmul.f32 %v12410_v15, %v12821_v35  ;;  %vm4692_vm2 = vcmp.gt.f32.partialorder %v12846_v3, 0.0  ;;  %v8350_v15 = vld [vmem:[%s14137_s5 + $0x38] sm:$0xff] }
 0x34c   : > { %3816 = vst [vmem:[#allocation2 + $0x1c8] sm:$0xff] %v12869_v51  ;;  %8890 = vpow2.f32 %v4775_v57  ;;  %v12875_v19 = vpop.f32.mrf.mxu0  ;;  %v4367_v4 = vadd.f32 %v4335_v39, %v4269_v29  ;;  %v4531_v27 = vmul.f32 %v12439_v0, %v12627_v30  ;;  %v3879_v59 = vmul.f32 %v12354_v18, %v12765_v8  ;;  %6231 = vmatpush.bf16.msra.mxu0 %v8350_v15 }
 0x34d   : > { %v5070_v37 = vmin.f32 %v12875_v19, 0.0  ;;  %v4368_v10 = vadd.f32 %v4336_v46, %v4270_v40  ;;  %v3880_v21 = vmul.f32 %v12354_v18, %v12767_v54  ;;  %v3945_v8 = vmul.f32 %v12363_v13, %v3911_v45  ;;  %v12912_v18 = vld [vmem:[%s14135_s3 + $0x22] ss:$0 sm:$0xff]  ;;  %v12955_v45 = vld [vmem:[%s14135_s3 + $0x23] ss:$0 sm:$0xff] }
 0x34e   : > { %v5580_v31 = vpack.c.bf16 %v12819_v41, %v12745_v5  ;;  %v3946_v60 = vmul.f32 %v12363_v13, %v12597_v50  ;;  %v4043_v54 = vmul.f32 %v12912_v18, %v12775_v44  ;;  %v4433_v2 = vmul.f32 %v12419_v7, %v12899_v49  ;;  %v5484_v13 = vld [vmem:[#allocation2 + $0x2f] sm:$0xff] }
 0x34f   : > { %v8885_v9 = vpop.eup %8884  ;;  %v5105_v17 = vmul.f32 1.442695, %v5070_v37  ;;  %v4434_v5 = vmul.f32 %v12419_v7, %v12901_v24  ;;  %v4532_v44 = vmul.f32 %v12439_v0, %v12664_v32  ;;  %v4629_v6 = vmul.f32 %v12452_v1, %v12903_v34  ;;  %v8358_v7 = vld [vmem:[%s14137_s5 + $0x78] sm:$0xff] }
 0x350   : > { %v8887_v38 = vpop.eup %8886  ;;  %v7851_v61 = vadd.f32 -1.0, %v8885_v9  ;;  %v4465_v33 = vadd.f32 %v4433_v2, %v4367_v4  ;;  %v12938_v0 = vld [vmem:[#allocation2 + $0x191] sm:$0xff]  ;;  %v5579_v12 = vpack.c.bf16 %v5484_v13, %v5483_v28  ;;  %5917 = vmatmul.bf16.vlgmr.msra.gmra.mxu2 %v5580_v31  ;;  %6320 = vmatpush.bf16.msra.mxu1 %v8358_v7  ;;  %v3977_v58 = vadd.f32 %v3945_v8, %v3879_v59 }
 0x351   : > { %v8889_v53 = vpop.eup %8888  ;;  %v7755_v52 = vadd.f32 -1.0, %v8887_v38  ;;  %8892 = vpow2.f32 %v5105_v17  ;;  %v4466_v26 = vadd.f32 %v4434_v5, %v4368_v10  ;;  %v3978_v57 = vadd.f32 %v3946_v60, %v3880_v21  ;;  %v12993_v5 = vld [vmem:[%s14135_s3 + $0x25] ss:$0 sm:$0xff] }
 0x352   : > { %v8891_v50 = vpop.eup %8890  ;;  %v5197_v41 = vsel %vm5037_vm15, %v12837_v16, %v7851_v61  ;;  %v7787_v25 = vadd.f32 -1.0, %v8889_v53  ;;  %v4563_v36 = vadd.f32 %v4531_v27, %v4465_v33  ;;  %v4630_v40 = vmul.f32 %v12452_v1, %v12938_v0  ;;  %5828 = vmatmul.bf16.vlgmr.msrb.gmra.mxu1 %v5579_v12 }
 0x353   : > { %v12931_v47 = vadd.f32 %v5197_v41, %v14263_v14  ;;  %v7788_v63 = vadd.f32 -1.0, %v8891_v50  ;;  %v12936_v16 = vsel %vm3625_vm1, %v12839_v43, %v7755_v52  ;;  %v5581_v43 = vpack.c.bf16 %v5548_v22, %v5547_v20  ;;  %v3913_v50 = vld [vmem:[#allocation2 + $0x188] sm:$0xff]  ;;  %v13006_v22 = vld [vmem:[%s14135_s3 + $0x26] ss:$0 sm:$0xff]  ;;  %v13013_v14 = vld [vmem:[%s14135_s3 + $0x20] ss:$0 sm:$0xff] }
 0x354   : > { %3817 = vst [vmem:[#allocation2 + $0x1d0] sm:$0xff] %v12936_v16  ;;  %v4851_v23 = vsel %vm4691_vm0, %v12844_v56, %v7787_v25  ;;  %v4564_v29 = vadd.f32 %v4532_v44, %v4466_v26  ;;  %v12960_v56 = vadd.f32 %v4629_v6, %v4563_v36  ;;  %v4044_v27 = vmul.f32 %v12912_v18, %v12821_v35  ;;  %v14264_v35 = vld [vmem:[#allocation12_spill] sm:$0xff]  ;;  %v12999_v6 = vld [vmem:[#allocation2 + $0x1a7] sm:$0xff] }
 0x355   : > { %5261 = vst [vmem:[#allocation2 + $0x48] sm:$0xff] %v12931_v47  ;;  %v4852_v42 = vsel %vm4692_vm2, %v12846_v3, %v7788_v63  ;;  %v4141_v3 = vmul.f32 %v12955_v45, %v12899_v49  ;;  %6006 = vmatmul.bf16.vlgmr.msra.gmra.mxu3 %v5581_v43  ;;  %v4075_v9 = vadd.f32 %v4043_v54, %v3977_v58  ;;  %vm5038_vm3 = vcmp.gt.f32.partialorder %v12875_v19, 0.0  ;;  %v12979_v54 = vld [vmem:[%s14135_s3 + $0x24] ss:$0 sm:$0xff]  ;;  %v13022_v58 = vld [vmem:[%s14135_s3 + $0x21] ss:$0 sm:$0xff] }
 0x356   : > { %v12948_v39 = vpop.f32.mrf.mxu3  ;;  %v4874_v46 = vpack.c.bf16 %v4852_v42, %v4851_v23  ;;  %v12964_v59 = vadd.f32 %v4630_v40, %v4564_v29  ;;  %v4142_v17 = vmul.f32 %v12955_v45, %v12901_v24  ;;  %v4725_v55 = vmin.f32 %v12960_v56, 0.0  ;;  %v13031_v23 = vld [vmem:[%s14135_s3 + $0x27] ss:$0 sm:$0xff] }
 0x357   : > { %v8893_v37 = vpop.eup %8892  ;;  %v3658_v4 = vmin.f32 %v12948_v39, 0.0  ;;  %v4076_v15 = vadd.f32 %v4044_v27, %v3978_v57  ;;  %v4173_v8 = vadd.f32 %v4141_v3, %v4075_v9  ;;  %v4240_v53 = vmul.f32 %v12979_v54, %v12664_v32 }
 0x358   : > { %v7852_v1 = vadd.f32 -1.0, %v8893_v37  ;;  %v4726_v21 = vmin.f32 %v12964_v59, 0.0  ;;  %v4777_v61 = vmul.f32 1.442695, %v4725_v55  ;;  %vm3626_vm4 = vcmp.gt.f32.partialorder %v12948_v39, 0.0 }
 0x359   : > { %v3718_v11 = vmul.f32 1.442695, %v3658_v4  ;;  %v4174_v31 = vadd.f32 %v4142_v17, %v4076_v15  ;;  %v4337_v13 = vmul.f32 %v12993_v5, %v12903_v34  ;;  %v4338_v20 = vmul.f32 %v12993_v5, %v12938_v0 }
 0x35a   : > { %v5198_v10 = vsel %vm5038_vm3, %v12875_v19, %v7852_v1  ;;  %v4779_v60 = vmul.f32 1.442695, %v4726_v21  ;;  %v4239_v19 = vmul.f32 %v12979_v54, %v12627_v30  ;;  %v3914_v30 = vld [vmem:[#allocation2 + $0x190] sm:$0xff]  ;;  %v4435_v7 = vmul.f32 %v13006_v22, %v12999_v6 }
 0x35b   : > { %4999 = vmatmul.bf16.gmra.mxu0 %v4874_v46  ;;  %v12973_v38 = vadd.f32 %v5198_v10, %v14264_v35  ;;  %8894 = vpow2.f32 %v3718_v11  ;;  %v4272_v44 = vadd.f32 %v4240_v53, %v4174_v31  ;;  %v3881_v63 = vmul.f32 %v13013_v14, %v12899_v49  ;;  %v4402_v10 = vld [vmem:[#allocation2 + $0x1af] sm:$0xff] }
 0x35c   : > { %8896 = vpow2.f32 %v4777_v61  ;;  %v4271_v25 = vadd.f32 %v4239_v19, %v4173_v8  ;;  %v3882_v33 = vmul.f32 %v13013_v14, %v12901_v24  ;;  %v3947_v42 = vmul.f32 %v13022_v58, %v3913_v50  ;;  %v13060_v21 = vld [vmem:[#allocation2 + $0x1a9] sm:$0xff]  ;;  %v13063_v31 = vld [vmem:[#allocation2 + $0x1b1] sm:$0xff] }
 0x35d   : > { %5262 = vst [vmem:[#allocation2 + $0x50] sm:$0xff] %v12973_v38  ;;  %8898 = vpow2.f32 %v4779_v60  ;;  %v3948_v36 = vmul.f32 %v13022_v58, %v3914_v30  ;;  %vm4693_vm5 = vcmp.gt.f32.partialorder %v12960_v56, 0.0  ;;  %vm4694_vm6 = vcmp.gt.f32.partialorder %v12964_v59, 0.0  ;;  %v5485_v53 = vld [vmem:[#allocation2 + $0x47] sm:$0xff] }
 0x35e   : > { %v12986_v52 = vpop.f32.mrf.mxu0  ;;  %v12988_v2 = vpop.f32.mrf.mxu3  ;;  %v4369_v49 = vadd.f32 %v4337_v13, %v4271_v25  ;;  %v4370_v24 = vadd.f32 %v4338_v20, %v4272_v44  ;;  %v4533_v29 = vmul.f32 %v13031_v23, %v12713_v48  ;;  %v4045_v40 = vmul.f32 %v12912_v18, %v12903_v34 }
 0x35f   : > { %v5071_v41 = vmin.f32 %v12986_v52, 0.0  ;;  %v3659_v32 = vmin.f32 %v12988_v2, 0.0  ;;  %vm5039_vm7 = vcmp.gt.f32.partialorder %v12986_v52, 0.0  ;;  %v3979_v1 = vadd.f32 %v3947_v42, %v3881_v63  ;;  %v4207_v42 = vld [vmem:[#allocation2 + $0x1a8] sm:$0xff] }
 0x360   : > { %v4467_v4 = vadd.f32 %v4435_v7, %v4369_v49  ;;  %v3980_v9 = vadd.f32 %v3948_v36, %v3882_v33  ;;  %vm3627_vm8 = vcmp.gt.f32.partialorder %v12988_v2, 0.0  ;;  %v4534_v34 = vmul.f32 %v13031_v23, %v12780_v62  ;;  %v3916_v49 = vld [vmem:[#allocation2 + $0x1b0] sm:$0xff] }
 0x361   : > { %v8895_v28 = vpop.eup %8894  ;;  %v5107_v26 = vmul.f32 1.442695, %v5071_v41  ;;  %v3720_v12 = vmul.f32 1.442695, %v3659_v32  ;;  %v4143_v17 = vmul.f32 %v12955_v45, %v12999_v6  ;;  %v4077_v8 = vadd.f32 %v4045_v40, %v3979_v1  ;;  %v13100_v1 = vld [vmem:[#allocation2 + $0x1c7] sm:$0xff] }
 0x362   : > { %v7756_v43 = vadd.f32 -1.0, %v8895_v28  ;;  %v8897_v57 = vpop.eup %8896  ;;  %v4565_v61 = vadd.f32 %v4533_v29, %v4467_v4  ;;  %v5583_v50 = vpack.c.bf16 %v12973_v38, %v12931_v47  ;;  %v4144_v32 = vmul.f32 %v12955_v45, %v4402_v10 }
 0x363   : > { %8900 = vpow2.f32 %v5107_v26  ;;  %v8899_v3 = vpop.eup %8898  ;;  %v7789_v46 = vadd.f32 -1.0, %v8897_v57  ;;  %v14265_v57 = vld [vmem:[#allocation14_spill] sm:$0xff]  ;;  %v4339_v4 = vmul.f32 %v12993_v5, %v13060_v21 }
 0x364   : > { %v13040_v37 = vsel %vm3626_vm4, %v12948_v39, %v7756_v43  ;;  %8902 = vpow2.f32 %v3720_v12  ;;  %v7790_v27 = vadd.f32 -1.0, %v8899_v3  ;;  %v4046_v39 = vmul.f32 %v12912_v18, %v12938_v0  ;;  %v5486_v13 = vld [vmem:[#allocation2 + $0x4f] sm:$0xff]  ;;  %5922 = vmatmul.bf16.gmra.mxu2 %v5583_v50 }
 0x365   : > { %3818 = vst [vmem:[#allocation2 + $0x1e8] sm:$0xff] %v13040_v37  ;;  %v4853_v11 = vsel %vm4693_vm5, %v12960_v56, %v7789_v46  ;;  %v4436_v0 = vmul.f32 %v13006_v22, %v4402_v10  ;;  %v13068_v56 = vld [vmem:[%s14135_s3 + $0x28] ss:$0 sm:$0xff]  ;;  %v5549_v30 = vld [vmem:[#allocation2 + $0x49] sm:$0xff]  ;;  %v5582_v63 = vpack.c.bf16 %v5486_v13, %v5485_v53  ;;  %v5550_v33 = vld [vmem:[#allocation2 + $0x51] sm:$0xff]  ;;  %v4175_v12 = vadd.f32 %v4143_v17, %v4077_v8 }
 0x366   : > { %v13045_v48 = vpop.f32.mrf.mxu0  ;;  %v4854_v55 = vsel %vm4694_vm6, %v12964_v59, %v7790_v27  ;;  %v4631_v59 = vmul.f32 %v13068_v56, %v13060_v21  ;;  %v4078_v41 = vadd.f32 %v4046_v39, %v3980_v9  ;;  %v5584_v26 = vpack.c.bf16 %v5550_v33, %v5549_v30  ;;  %v14266_v30 = vld [vmem:[#allocation16_spill] sm:$0xff] }
 0x367   : > { %v5072_v15 = vmin.f32 %v13045_v48, 0.0  ;;  %v4875_v35 = vpack.c.bf16 %v4854_v55, %v4853_v11  ;;  %v4468_v20 = vadd.f32 %v4436_v0, %v4370_v24  ;;  %v4632_v36 = vmul.f32 %v13068_v56, %v13063_v31  ;;  %5833 = vmatmul.bf16.gmra.mxu1 %v5582_v63  ;;  %v13131_v33 = vld [vmem:[#allocation2 + $0x1cf] sm:$0xff] }
 0x368   : > { %v13075_v7 = vadd.f32 %v4631_v59, %v4565_v61  ;;  %6011 = vmatmul.bf16.gmra.mxu3 %v5584_v26  ;;  %v4176_v40 = vadd.f32 %v4144_v32, %v4078_v41  ;;  %v4241_v46 = vmul.f32 %v12979_v54, %v4207_v42  ;;  %v4242_v27 = vmul.f32 %v12979_v54, %v12780_v62 }
 0x369   : > { %v8901_v60 = vpop.eup %8900  ;;  %v5109_v19 = vmul.f32 1.442695, %v5072_v15  ;;  %v4566_v38 = vadd.f32 %v4534_v34, %v4468_v20  ;;  %v3950_v9 = vmul.f32 %v13022_v58, %v3916_v49  ;;  %v4437_v17 = vmul.f32 %v13006_v22, %v13100_v1 }
 0x36a   : > { %v8903_v25 = vpop.eup %8902  ;;  %v7853_v44 = vadd.f32 -1.0, %v8901_v60  ;;  %v4727_v43 = vmin.f32 %v13075_v7, 0.0  ;;  %v4273_v39 = vadd.f32 %v4241_v46, %v4175_v12  ;;  %vm5040_vm9 = vcmp.gt.f32.partialorder %v13045_v48, 0.0  ;;  %v8357_v46 = vld [vmem:[%s14137_s5 + $0x70] sm:$0xff] }
 0x36b   : > { %5004 = vmatmul.bf16.gmra.mxu0 %v4875_v35  ;;  %v7757_v28 = vadd.f32 -1.0, %v8903_v25  ;;  %8904 = vpow2.f32 %v5109_v19  ;;  %v4274_v15 = vadd.f32 %v4242_v27, %v4176_v40  ;;  %v3883_v62 = vmul.f32 %v13013_v14, %v12999_v6  ;;  %v8349_v40 = vld [vmem:[%s14137_s5 + $0x30] sm:$0xff]  ;;  %6321 = vmatpush.bf16.msra.mxu1 %v8357_v46 }
 0x36c   : > { %v5199_v47 = vsel %vm5039_vm7, %v12986_v52, %v7853_v44  ;;  %v13092_v52 = vadd.f32 %v4632_v36, %v4566_v38  ;;  %v4781_v3 = vmul.f32 1.442695, %v4727_v43  ;;  %vm4695_vm10 = vcmp.gt.f32.partialorder %v13075_v7, 0.0  ;;  %v13139_v38 = vld [vmem:[#allocation2 + $0x1d1] sm:$0xff]  ;;  %6232 = vmatpush.bf16.msra.mxu0 %v8349_v40 }
 0x36d   : > { %v13084_v24 = vadd.f32 %v5199_v47, %v14265_v57  ;;  %v13089_v29 = vsel %vm3627_vm8, %v12988_v2, %v7757_v28  ;;  %v3884_v2 = vmul.f32 %v13013_v14, %v4402_v10  ;;  %v3949_v10 = vmul.f32 %v13022_v58, %v4207_v42  ;;  %v13133_v28 = vld [vmem:[#allocation2 + $0x1c9] sm:$0xff] }
 0x36e   : > { %3819 = vst [vmem:[#allocation2 + $0x1f0] sm:$0xff] %v13089_v29  ;;  %v4728_v34 = vmin.f32 %v13092_v52, 0.0  ;;  %8906 = vpow2.f32 %v4781_v3  ;;  %v4371_v61 = vadd.f32 %v4339_v4, %v4273_v39  ;;  %v4340_v59 = vmul.f32 %v12993_v5, %v13063_v31 }
 0x36f   : > { %5263 = vst [vmem:[#allocation2 + $0x68] sm:$0xff] %v13084_v24  ;;  %v4535_v60 = vmul.f32 %v13031_v23, %v12869_v51  ;;  %v3982_v19 = vadd.f32 %v3950_v9, %v3884_v2  ;;  %v4047_v53 = vmul.f32 %v12912_v18, %v13060_v21  ;;  %v3981_v32 = vadd.f32 %v3949_v10, %v3883_v62 }
 0x370   : > { %v4783_v0 = vmul.f32 1.442695, %v4728_v34  ;;  %v4469_v50 = vadd.f32 %v4437_v17, %v4371_v61  ;;  %v4048_v25 = vmul.f32 %v12912_v18, %v13063_v31  ;;  %v4145_v44 = vmul.f32 %v12955_v45, %v13100_v1 }
 0x371   : > { %v8905_v11 = vpop.eup %8904  ;;  %v13108_v55 = vpop.f32.mrf.mxu3  ;;  %vm4696_vm11 = vcmp.gt.f32.partialorder %v13092_v52, 0.0  ;;  %v4372_v63 = vadd.f32 %v4340_v59, %v4274_v15  ;;  %v4079_v31 = vadd.f32 %v4047_v53, %v3981_v32  ;;  %v4438_v42 = vmul.f32 %v13006_v22, %v13131_v33 }
 0x372   : > { %v7854_v8 = vadd.f32 -1.0, %v8905_v11  ;;  %v3660_v35 = vmin.f32 %v13108_v55, 0.0  ;;  %8908 = vpow2.f32 %v4783_v0  ;;  %vm3628_vm12 = vcmp.gt.f32.partialorder %v13108_v55, 0.0 }
 0x373   : > { %v4080_v26 = vadd.f32 %v4048_v25, %v3982_v19  ;;  %v4567_v47 = vadd.f32 %v4535_v60, %v4469_v50  ;;  %v4633_v36 = vmul.f32 %v13068_v56, %v13133_v28  ;;  %v4146_v43 = vmul.f32 %v12955_v45, %v13131_v33  ;;  %v3917_v19 = vld [vmem:[#allocation2 + $0x1c8] sm:$0xff] }
 0x374   : > { %v5200_v6 = vsel %vm5040_vm9, %v13045_v48, %v7854_v8  ;;  %v3722_v13 = vmul.f32 1.442695, %v3660_v35  ;;  %v8907_v20 = vpop.eup %8906  ;;  %v4536_v48 = vmul.f32 %v13031_v23, %v12936_v16  ;;  %v4177_v4 = vadd.f32 %v4145_v44, %v4079_v31  ;;  %v13182_v44 = vld [vmem:[#allocation2 + $0x1e7] sm:$0xff] }
 0x375   : > { %v5232_v41 = vadd.f32 %v5200_v6, %v14266_v30  ;;  %v7791_v21 = vadd.f32 -1.0, %v8907_v20  ;;  %v4243_v27 = vmul.f32 %v12979_v54, %v12869_v51  ;;  %v4470_v34 = vadd.f32 %v4438_v42, %v4372_v63 }
 0x376   : > { %8910 = vpow2.f32 %v3722_v13  ;;  %v13158_v39 = vadd.f32 %v4633_v36, %v4567_v47  ;;  %v4244_v17 = vmul.f32 %v12979_v54, %v12936_v16  ;;  %v4634_v62 = vmul.f32 %v13068_v56, %v13139_v38  ;;  %v5487_v60 = vld [vmem:[#allocation2 + $0x67] sm:$0xff] }
 0x377   : > { %5264 = vst [vmem:[#allocation2 + $0x70] sm:$0xff] %v5232_v41  ;;  %v5586_v3 = vpack.c.bf16 %v5232_v41, %v13084_v24  ;;  %v4855_v24 = vsel %vm4695_vm10, %v13075_v7, %v7791_v21  ;;  %v4568_v8 = vadd.f32 %v4536_v48, %v4470_v34  ;;  %v4178_v0 = vadd.f32 %v4146_v43, %v4080_v26 }
 0x378   : > { %v13135_v12 = vpop.f32.mrf.mxu0  ;;  %v8909_v2 = vpop.eup %8908  ;;  %v4729_v35 = vmin.f32 %v13158_v39, 0.0  ;;  %v4341_v7 = vmul.f32 %v12993_v5, %v13133_v28  ;;  %v3885_v20 = vmul.f32 %v13013_v14, %v13100_v1  ;;  %v4275_v21 = vadd.f32 %v4243_v27, %v4177_v4 }
 0x379   : > { %v5073_v49 = vmin.f32 %v13135_v12, 0.0  ;;  %v13146_v57 = vpop.f32.mrf.mxu3  ;;  %v7792_v15 = vadd.f32 -1.0, %v8909_v2  ;;  %5927 = vmatmul.bf16.gmra.mxu2 %v5586_v3  ;;  %v13173_v6 = vadd.f32 %v4634_v62, %v4568_v8  ;;  %v4276_v31 = vadd.f32 %v4244_v17, %v4178_v0  ;;  %v14267_v62 = vld [vmem:[#allocation18_spill] sm:$0xff]  ;;  %v4406_v8 = vld [vmem:[#allocation2 + $0x1ef] sm:$0xff] }
 0x37a   : > { %v3661_v9 = vmin.f32 %v13146_v57, 0.0  ;;  %v4785_v13 = vmul.f32 1.442695, %v4729_v35  ;;  %v4439_v26 = vmul.f32 %v13006_v22, %v13182_v44  ;;  %v3951_v1 = vmul.f32 %v13022_v58, %v3917_v19  ;;  %v13225_v35 = vld [vmem:[#allocation2 + $0x1e9] sm:$0xff] }
 0x37b   : > { %v5111_v11 = vmul.f32 1.442695, %v5073_v49  ;;  %v4856_v59 = vsel %vm4696_vm11, %v13092_v52, %v7792_v15  ;;  %v4730_v48 = vmin.f32 %v13173_v6, 0.0  ;;  %v3952_v42 = vmul.f32 %v13022_v58, %v12936_v16 }
 0x37c   : > { %v8911_v51 = vpop.eup %8910  ;;  %v3724_v10 = vmul.f32 1.442695, %v3661_v9  ;;  %v4876_v53 = vpack.c.bf16 %v4856_v59, %v4855_v24  ;;  %v4342_v36 = vmul.f32 %v12993_v5, %v13139_v38  ;;  %v4373_v43 = vadd.f32 %v4341_v7, %v4275_v21  ;;  %v13233_v7 = vld [vmem:[#allocation2 + $0x1f1] sm:$0xff] }
 0x37d   : > { %v7758_v61 = vadd.f32 -1.0, %v8911_v51  ;;  %8912 = vpow2.f32 %v5111_v11  ;;  %v4787_v47 = vmul.f32 1.442695, %v4730_v48  ;;  %v3886_v49 = vmul.f32 %v13013_v14, %v13131_v33 }
 0x37e   : > { %8914 = vpow2.f32 %v3724_v10  ;;  %v5488_v50 = vld [vmem:[#allocation2 + $0x6f] sm:$0xff]  ;;  %5009 = vmatmul.bf16.gmra.mxu0 %v4876_v53  ;;  %vm5041_vm13 = vcmp.gt.f32.partialorder %v13135_v12, 0.0  ;;  %vm3629_vm14 = vcmp.gt.f32.partialorder %v13146_v57, 0.0  ;;  %v4049_v46 = vmul.f32 %v12912_v18, %v13133_v28 }
 0x37f   : > { %v5551_v30 = vld [vmem:[#allocation2 + $0x69] sm:$0xff]  ;;  %v5552_v41 = vld [vmem:[#allocation2 + $0x71] sm:$0xff]  ;;  %v13178_v32 = vsel %vm3628_vm12, %v13108_v55, %v7758_v61  ;;  %v13180_v25 = vpack.c.bf16 %v5488_v50, %v5487_v60  ;;  %8916 = vpow2.f32 %v4785_v13  ;;  %vm4697_vm15 = vcmp.gt.f32.partialorder %v13158_v39, 0.0 }
 0x380   : > { %v5587_v52 = vpack.c.bf16 %v5552_v41, %v5551_v30  ;;  %3820 = vst [vmem:[#allocation2 + $0x208] sm:$0xff] %v13178_v32  ;;  %v13187_v63 = vpop.f32.mrf.mxu0  ;;  %vm4698_vm0 = vcmp.gt.f32.partialorder %v13173_v6, 0.0  ;;  %8918 = vpow2.f32 %v4787_v47  ;;  %v4374_v16 = vadd.f32 %v4342_v36, %v4276_v31 }
 0x381   : > { %v5074_v55 = vmin.f32 %v13187_v63, 0.0  ;;  %5838 = vmatmul.bf16.gmra.mxu1 %v13180_v25  ;;  %v4471_v2 = vadd.f32 %v4439_v26, %v4373_v43  ;;  %vm5042_vm1 = vcmp.gt.f32.partialorder %v13187_v63, 0.0  ;;  %v3983_v33 = vadd.f32 %v3951_v1, %v3885_v20 }
 0x382   : > { %6016 = vmatmul.bf16.gmra.mxu3 %v5587_v52  ;;  %v3984_v34 = vadd.f32 %v3952_v42, %v3886_v49  ;;  %v4537_v11 = vmul.f32 %v13031_v23, %v13040_v37  ;;  %v4538_v15 = vmul.f32 %v13031_v23, %v13089_v29  ;;  %v4147_v24 = vmul.f32 %v12955_v45, %v13182_v44 }
 0x383   : > { %v8913_v40 = vpop.eup %8912  ;;  %v5113_v3 = vmul.f32 1.442695, %v5074_v55  ;;  %v4081_v0 = vadd.f32 %v4049_v46, %v3983_v33  ;;  %v4440_v59 = vmul.f32 %v13006_v22, %v4406_v8  ;;  %v4148_v19 = vmul.f32 %v12955_v45, %v4406_v8 }
 0x384   : > { %v8915_v4 = vpop.eup %8914  ;;  %v7855_v27 = vadd.f32 -1.0, %v8913_v40  ;;  %v4569_v60 = vadd.f32 %v4537_v11, %v4471_v2  ;;  %v4245_v20 = vmul.f32 %v12979_v54, %v13040_v37  ;;  %v4246_v48 = vmul.f32 %v12979_v54, %v13089_v29 }
 0x385   : > { %v7759_v9 = vadd.f32 -1.0, %v8915_v4  ;;  %8920 = vpow2.f32 %v5113_v3  ;;  %v8917_v17 = vpop.eup %8916  ;;  %v4179_v50 = vadd.f32 %v4147_v24, %v4081_v0  ;;  %v4472_v41 = vadd.f32 %v4440_v59, %v4374_v16  ;;  %v14268_v16 = vld [vmem:[#allocation20_spill] sm:$0xff] }
 0x386   : > { %v5201_v28 = vsel %vm5041_vm13, %v13135_v12, %v7855_v27  ;;  %v4050_v12 = vmul.f32 %v12912_v18, %v13139_v38  ;;  %v7793_v38 = vadd.f32 -1.0, %v8917_v17  ;;  %v8919_v30 = vpop.eup %8918  ;;  %v4636_v26 = vmul.f32 %v13068_v56, %v13233_v7 }
 0x387   : > { %v13218_v51 = vadd.f32 %v5201_v28, %v14267_v62  ;;  %v13223_v10 = vsel %vm3629_vm14, %v13146_v57, %v7759_v9  ;;  %v4635_v57 = vmul.f32 %v13068_v56, %v13225_v35  ;;  %v7794_v55 = vadd.f32 -1.0, %v8919_v30  ;;  %v4407_v33 = vld [vmem:[#allocation2 + $0x207] sm:$0xff] }
 0x388   : > { %3821 = vst [vmem:[#allocation2 + $0x210] sm:$0xff] %v13223_v10  ;;  %v13230_v61 = vpop.f32.mrf.mxu0  ;;  %v4082_v13 = vadd.f32 %v4050_v12, %v3984_v34  ;;  %v4570_v47 = vadd.f32 %v4538_v15, %v4472_v41  ;;  %v4343_v43 = vmul.f32 %v12993_v5, %v13225_v35  ;;  %v4857_v37 = vsel %vm4697_vm15, %v13158_v39, %v7793_v38  ;;  %v3919_v39 = vld [vmem:[#allocation2 + $0x1e8] sm:$0xff] }
 0x389   : > { %5265 = vst [vmem:[#allocation2 + $0x88] sm:$0xff] %v13218_v51  ;;  %v5075_v53 = vmin.f32 %v13230_v61, 0.0  ;;  %v13240_v52 = vadd.f32 %v4635_v57, %v4569_v60  ;;  %v4858_v49 = vsel %vm4698_vm0, %v13173_v6, %v7794_v55  ;;  %v4277_v40 = vadd.f32 %v4245_v20, %v4179_v50  ;;  %v14269_v20 = vld [vmem:[#allocation22_spill] sm:$0xff] }
 0x38a   : > { %v4180_v1 = vadd.f32 %v4148_v19, %v4082_v13  ;;  %v4877_v46 = vpack.c.bf16 %v4858_v49, %v4857_v37  ;;  %v13260_v4 = vadd.f32 %v4636_v26, %v4570_v47  ;;  %vm5043_vm2 = vcmp.gt.f32.partialorder %v13230_v61, 0.0 }
 0x38b   : > { %v8921_v21 = vpop.eup %8920  ;;  %v5115_v31 = vmul.f32 1.442695, %v5075_v53  ;;  %v4731_v36 = vmin.f32 %v13240_v52, 0.0  ;;  %v4375_v17 = vadd.f32 %v4343_v43, %v4277_v40  ;;  %v4344_v15 = vmul.f32 %v12993_v5, %v13233_v7 }
 0x38c   : > { %v7856_v42 = vadd.f32 -1.0, %v8921_v21  ;;  %v4278_v9 = vadd.f32 %v4246_v48, %v4180_v1  ;;  %v4732_v6 = vmin.f32 %v13260_v4, 0.0  ;;  %v3887_v24 = vmul.f32 %v13013_v14, %v13182_v44 }
 0x38d   : > { %8922 = vpow2.f32 %v5115_v31  ;;  %v4789_v27 = vmul.f32 1.442695, %v4731_v36  ;;  %v3888_v0 = vmul.f32 %v13013_v14, %v4406_v8  ;;  %v3953_v59 = vmul.f32 %v13022_v58, %v3919_v39 }
 0x38e   : > { %v5202_v3 = vsel %vm5042_vm1, %v13187_v63, %v7856_v42  ;;  %5014 = vmatmul.bf16.gmra.mxu0 %v4877_v46  ;;  %v4441_v63 = vmul.f32 %v13006_v22, %v4407_v33  ;;  %v4791_v62 = vmul.f32 1.442695, %v4732_v6  ;;  %vm4699_vm3 = vcmp.gt.f32.partialorder %v13240_v52, 0.0 }
 0x38f   : > { %v5234_v2 = vadd.f32 %v5202_v3, %v14268_v16  ;;  %8924 = vpow2.f32 %v4789_v27  ;;  %v4376_v19 = vadd.f32 %v4344_v15, %v4278_v9  ;;  %v4051_v53 = vmul.f32 %v12912_v18, %v13225_v35  ;;  %v4408_v21 = vld [vmem:[#allocation2 + $0x20f] sm:$0xff] }
 0x390   : > { %v13264_v34 = vpop.f32.mrf.mxu0  ;;  %v4473_v12 = vadd.f32 %v4441_v63, %v4375_v17  ;;  %vm4700_vm4 = vcmp.gt.f32.partialorder %v13260_v4, 0.0  ;;  %8926 = vpow2.f32 %v4791_v62  ;;  %v4539_v14 = vmul.f32 %v13031_v23, %v13178_v32  ;;  %v4603_v31 = vld [vmem:[#allocation2 + $0x209] sm:$0xff]  ;;  %v4604_v55 = vld [vmem:[#allocation2 + $0x211] sm:$0xff] }
 0x391   : > { %5266 = vst [vmem:[#allocation2 + $0x90] sm:$0xff] %v5234_v2  ;;  %v5076_v28 = vmin.f32 %v13264_v34, 0.0  ;;  %v5589_v11 = vpack.c.bf16 %v5234_v2, %v13218_v51  ;;  %v3954_v51 = vmul.f32 %v13022_v58, %v13089_v29  ;;  %vm5044_vm5 = vcmp.gt.f32.partialorder %v13264_v34, 0.0  ;;  %v5489_v29 = vld [vmem:[#allocation2 + $0x87] sm:$0xff] }
 0x392   : > { %v4540_v44 = vmul.f32 %v13031_v23, %v13223_v10  ;;  %v3985_v8 = vadd.f32 %v3953_v59, %v3887_v24  ;;  %v4571_v35 = vadd.f32 %v4539_v14, %v4473_v12  ;;  %v4052_v30 = vmul.f32 %v12912_v18, %v13233_v7  ;;  %v8356_v3 = vld [vmem:[%s14137_s5 + $0x68] sm:$0xff] }
 0x393   : > { %v8923_v60 = vpop.eup %8922  ;;  %v5117_v57 = vmul.f32 1.442695, %v5076_v28  ;;  %5932 = vmatmul.bf16.gmra.mxu2 %v5589_v11  ;;  %v3986_v13 = vadd.f32 %v3954_v51, %v3888_v0  ;;  %v4149_v41 = vmul.f32 %v12955_v45, %v4407_v33  ;;  %v4247_v1 = vmul.f32 %v12979_v54, %v13178_v32  ;;  %6322 = vmatpush.bf16.msra.mxu1 %v8356_v3  ;;  %v4409_v62 = vld [vmem:[#allocation2 + $0x227] sm:$0xff] }
 0x394   : > { %v7857_v38 = vadd.f32 -1.0, %v8923_v60  ;;  %v4083_v26 = vadd.f32 %v4051_v53, %v3985_v8  ;;  %v4442_v43 = vmul.f32 %v13006_v22, %v4408_v21  ;;  %v4637_v37 = vmul.f32 %v13068_v56, %v4603_v31  ;;  %v4410_v60 = vld [vmem:[#allocation2 + $0x22f] sm:$0xff] }
 0x395   : > { %8928 = vpow2.f32 %v5117_v57  ;;  %v8925_v50 = vpop.eup %8924  ;;  %v4150_v49 = vmul.f32 %v12955_v45, %v4408_v21  ;;  %v4084_v46 = vadd.f32 %v4052_v30, %v3986_v13  ;;  %v4345_v63 = vmul.f32 %v12993_v5, %v4603_v31  ;;  %v14270_v53 = vld [vmem:[#allocation24_spill] sm:$0xff] }
 0x396   : > { %v5203_v58 = vsel %vm5043_vm2, %v13230_v61, %v7857_v38  ;;  %v4248_v61 = vmul.f32 %v12979_v54, %v13223_v10  ;;  %v7795_v47 = vadd.f32 -1.0, %v8925_v50  ;;  %v8348_v54 = vld [vmem:[%s14137_s5 + $0x28] sm:$0xff]  ;;  %v4638_v10 = vmul.f32 %v13068_v56, %v4604_v55  ;;  %v8927_v27 = vpop.eup %8926  ;;  %v4606_v30 = vld [vmem:[#allocation2 + $0x231] sm:$0xff] }
 0x397   : > { %v13294_v48 = vadd.f32 %v5203_v58, %v14269_v20  ;;  %v4474_v45 = vadd.f32 %v4442_v43, %v4376_v19  ;;  %v13316_v2 = vadd.f32 %v4637_v37, %v4571_v35  ;;  %v4181_v9 = vadd.f32 %v4149_v41, %v4083_v26  ;;  %6233 = vmatpush.bf16.msra.mxu0 %v8348_v54  ;;  %v4605_v13 = vld [vmem:[#allocation2 + $0x229] sm:$0xff] }
 0x398   : > { %v13300_v42 = vpop.f32.mrf.mxu0  ;;  %v5490_v36 = vld [vmem:[#allocation2 + $0x8f] sm:$0xff]  ;;  %v7796_v6 = vadd.f32 -1.0, %v8927_v27  ;;  %v4182_v17 = vadd.f32 %v4150_v49, %v4084_v46  ;;  %v4859_v11 = vsel %vm4699_vm3, %v13240_v52, %v7795_v47  ;;  %v4346_v14 = vmul.f32 %v12993_v5, %v4604_v55  ;;  %v9039_v5 = vld [vmem:[#allocation2] sm:$0xff] }
 0x399   : > { %v5553_v18 = vld [vmem:[#allocation2 + $0x89] sm:$0xff]  ;;  %v5554_v7 = vld [vmem:[#allocation2 + $0x91] sm:$0xff]  ;;  %5267 = vst [vmem:[#allocation2 + $0xa8] sm:$0xff] %v13294_v48  ;;  %v5077_v40 = vmin.f32 %v13300_v42, 0.0  ;;  %v13307_v32 = vpack.c.bf16 %v5490_v36, %v5489_v29  ;;  %v4572_v15 = vadd.f32 %v4540_v44, %v4474_v45  ;;  %v4733_v24 = vmin.f32 %v13316_v2, 0.0 }
 0x39a   : > { %v5590_v16 = vpack.c.bf16 %v5554_v7, %v5553_v18  ;;  %v4860_v12 = vsel %vm4700_vm4, %v13260_v4, %v7796_v6  ;;  %v4279_v0 = vadd.f32 %v4247_v1, %v4181_v9  ;;  %v4280_v59 = vadd.f32 %v4248_v61, %v4182_v17 }
 0x39b   : > { %v8929_v33 = vpop.eup %8928  ;;  %v5119_v39 = vmul.f32 1.442695, %v5077_v40  ;;  %5843 = vmatmul.bf16.gmra.mxu1 %v13307_v32  ;;  %v4878_v19 = vpack.c.bf16 %v4860_v12, %v4859_v11  ;;  %v13330_v52 = vadd.f32 %v4638_v10, %v4572_v15  ;;  %v4793_v51 = vmul.f32 1.442695, %v4733_v24 }
 0x39c   : > { %v7858_v28 = vadd.f32 -1.0, %v8929_v33  ;;  %6021 = vmatmul.bf16.gmra.mxu3 %v5590_v16  ;;  %v4377_v44 = vadd.f32 %v4345_v63, %v4279_v0  ;;  %v4443_v8 = vmul.f32 %v13006_v22, %v4409_v62  ;;  %v4444_v58 = vmul.f32 %v13006_v22, %v4410_v60  ;;  %v8346_v63 = vld [vmem:[%s14137_s5 + $0x18] sm:$0xff] }
 0x39d   : > { %8930 = vpow2.f32 %v5119_v39  ;;  %v4734_v50 = vmin.f32 %v13330_v52, 0.0  ;;  %v4378_v35 = vadd.f32 %v4346_v14, %v4280_v59  ;;  %v4541_v21 = vmul.f32 %v9039_v5, %v13031_v23  ;;  %v14271_v23 = vld [vmem:[#allocation26_spill] sm:$0xff]  ;;  %v14272_v59 = vld [vmem:[#allocation28_spill] sm:$0xff] }
 0x39e   : > { %v5204_v57 = vsel %vm5044_vm5, %v13264_v34, %v7858_v28  ;;  %5019 = vmatmul.bf16.gmra.mxu0 %v4878_v19  ;;  %8932 = vpow2.f32 %v4793_v51  ;;  %v4475_v20 = vadd.f32 %v4443_v8, %v4377_v44  ;;  %v4639_v31 = vmul.f32 %v13068_v56, %v4605_v13 }
 0x39f   : > { %v5236_v38 = vadd.f32 %v5204_v57, %v14270_v53  ;;  %v4795_v41 = vmul.f32 1.442695, %v4734_v50  ;;  %v4476_v1 = vadd.f32 %v4444_v58, %v4378_v35  ;;  %v4640_v61 = vmul.f32 %v13068_v56, %v4606_v30  ;;  %v8345_v53 = vld [vmem:[%s14137_s5 + $0x10] sm:$0xff] }
 0x3a0   : > { %v4982_v4 = vpop.f32.mrf.mxu0  ;;  %v4573_v47 = vadd.f32 %v4541_v21, %v4475_v20  ;;  %vm5045_vm6 = vcmp.gt.f32.partialorder %v13300_v42, 0.0  ;;  %v5491_v37 = vld [vmem:[#allocation2 + $0xa7] sm:$0xff]  ;;  %vm4701_vm7 = vcmp.gt.f32.partialorder %v13316_v2, 0.0  ;;  %vm4702_vm8 = vcmp.gt.f32.partialorder %v13330_v52, 0.0 }
 0x3a1   : > { %5268 = vst [vmem:[#allocation2 + $0xb0] sm:$0xff] %v5236_v38  ;;  %v5078_v34 = vmin.f32 %v4982_v4, 0.0  ;;  %v5592_v29 = vpack.c.bf16 %v5236_v38, %v13294_v48  ;;  %8934 = vpow2.f32 %v4795_v41  ;;  %v4574_v48 = vadd.f32 %v4541_v21, %v4476_v1 }
 0x3a2   : > { %v13343_v7 = vadd.f32 %v4639_v31, %v4573_v47  ;;  %vm5046_vm9 = vcmp.gt.f32.partialorder %v4982_v4, 0.0 }
 0x3a3   : > { %v8931_v55 = vpop.eup %8930  ;;  %v5121_v26 = vmul.f32 1.442695, %v5078_v34  ;;  %5937 = vmatmul.bf16.gmra.mxu2 %v5592_v29  ;;  %v13346_v49 = vadd.f32 %v4640_v61, %v4574_v48 }
 0x3a4   : > { %v7859_v22 = vadd.f32 -1.0, %v8931_v55  ;;  %v8933_v36 = vpop.eup %8932  ;;  %v4735_v3 = vmin.f32 %v13343_v7, 0.0  ;;  %v8343_v55 = vld [vmem:[%s14137_s5] sm:$0xff]  ;;  %vm4703_vm12 = vcmp.gt.f32.partialorder %v13343_v7, 0.0 }
 0x3a5   : > { %8936 = vpow2.f32 %v5121_v26  ;;  %v7797_v27 = vadd.f32 -1.0, %v8933_v36  ;;  %v4736_v33 = vmin.f32 %v13346_v49, 0.0  ;;  %vm4704_vm11 = vcmp.gt.f32.partialorder %v13346_v49, 0.0  ;;  %v8355_v26 = vld [vmem:[%s14137_s5 + $0x60] sm:$0xff] }
 0x3a6   : > { %v5205_v18 = vsel %vm5045_vm6, %v13300_v42, %v7859_v22  ;;  %v8347_v42 = vld [vmem:[%s14137_s5 + $0x20] sm:$0xff]  ;;  %v4797_v11 = vmul.f32 1.442695, %v4735_v3  ;;  %6323 = vmatpush.bf16.msra.mxu1 %v8355_v26 }
 0x3a7   : > { %v5237_v43 = vadd.f32 %v5205_v18, %v14271_v23  ;;  %v8935_v45 = vpop.eup %8934  ;;  %6234 = vmatpush.bf16.msra.mxu0 %v8347_v42  ;;  %v4799_v15 = vmul.f32 1.442695, %v4736_v33  ;;  %v4861_v24 = vsel %vm4701_vm7, %v13316_v2, %v7797_v27  ;;  %v14274_v23 = vld [vmem:[#allocation32_spill] sm:$0xff] }
 0x3a8   : > { %v4985_v40 = vpop.f32.mrf.mxu0  ;;  %v5492_v54 = vld [vmem:[#allocation2 + $0xaf] sm:$0xff]  ;;  %v7798_v17 = vadd.f32 -1.0, %v8935_v45 }
 0x3a9   : > { %v5555_v56 = vld [vmem:[#allocation2 + $0xa9] sm:$0xff]  ;;  %v5556_v10 = vld [vmem:[#allocation2 + $0xb1] sm:$0xff]  ;;  %5269 = vst [vmem:[#allocation2 + $0xc8] sm:$0xff] %v5237_v43  ;;  %v5079_v46 = vmin.f32 %v4985_v40, 0.0  ;;  %v13349_v16 = vpack.c.bf16 %v5492_v54, %v5491_v37  ;;  %vm5047_vm10 = vcmp.gt.f32.partialorder %v4985_v40, 0.0 }
 0x3aa   : > { %v5593_v9 = vpack.c.bf16 %v5556_v10, %v5555_v56  ;;  %v4862_v62 = vsel %vm4702_vm8, %v13330_v52, %v7798_v17  ;;  %v8344_v52 = vld [vmem:[%s14137_s5 + $0x8] sm:$0xff] }
 0x3ab   : > { %v8937_v39 = vpop.eup %8936  ;;  %v5123_v6 = vmul.f32 1.442695, %v5079_v46  ;;  %5848 = vmatmul.bf16.gmra.mxu1 %v13349_v16  ;;  %v4879_v0 = vpack.c.bf16 %v4862_v62, %v4861_v24  ;;  %6235 = vmatpush.bf16.msra.mxu0 %v8346_v63  ;;  %v14275_v46 = vld [vmem:[#allocation34_spill] sm:$0xff] }
 0x3ac   : > { %v7860_v28 = vadd.f32 -1.0, %v8937_v39  ;;  %6026 = vmatmul.bf16.gmra.mxu3 %v5593_v9  ;;  %v5291_v63 = vld [vmem:[#allocation2 + $0x7] sm:$0xff] }
 0x3ad   : > { %8938 = vpow2.f32 %v5123_v6 }
 0x3ae   : > { %v5206_v12 = vsel %vm5046_vm9, %v4982_v4, %v7860_v28  ;;  %8940 = vpow2.f32 %v4799_v15  ;;  %5024 = vmatmul.bf16.gmra.mxu0 %v4879_v0  ;;  %v14273_v4 = vld [vmem:[#allocation30_spill] sm:$0xff]  ;;  %v5292_v28 = vld [vmem:[#allocation2 + $0xf] sm:$0xff] }
 0x3af   : > { %v5238_v60 = vadd.f32 %v5206_v12, %v14272_v59  ;;  %8942 = vpow2.f32 %v4797_v11  ;;  %6236 = vmatpush.bf16.msra.mxu0 %v8345_v53  ;;  %v5387_v62 = vpack.c.bf16 %v5292_v28, %v5291_v63  ;;  %v14276_v0 = vld [vmem:[#allocation36_spill] sm:$0xff] }
 0x3b0   : > { %v4987_v57 = vpop.f32.mrf.mxu0  ;;  %v5493_v34 = vld [vmem:[#allocation2 + $0xc7] sm:$0xff] }
 0x3b1   : > { %5270 = vst [vmem:[#allocation2 + $0xd0] sm:$0xff] %v5238_v60  ;;  %v5080_v19 = vmin.f32 %v4987_v57, 0.0  ;;  %v5595_v51 = vpack.c.bf16 %v5238_v60, %v5237_v43  ;;  %vm5048_vm13 = vcmp.gt.f32.partialorder %v4987_v57, 0.0 }
 0x3b3   : > { %v8939_v38 = vpop.eup %8938  ;;  %v5125_v2 = vmul.f32 1.442695, %v5080_v19  ;;  %5942 = vmatmul.bf16.gmra.mxu2 %v5595_v51  ;;  %6237 = vmatpush.bf16.msra.mxu0 %v8344_v52  ;;  %v14277_v52 = vld [vmem:[#allocation7_spill] sm:$0xff] }
 0x3b4   : > { %v8941_v14 = vpop.eup %8940  ;;  %v7861_v44 = vadd.f32 -1.0, %v8939_v38 }
 0x3b5   : > { %8944 = vpow2.f32 %v5125_v2  ;;  %v8943_v8 = vpop.eup %8942  ;;  %v7800_v58 = vadd.f32 -1.0, %v8941_v14  ;;  %v14278_v14 = vunpack.c.l.bf16 %v14277_v52 }
 0x3b6   : > { %v5207_v13 = vsel %vm5047_vm10, %v4985_v40, %v7861_v44  ;;  %v7799_v5 = vadd.f32 -1.0, %v8943_v8 }
 0x3b7   : > { %v5239_v50 = vadd.f32 %v5207_v13, %v14273_v4  ;;  %v4864_v22 = vsel %vm4704_vm11, %v13346_v49, %v7800_v58  ;;  %6238 = vmatpush.bf16.msra.mxu0 %v8343_v55 }
 0x3b8   : > { %v4990_v29 = vpop.f32.mrf.mxu0  ;;  %v5494_v35 = vld [vmem:[#allocation2 + $0xcf] sm:$0xff]  ;;  %v4863_v48 = vsel %vm4703_vm12, %v13343_v7, %v7799_v5 }
 0x3b9   : > { %v5557_v30 = vld [vmem:[#allocation2 + $0xc9] sm:$0xff]  ;;  %v5558_v41 = vld [vmem:[#allocation2 + $0xd1] sm:$0xff]  ;;  %5271 = vst [vmem:[#allocation2 + $0xe8] sm:$0xff] %v5239_v50  ;;  %v5081_v20 = vmin.f32 %v4990_v29, 0.0  ;;  %v13371_v21 = vpack.c.bf16 %v5494_v35, %v5493_v34  ;;  %v4880_v18 = vpack.c.bf16 %v4864_v22, %v4863_v48  ;;  %vm5049_vm14 = vcmp.gt.f32.partialorder %v4990_v29, 0.0 }
 0x3ba   : > { %v5596_v31 = vpack.c.bf16 %v5558_v41, %v5557_v30  ;;  %v8354_v41 = vld [vmem:[%s14137_s5 + $0x58] sm:$0xff] }
 0x3bb   : > { %v8945_v1 = vpop.eup %8944  ;;  %v5127_v61 = vmul.f32 1.442695, %v5081_v20  ;;  %5853 = vmatmul.bf16.gmra.mxu1 %v13371_v21 }
 0x3bc   : > { %v7862_v47 = vadd.f32 -1.0, %v8945_v1  ;;  %6031 = vmatmul.bf16.gmra.mxu3 %v5596_v31  ;;  %v5294_v1 = vld [vmem:[#allocation2 + $0x2f] sm:$0xff]  ;;  %6324 = vmatpush.bf16.msra.mxu1 %v8354_v41 }
 0x3bd   : > { %8946 = vpow2.f32 %v5127_v61 }
 0x3be   : > { %v5208_v36 = vsel %vm5048_vm13, %v4987_v57, %v7862_v47  ;;  %5029 = vmatmul.bf16.gmra.mxu0 %v4880_v18  ;;  %v5293_v47 = vld [vmem:[#allocation2 + $0x27] sm:$0xff]  ;;  %v14279_v18 = vld [vmem:[#allocation9_spill] sm:$0xff] }
 0x3bf   : > { %v5240_v43 = vadd.f32 %v5208_v36, %v14274_v23  ;;  %v5390_v36 = vpack.c.bf16 %v5294_v1, %v5293_v47  ;;  %v14280_v23 = vunpack.c.l.bf16 %v14279_v18 }
 0x3c0   : > { %v4992_v37 = vpop.f32.mrf.mxu0  ;;  %v5495_v42 = vld [vmem:[#allocation2 + $0xe7] sm:$0xff] }
 0x3c1   : > { %5272 = vst [vmem:[#allocation2 + $0xf0] sm:$0xff] %v5240_v43  ;;  %v5082_v49 = vmin.f32 %v4992_v37, 0.0  ;;  %v5598_v40 = vpack.c.bf16 %v5240_v43, %v5239_v50  ;;  %vm5050_vm15 = vcmp.gt.f32.partialorder %v4992_v37, 0.0 }
 0x3c3   : > { %v8947_v54 = vpop.eup %8946  ;;  %v5129_v56 = vmul.f32 1.442695, %v5082_v49  ;;  %5947 = vmatmul.bf16.gmra.mxu2 %v5598_v40 }
 0x3c4   : > { %v7863_v10 = vadd.f32 -1.0, %v8947_v54 }
 0x3c5   : > { %8948 = vpow2.f32 %v5129_v56 }
 0x3c6   : > { %v5209_v3 = vsel %vm5049_vm14, %v4990_v29, %v7863_v10 }
 0x3c7   : > { %v5241_v27 = vadd.f32 %v5209_v3, %v14275_v46 }
 0x3c8   : > { %v4995_v7 = vpop.f32.mrf.mxu0  ;;  %v5496_v45 = vld [vmem:[#allocation2 + $0xef] sm:$0xff] }
 0x3c9   : > { %v5559_v9 = vld [vmem:[#allocation2 + $0xe9] sm:$0xff]  ;;  %v5560_v33 = vld [vmem:[#allocation2 + $0xf1] sm:$0xff]  ;;  %5273 = vst [vmem:[#allocation2 + $0x108] sm:$0xff] %v5241_v27  ;;  %v5083_v39 = vmin.f32 %v4995_v7, 0.0  ;;  %v13386_v6 = vpack.c.bf16 %v5496_v45, %v5495_v42  ;;  %vm5051_vm0 = vcmp.gt.f32.partialorder %v4995_v7, 0.0 }
 0x3ca   : > { %v5599_v17 = vpack.c.bf16 %v5560_v33, %v5559_v9 }
 0x3cb   : > { %v8949_v11 = vpop.eup %8948  ;;  %v5131_v15 = vmul.f32 1.442695, %v5083_v39  ;;  %5858 = vmatmul.bf16.gmra.mxu1 %v13386_v6 }
 0x3cc   : > { %v7864_v24 = vadd.f32 -1.0, %v8949_v11  ;;  %6036 = vmatmul.bf16.gmra.mxu3 %v5599_v17 }
 0x3cd   : > { %8950 = vpow2.f32 %v5131_v15 }
 0x3ce   : > { %v5210_v12 = vsel %vm5050_vm15, %v4992_v37, %v7864_v24  ;;  %6239 = vmatmul.bf16.vlgmr.msra.gmra.mxu0 %v5387_v62 }
 0x3cf   : > { %v5242_v59 = vadd.f32 %v5210_v12, %v14276_v0  ;;  %v5829_v30 = vpop.f32.mrf.mxu1  ;;  %v5296_v0 = vld [vmem:[#allocation2 + $0x4f] sm:$0xff] }
 0x3d0   : > { %v4997_v60 = vpop.f32.mrf.mxu0  ;;  %v5497_v8 = vld [vmem:[#allocation2 + $0x107] sm:$0xff] }
 0x3d1   : > { %5274 = vst [vmem:[#allocation2 + $0x110] sm:$0xff] %v5242_v59  ;;  %v5084_v57 = vmin.f32 %v4997_v60, 0.0  ;;  %v5601_v19 = vpack.c.bf16 %v5242_v59, %v5241_v27  ;;  %vm5052_vm1 = vcmp.gt.f32.partialorder %v4997_v60, 0.0 }
 0x3d3   : > { %v8951_v51 = vpop.eup %8950  ;;  %v5133_v53 = vmul.f32 1.442695, %v5084_v57  ;;  %5952 = vmatmul.bf16.gmra.mxu2 %v5601_v19  ;;  %v5918_v20 = vpop.f32.mrf.mxu2 }
 0x3d4   : > { %v7865_v38 = vadd.f32 -1.0, %v8951_v51  ;;  %v5919_v5 = vadd.f32 %v5918_v20, %v5829_v30 }
 0x3d5   : > { %8952 = vpow2.f32 %v5133_v53 }
 0x3d6   : > { %v5211_v2 = vsel %vm5051_vm0, %v4995_v7, %v7865_v38  ;;  %v14281_v7 = vld [vmem:[#allocation11_spill] sm:$0xff]  ;;  %v14283_v38 = vld [vmem:[#allocation13_spill] sm:$0xff] }
 0x3d7   : > { %v5243_v44 = vadd.f32 %v5211_v2, %v14278_v14  ;;  %v13402_v3 = vpop.f32.mrf.mxu1  ;;  %v14282_v45 = vunpack.c.l.bf16 %v14281_v7  ;;  %v14284_v2 = vunpack.c.l.bf16 %v14283_v38  ;;  %v14289_v38 = vld [vmem:[#allocation19_spill] sm:$0xff] }
 0x3d8   : > { %v5000_v13 = vpop.f32.mrf.mxu0  ;;  %v5498_v4 = vld [vmem:[#allocation2 + $0x10f] sm:$0xff]  ;;  %v6007_v31 = vpop.f32.mrf.mxu3 }
 0x3d9   : > { %v5561_v50 = vld [vmem:[#allocation2 + $0x109] sm:$0xff]  ;;  %v5562_v58 = vld [vmem:[#allocation2 + $0x111] sm:$0xff]  ;;  %5275 = vst [vmem:[#allocation2 + $0x128] sm:$0xff] %v5243_v44  ;;  %v5085_v34 = vmin.f32 %v5000_v13, 0.0  ;;  %v13392_v29 = vpack.c.bf16 %v5498_v4, %v5497_v8  ;;  %v13398_v22 = vadd.f32 %v6007_v31, %v5919_v5  ;;  %vm5053_vm2 = vcmp.gt.f32.partialorder %v5000_v13, 0.0 }
 0x3da   : > { %v5602_v35 = vpack.c.bf16 %v5562_v58, %v5561_v50  ;;  %v14285_v5 = vld [vmem:[#allocation15_spill] sm:$0xff] }
 0x3db   : > { %v8953_v55 = vpop.eup %8952  ;;  %v5135_v26 = vmul.f32 1.442695, %v5085_v34  ;;  %5863 = vmatmul.bf16.gmra.mxu1 %v13392_v29  ;;  %v13404_v46 = vpop.f32.mrf.mxu2  ;;  %v14286_v31 = vunpack.c.l.bf16 %v14285_v5 }
 0x3dc   : > { %v7866_v61 = vadd.f32 -1.0, %v8953_v55  ;;  %6041 = vmatmul.bf16.gmra.mxu3 %v5602_v35 }
 0x3dd   : > { %8954 = vpow2.f32 %v5135_v26 }
 0x3de   : > { %v5212_v48 = vsel %vm5052_vm1, %v4997_v60, %v7866_v61  ;;  %6244 = vmatmul.bf16.gmra.mxu0 %v5390_v36  ;;  %v5295_v60 = vld [vmem:[#allocation2 + $0x47] sm:$0xff] }
 0x3df   : > { %v5244_v43 = vadd.f32 %v5212_v48, %v14280_v23  ;;  %v13413_v19 = vpack.c.bf16 %v5296_v0, %v5295_v60 }
 0x3e0   : > { %v5002_v37 = vpop.f32.mrf.mxu0  ;;  %v13406_v42 = vpop.f32.mrf.mxu3  ;;  %v5499_v33 = vld [vmem:[#allocation2 + $0x127] sm:$0xff] }
 0x3e1   : > { %5276 = vst [vmem:[#allocation2 + $0x130] sm:$0xff] %v5244_v43  ;;  %v5086_v49 = vmin.f32 %v5002_v37, 0.0  ;;  %v5604_v40 = vpack.c.bf16 %v5244_v43, %v5243_v44  ;;  %vm5054_vm3 = vcmp.gt.f32.partialorder %v5002_v37, 0.0 }
 0x3e3   : > { %v8955_v54 = vpop.eup %8954  ;;  %v5137_v56 = vmul.f32 1.442695, %v5086_v49  ;;  %5957 = vmatmul.bf16.gmra.mxu2 %v5604_v40 }
 0x3e4   : > { %v7867_v10 = vadd.f32 -1.0, %v8955_v54  ;;  %v5834_v51 = vpop.f32.mrf.mxu1 }
 0x3e5   : > { %8956 = vpow2.f32 %v5137_v56  ;;  %v8353_v56 = vld [vmem:[%s14137_s5 + $0x50] sm:$0xff] }
 0x3e6   : > { %v5213_v27 = vsel %vm5053_vm2, %v5000_v13, %v7867_v10  ;;  %6325 = vmatpush.bf16.msra.mxu1 %v8353_v56 }
 0x3e7   : > { %v5245_v9 = vadd.f32 %v5213_v27, %v14282_v45  ;;  %v5923_v53 = vpop.f32.mrf.mxu2  ;;  %v14287_v27 = vld [vmem:[#allocation17_spill] sm:$0xff] }
 0x3e8   : > { %v5005_v39 = vpop.f32.mrf.mxu0  ;;  %v5500_v17 = vld [vmem:[#allocation2 + $0x12f] sm:$0xff]  ;;  %v5924_v14 = vadd.f32 %v5923_v53, %v5834_v51  ;;  %v14288_v7 = vunpack.c.l.bf16 %v14287_v27 }
 0x3e9   : > { %v5563_v63 = vld [vmem:[#allocation2 + $0x129] sm:$0xff]  ;;  %v5564_v28 = vld [vmem:[#allocation2 + $0x131] sm:$0xff]  ;;  %5277 = vst [vmem:[#allocation2 + $0x148] sm:$0xff] %v5245_v9  ;;  %v5087_v11 = vmin.f32 %v5005_v39, 0.0  ;;  %v13410_v15 = vpack.c.bf16 %v5500_v17, %v5499_v33  ;;  %vm5055_vm4 = vcmp.gt.f32.partialorder %v5005_v39, 0.0 }
 0x3ea   : > { %v5605_v24 = vpack.c.bf16 %v5564_v28, %v5563_v63 }
 0x3eb   : > { %v8957_v62 = vpop.eup %8956  ;;  %v5139_v12 = vmul.f32 1.442695, %v5087_v11  ;;  %5868 = vmatmul.bf16.gmra.mxu1 %v13410_v15  ;;  %v6012_v8 = vpop.f32.mrf.mxu3 }
 0x3ec   : > { %v7868_v59 = vadd.f32 -1.0, %v8957_v62  ;;  %6046 = vmatmul.bf16.gmra.mxu3 %v5605_v24  ;;  %v13418_v50 = vadd.f32 %v6012_v8, %v5924_v14  ;;  %v13420_v41 = vpop.f32.mrf.mxu1 }
 0x3ed   : > { %8958 = vpow2.f32 %v5139_v12 }
 0x3ee   : > { %v5214_v57 = vsel %vm5054_vm3, %v5002_v37, %v7868_v59  ;;  %6249 = vmatmul.bf16.gmra.mxu0 %v13413_v19 }
 0x3ef   : > { %v5246_v52 = vadd.f32 %v5214_v57, %v14284_v2  ;;  %v13422_v20 = vpop.f32.mrf.mxu2  ;;  %v14290_v2 = vunpack.c.l.bf16 %v14289_v38 }
 0x3f0   : > { %v5007_v44 = vpop.f32.mrf.mxu0  ;;  %v5501_v26 = vld [vmem:[#allocation2 + $0x147] sm:$0xff] }
 0x3f1   : > { %5278 = vst [vmem:[#allocation2 + $0x150] sm:$0xff] %v5246_v52  ;;  %v5088_v13 = vmin.f32 %v5007_v44, 0.0  ;;  %v5607_v4 = vpack.c.bf16 %v5246_v52, %v5245_v9  ;;  %vm5056_vm5 = vcmp.gt.f32.partialorder %v5007_v44, 0.0 }
 0x3f3   : > { %v8959_v58 = vpop.eup %8958  ;;  %v5141_v34 = vmul.f32 1.442695, %v5088_v13  ;;  %5962 = vmatmul.bf16.gmra.mxu2 %v5607_v4  ;;  %v13428_v18 = vpop.f32.mrf.mxu3 }
 0x3f4   : > { %v7869_v35 = vadd.f32 -1.0, %v8959_v58 }
 0x3f5   : > { %8960 = vpow2.f32 %v5141_v34 }
 0x3f6   : > { %v5215_v30 = vsel %vm5055_vm4, %v5005_v39, %v7869_v35 }
 0x3f7   : > { %v5247_v55 = vadd.f32 %v5215_v30, %v14286_v31  ;;  %v14291_v30 = vld [vmem:[#allocation21_spill] sm:$0xff] }
 0x3f8   : > { %v5502_v1 = vld [vmem:[#allocation2 + $0x14f] sm:$0xff]  ;;  %v14292_v5 = vunpack.c.l.bf16 %v14291_v30 }
 0x3f9   : > { %v5565_v61 = vld [vmem:[#allocation2 + $0x149] sm:$0xff]  ;;  %v5566_v47 = vld [vmem:[#allocation2 + $0x151] sm:$0xff]  ;;  %5279 = vst [vmem:[#allocation2 + $0x168] sm:$0xff] %v5247_v55  ;;  %v13426_v48 = vpack.c.bf16 %v5502_v1, %v5501_v26 }
 0x3fa   : > { %v5608_v36 = vpack.c.bf16 %v5566_v47, %v5565_v61 }
 0x3fb   : > { %v8961_v23 = vpop.eup %8960  ;;  %5873 = vmatmul.bf16.gmra.mxu1 %v13426_v48  ;;  %v5010_v37 = vpop.f32.mrf.mxu0 }
 0x3fc   : > { %v7870_v43 = vadd.f32 -1.0, %v8961_v23  ;;  %6051 = vmatmul.bf16.gmra.mxu3 %v5608_v36  ;;  %v5089_v40 = vmin.f32 %v5010_v37, 0.0  ;;  %v5928_v10 = vpop.f32.mrf.mxu2  ;;  %vm5057_vm6 = vcmp.gt.f32.partialorder %v5010_v37, 0.0 }
 0x3fe   : > { %v5216_v49 = vsel %vm5056_vm5, %v5007_v44, %v7870_v43  ;;  %v5839_v54 = vpop.f32.mrf.mxu1  ;;  %v5143_v33 = vmul.f32 1.442695, %v5089_v40  ;;  %6254 = vmatmul.bf16.gmra.mxu0 %v13180_v25  ;;  %v14293_v40 = vld [vmem:[#allocation23_spill] sm:$0xff] }
 0x3ff   : > { %v5248_v45 = vadd.f32 %v5216_v49, %v14288_v7  ;;  %v5929_v9 = vadd.f32 %v5928_v10, %v5839_v54  ;;  %v14294_v54 = vunpack.c.l.bf16 %v14293_v40 }
 0x400   : > { %8962 = vpow2.f32 %v5143_v33  ;;  %v5503_v24 = vld [vmem:[#allocation2 + $0x167] sm:$0xff] }
 0x401   : > { %5280 = vst [vmem:[#allocation2 + $0x170] sm:$0xff] %v5248_v45  ;;  %v5610_v39 = vpack.c.bf16 %v5248_v45, %v5247_v55 }
 0x403   : > { %5967 = vmatmul.bf16.gmra.mxu2 %v5610_v39  ;;  %v5012_v63 = vpop.f32.mrf.mxu0 }
 0x404   : > { %v5090_v11 = vmin.f32 %v5012_v63, 0.0  ;;  %v13444_v14 = vpop.f32.mrf.mxu2  ;;  %vm5058_vm7 = vcmp.gt.f32.partialorder %v5012_v63, 0.0 }
 0x405   : > { %v6017_v17 = vpop.f32.mrf.mxu3 }
 0x406   : > { %v13437_v28 = vadd.f32 %v6017_v17, %v5929_v9  ;;  %v8963_v62 = vpop.eup %8962  ;;  %v5145_v12 = vmul.f32 1.442695, %v5090_v11  ;;  %v13446_v13 = vpop.f32.mrf.mxu1  ;;  %v8352_v11 = vld [vmem:[%s14137_s5 + $0x48] sm:$0xff] }
 0x407   : > { %v7871_v57 = vadd.f32 -1.0, %v8963_v62  ;;  %6326 = vmatpush.bf16.msra.mxu1 %v8352_v11  ;;  %v14299_v11 = vld [vmem:[#allocation29_spill] sm:$0xff] }
 0x408   : > { %v5504_v0 = vld [vmem:[#allocation2 + $0x16f] sm:$0xff]  ;;  %8964 = vpow2.f32 %v5145_v12 }
 0x409   : > { %v5567_v59 = vld [vmem:[#allocation2 + $0x169] sm:$0xff]  ;;  %v5568_v60 = vld [vmem:[#allocation2 + $0x171] sm:$0xff]  ;;  %v13439_v51 = vpack.c.bf16 %v5504_v0, %v5503_v24  ;;  %v5217_v53 = vsel %vm5057_vm6, %v5010_v37, %v7871_v57 }
 0x40a   : > { %v5611_v25 = vpack.c.bf16 %v5568_v60, %v5567_v59  ;;  %v5249_v52 = vadd.f32 %v5217_v53, %v14290_v2  ;;  %v14295_v53 = vld [vmem:[#allocation25_spill] sm:$0xff] }
 0x40b   : > { %5878 = vmatmul.bf16.gmra.mxu1 %v13439_v51  ;;  %v5015_v44 = vpop.f32.mrf.mxu0  ;;  %v14296_v38 = vunpack.c.l.bf16 %v14295_v53  ;;  %v8398_v53 = vld [vmem:[%s14137_s5 + $0x1b8] sm:$0xff] }
 0x40c   : > { %6056 = vmatmul.bf16.gmra.mxu3 %v5611_v25  ;;  %5281 = vst [vmem:[#allocation2 + $0x188] sm:$0xff] %v5249_v52  ;;  %v5091_v8 = vmin.f32 %v5015_v44, 0.0  ;;  %vm5059_vm8 = vcmp.gt.f32.partialorder %v5015_v44, 0.0 }
 0x40d   : > { %v13451_v26 = vpop.f32.mrf.mxu3  ;;  %6835 = vmatpush.bf16.msrb.mxu3 %v8398_v53 }
 0x40e   : > { %v8965_v4 = vpop.eup %8964  ;;  %v5147_v58 = vmul.f32 1.442695, %v5091_v8  ;;  %6259 = vmatmul.bf16.gmra.mxu0 %v13307_v32 }
 0x40f   : > { %v7872_v34 = vadd.f32 -1.0, %v8965_v4 }
 0x410   : > { %8966 = vpow2.f32 %v5147_v58 }
 0x411   : > { %v5218_v35 = vsel %vm5058_vm7, %v5012_v63, %v7872_v34 }
 0x412   : > { %v5250_v31 = vadd.f32 %v5218_v35, %v14292_v5 }
 0x413   : > { %v5017_v55 = vpop.f32.mrf.mxu0  ;;  %v5505_v10 = vld [vmem:[#allocation2 + $0x187] sm:$0xff] }
 0x414   : > { %5282 = vst [vmem:[#allocation2 + $0x190] sm:$0xff] %v5250_v31  ;;  %v5092_v1 = vmin.f32 %v5017_v55, 0.0  ;;  %v5613_v61 = vpack.c.bf16 %v5250_v31, %v5249_v52  ;;  %vm5060_vm9 = vcmp.gt.f32.partialorder %v5017_v55, 0.0 }
 0x416   : > { %v5933_v47 = vpop.f32.mrf.mxu2  ;;  %v8967_v36 = vpop.eup %8966  ;;  %v5149_v23 = vmul.f32 1.442695, %v5092_v1  ;;  %5972 = vmatmul.bf16.gmra.mxu2 %v5613_v61  ;;  %v14297_v1 = vld [vmem:[#allocation27_spill] sm:$0xff] }
 0x417   : > { %v7873_v37 = vadd.f32 -1.0, %v8967_v36  ;;  %v14298_v61 = vunpack.c.l.bf16 %v14297_v1 }
 0x418   : > { %v5844_v43 = vpop.f32.mrf.mxu1  ;;  %8968 = vpow2.f32 %v5149_v23 }
 0x419   : > { %v5934_v32 = vadd.f32 %v5933_v47, %v5844_v43  ;;  %v5219_v49 = vsel %vm5059_vm8, %v5015_v44, %v7873_v37 }
 0x41a   : > { %v5251_v56 = vadd.f32 %v5219_v49, %v14294_v54 }
 0x41b   : > { %v5020_v27 = vpop.f32.mrf.mxu0  ;;  %v5506_v7 = vld [vmem:[#allocation2 + $0x18f] sm:$0xff] }
 0x41c   : > { %v5569_v45 = vld [vmem:[#allocation2 + $0x189] sm:$0xff]  ;;  %v5570_v9 = vld [vmem:[#allocation2 + $0x191] sm:$0xff]  ;;  %5283 = vst [vmem:[#allocation2 + $0x1a8] sm:$0xff] %v5251_v56  ;;  %v5093_v33 = vmin.f32 %v5020_v27, 0.0  ;;  %v13455_v39 = vpack.c.bf16 %v5506_v7, %v5505_v10  ;;  %vm5061_vm10 = vcmp.gt.f32.partialorder %v5020_v27, 0.0 }
 0x41d   : > { %v5614_v17 = vpack.c.bf16 %v5570_v9, %v5569_v45 }
 0x41e   : > { %v5935_v63 = vpop.f32.mrf.mxu2  ;;  %v8969_v62 = vpop.eup %8968  ;;  %v5151_v12 = vmul.f32 1.442695, %v5093_v33  ;;  %5883 = vmatmul.bf16.gmra.mxu1 %v13455_v39  ;;  %6264 = vmatmul.bf16.gmra.mxu0 %v13349_v16 }
 0x41f   : > { %v6022_v24 = vpop.f32.mrf.mxu3  ;;  %6061 = vmatmul.bf16.gmra.mxu3 %v5614_v17  ;;  %v7874_v60 = vadd.f32 -1.0, %v8969_v62 }
 0x420   : > { %v13461_v0 = vadd.f32 %v6022_v24, %v5934_v32  ;;  %v5846_v59 = vpop.f32.mrf.mxu1  ;;  %8970 = vpow2.f32 %v5151_v12  ;;  %v14300_v24 = vunpack.c.l.bf16 %v14299_v11  ;;  %v8363_v11 = vld [vmem:[%s14137_s5 + $0xa0] sm:$0xff] }
 0x421   : > { %v5936_v57 = vadd.f32 %v5935_v63, %v5846_v59  ;;  %v5220_v25 = vsel %vm5060_vm9, %v5017_v55, %v7874_v60 }
 0x422   : > { %v5252_v2 = vadd.f32 %v5220_v25, %v14296_v38  ;;  %v8351_v25 = vld [vmem:[%s14137_s5 + $0x40] sm:$0xff] }
 0x423   : > { %v5022_v52 = vpop.f32.mrf.mxu0  ;;  %v5507_v36 = vld [vmem:[#allocation2 + $0x1a7] sm:$0xff]  ;;  %6327 = vmatpush.bf16.msra.mxu1 %v8351_v25 }
 0x424   : > { %5284 = vst [vmem:[#allocation2 + $0x1b0] sm:$0xff] %v5252_v2  ;;  %v5094_v44 = vmin.f32 %v5022_v52, 0.0  ;;  %v5616_v8 = vpack.c.bf16 %v5252_v2, %v5251_v56  ;;  %vm5062_vm11 = vcmp.gt.f32.partialorder %v5022_v52, 0.0 }
 0x426   : > { %v5938_v4 = vpop.f32.mrf.mxu2  ;;  %v8971_v34 = vpop.eup %8970  ;;  %v5153_v35 = vmul.f32 1.442695, %v5094_v44  ;;  %5977 = vmatmul.bf16.gmra.mxu2 %v5616_v8 }
 0x427   : > { %v6024_v58 = vpop.f32.mrf.mxu3  ;;  %v7875_v16 = vadd.f32 -1.0, %v8971_v34  ;;  %v8365_v34 = vld [vmem:[%s14137_s5 + $0xb0] sm:$0xff] }
 0x428   : > { %v13466_v30 = vadd.f32 %v6024_v58, %v5936_v57  ;;  %v5849_v5 = vpop.f32.mrf.mxu1  ;;  %8972 = vpow2.f32 %v5153_v35  ;;  %v8397_v35 = vld [vmem:[%s14137_s5 + $0x1b0] sm:$0xff] }
 0x429   : > { %v5939_v31 = vadd.f32 %v5938_v4, %v5849_v5  ;;  %v5221_v55 = vsel %vm5061_vm10, %v5020_v27, %v7875_v16  ;;  %v14301_v16 = vld [vmem:[#allocation31_spill] sm:$0xff]  ;;  %6836 = vmatpush.bf16.msrb.mxu3 %v8397_v35 }
 0x42a   : > { %v5253_v47 = vadd.f32 %v5221_v55, %v14298_v61  ;;  %v8364_v61 = vld [vmem:[%s14137_s5 + $0xa8] sm:$0xff] }
 0x42b   : > { %v5025_v23 = vpop.f32.mrf.mxu0  ;;  %v5508_v43 = vld [vmem:[#allocation2 + $0x1af] sm:$0xff] }
 0x42c   : > { %v5571_v37 = vld [vmem:[#allocation2 + $0x1a9] sm:$0xff]  ;;  %v5572_v32 = vld [vmem:[#allocation2 + $0x1b1] sm:$0xff]  ;;  %5285 = vst [vmem:[#allocation2 + $0x1c8] sm:$0xff] %v5253_v47  ;;  %v5095_v49 = vmin.f32 %v5025_v23, 0.0  ;;  %v13470_v40 = vpack.c.bf16 %v5508_v43, %v5507_v36  ;;  %vm5063_vm12 = vcmp.gt.f32.partialorder %v5025_v23, 0.0 }
 0x42d   : > { %v5617_v54 = vpack.c.bf16 %v5572_v32, %v5571_v37 }
 0x42e   : > { %v5940_v56 = vpop.f32.mrf.mxu2  ;;  %v8973_v7 = vpop.eup %8972  ;;  %v5155_v45 = vmul.f32 1.442695, %v5095_v49  ;;  %5888 = vmatmul.bf16.gmra.mxu1 %v13470_v40  ;;  %6269 = vmatmul.bf16.gmra.mxu0 %v13371_v21  ;;  %v8366_v21 = vld [vmem:[%s14137_s5 + $0xb8] sm:$0xff] }
 0x42f   : > { %v6027_v10 = vpop.f32.mrf.mxu3  ;;  %6066 = vmatmul.bf16.gmra.mxu3 %v5617_v54  ;;  %v7876_v33 = vadd.f32 -1.0, %v8973_v7  ;;  %6409 = vmatpush.bf16.msrb.mxu2 %v8366_v21 }
 0x430   : > { %v13473_v27 = vadd.f32 %v6027_v10, %v5939_v31  ;;  %v5851_v9 = vpop.f32.mrf.mxu1  ;;  %8974 = vpow2.f32 %v5155_v45  ;;  %v14302_v31 = vunpack.c.l.bf16 %v14301_v16  ;;  %v8393_v16 = vld [vmem:[%s14137_s5 + $0x190] sm:$0xff] }
 0x431   : > { %v5941_v17 = vadd.f32 %v5940_v56, %v5851_v9  ;;  %v5222_v63 = vsel %vm5062_vm11, %v5022_v52, %v7876_v33  ;;  %v8396_v56 = vld [vmem:[%s14137_s5 + $0x1a8] sm:$0xff] }
 0x432   : > { %v5254_v62 = vadd.f32 %v5222_v63, %v14300_v24  ;;  %6837 = vmatpush.bf16.msrb.mxu3 %v8396_v56  ;;  %v8395_v24 = vld [vmem:[%s14137_s5 + $0x1a0] sm:$0xff] }
 0x433   : > { %v5027_v12 = vpop.f32.mrf.mxu0  ;;  %v5509_v1 = vld [vmem:[#allocation2 + $0x1c7] sm:$0xff]  ;;  %6410 = vmatpush.bf16.msrb.mxu2 %v8365_v34 }
 0x434   : > { %5286 = vst [vmem:[#allocation2 + $0x1d0] sm:$0xff] %v5254_v62  ;;  %v5096_v59 = vmin.f32 %v5027_v12, 0.0  ;;  %v5619_v60 = vpack.c.bf16 %v5254_v62, %v5253_v47  ;;  %vm5064_vm13 = vcmp.gt.f32.partialorder %v5027_v12, 0.0 }
 0x436   : > { %v5943_v57 = vpop.f32.mrf.mxu2  ;;  %v8975_v2 = vpop.eup %8974  ;;  %v5157_v52 = vmul.f32 1.442695, %v5096_v59  ;;  %5982 = vmatmul.bf16.gmra.mxu2 %v5619_v60  ;;  %v14303_v59 = vld [vmem:[#allocation33_spill] sm:$0xff]  ;;  %6838 = vmatpush.bf16.msrb.mxu3 %v8395_v24 }
 0x437   : > { %v6029_v38 = vpop.f32.mrf.mxu3  ;;  %v7877_v4 = vadd.f32 -1.0, %v8975_v2  ;;  %6411 = vmatpush.bf16.msrb.mxu2 %v8364_v61  ;;  %v14304_v60 = vunpack.c.l.bf16 %v14303_v59  ;;  %v8394_v2 = vld [vmem:[%s14137_s5 + $0x198] sm:$0xff]  ;;  %v8359_v59 = vld [vmem:[%s14137_s5 + $0x80] sm:$0xff] }
 0x438   : > { %v13487_v44 = vadd.f32 %v6029_v38, %v5941_v17  ;;  %v5854_v8 = vpop.f32.mrf.mxu1  ;;  %8976 = vpow2.f32 %v5157_v52 }
 0x439   : > { %v5944_v58 = vadd.f32 %v5943_v57, %v5854_v8  ;;  %v5223_v5 = vsel %vm5063_vm12, %v5025_v23, %v7877_v4 }
 0x43a   : > { %v5255_v55 = vadd.f32 %v5223_v5, %v14302_v31  ;;  %v8361_v5 = vld [vmem:[%s14137_s5 + $0x90] sm:$0xff]  ;;  %6839 = vmatpush.bf16.msrb.mxu3 %v8394_v2 }
 0x43b   : > { %v5030_v47 = vpop.f32.mrf.mxu0  ;;  %v5510_v36 = vld [vmem:[#allocation2 + $0x1cf] sm:$0xff]  ;;  %6412 = vmatpush.bf16.msrb.mxu2 %v8363_v11 }
 0x43c   : > { %v5573_v43 = vld [vmem:[#allocation2 + $0x1c9] sm:$0xff]  ;;  %v5574_v37 = vld [vmem:[#allocation2 + $0x1d1] sm:$0xff]  ;;  %5287 = vst [vmem:[#allocation2 + $0x1e8] sm:$0xff] %v5255_v55  ;;  %v5097_v32 = vmin.f32 %v5030_v47, 0.0  ;;  %v13500_v49 = vpack.c.bf16 %v5510_v36, %v5509_v1  ;;  %vm5065_vm14 = vcmp.gt.f32.partialorder %v5030_v47, 0.0 }
 0x43d   : > { %v5620_v54 = vpack.c.bf16 %v5574_v37, %v5573_v43  ;;  %v8360_v43 = vld [vmem:[%s14137_s5 + $0x88] sm:$0xff] }
 0x43e   : > { %v5945_v23 = vpop.f32.mrf.mxu2  ;;  %v8977_v7 = vpop.eup %8976  ;;  %v5159_v45 = vmul.f32 1.442695, %v5097_v32  ;;  %5893 = vmatmul.bf16.gmra.mxu1 %v13500_v49  ;;  %6274 = vmatmul.bf16.gmra.mxu0 %v13386_v6  ;;  %v8362_v6 = vld [vmem:[%s14137_s5 + $0x98] sm:$0xff] }
 0x43f   : > { %v6032_v10 = vpop.f32.mrf.mxu3  ;;  %6071 = vmatmul.bf16.gmra.mxu3 %v5620_v54  ;;  %v7878_v17 = vadd.f32 -1.0, %v8977_v7  ;;  %6413 = vmatpush.bf16.msrb.mxu2 %v8362_v6 }
 0x440   : > { %v13506_v9 = vadd.f32 %v6032_v10, %v5944_v58  ;;  %v5856_v33 = vpop.f32.mrf.mxu1  ;;  %8978 = vpow2.f32 %v5159_v45  ;;  %6840 = vmatpush.bf16.msrb.mxu3 %v8393_v16  ;;  %v8392_v45 = vld [vmem:[%s14137_s5 + $0x188] sm:$0xff] }
 0x441   : > { %v5946_v63 = vadd.f32 %v5945_v23, %v5856_v33  ;;  %v5224_v62 = vsel %vm5064_vm13, %v5027_v12, %v7878_v17  ;;  %v8406_v33 = vld [vmem:[%s14137_s5 + $0x1f8] sm:$0xff] }
 0x442   : > { %v5256_v57 = vadd.f32 %v5224_v62, %v14304_v60  ;;  %v8414_v60 = vld [vmem:[%s14137_s5 + $0x238] sm:$0xff]  ;;  %6924 = vmatpush.bf16.msrb.mxu0 %v8406_v33 }
 0x443   : > { %v5032_v25 = vpop.f32.mrf.mxu0  ;;  %v5511_v36 = vld [vmem:[#allocation2 + $0x1e7] sm:$0xff]  ;;  %6414 = vmatpush.bf16.msrb.mxu2 %v8361_v5  ;;  %7013 = vmatpush.bf16.msrb.mxu1 %v8414_v60 }
 0x444   : > { %5288 = vst [vmem:[#allocation2 + $0x1f0] sm:$0xff] %v5256_v57  ;;  %v5098_v21 = vmin.f32 %v5032_v25, 0.0  ;;  %v5622_v53 = vpack.c.bf16 %v5256_v57, %v5255_v55  ;;  %v14305_v55 = vld [vmem:[#allocation35_spill] sm:$0xff]  ;;  %vm5066_vm15 = vcmp.gt.f32.partialorder %v5032_v25, 0.0  ;;  %6841 = vmatpush.bf16.msrb.mxu3 %v8392_v45  ;;  %v8391_v57 = vld [vmem:[%s14137_s5 + $0x180] sm:$0xff] }
 0x445   : > { %v14306_v1 = vunpack.c.l.bf16 %v14305_v55 }
 0x446   : > { %v5948_v38 = vpop.f32.mrf.mxu2  ;;  %v8979_v12 = vpop.eup %8978  ;;  %v5161_v8 = vmul.f32 1.442695, %v5098_v21  ;;  %5987 = vmatmul.bf16.gmra.mxu2 %v5622_v53 }
 0x447   : > { %v6034_v52 = vpop.f32.mrf.mxu3  ;;  %v7879_v34 = vadd.f32 -1.0, %v8979_v12  ;;  %6415 = vmatpush.bf16.msrb.mxu2 %v8360_v43 }
 0x448   : > { %v13523_v4 = vadd.f32 %v6034_v52, %v5946_v63  ;;  %v5859_v58 = vpop.f32.mrf.mxu1  ;;  %8980 = vpow2.f32 %v5161_v8  ;;  %6842 = vmatpush.bf16.msrb.mxu3 %v8391_v57  ;;  %v8405_v57 = vld [vmem:[%s14137_s5 + $0x1f0] sm:$0xff] }
 0x449   : > { %v5949_v35 = vadd.f32 %v5948_v38, %v5859_v58  ;;  %v5225_v31 = vsel %vm5065_vm14, %v5030_v47, %v7879_v34  ;;  %6925 = vmatpush.bf16.msrb.mxu0 %v8405_v57 }
 0x44a   : > { %v5257_v61 = vadd.f32 %v5225_v31, %v14306_v1 }
 0x44b   : > { %v6240_v37 = vpop.f32.mrf.mxu0  ;;  %v5512_v32 = vld [vmem:[#allocation2 + $0x1ef] sm:$0xff]  ;;  %6416 = vmatpush.bf16.msrb.mxu2 %v8359_v59 }
 0x44c   : > { %v5575_v54 = vld [vmem:[#allocation2 + $0x1e9] sm:$0xff]  ;;  %v5576_v23 = vld [vmem:[#allocation2 + $0x1f1] sm:$0xff]  ;;  %5289 = vst [vmem:[#allocation2 + $0x208] sm:$0xff] %v5257_v61  ;;  %v13537_v56 = vadd.f32 %v6240_v37, %v13398_v22  ;;  %v13539_v10 = vpack.c.bf16 %v5512_v32, %v5511_v36 }
 0x44d   : > { %v5623_v47 = vpack.c.bf16 %v5576_v23, %v5575_v54  ;;  %v5355_v23 = vld [vmem:[#allocation2 + $0x9] sm:$0xff] }
 0x44e   : > { %v5950_v7 = vpop.f32.mrf.mxu2  ;;  %v8981_v63 = vpop.eup %8980  ;;  %5898 = vmatmul.bf16.gmra.mxu1 %v13539_v10  ;;  %6279 = vmatmul.bf16.gmra.mxu0 %v13392_v29  ;;  %v14307_v29 = vld [vmem:[#allocation37_spill] sm:$0xff] }
 0x44f   : > { %v6037_v17 = vpop.f32.mrf.mxu3  ;;  %6076 = vmatmul.bf16.gmra.mxu3 %v5623_v47  ;;  %v7880_v24 = vadd.f32 -1.0, %v8981_v63  ;;  %v14308_v21 = vunpack.c.l.bf16 %v14307_v29  ;;  %v5356_v47 = vld [vmem:[#allocation2 + $0x11] sm:$0xff] }
 0x450   : > { %v13548_v22 = vadd.f32 %v6037_v17, %v5949_v35  ;;  %v5861_v11 = vpop.f32.mrf.mxu1 }
 0x451   : > { %v5951_v62 = vadd.f32 %v5950_v7, %v5861_v11  ;;  %v5226_v6 = vsel %vm5066_vm15, %v5032_v25, %v7880_v24  ;;  %v5389_v7 = vpack.c.bf16 %v5356_v47, %v5355_v23  ;;  %v9040_v24 = vld [vmem:[#allocation2] sm:$0xff] }
 0x452   : > { %v5258_v53 = vadd.f32 %v5226_v6, %v14308_v21 }
 0x453   : > { %v13562_v38 = vpop.f32.mrf.mxu0  ;;  %v5513_v35 = vld [vmem:[#allocation2 + $0x207] sm:$0xff] }
 0x454   : > { %5290 = vst [vmem:[#allocation2 + $0x210] sm:$0xff] %v5258_v53  ;;  %v5625_v2 = vpack.c.bf16 %v5258_v53, %v5257_v61 }
 0x456   : > { %v5953_v52 = vpop.f32.mrf.mxu2  ;;  %5992 = vmatmul.bf16.gmra.mxu2 %v5625_v2  ;;  %v5357_v2 = vld [vmem:[#allocation2 + $0x29] sm:$0xff] }
 0x457   : > { %v6039_v12 = vpop.f32.mrf.mxu3 }
 0x458   : > { %v13564_v8 = vadd.f32 %v6039_v12, %v5951_v62  ;;  %v5864_v58 = vpop.f32.mrf.mxu1  ;;  %v5388_v62 = vpack.c.bf16 %v9040_v24, %v9040_v24 }
 0x459   : > { %v5954_v34 = vadd.f32 %v5953_v52, %v5864_v58  ;;  %v5358_v52 = vld [vmem:[#allocation2 + $0x31] sm:$0xff] }
 0x45a   : > { %v5392_v58 = vpack.c.bf16 %v5358_v52, %v5357_v2  ;;  %v6502_v2 = vld [vmem:[#allocation2 + $0x87] sm:$0xff] }
 0x45b   : > { %v6245_v5 = vpop.f32.mrf.mxu0  ;;  %v5514_v25 = vld [vmem:[#allocation2 + $0x20f] sm:$0xff] }
 0x45c   : > { %v5577_v16 = vld [vmem:[#allocation2 + $0x209] sm:$0xff]  ;;  %v5578_v31 = vld [vmem:[#allocation2 + $0x211] sm:$0xff]  ;;  %v13567_v55 = vadd.f32 %v6245_v5, %v13418_v50  ;;  %v5624_v1 = vpack.c.bf16 %v5514_v25, %v5513_v35 }
 0x45d   : > { %v5626_v36 = vpack.c.bf16 %v5578_v31, %v5577_v16  ;;  %v6501_v16 = vld [vmem:[#allocation2 + $0x6f] sm:$0xff] }
 0x45e   : > { %v5955_v43 = vpop.f32.mrf.mxu2  ;;  %5903 = vmatmul.bf16.gmra.mxu1 %v5624_v1  ;;  %6284 = vmatmul.bf16.gmra.mxu0 %v13410_v15  ;;  %v5325_v1 = vld [vmem:[#allocation2 + $0x28] sm:$0xff] }
 0x45f   : > { %v6042_v61 = vpop.f32.mrf.mxu3  ;;  %6081 = vmatmul.bf16.gmra.mxu3 %v5626_v36  ;;  %v6500_v36 = vld [vmem:[#allocation2 + $0x67] sm:$0xff] }
 0x460   : > { %v13569_v37 = vadd.f32 %v6042_v61, %v5954_v34  ;;  %v5866_v32 = vpop.f32.mrf.mxu1 }
 0x461   : > { %v5956_v54 = vadd.f32 %v5955_v43, %v5866_v32  ;;  %v6597_v32 = vpack.c.bf16 %v6501_v16, %v6500_v36 }
 0x463   : > { %v13572_v45 = vpop.f32.mrf.mxu0 }
 0x466   : > { %v5958_v33 = vpop.f32.mrf.mxu2  ;;  %6417 = vmatmul.bf16.vlgmr.msrb.gmra.mxu2 %v5389_v7 }
 0x467   : > { %v6044_v50 = vpop.f32.mrf.mxu3 }
 0x468   : > { %v13574_v17 = vadd.f32 %v6044_v50, %v5956_v54  ;;  %v5869_v63 = vpop.f32.mrf.mxu1  ;;  %v5359_v50 = vld [vmem:[#allocation2 + $0x49] sm:$0xff] }
 0x469   : > { %v5959_v11 = vadd.f32 %v5958_v33, %v5869_v63  ;;  %v5360_v63 = vld [vmem:[#allocation2 + $0x51] sm:$0xff] }
 0x46b   : > { %v6250_v59 = vpop.f32.mrf.mxu0 }
 0x46c   : > { %v13577_v60 = vadd.f32 %v6250_v59, %v13437_v28  ;;  %v8413_v28 = vld [vmem:[%s14137_s5 + $0x230] sm:$0xff] }
 0x46d   : > { %7014 = vmatpush.bf16.msrb.mxu1 %v8413_v28  ;;  %v5327_v28 = vld [vmem:[#allocation2 + $0x48] sm:$0xff] }
 0x46e   : > { %v5960_v15 = vpop.f32.mrf.mxu2  ;;  %6328 = vmatmul.bf16.vlgmr.msra.gmra.mxu1 %v5388_v62  ;;  %6289 = vmatmul.bf16.gmra.mxu0 %v13426_v48  ;;  %v5326_v48 = vld [vmem:[#allocation2 + $0x30] sm:$0xff] }
 0x46f   : > { %v6047_v6 = vpop.f32.mrf.mxu3  ;;  %6843 = vmatmul.bf16.vlgmr.msrb.gmra.mxu3 %v13413_v19  ;;  %v5391_v61 = vpack.c.bf16 %v5326_v48, %v5325_v1  ;;  %v5362_v1 = vld [vmem:[#allocation2 + $0x71] sm:$0xff] }
 0x470   : > { %v13583_v29 = vadd.f32 %v6047_v6, %v5959_v11  ;;  %v5871_v21 = vpop.f32.mrf.mxu1 }
 0x471   : > { %v5961_v53 = vadd.f32 %v5960_v15, %v5871_v21  ;;  %v5328_v21 = vld [vmem:[#allocation2 + $0x50] sm:$0xff] }
 0x473   : > { %v13589_v12 = vpop.f32.mrf.mxu0 }
 0x476   : > { %v5963_v34 = vpop.f32.mrf.mxu2  ;;  %6422 = vmatmul.bf16.gmra.mxu2 %v5392_v58 }
 0x477   : > { %v6049_v35 = vpop.f32.mrf.mxu3 }
 0x478   : > { %v13591_v19 = vadd.f32 %v6049_v35, %v5961_v53  ;;  %v5874_v5 = vpop.f32.mrf.mxu1  ;;  %v6503_v53 = vld [vmem:[#allocation2 + $0x8f] sm:$0xff] }
 0x479   : > { %v5964_v25 = vadd.f32 %v5963_v34, %v5874_v5  ;;  %v6600_v58 = vpack.c.bf16 %v6503_v53, %v6502_v2  ;;  %v8404_v35 = vld [vmem:[%s14137_s5 + $0x1e8] sm:$0xff]  ;;  %v8402_v53 = vld [vmem:[%s14137_s5 + $0x1d8] sm:$0xff] }
 0x47a   : > { %6926 = vmatpush.bf16.msrb.mxu0 %v8404_v35  ;;  %v5363_v2 = vld [vmem:[#allocation2 + $0x89] sm:$0xff] }
 0x47b   : > { %v6255_v31 = vpop.f32.mrf.mxu0 }
 0x47c   : > { %v13594_v43 = vadd.f32 %v6255_v31, %v13461_v0  ;;  %v13602_v0 = vpack.c.bf16 %v5360_v63, %v5359_v50  ;;  %v5361_v31 = vld [vmem:[#allocation2 + $0x69] sm:$0xff] }
 0x47d   : > { %v5329_v63 = vld [vmem:[#allocation2 + $0x68] sm:$0xff] }
 0x47e   : > { %v5965_v54 = vpop.f32.mrf.mxu2  ;;  %6333 = vmatmul.bf16.gmra.mxu1 %v5391_v61  ;;  %6294 = vmatmul.bf16.gmra.mxu0 %v13439_v51 }
 0x47f   : > { %v6052_v23 = vpop.f32.mrf.mxu3  ;;  %6848 = vmatmul.bf16.gmra.mxu3 %v6597_v32  ;;  %v13625_v32 = vpack.c.bf16 %v5362_v1, %v5361_v31  ;;  %v5332_v1 = vld [vmem:[#allocation2 + $0x90] sm:$0xff] }
 0x480   : > { %v13596_v47 = vadd.f32 %v6052_v23, %v5964_v25  ;;  %v5876_v7 = vpop.f32.mrf.mxu1 }
 0x481   : > { %v5966_v33 = vadd.f32 %v5965_v54, %v5876_v7  ;;  %v6505_v7 = vld [vmem:[#allocation2 + $0xaf] sm:$0xff] }
 0x483   : > { %v6257_v11 = vpop.f32.mrf.mxu0 }
 0x484   : > { %v13600_v24 = vadd.f32 %v6257_v11, %v13466_v30  ;;  %v13610_v30 = vpack.c.bf16 %v5328_v21, %v5327_v28  ;;  %v6504_v11 = vld [vmem:[#allocation2 + $0xa7] sm:$0xff] }
 0x485   : > { %v8403_v21 = vld [vmem:[%s14137_s5 + $0x1e0] sm:$0xff] }
 0x486   : > { %v5968_v62 = vpop.f32.mrf.mxu2  ;;  %6427 = vmatmul.bf16.gmra.mxu2 %v13602_v0  ;;  %6927 = vmatpush.bf16.msrb.mxu0 %v8403_v21  ;;  %v8411_v21 = vld [vmem:[%s14137_s5 + $0x220] sm:$0xff] }
 0x487   : > { %v6054_v59 = vpop.f32.mrf.mxu3 }
 0x488   : > { %v13604_v15 = vadd.f32 %v6054_v59, %v5966_v33  ;;  %v5879_v57 = vpop.f32.mrf.mxu1 }
 0x489   : > { %v5969_v6 = vadd.f32 %v5968_v62, %v5879_v57  ;;  %v6603_v57 = vpack.c.bf16 %v6505_v7, %v6504_v11 }
 0x48a   : > { %6928 = vmatpush.bf16.msrb.mxu0 %v8402_v53 }
 0x48b   : > { %v6260_v51 = vpop.f32.mrf.mxu0 }
 0x48c   : > { %v13608_v52 = vadd.f32 %v6260_v51, %v13473_v27  ;;  %v8412_v27 = vld [vmem:[%s14137_s5 + $0x228] sm:$0xff] }
 0x48d   : > { %7015 = vmatpush.bf16.msrb.mxu1 %v8412_v27  ;;  %v8400_v27 = vld [vmem:[%s14137_s5 + $0x1c8] sm:$0xff] }
 0x48e   : > { %6338 = vmatmul.bf16.gmra.mxu1 %v13610_v30  ;;  %v5970_v48 = vpop.f32.mrf.mxu2  ;;  %6299 = vmatmul.bf16.gmra.mxu0 %v13455_v39  ;;  %v5330_v39 = vld [vmem:[#allocation2 + $0x70] sm:$0xff] }
 0x48f   : > { %v6057_v34 = vpop.f32.mrf.mxu3  ;;  %6853 = vmatmul.bf16.gmra.mxu3 %v6600_v58  ;;  %v13630_v59 = vpack.c.bf16 %v5330_v39, %v5329_v63  ;;  %v5364_v58 = vld [vmem:[#allocation2 + $0x91] sm:$0xff] }
 0x490   : > { %v13616_v5 = vadd.f32 %v6057_v34, %v5969_v6  ;;  %v5881_v25 = vpop.f32.mrf.mxu1 }
 0x491   : > { %v5971_v16 = vadd.f32 %v5970_v48, %v5881_v25  ;;  %v13645_v48 = vpack.c.bf16 %v5364_v58, %v5363_v2  ;;  %v5366_v2 = vld [vmem:[#allocation2 + $0xb1] sm:$0xff]  ;;  %7016 = vmatpush.bf16.msrb.mxu1 %v8411_v21 }
 0x493   : > { %v6262_v36 = vpop.f32.mrf.mxu0  ;;  %14309 = vst [vmem:[#allocation38_spill] sm:$0xff] %v13645_v48 }
 0x494   : > { %v13623_v61 = vadd.f32 %v6262_v36, %v13487_v44  ;;  %v6507_v36 = vld [vmem:[#allocation2 + $0xcf] sm:$0xff] }
 0x496   : > { %6432 = vmatmul.bf16.gmra.mxu2 %v13625_v32 }
 0x497   : > { %v6059_v54 = vpop.f32.mrf.mxu3 }
 0x498   : > { %v13627_v23 = vadd.f32 %v6059_v54, %v5971_v16 }
 0x499   : > { %v5973_v33 = vpop.f32.mrf.mxu2 }
 0x49b   : > { %v5884_v50 = vpop.f32.mrf.mxu1  ;;  %v6265_v62 = vpop.f32.mrf.mxu0 }
 0x49c   : > { %v5974_v6 = vadd.f32 %v5973_v33, %v5884_v50  ;;  %v13633_v44 = vadd.f32 %v6265_v62, %v13506_v9  ;;  %v6506_v33 = vld [vmem:[#allocation2 + $0xc7] sm:$0xff] }
 0x49d   : > { %v6606_v11 = vpack.c.bf16 %v6507_v36, %v6506_v33 }
 0x49e   : > { %6343 = vmatmul.bf16.gmra.mxu1 %v13630_v59  ;;  %6304 = vmatmul.bf16.gmra.mxu0 %v13470_v40  ;;  %v8401_v40 = vld [vmem:[%s14137_s5 + $0x1d0] sm:$0xff] }
 0x49f   : > { %6858 = vmatmul.bf16.gmra.mxu3 %v6603_v57  ;;  %6929 = vmatpush.bf16.msrb.mxu0 %v8401_v40 }
 0x4a1   : > { %v5975_v28 = vpop.f32.mrf.mxu2 }
 0x4a2   : > { %v6062_v51 = vpop.f32.mrf.mxu3 }
 0x4a3   : > { %v13643_v9 = vadd.f32 %v6062_v51, %v5974_v6  ;;  %v5886_v34 = vpop.f32.mrf.mxu1  ;;  %v6267_v35 = vpop.f32.mrf.mxu0  ;;  %6930 = vmatpush.bf16.msrb.mxu0 %v8400_v27  ;;  %v8399_v6 = vld [vmem:[%s14137_s5 + $0x1c0] sm:$0xff]  ;;  %v5334_v27 = vld [vmem:[#allocation2 + $0xb0] sm:$0xff] }
 0x4a4   : > { %v5976_v25 = vadd.f32 %v5975_v28, %v5886_v34  ;;  %v13648_v16 = vadd.f32 %v6267_v35, %v13523_v4  ;;  %v5331_v4 = vld [vmem:[#allocation2 + $0x88] sm:$0xff] }
 0x4a5   : > { %v13659_v63 = vpack.c.bf16 %v5332_v1, %v5331_v4  ;;  %v5365_v28 = vld [vmem:[#allocation2 + $0xa9] sm:$0xff] }
 0x4a6   : > { %6437 = vmatmul.bf16.gmra.mxu2 %v13645_v48  ;;  %v6508_v4 = vld [vmem:[#allocation2 + $0xe7] sm:$0xff] }
 0x4a7   : > { %6931 = vmatpush.bf16.msrb.mxu0 %v8399_v6 }
 0x4a9   : > { %v5978_v54 = vpop.f32.mrf.mxu2 }
 0x4aa   : > { %v6064_v31 = vpop.f32.mrf.mxu3 }
 0x4ab   : > { %v13657_v39 = vadd.f32 %v6064_v31, %v5976_v25  ;;  %v5889_v7 = vpop.f32.mrf.mxu1  ;;  %v6270_v50 = vpop.f32.mrf.mxu0  ;;  %v13674_v25 = vpack.c.bf16 %v5366_v2, %v5365_v28  ;;  %v6509_v31 = vld [vmem:[#allocation2 + $0xef] sm:$0xff] }
 0x4ac   : > { %v5979_v62 = vadd.f32 %v5978_v54, %v5889_v7  ;;  %v13662_v57 = vadd.f32 %v6270_v50, %v13548_v22  ;;  %v5333_v7 = vld [vmem:[#allocation2 + $0xa8] sm:$0xff] }
 0x4ad   : > { %14310 = vst [vmem:[#allocation45_spill] sm:$0xff] %v13674_v25  ;;  %v13682_v50 = vpack.c.bf16 %v5334_v27, %v5333_v7  ;;  %v5336_v27 = vld [vmem:[#allocation2 + $0xd0] sm:$0xff]  ;;  %v5335_v7 = vld [vmem:[#allocation2 + $0xc8] sm:$0xff] }
 0x4ae   : > { %6348 = vmatmul.bf16.gmra.mxu1 %v13659_v63  ;;  %6309 = vmatmul.bf16.gmra.mxu0 %v13500_v49 }
 0x4af   : > { %6863 = vmatmul.bf16.gmra.mxu3 %v6606_v11  ;;  %v6609_v11 = vpack.c.bf16 %v6509_v31, %v6508_v4  ;;  %v6511_v31 = vld [vmem:[#allocation2 + $0x10f] sm:$0xff]  ;;  %v6510_v4 = vld [vmem:[#allocation2 + $0x107] sm:$0xff] }
 0x4b1   : > { %v5980_v51 = vpop.f32.mrf.mxu2 }
 0x4b2   : > { %v6067_v53 = vpop.f32.mrf.mxu3 }
 0x4b3   : > { %v13672_v22 = vadd.f32 %v6067_v53, %v5979_v62  ;;  %v5891_v58 = vpop.f32.mrf.mxu1  ;;  %v6272_v34 = vpop.f32.mrf.mxu0  ;;  %v5367_v53 = vld [vmem:[#allocation2 + $0xc9] sm:$0xff] }
 0x4b4   : > { %v5981_v35 = vadd.f32 %v5980_v51, %v5891_v58  ;;  %v13677_v40 = vadd.f32 %v6272_v34, %v13564_v8  ;;  %v5368_v51 = vld [vmem:[#allocation2 + $0xd1] sm:$0xff] }
 0x4b6   : > { %6442 = vmatmul.bf16.gmra.mxu2 %v13674_v25 }
 0x4b9   : > { %v5983_v1 = vpop.f32.mrf.mxu2 }
 0x4ba   : > { %v6069_v49 = vpop.f32.mrf.mxu3 }
 0x4bb   : > { %v13680_v36 = vadd.f32 %v6069_v49, %v5981_v35  ;;  %v5894_v54 = vpop.f32.mrf.mxu1  ;;  %v6275_v33 = vpop.f32.mrf.mxu0  ;;  %v13691_v35 = vpack.c.bf16 %v5368_v51, %v5367_v53 }
 0x4bc   : > { %v5984_v62 = vadd.f32 %v5983_v1, %v5894_v54  ;;  %v13685_v6 = vadd.f32 %v6275_v33, %v13569_v37 }
 0x4bd   : > { %14311 = vst [vmem:[#allocation39_spill] sm:$0xff] %v13691_v35 }
 0x4be   : > { %6353 = vmatmul.bf16.gmra.mxu1 %v13682_v50  ;;  %6314 = vmatmul.bf16.gmra.mxu0 %v13539_v10 }
 0x4bf   : > { %6868 = vmatmul.bf16.gmra.mxu3 %v6609_v11  ;;  %v13699_v11 = vpack.c.bf16 %v5336_v27, %v5335_v7  ;;  %v6513_v7 = vld [vmem:[#allocation2 + $0x12f] sm:$0xff] }
 0x4c1   : > { %v5985_v21 = vpop.f32.mrf.mxu2 }
 0x4c2   : > { %v6072_v8 = vpop.f32.mrf.mxu3 }
 0x4c3   : > { %v13689_v28 = vadd.f32 %v6072_v8, %v5984_v62  ;;  %v5896_v2 = vpop.f32.mrf.mxu1  ;;  %v6277_v58 = vpop.f32.mrf.mxu0  ;;  %v6612_v62 = vpack.c.bf16 %v6511_v31, %v6510_v4 }
 0x4c4   : > { %v5986_v34 = vadd.f32 %v5985_v21, %v5896_v2  ;;  %v13694_v49 = vadd.f32 %v6277_v58, %v13574_v17  ;;  %v8410_v17 = vld [vmem:[%s14137_s5 + $0x218] sm:$0xff]  ;;  %v5369_v2 = vld [vmem:[#allocation2 + $0xe9] sm:$0xff] }
 0x4c5   : > { %v5370_v58 = vld [vmem:[#allocation2 + $0xf1] sm:$0xff]  ;;  %7017 = vmatpush.bf16.msrb.mxu1 %v8410_v17  ;;  %v5337_v17 = vld [vmem:[#allocation2 + $0xe8] sm:$0xff] }
 0x4c6   : > { %6447 = vmatmul.bf16.gmra.mxu2 %v13691_v35  ;;  %v13711_v31 = vpack.c.bf16 %v5370_v58, %v5369_v2 }
 0x4c8   : > { %14312 = vst [vmem:[#allocation41_spill] sm:$0xff] %v13711_v31 }
 0x4c9   : > { %v5988_v10 = vpop.f32.mrf.mxu2 }
 0x4ca   : > { %v6074_v37 = vpop.f32.mrf.mxu3 }
 0x4cb   : > { %v13697_v1 = vadd.f32 %v6074_v37, %v5986_v34  ;;  %v5899_v54 = vpop.f32.mrf.mxu1  ;;  %v6280_v33 = vpop.f32.mrf.mxu0 }
 0x4cc   : > { %v5989_v8 = vadd.f32 %v5988_v10, %v5899_v54  ;;  %v13702_v21 = vadd.f32 %v6280_v33, %v13583_v29  ;;  %v5338_v54 = vld [vmem:[#allocation2 + $0xf0] sm:$0xff] }
 0x4cd   : > { %v13719_v35 = vpack.c.bf16 %v5338_v54, %v5337_v17 }
 0x4ce   : > { %6358 = vmatmul.bf16.gmra.mxu1 %v13699_v11  ;;  %6932 = vmatmul.bf16.vlgmr.msrb.gmra.mxu0 %v13610_v30 }
 0x4cf   : > { %6873 = vmatmul.bf16.gmra.mxu3 %v6612_v62 }
 0x4d1   : > { %v5990_v51 = vpop.f32.mrf.mxu2 }
 0x4d2   : > { %v6077_v53 = vpop.f32.mrf.mxu3 }
 0x4d3   : > { %v13709_v34 = vadd.f32 %v6077_v53, %v5989_v8  ;;  %v5901_v37 = vpop.f32.mrf.mxu1  ;;  %v6282_v27 = vpop.f32.mrf.mxu0  ;;  %v6512_v8 = vld [vmem:[#allocation2 + $0x127] sm:$0xff] }
 0x4d4   : > { %v5991_v29 = vadd.f32 %v5990_v51, %v5901_v37  ;;  %v13714_v10 = vadd.f32 %v6282_v27, %v13591_v19  ;;  %v6615_v51 = vpack.c.bf16 %v6513_v7, %v6512_v8  ;;  %v5371_v27 = vld [vmem:[#allocation2 + $0x109] sm:$0xff] }
 0x4d6   : > { %6452 = vmatmul.bf16.gmra.mxu2 %v13711_v31 }
 0x4d9   : > { %v5993_v4 = vpop.f32.mrf.mxu2 }
 0x4da   : > { %v6079_v30 = vpop.f32.mrf.mxu3 }
 0x4db   : > { %v13717_v33 = vadd.f32 %v6079_v30, %v5991_v29  ;;  %v5904_v62 = vpop.f32.mrf.mxu1  ;;  %v6285_v53 = vpop.f32.mrf.mxu0  ;;  %v5372_v29 = vld [vmem:[#allocation2 + $0x111] sm:$0xff] }
 0x4dc   : > { %v5994_v2 = vadd.f32 %v5993_v4, %v5904_v62  ;;  %v13722_v58 = vadd.f32 %v6285_v53, %v13596_v47  ;;  %v13728_v17 = vpack.c.bf16 %v5372_v29, %v5371_v27  ;;  %v5340_v4 = vld [vmem:[#allocation2 + $0x110] sm:$0xff] }
 0x4dd   : > { %v6515_v62 = vld [vmem:[#allocation2 + $0x14f] sm:$0xff] }
 0x4de   : > { %6363 = vmatmul.bf16.gmra.mxu1 %v13719_v35  ;;  %6937 = vmatmul.bf16.gmra.mxu0 %v13630_v59 }
 0x4df   : > { %6878 = vmatmul.bf16.gmra.mxu3 %v6615_v51  ;;  %v5339_v51 = vld [vmem:[#allocation2 + $0x108] sm:$0xff] }
 0x4e1   : > { %v5995_v37 = vpop.f32.mrf.mxu2 }
 0x4e2   : > { %v6082_v19 = vpop.f32.mrf.mxu3 }
 0x4e3   : > { %v13726_v30 = vadd.f32 %v6082_v19, %v5994_v2  ;;  %v5906_v31 = vpop.f32.mrf.mxu1  ;;  %v6287_v25 = vpop.f32.mrf.mxu0  ;;  %v6514_v2 = vld [vmem:[#allocation2 + $0x147] sm:$0xff] }
 0x4e4   : > { %v5996_v54 = vadd.f32 %v5995_v37, %v5906_v31  ;;  %v13731_v7 = vadd.f32 %v6287_v25, %v13604_v15  ;;  %v13737_v31 = vpack.c.bf16 %v5340_v4, %v5339_v51  ;;  %v6618_v37 = vpack.c.bf16 %v6515_v62, %v6514_v2 }
 0x4e5   : > { %v5921_v25 = vadd.f32 %v13404_v46, %v13402_v3 }
 0x4e6   : > { %6457 = vmatmul.bf16.gmra.mxu2 %v13728_v17 }
 0x4e7   : > { %v6010_v29 = vadd.f32 %v13406_v42, %v5921_v25  ;;  %v6517_v42 = vld [vmem:[#allocation2 + $0x16f] sm:$0xff] }
 0x4e9   : > { %v6418_v59 = vpop.f32.mrf.mxu2  ;;  %v6243_v4 = vadd.f32 %v13562_v38, %v6010_v29 }
 0x4ea   : > { %v6084_v47 = vpop.f32.mrf.mxu3 }
 0x4eb   : > { %v13734_v8 = vadd.f32 %v6084_v47, %v5996_v54  ;;  %v6329_v53 = vpop.f32.mrf.mxu1  ;;  %v6290_v19 = vpop.f32.mrf.mxu0  ;;  %v5373_v47 = vld [vmem:[#allocation2 + $0x129] sm:$0xff] }
 0x4ec   : > { %v6330_v48 = vadd.f32 %v6329_v53, %v13537_v56  ;;  %v13740_v15 = vadd.f32 %v6290_v19, %v13616_v5  ;;  %v8409_v56 = vld [vmem:[%s14137_s5 + $0x210] sm:$0xff]  ;;  %v5341_v19 = vld [vmem:[#allocation2 + $0x128] sm:$0xff] }
 0x4ed   : > { %v5374_v5 = vld [vmem:[#allocation2 + $0x131] sm:$0xff]  ;;  %7018 = vmatpush.bf16.msrb.mxu1 %v8409_v56 }
 0x4ee   : > { %6368 = vmatmul.bf16.gmra.mxu1 %v13737_v31  ;;  %v13745_v27 = vadd.f32 %v6418_v59, %v6330_v48  ;;  %6942 = vmatmul.bf16.gmra.mxu0 %v13659_v63  ;;  %v13753_v53 = vpack.c.bf16 %v5374_v5, %v5373_v47  ;;  %v5342_v59 = vld [vmem:[#allocation2 + $0x130] sm:$0xff] }
 0x4ef   : > { %6883 = vmatmul.bf16.gmra.mxu3 %v6618_v37  ;;  %v6516_v37 = vld [vmem:[#allocation2 + $0x167] sm:$0xff]  ;;  %v13762_v56 = vpack.c.bf16 %v5342_v59, %v5341_v19 }
 0x4f0   : > { %v6621_v29 = vpack.c.bf16 %v6517_v42, %v6516_v37  ;;  %v5343_v19 = vld [vmem:[#allocation2 + $0x148] sm:$0xff] }
 0x4f1   : > { %v6420_v54 = vpop.f32.mrf.mxu2  ;;  %v6518_v37 = vld [vmem:[#allocation2 + $0x187] sm:$0xff] }
 0x4f3   : > { %v6331_v3 = vpop.f32.mrf.mxu1  ;;  %v6292_v46 = vpop.f32.mrf.mxu0 }
 0x4f4   : > { %v6332_v62 = vadd.f32 %v6331_v3, %v6243_v4  ;;  %v13756_v48 = vadd.f32 %v6292_v46, %v13627_v23  ;;  %v5926_v23 = vadd.f32 %v13422_v20, %v13420_v41  ;;  %v5376_v3 = vld [vmem:[#allocation2 + $0x151] sm:$0xff] }
 0x4f6   : > { %v13758_v63 = vadd.f32 %v6420_v54, %v6332_v62  ;;  %6462 = vmatmul.bf16.gmra.mxu2 %v13753_v53  ;;  %v6015_v5 = vadd.f32 %v13428_v18, %v5926_v23 }
 0x4f8   : > { %v6248_v46 = vadd.f32 %v13572_v45, %v6015_v5 }
 0x4f9   : > { %v6423_v51 = vpop.f32.mrf.mxu2 }
 0x4fb   : > { %v6334_v2 = vpop.f32.mrf.mxu1  ;;  %v6295_v25 = vpop.f32.mrf.mxu0 }
 0x4fc   : > { %v6335_v38 = vadd.f32 %v6334_v2, %v13567_v55  ;;  %v13765_v47 = vadd.f32 %v6295_v25, %v13643_v9  ;;  %v5375_v55 = vld [vmem:[#allocation2 + $0x149] sm:$0xff] }
 0x4fd   : > { %v13775_v42 = vpack.c.bf16 %v5376_v3, %v5375_v55  ;;  %v5377_v3 = vld [vmem:[#allocation2 + $0x169] sm:$0xff] }
 0x4fe   : > { %6373 = vmatmul.bf16.gmra.mxu1 %v13762_v56  ;;  %v13770_v54 = vadd.f32 %v6423_v51, %v6335_v38  ;;  %6947 = vmatmul.bf16.gmra.mxu0 %v13682_v50  ;;  %v5344_v50 = vld [vmem:[#allocation2 + $0x150] sm:$0xff] }
 0x4ff   : > { %6888 = vmatmul.bf16.gmra.mxu3 %v6621_v29  ;;  %v6519_v51 = vld [vmem:[#allocation2 + $0x18f] sm:$0xff]  ;;  %v13784_v38 = vpack.c.bf16 %v5344_v50, %v5343_v19 }
 0x500   : > { %v6624_v29 = vpack.c.bf16 %v6519_v51, %v6518_v37  ;;  %v5346_v50 = vld [vmem:[#allocation2 + $0x170] sm:$0xff]  ;;  %v13808_v37 = vpop.f32.mrf.mxu3 }
 0x501   : > { %v6425_v4 = vpop.f32.mrf.mxu2 }
 0x503   : > { %v6336_v62 = vpop.f32.mrf.mxu1  ;;  %v6297_v9 = vpop.f32.mrf.mxu0 }
 0x504   : > { %v6337_v59 = vadd.f32 %v6336_v62, %v6248_v46  ;;  %v13778_v41 = vadd.f32 %v6297_v9, %v13657_v39  ;;  %v5931_v39 = vadd.f32 %v13444_v14, %v13446_v13 }
 0x506   : > { %v13780_v20 = vadd.f32 %v6425_v4, %v6337_v59  ;;  %6467 = vmatmul.bf16.gmra.mxu2 %v13775_v42  ;;  %v6020_v4 = vadd.f32 %v13451_v26, %v5931_v39  ;;  %v6521_v26 = vld [vmem:[#allocation2 + $0x1af] sm:$0xff] }
 0x508   : > { %v6253_v46 = vadd.f32 %v13589_v12, %v6020_v4  ;;  %v5380_v4 = vld [vmem:[#allocation2 + $0x191] sm:$0xff] }
 0x509   : > { %v6428_v18 = vpop.f32.mrf.mxu2 }
 0x50b   : > { %v6339_v2 = vpop.f32.mrf.mxu1  ;;  %v6300_v25 = vpop.f32.mrf.mxu0 }
 0x50c   : > { %v6340_v45 = vadd.f32 %v6339_v2, %v13577_v60  ;;  %v13787_v23 = vadd.f32 %v6300_v25, %v13672_v22  ;;  %v8408_v60 = vld [vmem:[%s14137_s5 + $0x208] sm:$0xff]  ;;  %v5378_v22 = vld [vmem:[#allocation2 + $0x171] sm:$0xff] }
 0x50d   : > { %7019 = vmatpush.bf16.msrb.mxu1 %v8408_v60  ;;  %v13800_v9 = vpack.c.bf16 %v5378_v22, %v5377_v3  ;;  %v6520_v2 = vld [vmem:[#allocation2 + $0x1a7] sm:$0xff] }
 0x50e   : > { %6378 = vmatmul.bf16.gmra.mxu1 %v13784_v38  ;;  %v13792_v5 = vadd.f32 %v6428_v18, %v6340_v45  ;;  %6952 = vmatmul.bf16.gmra.mxu0 %v13699_v11  ;;  %v5345_v18 = vld [vmem:[#allocation2 + $0x168] sm:$0xff] }
 0x50f   : > { %6893 = vmatmul.bf16.gmra.mxu3 %v6624_v29  ;;  %v13811_v45 = vpack.c.bf16 %v5346_v50, %v5345_v18  ;;  %v6627_v29 = vpack.c.bf16 %v6521_v26, %v6520_v2  ;;  %v5379_v60 = vld [vmem:[#allocation2 + $0x189] sm:$0xff] }
 0x510   : > { %v5347_v26 = vld [vmem:[#allocation2 + $0x188] sm:$0xff] }
 0x511   : > { %v6430_v55 = vpop.f32.mrf.mxu2 }
 0x513   : > { %v6341_v14 = vpop.f32.mrf.mxu1  ;;  %v6302_v13 = vpop.f32.mrf.mxu0 }
 0x514   : > { %v6342_v62 = vadd.f32 %v6341_v14, %v6253_v46  ;;  %v13803_v59 = vadd.f32 %v6302_v13, %v13680_v36  ;;  %v13826_v14 = vpop.f32.mrf.mxu3 }
 0x516   : > { %v13805_v11 = vadd.f32 %v6430_v55, %v6342_v62  ;;  %6472 = vmatmul.bf16.gmra.mxu2 %v13800_v9  ;;  %v5348_v62 = vld [vmem:[#allocation2 + $0x190] sm:$0xff] }
 0x517   : > { %v13834_v2 = vpack.c.bf16 %v5348_v62, %v5347_v26 }
 0x519   : > { %v6433_v19 = vpop.f32.mrf.mxu2 }
 0x51b   : > { %v6344_v51 = vpop.f32.mrf.mxu1  ;;  %v6305_v12 = vpop.f32.mrf.mxu0 }
 0x51c   : > { %v6345_v25 = vadd.f32 %v6344_v51, %v13594_v43  ;;  %v13814_v36 = vadd.f32 %v6305_v12, %v13689_v28  ;;  %v13821_v43 = vpack.c.bf16 %v5380_v4, %v5379_v60  ;;  %v6522_v51 = vld [vmem:[#allocation2 + $0x1c7] sm:$0xff] }
 0x51d   : > { %v8407_v12 = vld [vmem:[%s14137_s5 + $0x200] sm:$0xff] }
 0x51e   : > { %6383 = vmatmul.bf16.gmra.mxu1 %v13811_v45  ;;  %v13817_v39 = vadd.f32 %v6433_v19, %v6345_v25  ;;  %6957 = vmatmul.bf16.gmra.mxu0 %v13719_v35  ;;  %v6523_v35 = vld [vmem:[#allocation2 + $0x1cf] sm:$0xff]  ;;  %v13844_v25 = vpop.f32.mrf.mxu3 }
 0x51f   : > { %6898 = vmatmul.bf16.gmra.mxu3 %v6627_v29  ;;  %v5381_v29 = vld [vmem:[#allocation2 + $0x1a9] sm:$0xff]  ;;  %7020 = vmatpush.bf16.msrb.mxu1 %v8407_v12  ;;  %v5384_v12 = vld [vmem:[#allocation2 + $0x1d1] sm:$0xff] }
 0x521   : > { %v6435_v28 = vpop.f32.mrf.mxu2 }
 0x523   : > { %v6346_v55 = vpop.f32.mrf.mxu1  ;;  %v6307_v3 = vpop.f32.mrf.mxu0 }
 0x524   : > { %v6347_v22 = vadd.f32 %v6346_v55, %v13600_v24  ;;  %v13824_v46 = vadd.f32 %v6307_v3, %v13697_v1  ;;  %v6630_v1 = vpack.c.bf16 %v6523_v35, %v6522_v51  ;;  %v5349_v35 = vld [vmem:[#allocation2 + $0x1a8] sm:$0xff] }
 0x526   : > { %v13828_v13 = vadd.f32 %v6435_v28, %v6347_v22  ;;  %6477 = vmatmul.bf16.gmra.mxu2 %v13821_v43  ;;  %v6525_v22 = vld [vmem:[#allocation2 + $0x1ef] sm:$0xff]  ;;  %v13855_v28 = vpop.f32.mrf.mxu3 }
 0x52b   : > { %v6349_v50 = vpop.f32.mrf.mxu1  ;;  %v6310_v18 = vpop.f32.mrf.mxu0 }
 0x52c   : > { %v13832_v24 = vadd.f32 %v6349_v50, %v13608_v52  ;;  %v13837_v19 = vadd.f32 %v6310_v18, %v13709_v34  ;;  %v5382_v52 = vld [vmem:[#allocation2 + $0x1b1] sm:$0xff]  ;;  %v6524_v50 = vld [vmem:[#allocation2 + $0x1e7] sm:$0xff] }
 0x52d   : > { %v13849_v34 = vpack.c.bf16 %v5382_v52, %v5381_v29  ;;  %v6633_v18 = vpack.c.bf16 %v6525_v22, %v6524_v50  ;;  %v6527_v22 = vld [vmem:[#allocation2 + $0x20f] sm:$0xff] }
 0x52e   : > { %6388 = vmatmul.bf16.gmra.mxu1 %v13834_v2  ;;  %6962 = vmatmul.bf16.gmra.mxu0 %v13737_v31  ;;  %v5350_v31 = vld [vmem:[#allocation2 + $0x1b0] sm:$0xff]  ;;  %v13864_v52 = vpop.f32.mrf.mxu3 }
 0x52f   : > { %6903 = vmatmul.bf16.gmra.mxu3 %v6630_v1 }
 0x533   : > { %v6351_v60 = vpop.f32.mrf.mxu1  ;;  %v6312_v4 = vpop.f32.mrf.mxu0 }
 0x534   : > { %v13847_v55 = vadd.f32 %v6351_v60, %v13623_v61  ;;  %v13852_v3 = vadd.f32 %v6312_v4, %v13717_v33  ;;  %v5427_v61 = vpack.c.bf16 %v5350_v31, %v5349_v35  ;;  %v5383_v33 = vld [vmem:[#allocation2 + $0x1c9] sm:$0xff] }
 0x535   : > { %v6526_v35 = vld [vmem:[#allocation2 + $0x207] sm:$0xff] }
 0x536   : > { %6482 = vmatmul.bf16.gmra.mxu2 %v13849_v34 }
 0x53b   : > { %v6354_v62 = vpop.f32.mrf.mxu1  ;;  %v6315_v26 = vpop.f32.mrf.mxu0 }
 0x53c   : > { %v13858_v51 = vadd.f32 %v6354_v62, %v13633_v44  ;;  %v13861_v1 = vadd.f32 %v6315_v26, %v13726_v30  ;;  %v13869_v44 = vpack.c.bf16 %v5384_v12, %v5383_v33  ;;  %v5352_v30 = vld [vmem:[#allocation2 + $0x1d0] sm:$0xff] }
 0x53e   : > { %14313 = vst [vmem:[#allocation42_spill] sm:$0xff] %v13858_v51  ;;  %6393 = vmatmul.bf16.gmra.mxu1 %v5427_v61  ;;  %6967 = vmatmul.bf16.gmra.mxu0 %v13762_v56  ;;  %v5351_v56 = vld [vmem:[#allocation2 + $0x1c8] sm:$0xff]  ;;  %v13878_v51 = vpop.f32.mrf.mxu3 }
 0x53f   : > { %6908 = vmatmul.bf16.gmra.mxu3 %v6633_v18  ;;  %v5430_v26 = vpack.c.bf16 %v5352_v30, %v5351_v56  ;;  %v6636_v18 = vpack.c.bf16 %v6527_v22, %v6526_v35  ;;  %v5353_v30 = vld [vmem:[#allocation2 + $0x1e8] sm:$0xff] }
 0x543   : > { %v6356_v29 = vpop.f32.mrf.mxu1  ;;  %v6317_v60 = vpop.f32.mrf.mxu0 }
 0x544   : > { %v13867_v4 = vadd.f32 %v6356_v29, %v13648_v16  ;;  %v13872_v31 = vadd.f32 %v6317_v60, %v13734_v8  ;;  %v5385_v16 = vld [vmem:[#allocation2 + $0x1e9] sm:$0xff]  ;;  %v5386_v8 = vld [vmem:[#allocation2 + $0x1f1] sm:$0xff] }
 0x545   : > { %v13884_v29 = vpack.c.bf16 %v5386_v8, %v5385_v16 }
 0x546   : > { %6487 = vmatmul.bf16.gmra.mxu2 %v13869_v44 }
 0x54b   : > { %v6359_v62 = vpop.f32.mrf.mxu1 }
 0x54c   : > { %v13876_v50 = vadd.f32 %v6359_v62, %v13662_v57  ;;  %v5354_v57 = vld [vmem:[#allocation2 + $0x1f0] sm:$0xff] }
 0x54d   : > { %v5433_v62 = vpack.c.bf16 %v5354_v57, %v5353_v30  ;;  %v14314_v57 = vld [vmem:[#allocation38_spill] sm:$0xff] }
 0x54e   : > { %6398 = vmatmul.bf16.gmra.mxu1 %v5430_v26  ;;  %6972 = vmatmul.bf16.gmra.mxu0 %v13784_v38 }
 0x54f   : > { %6913 = vmatmul.bf16.gmra.mxu3 %v6636_v18 }
 0x553   : > { %v6361_v33 = vpop.f32.mrf.mxu1 }
 0x554   : > { %v13882_v12 = vadd.f32 %v6361_v33, %v13677_v40 }
 0x556   : > { %6492 = vmatmul.bf16.gmra.mxu2 %v13884_v29 }
 0x55b   : > { %v6364_v60 = vpop.f32.mrf.mxu1 }
 0x55c   : > { %v13888_v22 = vadd.f32 %v6364_v60, %v13685_v6 }
 0x55e   : > { %6403 = vmatmul.bf16.gmra.mxu1 %v5433_v62  ;;  %6977 = vmatmul.bf16.gmra.mxu0 %v13811_v45  ;;  %v6933_v45 = vpop.f32.mrf.mxu0 }
 0x563   : > { %v6366_v38 = vpop.f32.mrf.mxu1 }
 0x564   : > { %v13892_v56 = vadd.f32 %v6366_v38, %v13694_v49 }
 0x566   : > { %v6935_v33 = vpop.f32.mrf.mxu0 }
 0x56b   : > { %v6369_v40 = vpop.f32.mrf.mxu1 }
 0x56c   : > { %v13895_v35 = vadd.f32 %v6369_v40, %v13702_v21 }
 0x56e   : > { %7021 = vmatmul.bf16.vlgmr.msrb.gmra.mxu1 %v13602_v0  ;;  %6982 = vmatmul.bf16.gmra.mxu0 %v13834_v2 }
 0x573   : > { %v6371_v18 = vpop.f32.mrf.mxu1 }
 0x574   : > { %v13900_v6 = vadd.f32 %v6371_v18, %v13714_v10  ;;  %v6938_v10 = vpop.f32.mrf.mxu0 }
 0x57b   : > { %v6374_v16 = vpop.f32.mrf.mxu1 }
 0x57c   : > { %v13903_v8 = vadd.f32 %v6374_v16, %v13722_v58  ;;  %v13916_v30 = vpop.f32.mrf.mxu0  ;;  %v6558_v16 = vld [vmem:[#allocation2 + $0x208] sm:$0xff] }
 0x57e   : > { %7026 = vmatmul.bf16.gmra.mxu1 %v13625_v32  ;;  %6987 = vmatmul.bf16.gmra.mxu0 %v5427_v61 }
 0x583   : > { %v6376_v49 = vpop.f32.mrf.mxu1 }
 0x584   : > { %v13907_v21 = vadd.f32 %v6376_v49, %v13731_v7  ;;  %v14315_v7 = vld [vmem:[#allocation45_spill] sm:$0xff]  ;;  %v13925_v40 = vpop.f32.mrf.mxu0 }
 0x58b   : > { %v6379_v0 = vpop.f32.mrf.mxu1 }
 0x58c   : > { %v13910_v2 = vadd.f32 %v6379_v0, %v13740_v15  ;;  %v14316_v0 = vld [vmem:[#allocation39_spill] sm:$0xff] }
 0x58e   : > { %7031 = vmatmul.bf16.gmra.mxu1 %v14314_v57  ;;  %6992 = vmatmul.bf16.gmra.mxu0 %v5430_v26  ;;  %v6559_v26 = vld [vmem:[#allocation2 + $0x210] sm:$0xff] }
 0x58f   : > { %v6637_v49 = vpack.c.bf16 %v6559_v26, %v6558_v16 }
 0x593   : > { %v6381_v60 = vpop.f32.mrf.mxu1 }
 0x594   : > { %v13914_v58 = vadd.f32 %v6381_v60, %v13756_v48 }
 0x59b   : > { %v6384_v32 = vpop.f32.mrf.mxu1 }
 0x59c   : > { %v13919_v61 = vadd.f32 %v6384_v32, %v13765_v47  ;;  %v13931_v47 = vpop.f32.mrf.mxu0  ;;  %v14317_v32 = vld [vmem:[#allocation41_spill] sm:$0xff] }
 0x59e   : > { %7036 = vmatmul.bf16.gmra.mxu1 %v14315_v7  ;;  %6997 = vmatmul.bf16.gmra.mxu0 %v5433_v62 }
 0x5a3   : > { %v6386_v38 = vpop.f32.mrf.mxu1 }
 0x5a4   : > { %v13923_v15 = vadd.f32 %v6386_v38, %v13778_v41 }
 0x5ab   : > { %v6389_v18 = vpop.f32.mrf.mxu1 }
 0x5ac   : > { %v13928_v48 = vadd.f32 %v6389_v18, %v13787_v23 }
 0x5ae   : > { %7041 = vmatmul.bf16.gmra.mxu1 %v14316_v0  ;;  %7002 = vmatmul.bf16.gmra.mxu0 %v6637_v49  ;;  %v13957_v0 = vpop.f32.mrf.mxu3 }
 0x5b3   : > { %v6391_v57 = vpop.f32.mrf.mxu1 }
 0x5b4   : > { %v13934_v62 = vadd.f32 %v6391_v57, %v13803_v59 }
 0x5bb   : > { %v6394_v41 = vpop.f32.mrf.mxu1 }
 0x5bc   : > { %v13937_v60 = vadd.f32 %v6394_v41, %v13814_v36 }
 0x5be   : > { %7046 = vmatmul.bf16.gmra.mxu1 %v14317_v32  ;;  %v6936_v32 = vadd.f32 %v6935_v33, %v13826_v14  ;;  %v6939_v14 = vadd.f32 %v6938_v10, %v13844_v25 }
 0x5c3   : > { %v6396_v7 = vpop.f32.mrf.mxu1 }
 0x5c4   : > { %v13941_v23 = vadd.f32 %v6396_v7, %v13824_v46 }
 0x5cb   : > { %v6399_v38 = vpop.f32.mrf.mxu1 }
 0x5cc   : > { %v13944_v26 = vadd.f32 %v6399_v38, %v13837_v19  ;;  %v13959_v19 = vpop.f32.mrf.mxu0 }
 0x5ce   : > { %7051 = vmatmul.bf16.gmra.mxu1 %v13728_v17  ;;  %v6934_v17 = vadd.f32 %v6933_v45, %v13808_v37 }
 0x5d3   : > { %v6401_v18 = vpop.f32.mrf.mxu1 }
 0x5d4   : > { %v13948_v59 = vadd.f32 %v6401_v18, %v13852_v3 }
 0x5db   : > { %v6404_v16 = vpop.f32.mrf.mxu1 }
 0x5dc   : > { %v13951_v36 = vadd.f32 %v6404_v16, %v13861_v1  ;;  %v13964_v1 = vpop.f32.mrf.mxu3 }
 0x5de   : > { %7056 = vmatmul.bf16.gmra.mxu1 %v13753_v53  ;;  %v6950_v53 = vpop.f32.mrf.mxu0 }
 0x5e3   : > { %v6406_v49 = vpop.f32.mrf.mxu1 }
 0x5e4   : > { %v13955_v46 = vadd.f32 %v6406_v49, %v13872_v31  ;;  %v13970_v31 = vld [vmem:[%s14138_s6] ss:$0 sm:$0xff] }
 0x5e6   : > { %v6953_v16 = vpop.f32.mrf.mxu0 }
 0x5eb   : > { %v7022_v3 = vpop.f32.mrf.mxu1 }
 0x5ec   : > { %v7023_v57 = vadd.f32 %v7022_v3, %v6934_v17 }
 0x5ee   : > { %v7102_v41 = vadd.f32 %v7023_v57, %v13745_v27  ;;  %7061 = vmatmul.bf16.gmra.mxu1 %v13775_v42  ;;  %v13978_v42 = vpop.f32.mrf.mxu3  ;;  %v13981_v57 = vpop.f32.mrf.mxu2 }
 0x5f0   : > { %v7138_v37 = vadd.f32 %v13970_v31, %v7102_v41  ;;  %v6941_v41 = vadd.f32 %v13916_v30, %v13855_v28 }
 0x5f2   : > { %v7170_v33 = vmax.f32 %v7138_v37, 0.0 }
 0x5f3   : > { %v7024_v7 = vpop.f32.mrf.mxu1 }
 0x5f4   : > { %v7025_v38 = vadd.f32 %v7024_v7, %v6936_v32  ;;  %v6955_v7 = vpop.f32.mrf.mxu0 }
 0x5f6   : > { %v7103_v45 = vadd.f32 %v7025_v38, %v13758_v63  ;;  %v6866_v10 = vpop.f32.mrf.mxu3 }
 0x5f8   : > { %v7139_v27 = vadd.f32 %v13970_v31, %v7103_v45  ;;  %v6440_v45 = vpop.f32.mrf.mxu2 }
 0x5fa   : > { %v7171_v18 = vmax.f32 %v7139_v27, 0.0 }
 0x5fb   : > { %v7027_v49 = vpop.f32.mrf.mxu1 }
 0x5fc   : > { %v8419_v17 = vpack.c.bf16 %v7171_v18, %v7170_v33  ;;  %v7028_v3 = vadd.f32 %v7027_v49, %v6939_v14 }
 0x5fe   : > { %8420 = vst [vmem:[%s13983_s20] sm:$0xff] %v8419_v17   ;;  %v7104_v63 = vadd.f32 %v7028_v3, %v13770_v54  ;;  %7066 = vmatmul.bf16.gmra.mxu1 %v13800_v9  ;;  %v6944_v54 = vadd.f32 %v13925_v40, %v13864_v52  ;;  %v13995_v30 = vpop.f32.mrf.mxu3  ;;  %v6958_v17 = vpop.f32.mrf.mxu0  ;;  %v6946_v3 = vadd.f32 %v13931_v47, %v13878_v51 }
 0x600   : > { %v7140_v38 = vadd.f32 %v13970_v31, %v7104_v63 }
 0x602   : > { %v7172_v14 = vmax.f32 %v7140_v38, 0.0 }
 0x603   : > { %v7029_v25 = vpop.f32.mrf.mxu1 }
 0x604   : > { %v7030_v32 = vadd.f32 %v7029_v25, %v6941_v41 }
 0x606   : > { %v7105_v37 = vadd.f32 %v7030_v32, %v13780_v20  ;;  %v14000_v20 = vpop.f32.mrf.mxu2  ;;  %v14006_v25 = vpop.f32.mrf.mxu3 }
 0x608   : > { %v7141_v27 = vadd.f32 %v13970_v31, %v7105_v37 }
 0x60a   : > { %v7173_v9 = vmax.f32 %v7141_v27, 0.0 }
 0x60b   : > { %v7032_v33 = vpop.f32.mrf.mxu1 }
 0x60c   : > { %v8424_v18 = vpack.c.bf16 %v7173_v9, %v7172_v14  ;;  %v7033_v28 = vadd.f32 %v7032_v33, %v6944_v54  ;;  %v6949_v54 = vadd.f32 %v13959_v19, %v13957_v0 }
 0x60e   : > { %8496 = vst [vmem:[%s13983_s20 + $0x8] sm:$0xff] %v8424_v18   ;;  %v7106_v49 = vadd.f32 %v7033_v28, %v13792_v5  ;;  %7071 = vmatmul.bf16.gmra.mxu1 %v13821_v43  ;;  %v6960_v5 = vpop.f32.mrf.mxu0  ;;  %v6445_v37 = vpop.f32.mrf.mxu2 }
 0x60f   : > { %v14013_v47 = vpop.f32.mrf.mxu3 }
 0x610   : > { %v7142_v63 = vadd.f32 %v13970_v31, %v7106_v49 }
 0x612   : > { %v7174_v38 = vmax.f32 %v7142_v63, 0.0 }
 0x613   : > { %v7034_v52 = vpop.f32.mrf.mxu1 }
 0x614   : > { %v7035_v40 = vadd.f32 %v7034_v52, %v6946_v3 }
 0x616   : > { %v7107_v41 = vadd.f32 %v7035_v40, %v13805_v11  ;;  %v6951_v11 = vadd.f32 %v6950_v53, %v13964_v1  ;;  %v14017_v33 = vpop.f32.mrf.mxu0  ;;  %v14019_v49 = vpop.f32.mrf.mxu2  ;;  %v6954_v1 = vadd.f32 %v6953_v16, %v13978_v42 }
 0x617   : > { %v6876_v63 = vpop.f32.mrf.mxu3 }
 0x618   : > { %v7143_v32 = vadd.f32 %v13970_v31, %v7107_v41 }
 0x61a   : > { %v7175_v43 = vmax.f32 %v7143_v32, 0.0 }
 0x61b   : > { %v7037_v27 = vpop.f32.mrf.mxu1 }
 0x61c   : > { %v8429_v14 = vpack.c.bf16 %v7175_v43, %v7174_v38  ;;  %v7038_v51 = vadd.f32 %v7037_v27, %v6949_v54  ;;  %v6439_v38 = vadd.f32 %v13981_v57, %v13832_v24  ;;  %v6956_v43 = vadd.f32 %v6955_v7, %v6866_v10  ;;  %v6528_v27 = vld [vmem:[#allocation2 + $0x227] sm:$0xff]  ;;  %v6529_v54 = vld [vmem:[#allocation2 + $0x22f] sm:$0xff] }
 0x61d   : > { %v6959_v7 = vadd.f32 %v6958_v17, %v13995_v30  ;;  %v6446_v30 = vadd.f32 %v6445_v37, %v13867_v4 }
 0x61e   : > { %8497 = vst [vmem:[%s13983_s20 + $0x10] sm:$0xff] %v8429_v14   ;;  %7076 = vmatmul.bf16.gmra.mxu1 %v13849_v34  ;;  %v7108_v9 = vadd.f32 %v7038_v51, %v13817_v39  ;;  %v6965_v39 = vpop.f32.mrf.mxu0  ;;  %v6450_v32 = vpop.f32.mrf.mxu2  ;;  %v6639_v51 = vpack.c.bf16 %v6529_v54, %v6528_v27  ;;  %v6590_v54 = vld [vmem:[#allocation2 + $0x209] sm:$0xff] }
 0x61f   : > { %v6879_v16 = vpop.f32.mrf.mxu3 }
 0x620   : > { %v7144_v0 = vadd.f32 %v13970_v31, %v7108_v9  ;;  %6918 = vmatmul.bf16.gmra.mxu3 %v6639_v51 }
 0x622   : > { %v7176_v34 = vmax.f32 %v7144_v0, 0.0 }
 0x623   : > { %v7039_v18 = vpop.f32.mrf.mxu1 }
 0x624   : > { %v7040_v28 = vadd.f32 %v7039_v18, %v6951_v11  ;;  %v6441_v11 = vadd.f32 %v6440_v45, %v13847_v55  ;;  %v9041_v55 = vld [vmem:[#allocation2] sm:$0xff] }
 0x625   : > { %v6640_v45 = vpack.c.bf16 %v9041_v55, %v9041_v55 }
 0x626   : > { %v7109_v19 = vadd.f32 %v7040_v28, %v13828_v13  ;;  %v14032_v0 = vpop.f32.mrf.mxu2 }
 0x627   : > { %7007 = vmatmul.bf16.gmra.mxu0 %v6640_v45 }
 0x628   : > { %v7145_v3 = vadd.f32 %v13970_v31, %v7109_v19 }
 0x62a   : > { %v7177_v52 = vmax.f32 %v7145_v3, 0.0 }
 0x62b   : > { %v7042_v40 = vpop.f32.mrf.mxu1 }
 0x62c   : > { %v8434_v53 = vpack.c.bf16 %v7177_v52, %v7176_v34  ;;  %v7043_v41 = vadd.f32 %v7042_v40, %v6954_v1  ;;  %v14318_v34 = vld [vmem:[#allocation42_spill] sm:$0xff]  ;;  %v6881_v40 = vpop.f32.mrf.mxu3 }
 0x62d   : > { %v6444_v52 = vadd.f32 %v14000_v20, %v14318_v34  ;;  %v6592_v34 = vld [vmem:[#allocation2 + $0x229] sm:$0xff] }
 0x62e   : > { %8498 = vst [vmem:[%s13983_s20 + $0x18] sm:$0xff] %v8434_v53   ;;  %7081 = vmatmul.bf16.gmra.mxu1 %v13869_v44  ;;  %v7110_v13 = vadd.f32 %v7043_v41, %v6439_v38  ;;  %v6968_v44 = vpop.f32.mrf.mxu0  ;;  %v6961_v53 = vadd.f32 %v6960_v5, %v14006_v25  ;;  %v6455_v38 = vpop.f32.mrf.mxu2  ;;  %v6964_v25 = vadd.f32 %v14017_v33, %v14013_v47 }
 0x630   : > { %v7146_v9 = vadd.f32 %v13970_v31, %v7110_v13 }
 0x632   : > { %v7178_v24 = vmax.f32 %v7146_v9, 0.0 }
 0x633   : > { %v7044_v14 = vpop.f32.mrf.mxu1 }
 0x634   : > { %v7045_v42 = vadd.f32 %v7044_v14, %v6956_v43  ;;  %v6591_v14 = vld [vmem:[#allocation2 + $0x211] sm:$0xff]  ;;  %v6884_v20 = vpop.f32.mrf.mxu3 }
 0x636   : > { %v7111_v18 = vadd.f32 %v7045_v42, %v6441_v11  ;;  %v6970_v1 = vpop.f32.mrf.mxu0  ;;  %v6458_v4 = vpop.f32.mrf.mxu2 }
 0x638   : > { %v7147_v28 = vadd.f32 %v13970_v31, %v7111_v18  ;;  %v6638_v18 = vpack.c.bf16 %v6591_v14, %v6590_v54  ;;  %v6456_v14 = vadd.f32 %v6455_v38, %v13892_v56 }
 0x63a   : > { %v7179_v57 = vmax.f32 %v7147_v28, 0.0  ;;  %v6449_v28 = vadd.f32 %v14019_v49, %v13876_v50 }
 0x63b   : > { %v7047_v10 = vpop.f32.mrf.mxu1 }
 0x63c   : > { %v8439_v19 = vpack.c.bf16 %v7179_v57, %v7178_v24  ;;  %v7048_v3 = vadd.f32 %v7047_v10, %v6959_v7  ;;  %v6966_v24 = vadd.f32 %v6965_v39, %v6876_v63  ;;  %v6451_v7 = vadd.f32 %v6450_v32, %v13882_v12 }
 0x63d   : > { %v6969_v63 = vadd.f32 %v6968_v44, %v6879_v16 }
 0x63e   : > { %8499 = vst [vmem:[%s13983_s20 + $0x20] sm:$0xff] %v8439_v19   ;;  %7086 = vmatmul.bf16.gmra.mxu1 %v13884_v29  ;;  %v7112_v41 = vadd.f32 %v7048_v3, %v6444_v52  ;;  %v6973_v42 = vpop.f32.mrf.mxu0  ;;  %v6886_v19 = vpop.f32.mrf.mxu3  ;;  %v6593_v52 = vld [vmem:[#allocation2 + $0x231] sm:$0xff] }
 0x63f   : > { %v6460_v45 = vpop.f32.mrf.mxu2  ;;  %v6641_v50 = vpack.c.bf16 %v6593_v52, %v6592_v34 }
 0x640   : > { %v7148_v13 = vadd.f32 %v13970_v31, %v7112_v41 }
 0x642   : > { %v7180_v51 = vmax.f32 %v7148_v13, 0.0 }
 0x643   : > { %v7049_v43 = vpop.f32.mrf.mxu1 }
 0x644   : > { %v7050_v17 = vadd.f32 %v7049_v43, %v6961_v53 }
 0x646   : > { %v7113_v29 = vadd.f32 %v7050_v17, %v6446_v30  ;;  %v6975_v55 = vpop.f32.mrf.mxu0  ;;  %v6889_v30 = vpop.f32.mrf.mxu3  ;;  %v6454_v17 = vadd.f32 %v14032_v0, %v13888_v22  ;;  %v6974_v22 = vadd.f32 %v6973_v42, %v6884_v20 }
 0x647   : > { %v6463_v13 = vpop.f32.mrf.mxu2  ;;  %v6976_v56 = vadd.f32 %v6975_v55, %v6886_v19 }
 0x648   : > { %v7149_v27 = vadd.f32 %v13970_v31, %v7113_v29  ;;  %v6971_v29 = vadd.f32 %v6970_v1, %v6881_v40  ;;  %v6459_v1 = vadd.f32 %v6458_v4, %v13895_v35 }
 0x64a   : > { %v7181_v11 = vmax.f32 %v7149_v27, 0.0 }
 0x64b   : > { %v7052_v9 = vpop.f32.mrf.mxu1 }
 0x64c   : > { %v8444_v5 = vpack.c.bf16 %v7181_v11, %v7180_v51  ;;  %v7053_v37 = vadd.f32 %v7052_v9, %v6964_v25 }
 0x64e   : > { %8500 = vst [vmem:[%s13983_s20 + $0x28] sm:$0xff] %v8444_v5   ;;  %7091 = vmatmul.bf16.gmra.mxu1 %v6638_v18  ;;  %v7114_v57 = vadd.f32 %v7053_v37, %v6449_v28  ;;  %v6978_v32 = vpop.f32.mrf.mxu0  ;;  %v6891_v44 = vpop.f32.mrf.mxu3 }
 0x64f   : > { %v6465_v37 = vpop.f32.mrf.mxu2  ;;  %v6979_v35 = vadd.f32 %v6978_v32, %v6889_v30 }
 0x650   : > { %v7150_v47 = vadd.f32 %v13970_v31, %v7114_v57 }
 0x652   : > { %v7182_v41 = vmax.f32 %v7150_v47, 0.0 }
 0x653   : > { %v7054_v10 = vpop.f32.mrf.mxu1 }
 0x654   : > { %v7055_v3 = vadd.f32 %v7054_v10, %v6966_v24 }
 0x656   : > { %v7115_v33 = vadd.f32 %v7055_v3, %v6451_v7  ;;  %v6980_v25 = vpop.f32.mrf.mxu0  ;;  %v6894_v24 = vpop.f32.mrf.mxu3  ;;  %v6461_v7 = vadd.f32 %v6460_v45, %v13900_v6 }
 0x657   : > { %v6468_v47 = vpop.f32.mrf.mxu2  ;;  %v6981_v6 = vadd.f32 %v6980_v25, %v6891_v44 }
 0x658   : > { %v7151_v53 = vadd.f32 %v13970_v31, %v7115_v33 }
 0x65a   : > { %v7183_v43 = vmax.f32 %v7151_v53, 0.0 }
 0x65b   : > { %v7057_v49 = vpop.f32.mrf.mxu1 }
 0x65c   : > { %v8449_v39 = vpack.c.bf16 %v7183_v43, %v7182_v41  ;;  %v7058_v12 = vadd.f32 %v7057_v49, %v6969_v63  ;;  %v6466_v63 = vadd.f32 %v6465_v37, %v13907_v21 }
 0x65e   : > { %8501 = vst [vmem:[%s13983_s20 + $0x30] sm:$0xff] %v8449_v39   ;;  %7096 = vmatmul.bf16.gmra.mxu1 %v6641_v50  ;;  %v7116_v27 = vadd.f32 %v7058_v12, %v6454_v17  ;;  %v6983_v57 = vpop.f32.mrf.mxu0  ;;  %v6896_v41 = vpop.f32.mrf.mxu3  ;;  %v6464_v50 = vadd.f32 %v6463_v13, %v13903_v8 }
 0x65f   : > { %v6470_v43 = vpop.f32.mrf.mxu2 }
 0x660   : > { %v7152_v11 = vadd.f32 %v13970_v31, %v7116_v27  ;;  %v6471_v37 = vadd.f32 %v6470_v43, %v13914_v58 }
 0x662   : > { %v7184_v5 = vmax.f32 %v7152_v11, 0.0  ;;  %v6984_v11 = vadd.f32 %v6983_v57, %v6894_v24 }
 0x663   : > { %v7059_v54 = vpop.f32.mrf.mxu1 }
 0x664   : > { %v7060_v51 = vadd.f32 %v7059_v54, %v6971_v29 }
 0x666   : > { %v7117_v16 = vadd.f32 %v7060_v51, %v6456_v14  ;;  %v6985_v19 = vpop.f32.mrf.mxu0  ;;  %v6899_v12 = vpop.f32.mrf.mxu3 }
 0x667   : > { %v6473_v32 = vpop.f32.mrf.mxu2 }
 0x668   : > { %v7153_v9 = vadd.f32 %v13970_v31, %v7117_v16  ;;  %v6469_v16 = vadd.f32 %v6468_v47, %v13910_v2  ;;  %v6474_v47 = vadd.f32 %v6473_v32, %v13919_v61 }
 0x66a   : > { %v7185_v18 = vmax.f32 %v7153_v9, 0.0  ;;  %v6986_v9 = vadd.f32 %v6985_v19, %v6896_v41 }
 0x66b   : > { %v7062_v28 = vpop.f32.mrf.mxu1 }
 0x66c   : > { %v8454_v0 = vpack.c.bf16 %v7185_v18, %v7184_v5  ;;  %v7063_v40 = vadd.f32 %v7062_v28, %v6974_v22 }
 0x66e   : > { %8502 = vst [vmem:[%s13983_s20 + $0x38] sm:$0xff] %v8454_v0   ;;  %v7118_v38 = vadd.f32 %v7063_v40, %v6459_v1  ;;  %v6988_v27 = vpop.f32.mrf.mxu0  ;;  %v6901_v44 = vpop.f32.mrf.mxu3 }
 0x66f   : > { %v6475_v5 = vpop.f32.mrf.mxu2  ;;  %v6989_v57 = vadd.f32 %v6988_v27, %v6899_v12 }
 0x670   : > { %v7154_v33 = vadd.f32 %v13970_v31, %v7118_v38 }
 0x672   : > { %v7186_v42 = vmax.f32 %v7154_v33, 0.0 }
 0x673   : > { %v7064_v10 = vpop.f32.mrf.mxu1 }
 0x674   : > { %v7065_v3 = vadd.f32 %v7064_v10, %v6976_v56 }
 0x676   : > { %v7119_v34 = vadd.f32 %v7065_v3, %v6461_v7  ;;  %v6990_v21 = vpop.f32.mrf.mxu0  ;;  %v6904_v1 = vpop.f32.mrf.mxu3 }
 0x677   : > { %v6478_v7 = vpop.f32.mrf.mxu2  ;;  %v6991_v33 = vadd.f32 %v6990_v21, %v6901_v44 }
 0x678   : > { %v7155_v20 = vadd.f32 %v13970_v31, %v7119_v34 }
 0x67a   : > { %v7187_v52 = vmax.f32 %v7155_v20, 0.0  ;;  %v6476_v20 = vadd.f32 %v6475_v5, %v13923_v15  ;;  %v6479_v15 = vadd.f32 %v6478_v7, %v13928_v48 }
 0x67b   : > { %v7067_v53 = vpop.f32.mrf.mxu1 }
 0x67c   : > { %v8459_v4 = vpack.c.bf16 %v7187_v52, %v7186_v42  ;;  %v7068_v55 = vadd.f32 %v7067_v53, %v6979_v35 }
 0x67e   : > { %8503 = vst [vmem:[%s13983_s20 + $0x40] sm:$0xff] %v8459_v4   ;;  %v7120_v45 = vadd.f32 %v7068_v55, %v6464_v50  ;;  %v6993_v38 = vpop.f32.mrf.mxu0  ;;  %v6906_v42 = vpop.f32.mrf.mxu3 }
 0x67f   : > { %v6480_v4 = vpop.f32.mrf.mxu2 }
 0x680   : > { %v7156_v17 = vadd.f32 %v13970_v31, %v7120_v45  ;;  %v6481_v27 = vadd.f32 %v6480_v4, %v13934_v62 }
 0x682   : > { %v7188_v54 = vmax.f32 %v7156_v17, 0.0 }
 0x683   : > { %v7069_v49 = vpop.f32.mrf.mxu1 }
 0x684   : > { %v7070_v39 = vadd.f32 %v7069_v49, %v6981_v6  ;;  %v6994_v6 = vadd.f32 %v6993_v38, %v6904_v1 }
 0x686   : > { %v7121_v29 = vadd.f32 %v7070_v39, %v6466_v63  ;;  %v6995_v53 = vpop.f32.mrf.mxu0  ;;  %v6909_v45 = vpop.f32.mrf.mxu3 }
 0x687   : > { %v6483_v39 = vpop.f32.mrf.mxu2  ;;  %v6996_v12 = vadd.f32 %v6995_v53, %v6906_v42 }
 0x688   : > { %v7157_v30 = vadd.f32 %v13970_v31, %v7121_v29 }
 0x68a   : > { %v7189_v14 = vmax.f32 %v7157_v30, 0.0 }
 0x68b   : > { %v7072_v51 = vpop.f32.mrf.mxu1 }
 0x68c   : > { %v8464_v8 = vpack.c.bf16 %v7189_v14, %v7188_v54  ;;  %v7073_v13 = vadd.f32 %v7072_v51, %v6984_v11 }
 0x68e   : > { %8504 = vst [vmem:[%s13983_s20 + $0x48] sm:$0xff] %v8464_v8   ;;  %v7122_v25 = vadd.f32 %v7073_v13, %v6469_v16  ;;  %v6998_v63 = vpop.f32.mrf.mxu0  ;;  %v6911_v14 = vpop.f32.mrf.mxu3 }
 0x68f   : > { %v6485_v16 = vpop.f32.mrf.mxu2  ;;  %v6999_v48 = vadd.f32 %v6998_v63, %v6909_v45 }
 0x690   : > { %v7158_v22 = vadd.f32 %v13970_v31, %v7122_v25  ;;  %v6484_v25 = vadd.f32 %v6483_v39, %v13937_v60 }
 0x692   : > { %v7190_v24 = vmax.f32 %v7158_v22, 0.0  ;;  %v6486_v22 = vadd.f32 %v6485_v16, %v13941_v23 }
 0x693   : > { %v7074_v18 = vpop.f32.mrf.mxu1 }
 0x694   : > { %v7075_v28 = vadd.f32 %v7074_v18, %v6986_v9 }
 0x696   : > { %v7123_v0 = vadd.f32 %v7075_v28, %v6471_v37  ;;  %v7000_v11 = vpop.f32.mrf.mxu0  ;;  %v6914_v5 = vpop.f32.mrf.mxu3 }
 0x697   : > { %v7001_v62 = vadd.f32 %v7000_v11, %v6911_v14 }
 0x698   : > { %v7159_v40 = vadd.f32 %v13970_v31, %v7123_v0 }
 0x69a   : > { %v7191_v56 = vmax.f32 %v7159_v40, 0.0  ;;  %v6488_v40 = vpop.f32.mrf.mxu2 }
 0x69b   : > { %v7077_v2 = vpop.f32.mrf.mxu1 }
 0x69c   : > { %v8469_v10 = vpack.c.bf16 %v7191_v56, %v7190_v24  ;;  %v7078_v3 = vadd.f32 %v7077_v2, %v6989_v57 }
 0x69e   : > { %8505 = vst [vmem:[%s13983_s20 + $0x50] sm:$0xff] %v8469_v10   ;;  %v7124_v58 = vadd.f32 %v7078_v3, %v6474_v47  ;;  %v7003_v37 = vpop.f32.mrf.mxu0  ;;  %v6916_v7 = vpop.f32.mrf.mxu3 }
 0x69f   : > { %v7004_v10 = vadd.f32 %v7003_v37, %v6914_v5 }
 0x6a0   : > { %v7160_v41 = vadd.f32 %v13970_v31, %v7124_v58  ;;  %v6489_v58 = vadd.f32 %v6488_v40, %v13944_v26 }
 0x6a2   : > { %v7192_v55 = vmax.f32 %v7160_v41, 0.0 }
 0x6a3   : > { %v7079_v34 = vpop.f32.mrf.mxu1 }
 0x6a4   : > { %v7080_v52 = vadd.f32 %v7079_v34, %v6991_v33  ;;  %v6490_v33 = vpop.f32.mrf.mxu2 }
 0x6a5   : > { %v6491_v42 = vadd.f32 %v6490_v33, %v13948_v59 }
 0x6a6   : > { %v7125_v35 = vadd.f32 %v7080_v52, %v6476_v20  ;;  %v7005_v3 = vpop.f32.mrf.mxu0  ;;  %v6919_v53 = vpop.f32.mrf.mxu3 }
 0x6a7   : > { %v7006_v23 = vadd.f32 %v7005_v3, %v6916_v7 }
 0x6a8   : > { %v7161_v19 = vadd.f32 %v13970_v31, %v7125_v35 }
 0x6aa   : > { %v7193_v43 = vmax.f32 %v7161_v19, 0.0 }
 0x6ab   : > { %v7082_v50 = vpop.f32.mrf.mxu1 }
 0x6ac   : > { %v8474_v61 = vpack.c.bf16 %v7193_v43, %v7192_v55  ;;  %v7083_v49 = vadd.f32 %v7082_v50, %v6994_v6  ;;  %v6493_v55 = vpop.f32.mrf.mxu2 }
 0x6ad   : > { %v6494_v63 = vadd.f32 %v6493_v55, %v13951_v36 }
 0x6ae   : > { %8506 = vst [vmem:[%s13983_s20 + $0x58] sm:$0xff] %v8474_v61   ;;  %v7126_v17 = vadd.f32 %v7083_v49, %v6479_v15  ;;  %v7008_v41 = vpop.f32.mrf.mxu0  ;;  %v6921_v49 = vpop.f32.mrf.mxu3 }
 0x6af   : > { %v7009_v50 = vadd.f32 %v7008_v41, %v6919_v53 }
 0x6b0   : > { %v7162_v32 = vadd.f32 %v13970_v31, %v7126_v17 }
 0x6b2   : > { %v7194_v8 = vmax.f32 %v7162_v32, 0.0 }
 0x6b3   : > { %v7084_v29 = vpop.f32.mrf.mxu1 }
 0x6b4   : > { %v7085_v30 = vadd.f32 %v7084_v29, %v6996_v12  ;;  %v6495_v12 = vpop.f32.mrf.mxu2 }
 0x6b5   : > { %v6496_v29 = vadd.f32 %v6495_v12, %v13955_v46 }
 0x6b6   : > { %v7127_v54 = vadd.f32 %v7085_v30, %v6481_v27  ;;  %v7010_v59 = vpop.f32.mrf.mxu0 }
 0x6b7   : > { %v7011_v15 = vadd.f32 %v7010_v59, %v6921_v49 }
 0x6b8   : > { %v7163_v51 = vadd.f32 %v13970_v31, %v7127_v54 }
 0x6ba   : > { %v7195_v13 = vmax.f32 %v7163_v51, 0.0 }
 0x6bb   : > { %v7087_v44 = vpop.f32.mrf.mxu1 }
 0x6bc   : > { %v8479_v21 = vpack.c.bf16 %v7195_v13, %v7194_v8  ;;  %v7088_v9 = vadd.f32 %v7087_v44, %v6999_v48 }
 0x6be   : > { %8507 = vst [vmem:[%s13983_s20 + $0x60] sm:$0xff] %v8479_v21   ;;  %v7128_v18 = vadd.f32 %v7088_v9, %v6484_v25 }
 0x6c0   : > { %v7164_v1 = vadd.f32 %v13970_v31, %v7128_v18 }
 0x6c2   : > { %v7196_v38 = vmax.f32 %v7164_v1, 0.0 }
 0x6c3   : > { %v7089_v28 = vpop.f32.mrf.mxu1 }
 0x6c4   : > { %v7090_v0 = vadd.f32 %v7089_v28, %v7001_v62 }
 0x6c6   : > { %v7129_v24 = vadd.f32 %v7090_v0, %v6486_v22 }
 0x6c8   : > { %v7165_v56 = vadd.f32 %v13970_v31, %v7129_v24 }
 0x6ca   : > { %v7197_v2 = vmax.f32 %v7165_v56, 0.0 }
 0x6cb   : > { %v7092_v57 = vpop.f32.mrf.mxu1 }
 0x6cc   : > { %v8484_v60 = vpack.c.bf16 %v7197_v2, %v7196_v38  ;;  %v7093_v47 = vadd.f32 %v7092_v57, %v7004_v10 }
 0x6ce   : > { %8508 = vst [vmem:[%s13983_s20 + $0x68] sm:$0xff] %v8484_v60   ;;  %v7130_v34 = vadd.f32 %v7093_v47, %v6489_v58 }
 0x6d0   : > { %v7166_v35 = vadd.f32 %v13970_v31, %v7130_v34 }
 0x6d2   : > { %v7198_v43 = vmax.f32 %v7166_v35, 0.0 }
 0x6d3   : > { %v7094_v20 = vpop.f32.mrf.mxu1 }
 0x6d4   : > { %v7095_v52 = vadd.f32 %v7094_v20, %v7006_v23 }
 0x6d6   : > { %v7131_v4 = vadd.f32 %v7095_v52, %v6491_v42 }
 0x6d8   : > { %v7167_v19 = vadd.f32 %v13970_v31, %v7131_v4 }
 0x6da   : > { %v7199_v6 = vmax.f32 %v7167_v19, 0.0 }
 0x6db   : > { %v7097_v26 = vpop.f32.mrf.mxu1 }
 0x6dc   : > { %v8489_v61 = vpack.c.bf16 %v7199_v6, %v7198_v43  ;;  %v7098_v45 = vadd.f32 %v7097_v26, %v7009_v50 }
 0x6de   : > { %8509 = vst [vmem:[%s13983_s20 + $0x70] sm:$0xff] %v8489_v61   ;;  %v7132_v39 = vadd.f32 %v7098_v45, %v6494_v63 }
 0x6e0   : > { %v7168_v30 = vadd.f32 %v13970_v31, %v7132_v39 }
 0x6e2   : > { %v7200_v54 = vmax.f32 %v7168_v30, 0.0 }
 0x6e3   : > { %v7099_v17 = vpop.f32.mrf.mxu1 }
 0x6e4   : > { %v7100_v27 = vadd.f32 %v7099_v17, %v7011_v15 }
 0x6e6   : > { %v7133_v32 = vadd.f32 %v7100_v27, %v6496_v29 }
 0x6e8   : > { %v7169_v36 = vadd.f32 %v13970_v31, %v7133_v32 }
 0x6ea   : > { %v7201_v14 = vmax.f32 %v7169_v36, 0.0 }
 0x6ec   : > { %v8494_v51 = vpack.c.bf16 %v7201_v14, %v7200_v54 }
 0x6ee   : > { %8510 = vst [vmem:[%s13983_s20 + $0x78] sm:$0xff] %v8494_v51  }
 0x6ef   : > { %9069 = shalt.err (!%p9066_p3)
}
 0x6f0   : > { %s9107_s17 = smov 64   ;;  %s9108_s20 = smov 4  }
 0x6f1   : > { %8527 = dma.vmem_to_hbm [thread:$0]  (%p9187_p5), %s7280_s8, 2048, %s7282_s9, %s7267_s28, %s9107_s17, %s9107_s17, %s9108_s20  }
 0x6f2 PF: > { %p8533_p4 = scmp.ge.s32.totalorder %s9104_s27, 2  ;;  %s7296_s22 = sand.u32 1, %s9092_s24  }
 0x6f3   : > { %s7297_s23 = scalar_lea.sflag [#allocation4], %s7296_s22 }
 0x6f4   : > { %p8530_p7 = pnand %p8533_p4, %p9191_p6 }
 0x6f6   : > { %p8531_p8 = pneg %p8530_p7 }
 0x6f8   : > { %9087 = dma.done.wait (%p8531_p8), %s7297_s23, 2048  }
 0x6f9   : > { %9089 = vsyncadd (%p8531_p8), %s7297_s23, 4294965248  ;;  %p17_p9 = scmp.ge.s32.totalorder %s9174_s30, 4   ;;  %s14319_s24 = smov %s9096_s25 }
 0x6fa   : > { %s14320_s25 = smov %s9100_s26  ;;  %s14321_s26 = smov %s9185_s10 }
 0x6fb   : > { %s14322_s27 = smov %s9174_s30  ;;  %19 = sbr.rel (!%p17_p9) target bundleno = 3 (0x3), region = 92 }
 0x700   :  { %7303 = vsyncpa [#allocation4], 1 }
 0x701   :  { %7305 = vsyncpa [#allocation4 + $0x1], 1 }

</bundles_post_ra>
